<compile_context>
chip_gen: v6e
topology: v6e:2x2x1
jax: 0.10.0
libtpu: 0.0.40
codegen_flags: <defaults>
</compile_context>

<pallas_src>
import numpy as np
import jax
import jax.numpy as jnp
from jax import lax
from jax.experimental import pallas as pl
from jax.experimental.pallas import tpu as pltpu

NH = 128            # hidden channels (self.Nh)
SP = 4              # spatial extent per axis
NVOX = SP ** 3      # 64 voxels
DIN = 1024          # linear in_features
VCH = 8             # voxels of linear output computed per grid step
NSTEPS = NVOX // VCH
KTAPS = 27          # 3x3x3 conv taps


def _build_shift_matrices():
    """S[k, v, u] = 1 iff voxel u is the (kd,kh,kw) neighbor of voxel v (zero pad)."""
    S = np.zeros((KTAPS, NVOX, NVOX), np.float32)
    for kd in range(3):
        for kh in range(3):
            for kw in range(3):
                k = kd * 9 + kh * 3 + kw
                for d in range(SP):
                    for h in range(SP):
                        for w in range(SP):
                            v = d * 16 + h * 4 + w
                            nd, nh, nw = d + kd - 1, h + kh - 1, w + kw - 1
                            if 0 <= nd < SP and 0 <= nh < SP and 0 <= nw < SP:
                                S[k, v, nd * 16 + nh * 4 + nw] = 1.0
    return S


def _lstm3d_kernel(x_ref, wz_ref, wr_ref, wm_ref, h_ref, wczr_ref, wcm_ref,
                   bz_ref, br_ref, bm_ref, s_ref, out_ref,
                   accz, accr, accm, czr):
    j = pl.program_id(0)
    B = x_ref.shape[0]
    BN = h_ref.shape[0]

    # ---- streamed linears: one (B,1024)x(1024, VCH*NH) bf16 matmul per gate ----
    xb = x_ref[...].astype(jnp.bfloat16)

    def stream_gate(w_ref, acc):
        y = jnp.dot(xb, w_ref[...], preferred_element_type=jnp.float32)  # (B, VCH*NH)
        for vv in range(VCH):                       # static lane-tile slices
            v = j * VCH + vv
            acc[:, pl.ds(v, 1), :] = y[:, vv * NH:(vv + 1) * NH][:, None, :]

    stream_gate(wz_ref, accz)
    stream_gate(wr_ref, accr)
    stream_gate(wm_ref, accm)

    def conv27(w_ref, lhs_bf16, width):
        # 27 shift-matmuls: (BN,BN)x(BN,NH) gather, then (BN,NH)x(NH,width) weights
        def body(k, acc):
            sh = jnp.dot(s_ref[k], lhs_bf16,
                         preferred_element_type=jnp.float32).astype(jnp.bfloat16)
            return acc + jnp.dot(sh, w_ref[k], preferred_element_type=jnp.float32)
        return lax.fori_loop(0, KTAPS, body, jnp.zeros((BN, width), jnp.float32))

    # ---- z/r conv depends only on h (resident from step 0): compute it on the
    #      first step so it overlaps the weight-streaming DMA pipeline ----
    @pl.when(j == 0)
    def _conv_zr():
        hb = h_ref[...].astype(jnp.bfloat16)        # (BN, NH)
        czr[...] = conv27(wczr_ref, hb, 2 * NH)

    # ---- last step: m-gate conv + activations + state update ----
    @pl.when(j == pl.num_programs(0) - 1)
    def _finalize():
        h = h_ref[...]                              # (BN, NH) f32
        lz = accz[...].reshape(BN, NH)              # layout-preserving collapse
        lr = accr[...].reshape(BN, NH)
        lm = accm[...].reshape(BN, NH)
        z = jax.nn.sigmoid(czr[:, pl.ds(0, NH)] + lz + bz_ref[...])
        r = jax.nn.sigmoid(czr[:, pl.ds(NH, NH)] + lr + br_ref[...])
        rh = (r * h).astype(jnp.bfloat16)
        cm = conv27(wcm_ref, rh, NH)
        mem = jnp.tanh(cm + lm + bm_ref[...])
        out_ref[...] = (1.0 - z) * h + z * mem


def pack_params(params, batch_size):
    """One-time host-side packing of the PyTorch-layout parameters."""
    B = batch_size

    def lin_w(w):   # torch (8192, 1024) -> (NSTEPS, 1024, VCH*NH), bf16
        w3 = w.reshape(NH, NVOX, DIN).transpose(1, 2, 0)             # (v, i, c)
        w3 = w3.reshape(NSTEPS, VCH, DIN, NH).transpose(0, 2, 1, 3)  # (j, i, vv, c)
        return w3.reshape(NSTEPS, DIN, VCH * NH).astype(jnp.bfloat16)

    def conv_w(w):  # torch (O, I, 3, 3, 3) -> (27, I, O)
        return w.transpose(2, 3, 4, 1, 0).reshape(KTAPS, NH, NH)

    def bias_w(b):  # (1, 128, 4, 4, 4) -> (B*64, 128), tiled over batch
        bk = b.reshape(NH, SP, SP, SP).transpose(1, 2, 3, 0).reshape(NVOX, NH)
        return jnp.tile(bk, (B, 1)).astype(jnp.float32)

    S = _build_shift_matrices()
    S_kb = np.stack([np.kron(np.eye(B, dtype=np.float32), S[k])
                     for k in range(KTAPS)])                         # (27, B*64, B*64)

    wczr = jnp.concatenate([conv_w(params["wconv_z"]),
                            conv_w(params["wconv_r"])], axis=-1)     # (27, 128, 256)

    return {
        "wz": lin_w(params["wlin_z"]),
        "wr": lin_w(params["wlin_r"]),
        "wm": lin_w(params["wlin_m"]),
        "wczr": wczr.astype(jnp.bfloat16),
        "wcm": conv_w(params["wconv_m"]).astype(jnp.bfloat16),
        "bz": bias_w(params["bias_z"]),
        "br": bias_w(params["bias_r"]),
        "bm": bias_w(params["bias_m"]),
        "shift": jnp.asarray(S_kb, dtype=jnp.bfloat16),
    }


def three_dim_lstm_forward(x, hidden_nchw, packed):
    """x: (B, 1024), hidden_nchw: (B, 128, 4, 4, 4) -> new hidden (B, 128, 4, 4, 4)."""
    B = x.shape[0]
    BN = B * NVOX

    h_k = hidden_nchw.transpose(0, 2, 3, 4, 1).reshape(BN, NH)

    full2 = lambda shape: pl.BlockSpec(shape, lambda j: (0, 0))
    full3 = lambda shape: pl.BlockSpec(shape, lambda j: (0, 0, 0))
    wspec = pl.BlockSpec((None, DIN, VCH * NH), lambda j: (j, 0, 0))

    out = pl.pallas_call(
        _lstm3d_kernel,
        out_shape=jax.ShapeDtypeStruct((BN, NH), jnp.float32),
        grid_spec=pltpu.PrefetchScalarGridSpec(
            num_scalar_prefetch=0,
            grid=(NSTEPS,),
            in_specs=[
                full2((B, DIN)),                      # x
                wspec, wspec, wspec,                  # streamed bf16 linear weights
                full2((BN, NH)),                      # hidden (channel-last, batch-flattened)
                full3((KTAPS, NH, 2 * NH)),           # fused z|r conv weights
                full3((KTAPS, NH, NH)),               # m conv weights
                full2((BN, NH)),                      # bias z
                full2((BN, NH)),                      # bias r
                full2((BN, NH)),                      # bias m
                full3((KTAPS, BN, BN)),               # batch-block-diag shift matrices
            ],
            out_specs=full2((BN, NH)),
            scratch_shapes=[pltpu.VMEM((B, NVOX, NH), jnp.float32)] * 3
                           + [pltpu.VMEM((BN, 2 * NH), jnp.float32)],
        ),
        compiler_params=pltpu.CompilerParams(
            # Must stay "arbitrary": scratch accumulates across grid steps and
            # the finalize runs on the last step.
            # TODO(synk): on v7x, split the weight stream across the 2 TensorCores
            # (streaming pallas_call marked "parallel" + separate tiny finalize call).
            dimension_semantics=("arbitrary",),
            vmem_limit_bytes=40 * 1024 * 1024,
        ),
    )(x, packed["wz"], packed["wr"], packed["wm"], h_k,
      packed["wczr"], packed["wcm"],
      packed["bz"], packed["br"], packed["bm"], packed["shift"])

    # back to PyTorch NCDHW layout
    return out.reshape(B, SP, SP, SP, NH).transpose(0, 4, 1, 2, 3)


def ref_forward(x, h, params, round_bf16=False):
    """Pure-JAX reference mirroring the PyTorch forward (NCDHW).

    round_bf16=True pre-rounds the same tensors the kernel casts to bf16
    (x, h-for-conv, all weights, r*h-for-conv) so the kernel math can be
    checked with a tight tolerance; round_bf16=False is the exact f32 module.
    """
    hi = lax.Precision.HIGHEST
    rd = (lambda a: a.astype(jnp.bfloat16).astype(jnp.float32)) if round_bf16 \
        else (lambda a: a)

    def conv3(inp, w):
        return lax.conv_general_dilated(
            inp, w, window_strides=(1, 1, 1), padding=[(1, 1)] * 3,
            dimension_numbers=("NCDHW", "OIDHW", "NCDHW"), precision=hi)

    B = x.shape[0]
    xq, hq = rd(x), rd(h)
    lz = jnp.dot(xq, rd(params["wlin_z"]).T, precision=hi).reshape(B, NH, SP, SP, SP)
    z = jax.nn.sigmoid(conv3(hq, rd(params["wconv_z"])) + lz + params["bias_z"])
    lr = jnp.dot(xq, rd(params["wlin_r"]).T, precision=hi).reshape(B, NH, SP, SP, SP)
    r = jax.nn.sigmoid(conv3(hq, rd(params["wconv_r"])) + lr + params["bias_r"])
    lm = jnp.dot(xq, rd(params["wlin_m"]).T, precision=hi).reshape(B, NH, SP, SP, SP)
    mem = jnp.tanh(conv3(rd(r * h), rd(params["wconv_m"])) + lm + params["bias_m"])
    return (1.0 - z) * h + z * mem


if __name__ == "__main__":
    B = 2
    key = jax.random.PRNGKey(0)
    ks = jax.random.split(key, 11)

    # Deterministic synthetic parameters (shapes follow Three_Dim_LSTM.__init__).
    params = {
        "wlin_z": jax.random.normal(ks[0], (NH * NVOX, DIN), jnp.float32) * 0.02,
        "wlin_r": jax.random.normal(ks[1], (NH * NVOX, DIN), jnp.float32) * 0.02,
        "wlin_m": jax.random.normal(ks[2], (NH * NVOX, DIN), jnp.float32) * 0.02,
        "wconv_z": jax.random.normal(ks[3], (NH, NH, 3, 3, 3), jnp.float32) * 0.02,
        "wconv_r": jax.random.normal(ks[4], (NH, NH, 3, 3, 3), jnp.float32) * 0.02,
        "wconv_m": jax.random.normal(ks[5], (NH, NH, 3, 3, 3), jnp.float32) * 0.02,
        "bias_z": jax.random.uniform(ks[6], (1, NH, SP, SP, SP), jnp.float32),
        "bias_r": jax.random.uniform(ks[7], (1, NH, SP, SP, SP), jnp.float32),
        "bias_m": jax.random.uniform(ks[8], (1, NH, SP, SP, SP), jnp.float32),
    }
    x = jax.random.normal(ks[9], (B, DIN), jnp.float32)
    hidden = jax.random.normal(ks[10], (B, NH, SP, SP, SP), jnp.float32) * 0.5

    packed = pack_params(params, B)          # one-time host-side weight packing (bf16)
    fwd = jax.jit(three_dim_lstm_forward)
    out = jax.block_until_ready(fwd(x, hidden, packed))
    assert out.shape == (B, NH, SP, SP, SP), out.shape

    # Tight check: reference with the same bf16 rounding the kernel applies.
    err_tight = float(jnp.max(jnp.abs(out - ref_forward(x, hidden, params, True))))
    # Loose check vs the exact f32 module: bf16 weight streaming is a deliberate
    # bandwidth optimization, so the tolerance is loosened accordingly.
    err_loose = float(jnp.max(jnp.abs(out - ref_forward(x, hidden, params, False))))

    assert err_tight < 3e-3, f"matched-precision max abs error: {err_tight}"
    assert err_loose < 5e-2, f"fp32-reference max abs error: {err_loose}"
    print("KERNEL_OK")
</pallas_src>

<mosaic_0001>
module attributes {stable_mosaic.version = 11 : i64} {
  func.func @_lstm3d_kernel(%arg0: i32, %arg1: memref<2x1024xf32, #tpu.memory_space<vmem>>, %arg2: memref<1x1024x1024xbf16, #tpu.memory_space<vmem>>, %arg3: memref<1x1024x1024xbf16, #tpu.memory_space<vmem>>, %arg4: memref<1x1024x1024xbf16, #tpu.memory_space<vmem>>, %arg5: memref<128x128xf32, #tpu.memory_space<vmem>>, %arg6: memref<27x128x256xbf16, #tpu.memory_space<vmem>>, %arg7: memref<27x128x128xbf16, #tpu.memory_space<vmem>>, %arg8: memref<128x128xf32, #tpu.memory_space<vmem>>, %arg9: memref<128x128xf32, #tpu.memory_space<vmem>>, %arg10: memref<128x128xf32, #tpu.memory_space<vmem>>, %arg11: memref<27x128x128xbf16, #tpu.memory_space<vmem>>, %arg12: memref<128x128xf32, #tpu.memory_space<vmem>>, %arg13: memref<2x64x128xf32, #tpu.memory_space<vmem>>, %arg14: memref<2x64x128xf32, #tpu.memory_space<vmem>>, %arg15: memref<2x64x128xf32, #tpu.memory_space<vmem>>, %arg16: memref<128x256xf32, #tpu.memory_space<vmem>>) attributes {dimension_semantics = [#tpu.dimension_semantics<arbitrary>], iteration_bounds = array<i64: 8>, scalar_prefetch = 0 : i64, scratch_operands = 4 : i64, tpu.core_type = #tpu.core_type<tc>, window_params = [{pipeline_mode = #tpu.pipeline_mode<synchronous>, transform_indices = @transform_0, window_bounds = array<i64: 2, 1024>}, {transform_indices = @transform_1, window_bounds = array<i64: 1, 1024, 1024>}, {transform_indices = @transform_2, window_bounds = array<i64: 1, 1024, 1024>}, {transform_indices = @transform_3, window_bounds = array<i64: 1, 1024, 1024>}, {pipeline_mode = #tpu.pipeline_mode<synchronous>, transform_indices = @transform_4, window_bounds = array<i64: 128, 128>}, {pipeline_mode = #tpu.pipeline_mode<synchronous>, transform_indices = @transform_5, window_bounds = array<i64: 27, 128, 256>}, {pipeline_mode = #tpu.pipeline_mode<synchronous>, transform_indices = @transform_6, window_bounds = array<i64: 27, 128, 128>}, {pipeline_mode = #tpu.pipeline_mode<synchronous>, transform_indices = @transform_7, window_bounds = array<i64: 128, 128>}, {pipeline_mode = #tpu.pipeline_mode<synchronous>, transform_indices = @transform_8, window_bounds = array<i64: 128, 128>}, {pipeline_mode = #tpu.pipeline_mode<synchronous>, transform_indices = @transform_9, window_bounds = array<i64: 128, 128>}, {pipeline_mode = #tpu.pipeline_mode<synchronous>, transform_indices = @transform_10, window_bounds = array<i64: 27, 128, 128>}, {pipeline_mode = #tpu.pipeline_mode<synchronous>, transform_indices = @transform_11, window_bounds = array<i64: 128, 128>}]} {
    %c0 = arith.constant 0 : index
    %c0_0 = arith.constant 0 : index
    %0 = vector.load %arg1[%c0, %c0_0] : memref<2x1024xf32, #tpu.memory_space<vmem>>, vector<2x1024xf32>
    %1 = arith.truncf %0 : vector<2x1024xf32> to vector<2x1024xbf16>
    %c0_1 = arith.constant 0 : index
    %c0_2 = arith.constant 0 : index
    %c0_3 = arith.constant 0 : index
    %2 = vector.load %arg2[%c0_1, %c0_2, %c0_3] : memref<1x1024x1024xbf16, #tpu.memory_space<vmem>>, vector<1x1024x1024xbf16>
    %3 = vector.shape_cast %2 : vector<1x1024x1024xbf16> to vector<1024x1024xbf16>
    %cst = arith.constant dense<0.000000e+00> : vector<2x1024xf32>
    %4 = tpu.matmul %1, %3, %cst {dimension_numbers = #tpu.dot_dimension_numbers<[1], [0], [0], [1], [0, 0, 1, 1], [], []>} : vector<2x1024xbf16>, vector<1024x1024xbf16>, vector<2x1024xf32> -> vector<2x1024xf32>
    %c8_i32 = arith.constant 8 : i32
    %5 = arith.muli %arg0, %c8_i32 : i32
    %c0_i32 = arith.constant 0 : i32
    %6 = arith.addi %5, %c0_i32 : i32
    %7 = vector.extract_strided_slice %4 {offsets = [0, 0], sizes = [2, 128], strides = [1, 1]} : vector<2x1024xf32> to vector<2x128xf32>
    %8 = vector.shape_cast %7 : vector<2x128xf32> to vector<2x1x128xf32>
    %c0_4 = arith.constant 0 : index
    %9 = arith.index_cast %6 : i32 to index
    %c0_5 = arith.constant 0 : index
    %10 = vector.load %arg13[%c0_4, %9, %c0_5] : memref<2x64x128xf32, #tpu.memory_space<vmem>>, vector<2x1x128xf32>
    tpu.vector_store %arg13[%c0_4, %9, %c0_5], %8 {strides = array<i32>} : memref<2x64x128xf32, #tpu.memory_space<vmem>>, vector<2x1x128xf32>,
    %c8_i32_6 = arith.constant 8 : i32
    %11 = arith.muli %arg0, %c8_i32_6 : i32
    %c1_i32 = arith.constant 1 : i32
    %12 = arith.addi %11, %c1_i32 : i32
    %13 = vector.extract_strided_slice %4 {offsets = [0, 128], sizes = [2, 128], strides = [1, 1]} : vector<2x1024xf32> to vector<2x128xf32>
    %14 = vector.shape_cast %13 : vector<2x128xf32> to vector<2x1x128xf32>
    %c0_7 = arith.constant 0 : index
    %15 = arith.index_cast %12 : i32 to index
    %c0_8 = arith.constant 0 : index
    %16 = vector.load %arg13[%c0_7, %15, %c0_8] : memref<2x64x128xf32, #tpu.memory_space<vmem>>, vector<2x1x128xf32>
    tpu.vector_store %arg13[%c0_7, %15, %c0_8], %14 {strides = array<i32>} : memref<2x64x128xf32, #tpu.memory_space<vmem>>, vector<2x1x128xf32>,
    %c8_i32_9 = arith.constant 8 : i32
    %17 = arith.muli %arg0, %c8_i32_9 : i32
    %c2_i32 = arith.constant 2 : i32
    %18 = arith.addi %17, %c2_i32 : i32
    %19 = vector.extract_strided_slice %4 {offsets = [0, 256], sizes = [2, 128], strides = [1, 1]} : vector<2x1024xf32> to vector<2x128xf32>
    %20 = vector.shape_cast %19 : vector<2x128xf32> to vector<2x1x128xf32>
    %c0_10 = arith.constant 0 : index
    %21 = arith.index_cast %18 : i32 to index
    %c0_11 = arith.constant 0 : index
    %22 = vector.load %arg13[%c0_10, %21, %c0_11] : memref<2x64x128xf32, #tpu.memory_space<vmem>>, vector<2x1x128xf32>
    tpu.vector_store %arg13[%c0_10, %21, %c0_11], %20 {strides = array<i32>} : memref<2x64x128xf32, #tpu.memory_space<vmem>>, vector<2x1x128xf32>,
    %c8_i32_12 = arith.constant 8 : i32
    %23 = arith.muli %arg0, %c8_i32_12 : i32
    %c3_i32 = arith.constant 3 : i32
    %24 = arith.addi %23, %c3_i32 : i32
    %25 = vector.extract_strided_slice %4 {offsets = [0, 384], sizes = [2, 128], strides = [1, 1]} : vector<2x1024xf32> to vector<2x128xf32>
    %26 = vector.shape_cast %25 : vector<2x128xf32> to vector<2x1x128xf32>
    %c0_13 = arith.constant 0 : index
    %27 = arith.index_cast %24 : i32 to index
    %c0_14 = arith.constant 0 : index
    %28 = vector.load %arg13[%c0_13, %27, %c0_14] : memref<2x64x128xf32, #tpu.memory_space<vmem>>, vector<2x1x128xf32>
    tpu.vector_store %arg13[%c0_13, %27, %c0_14], %26 {strides = array<i32>} : memref<2x64x128xf32, #tpu.memory_space<vmem>>, vector<2x1x128xf32>,
    %c8_i32_15 = arith.constant 8 : i32
    %29 = arith.muli %arg0, %c8_i32_15 : i32
    %c4_i32 = arith.constant 4 : i32
    %30 = arith.addi %29, %c4_i32 : i32
    %31 = vector.extract_strided_slice %4 {offsets = [0, 512], sizes = [2, 128], strides = [1, 1]} : vector<2x1024xf32> to vector<2x128xf32>
    %32 = vector.shape_cast %31 : vector<2x128xf32> to vector<2x1x128xf32>
    %c0_16 = arith.constant 0 : index
    %33 = arith.index_cast %30 : i32 to index
    %c0_17 = arith.constant 0 : index
    %34 = vector.load %arg13[%c0_16, %33, %c0_17] : memref<2x64x128xf32, #tpu.memory_space<vmem>>, vector<2x1x128xf32>
    tpu.vector_store %arg13[%c0_16, %33, %c0_17], %32 {strides = array<i32>} : memref<2x64x128xf32, #tpu.memory_space<vmem>>, vector<2x1x128xf32>,
    %c8_i32_18 = arith.constant 8 : i32
    %35 = arith.muli %arg0, %c8_i32_18 : i32
    %c5_i32 = arith.constant 5 : i32
    %36 = arith.addi %35, %c5_i32 : i32
    %37 = vector.extract_strided_slice %4 {offsets = [0, 640], sizes = [2, 128], strides = [1, 1]} : vector<2x1024xf32> to vector<2x128xf32>
    %38 = vector.shape_cast %37 : vector<2x128xf32> to vector<2x1x128xf32>
    %c0_19 = arith.constant 0 : index
    %39 = arith.index_cast %36 : i32 to index
    %c0_20 = arith.constant 0 : index
    %40 = vector.load %arg13[%c0_19, %39, %c0_20] : memref<2x64x128xf32, #tpu.memory_space<vmem>>, vector<2x1x128xf32>
    tpu.vector_store %arg13[%c0_19, %39, %c0_20], %38 {strides = array<i32>} : memref<2x64x128xf32, #tpu.memory_space<vmem>>, vector<2x1x128xf32>,
    %c8_i32_21 = arith.constant 8 : i32
    %41 = arith.muli %arg0, %c8_i32_21 : i32
    %c6_i32 = arith.constant 6 : i32
    %42 = arith.addi %41, %c6_i32 : i32
    %43 = vector.extract_strided_slice %4 {offsets = [0, 768], sizes = [2, 128], strides = [1, 1]} : vector<2x1024xf32> to vector<2x128xf32>
    %44 = vector.shape_cast %43 : vector<2x128xf32> to vector<2x1x128xf32>
    %c0_22 = arith.constant 0 : index
    %45 = arith.index_cast %42 : i32 to index
    %c0_23 = arith.constant 0 : index
    %46 = vector.load %arg13[%c0_22, %45, %c0_23] : memref<2x64x128xf32, #tpu.memory_space<vmem>>, vector<2x1x128xf32>
    tpu.vector_store %arg13[%c0_22, %45, %c0_23], %44 {strides = array<i32>} : memref<2x64x128xf32, #tpu.memory_space<vmem>>, vector<2x1x128xf32>,
    %c8_i32_24 = arith.constant 8 : i32
    %47 = arith.muli %arg0, %c8_i32_24 : i32
    %c7_i32 = arith.constant 7 : i32
    %48 = arith.addi %47, %c7_i32 : i32
    %49 = vector.extract_strided_slice %4 {offsets = [0, 896], sizes = [2, 128], strides = [1, 1]} : vector<2x1024xf32> to vector<2x128xf32>
    %50 = vector.shape_cast %49 : vector<2x128xf32> to vector<2x1x128xf32>
    %c0_25 = arith.constant 0 : index
    %51 = arith.index_cast %48 : i32 to index
    %c0_26 = arith.constant 0 : index
    %52 = vector.load %arg13[%c0_25, %51, %c0_26] : memref<2x64x128xf32, #tpu.memory_space<vmem>>, vector<2x1x128xf32>
    tpu.vector_store %arg13[%c0_25, %51, %c0_26], %50 {strides = array<i32>} : memref<2x64x128xf32, #tpu.memory_space<vmem>>, vector<2x1x128xf32>,
    %c0_27 = arith.constant 0 : index
    %c0_28 = arith.constant 0 : index
    %c0_29 = arith.constant 0 : index
    %53 = vector.load %arg3[%c0_27, %c0_28, %c0_29] : memref<1x1024x1024xbf16, #tpu.memory_space<vmem>>, vector<1x1024x1024xbf16>
    %54 = vector.shape_cast %53 : vector<1x1024x1024xbf16> to vector<1024x1024xbf16>
    %cst_30 = arith.constant dense<0.000000e+00> : vector<2x1024xf32>
    %55 = tpu.matmul %1, %54, %cst_30 {dimension_numbers = #tpu.dot_dimension_numbers<[1], [0], [0], [1], [0, 0, 1, 1], [], []>} : vector<2x1024xbf16>, vector<1024x1024xbf16>, vector<2x1024xf32> -> vector<2x1024xf32>
    %c8_i32_31 = arith.constant 8 : i32
    %56 = arith.muli %arg0, %c8_i32_31 : i32
    %c0_i32_32 = arith.constant 0 : i32
    %57 = arith.addi %56, %c0_i32_32 : i32
    %58 = vector.extract_strided_slice %55 {offsets = [0, 0], sizes = [2, 128], strides = [1, 1]} : vector<2x1024xf32> to vector<2x128xf32>
    %59 = vector.shape_cast %58 : vector<2x128xf32> to vector<2x1x128xf32>
    %c0_33 = arith.constant 0 : index
    %60 = arith.index_cast %57 : i32 to index
    %c0_34 = arith.constant 0 : index
    %61 = vector.load %arg14[%c0_33, %60, %c0_34] : memref<2x64x128xf32, #tpu.memory_space<vmem>>, vector<2x1x128xf32>
    tpu.vector_store %arg14[%c0_33, %60, %c0_34], %59 {strides = array<i32>} : memref<2x64x128xf32, #tpu.memory_space<vmem>>, vector<2x1x128xf32>,
    %c8_i32_35 = arith.constant 8 : i32
    %62 = arith.muli %arg0, %c8_i32_35 : i32
    %c1_i32_36 = arith.constant 1 : i32
    %63 = arith.addi %62, %c1_i32_36 : i32
    %64 = vector.extract_strided_slice %55 {offsets = [0, 128], sizes = [2, 128], strides = [1, 1]} : vector<2x1024xf32> to vector<2x128xf32>
    %65 = vector.shape_cast %64 : vector<2x128xf32> to vector<2x1x128xf32>
    %c0_37 = arith.constant 0 : index
    %66 = arith.index_cast %63 : i32 to index
    %c0_38 = arith.constant 0 : index
    %67 = vector.load %arg14[%c0_37, %66, %c0_38] : memref<2x64x128xf32, #tpu.memory_space<vmem>>, vector<2x1x128xf32>
    tpu.vector_store %arg14[%c0_37, %66, %c0_38], %65 {strides = array<i32>} : memref<2x64x128xf32, #tpu.memory_space<vmem>>, vector<2x1x128xf32>,
    %c8_i32_39 = arith.constant 8 : i32
    %68 = arith.muli %arg0, %c8_i32_39 : i32
    %c2_i32_40 = arith.constant 2 : i32
    %69 = arith.addi %68, %c2_i32_40 : i32
    %70 = vector.extract_strided_slice %55 {offsets = [0, 256], sizes = [2, 128], strides = [1, 1]} : vector<2x1024xf32> to vector<2x128xf32>
    %71 = vector.shape_cast %70 : vector<2x128xf32> to vector<2x1x128xf32>
    %c0_41 = arith.constant 0 : index
    %72 = arith.index_cast %69 : i32 to index
    %c0_42 = arith.constant 0 : index
    %73 = vector.load %arg14[%c0_41, %72, %c0_42] : memref<2x64x128xf32, #tpu.memory_space<vmem>>, vector<2x1x128xf32>
    tpu.vector_store %arg14[%c0_41, %72, %c0_42], %71 {strides = array<i32>} : memref<2x64x128xf32, #tpu.memory_space<vmem>>, vector<2x1x128xf32>,
    %c8_i32_43 = arith.constant 8 : i32
    %74 = arith.muli %arg0, %c8_i32_43 : i32
    %c3_i32_44 = arith.constant 3 : i32
    %75 = arith.addi %74, %c3_i32_44 : i32
    %76 = vector.extract_strided_slice %55 {offsets = [0, 384], sizes = [2, 128], strides = [1, 1]} : vector<2x1024xf32> to vector<2x128xf32>
    %77 = vector.shape_cast %76 : vector<2x128xf32> to vector<2x1x128xf32>
    %c0_45 = arith.constant 0 : index
    %78 = arith.index_cast %75 : i32 to index
    %c0_46 = arith.constant 0 : index
    %79 = vector.load %arg14[%c0_45, %78, %c0_46] : memref<2x64x128xf32, #tpu.memory_space<vmem>>, vector<2x1x128xf32>
    tpu.vector_store %arg14[%c0_45, %78, %c0_46], %77 {strides = array<i32>} : memref<2x64x128xf32, #tpu.memory_space<vmem>>, vector<2x1x128xf32>,
    %c8_i32_47 = arith.constant 8 : i32
    %80 = arith.muli %arg0, %c8_i32_47 : i32
    %c4_i32_48 = arith.constant 4 : i32
    %81 = arith.addi %80, %c4_i32_48 : i32
    %82 = vector.extract_strided_slice %55 {offsets = [0, 512], sizes = [2, 128], strides = [1, 1]} : vector<2x1024xf32> to vector<2x128xf32>
    %83 = vector.shape_cast %82 : vector<2x128xf32> to vector<2x1x128xf32>
    %c0_49 = arith.constant 0 : index
    %84 = arith.index_cast %81 : i32 to index
    %c0_50 = arith.constant 0 : index
    %85 = vector.load %arg14[%c0_49, %84, %c0_50] : memref<2x64x128xf32, #tpu.memory_space<vmem>>, vector<2x1x128xf32>
    tpu.vector_store %arg14[%c0_49, %84, %c0_50], %83 {strides = array<i32>} : memref<2x64x128xf32, #tpu.memory_space<vmem>>, vector<2x1x128xf32>,
    %c8_i32_51 = arith.constant 8 : i32
    %86 = arith.muli %arg0, %c8_i32_51 : i32
    %c5_i32_52 = arith.constant 5 : i32
    %87 = arith.addi %86, %c5_i32_52 : i32
    %88 = vector.extract_strided_slice %55 {offsets = [0, 640], sizes = [2, 128], strides = [1, 1]} : vector<2x1024xf32> to vector<2x128xf32>
    %89 = vector.shape_cast %88 : vector<2x128xf32> to vector<2x1x128xf32>
    %c0_53 = arith.constant 0 : index
    %90 = arith.index_cast %87 : i32 to index
    %c0_54 = arith.constant 0 : index
    %91 = vector.load %arg14[%c0_53, %90, %c0_54] : memref<2x64x128xf32, #tpu.memory_space<vmem>>, vector<2x1x128xf32>
    tpu.vector_store %arg14[%c0_53, %90, %c0_54], %89 {strides = array<i32>} : memref<2x64x128xf32, #tpu.memory_space<vmem>>, vector<2x1x128xf32>,
    %c8_i32_55 = arith.constant 8 : i32
    %92 = arith.muli %arg0, %c8_i32_55 : i32
    %c6_i32_56 = arith.constant 6 : i32
    %93 = arith.addi %92, %c6_i32_56 : i32
    %94 = vector.extract_strided_slice %55 {offsets = [0, 768], sizes = [2, 128], strides = [1, 1]} : vector<2x1024xf32> to vector<2x128xf32>
    %95 = vector.shape_cast %94 : vector<2x128xf32> to vector<2x1x128xf32>
    %c0_57 = arith.constant 0 : index
    %96 = arith.index_cast %93 : i32 to index
    %c0_58 = arith.constant 0 : index
    %97 = vector.load %arg14[%c0_57, %96, %c0_58] : memref<2x64x128xf32, #tpu.memory_space<vmem>>, vector<2x1x128xf32>
    tpu.vector_store %arg14[%c0_57, %96, %c0_58], %95 {strides = array<i32>} : memref<2x64x128xf32, #tpu.memory_space<vmem>>, vector<2x1x128xf32>,
    %c8_i32_59 = arith.constant 8 : i32
    %98 = arith.muli %arg0, %c8_i32_59 : i32
    %c7_i32_60 = arith.constant 7 : i32
    %99 = arith.addi %98, %c7_i32_60 : i32
    %100 = vector.extract_strided_slice %55 {offsets = [0, 896], sizes = [2, 128], strides = [1, 1]} : vector<2x1024xf32> to vector<2x128xf32>
    %101 = vector.shape_cast %100 : vector<2x128xf32> to vector<2x1x128xf32>
    %c0_61 = arith.constant 0 : index
    %102 = arith.index_cast %99 : i32 to index
    %c0_62 = arith.constant 0 : index
    %103 = vector.load %arg14[%c0_61, %102, %c0_62] : memref<2x64x128xf32, #tpu.memory_space<vmem>>, vector<2x1x128xf32>
    tpu.vector_store %arg14[%c0_61, %102, %c0_62], %101 {strides = array<i32>} : memref<2x64x128xf32, #tpu.memory_space<vmem>>, vector<2x1x128xf32>,
    %c0_63 = arith.constant 0 : index
    %c0_64 = arith.constant 0 : index
    %c0_65 = arith.constant 0 : index
    %104 = vector.load %arg4[%c0_63, %c0_64, %c0_65] : memref<1x1024x1024xbf16, #tpu.memory_space<vmem>>, vector<1x1024x1024xbf16>
    %105 = vector.shape_cast %104 : vector<1x1024x1024xbf16> to vector<1024x1024xbf16>
    %cst_66 = arith.constant dense<0.000000e+00> : vector<2x1024xf32>
    %106 = tpu.matmul %1, %105, %cst_66 {dimension_numbers = #tpu.dot_dimension_numbers<[1], [0], [0], [1], [0, 0, 1, 1], [], []>} : vector<2x1024xbf16>, vector<1024x1024xbf16>, vector<2x1024xf32> -> vector<2x1024xf32>
    %c8_i32_67 = arith.constant 8 : i32
    %107 = arith.muli %arg0, %c8_i32_67 : i32
    %c0_i32_68 = arith.constant 0 : i32
    %108 = arith.addi %107, %c0_i32_68 : i32
    %109 = vector.extract_strided_slice %106 {offsets = [0, 0], sizes = [2, 128], strides = [1, 1]} : vector<2x1024xf32> to vector<2x128xf32>
    %110 = vector.shape_cast %109 : vector<2x128xf32> to vector<2x1x128xf32>
    %c0_69 = arith.constant 0 : index
    %111 = arith.index_cast %108 : i32 to index
    %c0_70 = arith.constant 0 : index
    %112 = vector.load %arg15[%c0_69, %111, %c0_70] : memref<2x64x128xf32, #tpu.memory_space<vmem>>, vector<2x1x128xf32>
    tpu.vector_store %arg15[%c0_69, %111, %c0_70], %110 {strides = array<i32>} : memref<2x64x128xf32, #tpu.memory_space<vmem>>, vector<2x1x128xf32>,
    %c8_i32_71 = arith.constant 8 : i32
    %113 = arith.muli %arg0, %c8_i32_71 : i32
    %c1_i32_72 = arith.constant 1 : i32
    %114 = arith.addi %113, %c1_i32_72 : i32
    %115 = vector.extract_strided_slice %106 {offsets = [0, 128], sizes = [2, 128], strides = [1, 1]} : vector<2x1024xf32> to vector<2x128xf32>
    %116 = vector.shape_cast %115 : vector<2x128xf32> to vector<2x1x128xf32>
    %c0_73 = arith.constant 0 : index
    %117 = arith.index_cast %114 : i32 to index
    %c0_74 = arith.constant 0 : index
    %118 = vector.load %arg15[%c0_73, %117, %c0_74] : memref<2x64x128xf32, #tpu.memory_space<vmem>>, vector<2x1x128xf32>
    tpu.vector_store %arg15[%c0_73, %117, %c0_74], %116 {strides = array<i32>} : memref<2x64x128xf32, #tpu.memory_space<vmem>>, vector<2x1x128xf32>,
    %c8_i32_75 = arith.constant 8 : i32
    %119 = arith.muli %arg0, %c8_i32_75 : i32
    %c2_i32_76 = arith.constant 2 : i32
    %120 = arith.addi %119, %c2_i32_76 : i32
    %121 = vector.extract_strided_slice %106 {offsets = [0, 256], sizes = [2, 128], strides = [1, 1]} : vector<2x1024xf32> to vector<2x128xf32>
    %122 = vector.shape_cast %121 : vector<2x128xf32> to vector<2x1x128xf32>
    %c0_77 = arith.constant 0 : index
    %123 = arith.index_cast %120 : i32 to index
    %c0_78 = arith.constant 0 : index
    %124 = vector.load %arg15[%c0_77, %123, %c0_78] : memref<2x64x128xf32, #tpu.memory_space<vmem>>, vector<2x1x128xf32>
    tpu.vector_store %arg15[%c0_77, %123, %c0_78], %122 {strides = array<i32>} : memref<2x64x128xf32, #tpu.memory_space<vmem>>, vector<2x1x128xf32>,
    %c8_i32_79 = arith.constant 8 : i32
    %125 = arith.muli %arg0, %c8_i32_79 : i32
    %c3_i32_80 = arith.constant 3 : i32
    %126 = arith.addi %125, %c3_i32_80 : i32
    %127 = vector.extract_strided_slice %106 {offsets = [0, 384], sizes = [2, 128], strides = [1, 1]} : vector<2x1024xf32> to vector<2x128xf32>
    %128 = vector.shape_cast %127 : vector<2x128xf32> to vector<2x1x128xf32>
    %c0_81 = arith.constant 0 : index
    %129 = arith.index_cast %126 : i32 to index
    %c0_82 = arith.constant 0 : index
    %130 = vector.load %arg15[%c0_81, %129, %c0_82] : memref<2x64x128xf32, #tpu.memory_space<vmem>>, vector<2x1x128xf32>
    tpu.vector_store %arg15[%c0_81, %129, %c0_82], %128 {strides = array<i32>} : memref<2x64x128xf32, #tpu.memory_space<vmem>>, vector<2x1x128xf32>,
    %c8_i32_83 = arith.constant 8 : i32
    %131 = arith.muli %arg0, %c8_i32_83 : i32
    %c4_i32_84 = arith.constant 4 : i32
    %132 = arith.addi %131, %c4_i32_84 : i32
    %133 = vector.extract_strided_slice %106 {offsets = [0, 512], sizes = [2, 128], strides = [1, 1]} : vector<2x1024xf32> to vector<2x128xf32>
    %134 = vector.shape_cast %133 : vector<2x128xf32> to vector<2x1x128xf32>
    %c0_85 = arith.constant 0 : index
    %135 = arith.index_cast %132 : i32 to index
    %c0_86 = arith.constant 0 : index
    %136 = vector.load %arg15[%c0_85, %135, %c0_86] : memref<2x64x128xf32, #tpu.memory_space<vmem>>, vector<2x1x128xf32>
    tpu.vector_store %arg15[%c0_85, %135, %c0_86], %134 {strides = array<i32>} : memref<2x64x128xf32, #tpu.memory_space<vmem>>, vector<2x1x128xf32>,
    %c8_i32_87 = arith.constant 8 : i32
    %137 = arith.muli %arg0, %c8_i32_87 : i32
    %c5_i32_88 = arith.constant 5 : i32
    %138 = arith.addi %137, %c5_i32_88 : i32
    %139 = vector.extract_strided_slice %106 {offsets = [0, 640], sizes = [2, 128], strides = [1, 1]} : vector<2x1024xf32> to vector<2x128xf32>
    %140 = vector.shape_cast %139 : vector<2x128xf32> to vector<2x1x128xf32>
    %c0_89 = arith.constant 0 : index
    %141 = arith.index_cast %138 : i32 to index
    %c0_90 = arith.constant 0 : index
    %142 = vector.load %arg15[%c0_89, %141, %c0_90] : memref<2x64x128xf32, #tpu.memory_space<vmem>>, vector<2x1x128xf32>
    tpu.vector_store %arg15[%c0_89, %141, %c0_90], %140 {strides = array<i32>} : memref<2x64x128xf32, #tpu.memory_space<vmem>>, vector<2x1x128xf32>,
    %c8_i32_91 = arith.constant 8 : i32
    %143 = arith.muli %arg0, %c8_i32_91 : i32
    %c6_i32_92 = arith.constant 6 : i32
    %144 = arith.addi %143, %c6_i32_92 : i32
    %145 = vector.extract_strided_slice %106 {offsets = [0, 768], sizes = [2, 128], strides = [1, 1]} : vector<2x1024xf32> to vector<2x128xf32>
    %146 = vector.shape_cast %145 : vector<2x128xf32> to vector<2x1x128xf32>
    %c0_93 = arith.constant 0 : index
    %147 = arith.index_cast %144 : i32 to index
    %c0_94 = arith.constant 0 : index
    %148 = vector.load %arg15[%c0_93, %147, %c0_94] : memref<2x64x128xf32, #tpu.memory_space<vmem>>, vector<2x1x128xf32>
    tpu.vector_store %arg15[%c0_93, %147, %c0_94], %146 {strides = array<i32>} : memref<2x64x128xf32, #tpu.memory_space<vmem>>, vector<2x1x128xf32>,
    %c8_i32_95 = arith.constant 8 : i32
    %149 = arith.muli %arg0, %c8_i32_95 : i32
    %c7_i32_96 = arith.constant 7 : i32
    %150 = arith.addi %149, %c7_i32_96 : i32
    %151 = vector.extract_strided_slice %106 {offsets = [0, 896], sizes = [2, 128], strides = [1, 1]} : vector<2x1024xf32> to vector<2x128xf32>
    %152 = vector.shape_cast %151 : vector<2x128xf32> to vector<2x1x128xf32>
    %c0_97 = arith.constant 0 : index
    %153 = arith.index_cast %150 : i32 to index
    %c0_98 = arith.constant 0 : index
    %154 = vector.load %arg15[%c0_97, %153, %c0_98] : memref<2x64x128xf32, #tpu.memory_space<vmem>>, vector<2x1x128xf32>
    tpu.vector_store %arg15[%c0_97, %153, %c0_98], %152 {strides = array<i32>} : memref<2x64x128xf32, #tpu.memory_space<vmem>>, vector<2x1x128xf32>,
    %c0_i32_99 = arith.constant 0 : i32
    %155 = arith.cmpi eq, %arg0, %c0_i32_99 : i32
    %156 = arith.extui %155 : i1 to i32
    %c0_i32_100 = arith.constant 0 : i32
    %157 = arith.cmpi ne, %156, %c0_i32_100 : i32
    scf.if %157 {
      %c0_103 = arith.constant 0 : index
      %c0_104 = arith.constant 0 : index
      %161 = vector.load %arg5[%c0_103, %c0_104] : memref<128x128xf32, #tpu.memory_space<vmem>>, vector<128x128xf32>
      %162 = arith.truncf %161 : vector<128x128xf32> to vector<128x128xbf16>
      %cst_105 = arith.constant 0.000000e+00 : f32
      %163 = vector.broadcast %cst_105 : f32 to vector<128x256xf32>
      %c0_i32_106 = arith.constant 0 : i32
      %c27_i32 = arith.constant 27 : i32
      %164 = arith.addi %c0_i32_106, %c27_i32 : i32
      %c1_i32_107 = arith.constant 1 : i32
      %165 = scf.for %arg17 = %c0_i32_106 to %164 step %c1_i32_107 iter_args(%arg18 = %163) -> (vector<128x256xf32>)  : i32 {
        %167 = arith.index_cast %arg17 : i32 to index
        %c0_111 = arith.constant 0 : index
        %c0_112 = arith.constant 0 : index
        %168 = vector.load %arg11[%167, %c0_111, %c0_112] : memref<27x128x128xbf16, #tpu.memory_space<vmem>>, vector<1x128x128xbf16>
        %169 = vector.shape_cast %168 : vector<1x128x128xbf16> to vector<128x128xbf16>
        %cst_113 = arith.constant dense<0.000000e+00> : vector<128x128xf32>
        %170 = tpu.matmul %169, %162, %cst_113 {dimension_numbers = #tpu.dot_dimension_numbers<[1], [0], [0], [1], [0, 0, 1, 1], [], []>} : vector<128x128xbf16>, vector<128x128xbf16>, vector<128x128xf32> -> vector<128x128xf32>
        %171 = arith.truncf %170 : vector<128x128xf32> to vector<128x128xbf16>
        %172 = arith.index_cast %arg17 : i32 to index
        %c0_114 = arith.constant 0 : index
        %c0_115 = arith.constant 0 : index
        %173 = vector.load %arg6[%172, %c0_114, %c0_115] : memref<27x128x256xbf16, #tpu.memory_space<vmem>>, vector<1x128x256xbf16>
        %174 = vector.shape_cast %173 : vector<1x128x256xbf16> to vector<128x256xbf16>
        %cst_116 = arith.constant dense<0.000000e+00> : vector<128x256xf32>
        %175 = tpu.matmul %171, %174, %cst_116 {dimension_numbers = #tpu.dot_dimension_numbers<[1], [0], [0], [1], [0, 0, 1, 1], [], []>} : vector<128x128xbf16>, vector<128x256xbf16>, vector<128x256xf32> -> vector<128x256xf32>
        %176 = arith.addf %arg18, %175 : vector<128x256xf32>
        scf.yield %176 : vector<128x256xf32>
      }
      %c27_i32_108 = arith.constant 27 : i32
      %c0_109 = arith.constant 0 : index
      %c0_110 = arith.constant 0 : index
      %166 = vector.load %arg16[%c0_109, %c0_110] : memref<128x256xf32, #tpu.memory_space<vmem>>, vector<128x256xf32>
      tpu.vector_store %arg16[%c0_109, %c0_110], %165 {strides = array<i32>} : memref<128x256xf32, #tpu.memory_space<vmem>>, vector<128x256xf32>,
    } else {
    }
    %c7_i32_101 = arith.constant 7 : i32
    %158 = arith.cmpi eq, %arg0, %c7_i32_101 : i32
    %159 = arith.extui %158 : i1 to i32
    %c0_i32_102 = arith.constant 0 : i32
    %160 = arith.cmpi ne, %159, %c0_i32_102 : i32
    scf.if %160 {
      %c0_103 = arith.constant 0 : index
      %c0_104 = arith.constant 0 : index
      %161 = vector.load %arg5[%c0_103, %c0_104] : memref<128x128xf32, #tpu.memory_space<vmem>>, vector<128x128xf32>
      %c0_105 = arith.constant 0 : index
      %c0_106 = arith.constant 0 : index
      %c0_107 = arith.constant 0 : index
      %162 = vector.load %arg13[%c0_105, %c0_106, %c0_107] : memref<2x64x128xf32, #tpu.memory_space<vmem>>, vector<2x64x128xf32>
      %163 = vector.shape_cast %162 : vector<2x64x128xf32> to vector<128x128xf32>
      %c0_108 = arith.constant 0 : index
      %c0_109 = arith.constant 0 : index
      %c0_110 = arith.constant 0 : index
      %164 = vector.load %arg14[%c0_108, %c0_109, %c0_110] : memref<2x64x128xf32, #tpu.memory_space<vmem>>, vector<2x64x128xf32>
      %165 = vector.shape_cast %164 : vector<2x64x128xf32> to vector<128x128xf32>
      %c0_111 = arith.constant 0 : index
      %c0_112 = arith.constant 0 : index
      %c0_113 = arith.constant 0 : index
      %166 = vector.load %arg15[%c0_111, %c0_112, %c0_113] : memref<2x64x128xf32, #tpu.memory_space<vmem>>, vector<2x64x128xf32>
      %167 = vector.shape_cast %166 : vector<2x64x128xf32> to vector<128x128xf32>
      %c0_114 = arith.constant 0 : index
      %c0_115 = arith.constant 0 : index
      %168 = vector.load %arg16[%c0_114, %c0_115] : memref<128x256xf32, #tpu.memory_space<vmem>>, vector<128x128xf32>
      %169 = arith.addf %168, %163 : vector<128x128xf32>
      %c0_116 = arith.constant 0 : index
      %c0_117 = arith.constant 0 : index
      %170 = vector.load %arg8[%c0_116, %c0_117] : memref<128x128xf32, #tpu.memory_space<vmem>>, vector<128x128xf32>
      %171 = arith.addf %169, %170 : vector<128x128xf32>
      %172 = arith.negf %171 : vector<128x128xf32>
      %173 = math.exp %172 : vector<128x128xf32>
      %cst_118 = arith.constant 1.000000e+00 : f32
      %174 = vector.broadcast %cst_118 : f32 to vector<128x128xf32>
      %175 = arith.addf %174, %173 : vector<128x128xf32>
      %176 = arith.divf %174, %175 : vector<128x128xf32>
      %c0_119 = arith.constant 0 : index
      %c128 = arith.constant 128 : index
      %177 = vector.load %arg16[%c0_119, %c128] : memref<128x256xf32, #tpu.memory_space<vmem>>, vector<128x128xf32>
      %178 = arith.addf %177, %165 : vector<128x128xf32>
      %c0_120 = arith.constant 0 : index
      %c0_121 = arith.constant 0 : index
      %179 = vector.load %arg9[%c0_120, %c0_121] : memref<128x128xf32, #tpu.memory_space<vmem>>, vector<128x128xf32>
      %180 = arith.addf %178, %179 : vector<128x128xf32>
      %181 = arith.negf %180 : vector<128x128xf32>
      %182 = math.exp %181 : vector<128x128xf32>
      %cst_122 = arith.constant 1.000000e+00 : f32
      %183 = vector.broadcast %cst_122 : f32 to vector<128x128xf32>
      %184 = arith.addf %183, %182 : vector<128x128xf32>
      %185 = arith.divf %183, %184 : vector<128x128xf32>
      %186 = arith.mulf %185, %161 : vector<128x128xf32>
      %187 = arith.truncf %186 : vector<128x128xf32> to vector<128x128xbf16>
      %cst_123 = arith.constant 0.000000e+00 : f32
      %188 = vector.broadcast %cst_123 : f32 to vector<128x128xf32>
      %c0_i32_124 = arith.constant 0 : i32
      %c27_i32 = arith.constant 27 : i32
      %189 = arith.addi %c0_i32_124, %c27_i32 : i32
      %c1_i32_125 = arith.constant 1 : i32
      %190 = scf.for %arg17 = %c0_i32_124 to %189 step %c1_i32_125 iter_args(%arg18 = %188) -> (vector<128x128xf32>)  : i32 {
        %201 = arith.index_cast %arg17 : i32 to index
        %c0_132 = arith.constant 0 : index
        %c0_133 = arith.constant 0 : index
        %202 = vector.load %arg11[%201, %c0_132, %c0_133] : memref<27x128x128xbf16, #tpu.memory_space<vmem>>, vector<1x128x128xbf16>
        %203 = vector.shape_cast %202 : vector<1x128x128xbf16> to vector<128x128xbf16>
        %cst_134 = arith.constant dense<0.000000e+00> : vector<128x128xf32>
        %204 = tpu.matmul %203, %187, %cst_134 {dimension_numbers = #tpu.dot_dimension_numbers<[1], [0], [0], [1], [0, 0, 1, 1], [], []>} : vector<128x128xbf16>, vector<128x128xbf16>, vector<128x128xf32> -> vector<128x128xf32>
        %205 = arith.truncf %204 : vector<128x128xf32> to vector<128x128xbf16>
        %206 = arith.index_cast %arg17 : i32 to index
        %c0_135 = arith.constant 0 : index
        %c0_136 = arith.constant 0 : index
        %207 = vector.load %arg7[%206, %c0_135, %c0_136] : memref<27x128x128xbf16, #tpu.memory_space<vmem>>, vector<1x128x128xbf16>
        %208 = vector.shape_cast %207 : vector<1x128x128xbf16> to vector<128x128xbf16>
        %cst_137 = arith.constant dense<0.000000e+00> : vector<128x128xf32>
        %209 = tpu.matmul %205, %208, %cst_137 {dimension_numbers = #tpu.dot_dimension_numbers<[1], [0], [0], [1], [0, 0, 1, 1], [], []>} : vector<128x128xbf16>, vector<128x128xbf16>, vector<128x128xf32> -> vector<128x128xf32>
        %210 = arith.addf %arg18, %209 : vector<128x128xf32>
        scf.yield %210 : vector<128x128xf32>
      }
      %c27_i32_126 = arith.constant 27 : i32
      %191 = arith.addf %190, %167 : vector<128x128xf32>
      %c0_127 = arith.constant 0 : index
      %c0_128 = arith.constant 0 : index
      %192 = vector.load %arg10[%c0_127, %c0_128] : memref<128x128xf32, #tpu.memory_space<vmem>>, vector<128x128xf32>
      %193 = arith.addf %191, %192 : vector<128x128xf32>
      %194 = math.tanh %193 : vector<128x128xf32>
      %cst_129 = arith.constant 1.000000e+00 : f32
      %195 = vector.broadcast %cst_129 : f32 to vector<128x128xf32>
      %196 = arith.subf %195, %176 : vector<128x128xf32>
      %197 = arith.mulf %196, %161 : vector<128x128xf32>
      %198 = arith.mulf %176, %194 : vector<128x128xf32>
      %199 = arith.addf %197, %198 : vector<128x128xf32>
      %c0_130 = arith.constant 0 : index
      %c0_131 = arith.constant 0 : index
      %200 = vector.load %arg12[%c0_130, %c0_131] : memref<128x128xf32, #tpu.memory_space<vmem>>, vector<128x128xf32>
      tpu.vector_store %arg12[%c0_130, %c0_131], %199 {strides = array<i32>} : memref<128x128xf32, #tpu.memory_space<vmem>>, vector<128x128xf32>,
    } else {
    }
    return
  }
  func.func @transform_0(%arg0: i32) -> (i32, i32) {
    %c0_i32 = arith.constant 0 : i32
    %c0_i32_0 = arith.constant 0 : i32
    %c0_i32_1 = arith.constant 0 : i32
    return %c0_i32, %c0_i32_0 : i32, i32
  }
  func.func @transform_1(%arg0: i32) -> (i32, i32, i32) {
    %c0_i32 = arith.constant 0 : i32
    %c0_i32_0 = arith.constant 0 : i32
    %c0_i32_1 = arith.constant 0 : i32
    return %arg0, %c0_i32, %c0_i32_0 : i32, i32, i32
  }
  func.func @transform_2(%arg0: i32) -> (i32, i32, i32) {
    %c0_i32 = arith.constant 0 : i32
    %c0_i32_0 = arith.constant 0 : i32
    %c0_i32_1 = arith.constant 0 : i32
    return %arg0, %c0_i32, %c0_i32_0 : i32, i32, i32
  }
  func.func @transform_3(%arg0: i32) -> (i32, i32, i32) {
    %c0_i32 = arith.constant 0 : i32
    %c0_i32_0 = arith.constant 0 : i32
    %c0_i32_1 = arith.constant 0 : i32
    return %arg0, %c0_i32, %c0_i32_0 : i32, i32, i32
  }
  func.func @transform_4(%arg0: i32) -> (i32, i32) {
    %c0_i32 = arith.constant 0 : i32
    %c0_i32_0 = arith.constant 0 : i32
    %c0_i32_1 = arith.constant 0 : i32
    return %c0_i32, %c0_i32_0 : i32, i32
  }
  func.func @transform_5(%arg0: i32) -> (i32, i32, i32) {
    %c0_i32 = arith.constant 0 : i32
    %c0_i32_0 = arith.constant 0 : i32
    %c0_i32_1 = arith.constant 0 : i32
    %c0_i32_2 = arith.constant 0 : i32
    return %c0_i32, %c0_i32_0, %c0_i32_1 : i32, i32, i32
  }
  func.func @transform_6(%arg0: i32) -> (i32, i32, i32) {
    %c0_i32 = arith.constant 0 : i32
    %c0_i32_0 = arith.constant 0 : i32
    %c0_i32_1 = arith.constant 0 : i32
    %c0_i32_2 = arith.constant 0 : i32
    return %c0_i32, %c0_i32_0, %c0_i32_1 : i32, i32, i32
  }
  func.func @transform_7(%arg0: i32) -> (i32, i32) {
    %c0_i32 = arith.constant 0 : i32
    %c0_i32_0 = arith.constant 0 : i32
    %c0_i32_1 = arith.constant 0 : i32
    return %c0_i32, %c0_i32_0 : i32, i32
  }
  func.func @transform_8(%arg0: i32) -> (i32, i32) {
    %c0_i32 = arith.constant 0 : i32
    %c0_i32_0 = arith.constant 0 : i32
    %c0_i32_1 = arith.constant 0 : i32
    return %c0_i32, %c0_i32_0 : i32, i32
  }
  func.func @transform_9(%arg0: i32) -> (i32, i32) {
    %c0_i32 = arith.constant 0 : i32
    %c0_i32_0 = arith.constant 0 : i32
    %c0_i32_1 = arith.constant 0 : i32
    return %c0_i32, %c0_i32_0 : i32, i32
  }
  func.func @transform_10(%arg0: i32) -> (i32, i32, i32) {
    %c0_i32 = arith.constant 0 : i32
    %c0_i32_0 = arith.constant 0 : i32
    %c0_i32_1 = arith.constant 0 : i32
    %c0_i32_2 = arith.constant 0 : i32
    return %c0_i32, %c0_i32_0, %c0_i32_1 : i32, i32, i32
  }
  func.func @transform_11(%arg0: i32) -> (i32, i32) {
    %c0_i32 = arith.constant 0 : i32
    %c0_i32_0 = arith.constant 0 : i32
    %c0_i32_1 = arith.constant 0 : i32
    return %c0_i32, %c0_i32_0 : i32, i32
  }
}

</mosaic_0001>

<bundles_post_ra>
// kernel: three_dim_lstm_forward.1
= control target key start
LH: loop header
LB: loop body
LE: loop exit
PB: predicated region body
PF: predicated region fallthrough
CT: control target
= control target key end

     0   :  { %s21005_s0 = inlined_call_operand.hbm [shape: f32[2,1024], index: 0, kind: input, shape index: {}]   ;;  %s21006_s1 = inlined_call_operand.hbm [shape: bf16[8,1024,1024], index: 1, kind: input, shape index: {}]   ;;  %s21007_s2 = inlined_call_operand.hbm [shape: bf16[8,1024,1024], index: 2, kind: input, shape index: {}]   ;;  %s21008_s3 = inlined_call_operand.hbm [shape: bf16[8,1024,1024], index: 3, kind: input, shape index: {}]   ;;  %s21009_s4 = inlined_call_operand.hbm [shape: f32[128,128], index: 4, kind: input, shape index: {}]   ;;  %s21010_s5 = inlined_call_operand.hbm [shape: bf16[27,128,256], index: 5, kind: input, shape index: {}]   ;;  %s21011_s6 = inlined_call_operand.hbm [shape: bf16[27,128,128], index: 6, kind: input, shape index: {}]   ;;  %s21012_s7 = inlined_call_operand.hbm [shape: f32[128,128], index: 7, kind: input, shape index: {}]   ;;  %s21013_s8 = inlined_call_operand.hbm [shape: f32[128,128], index: 8, kind: input, shape index: {}]   ;;  %s21014_s9 = inlined_call_operand.hbm [shape: f32[128,128], index: 9, kind: input, shape index: {}]   ;;  %s21015_s10 = inlined_call_operand.hbm [shape: bf16[27,128,128], index: 10, kind: input, shape index: {}]   ;;  %s21016_s11 = inlined_call_operand.hbm [shape: f32[128,128], index: 11, kind: output, shape index: {}]  }
   0x1   :  { %21078 = sst [smem:[#allocation80_spill]] %s21005_s0 }
   0x2   :  { %21079 = sst [smem:[#allocation81_spill]] %s21006_s1 }
   0x3   :  { %21080 = sst [smem:[#allocation82_spill]] %s21009_s4 }
   0x4   :  { %21081 = sst [smem:[#allocation83_spill]] %s21010_s5 }
   0x5   :  { %21082 = sst [smem:[#allocation84_spill]] %s21012_s7 }
   0x6   :  { %21083 = sst [smem:[#allocation85_spill]] %s21014_s9 }
   0x7   :  { %16 = vsyncpa [#allocation7], 0 }
   0x8   :  { %17 = vsyncpa [#allocation10], 0 }
   0x9   :  { %19 = vsyncpa [#allocation10 + $0x1], 0 }
   0xa   :  { %20 = vsyncpa [#allocation13], 0 }
   0xb   :  { %22 = vsyncpa [#allocation13 + $0x1], 0 }
   0xc   :  { %23 = vsyncpa [#allocation16], 0 }
   0xd   :  { %24 = vsyncpa [#allocation19], 0 }
   0xe   :  { %25 = vsyncpa [#allocation22], 0 }
   0xf   :  { %26 = vsyncpa [#allocation8], 0  ;;  %s17910_s17 = smov 0   ;;  %s17912_s18 = smov 0  }
  0x10   :  { %s17914_s19 = smov 0   ;;  %s17916_s20 = smov 0  }
  0x11 LB: > { %21084 = sst [smem:[#allocation33_spill]] %s17621_s19  ;;  %s17827_s21 = smov [#allocation14]   ;;  %s17625_s20 = sphi %s17916_s20, %s21305_s20   ;;  %s17621_s19 = sphi %s17914_s19, %s21302_s19   ;;  %s17617_s18 = sphi %s17912_s18, %s21304_s18   ;;  %s17613_s17 = sphi %s17910_s17, %s21303_s17  }
  0x12   : > { %s327_s22 = sshll.u32 %s17827_s21, 4  ;;  %s17931_s23 = sadd.s32 4294967295, %s17625_s20   ;;  %s328_s22 = int_to_ptr.vmem [resolvable:$true] %s327_s22 }
  0x13   : > { %p14358_p0 = scmp.ge.s32.totalorder %s17625_s20, 1  ;;  %p21019_p1 = scmp.eq.s32.totalorder %s17931_s23, 0 }
  0x14   : > { %p304_p2 = scmp.lt.s32.totalorder %s17625_s20, 9  ;;  %s17828_s25 = smov [#allocation15]  }
  0x15   : > { %s340_s26 = sshll.u32 %s17828_s25, 4  ;;  %s17829_s28 = smov [#allocation18]   ;;  %s17949_s26 = int_to_ptr.vmem [resolvable:$true] %s340_s26 }
  0x16   : > { %p17937_p4 = pnand %p14358_p0, %p304_p2  ;;  %s366_s29 = sshll.u32 %s17829_s28, 4  ;;  %s17951_s29 = int_to_ptr.vmem [resolvable:$true] %s366_s29 }
  0x17   : > { %s17058_s12 = scalar_lea.vmem %s328_s22, 2048  ;;  %p17066_p11 = scmp.lt.s32.totalorder %s328_s22, %s328_s22 }
  0x18   : > { %s21085_s24 = scalar_select %p17937_p4, 1, 0 }
  0x19   : > { %p16331_p5 = pneg %p17937_p4  ;;  %p17059_p8 = scmp.ne.s32.totalorder %s328_s22, %s17058_s12 }
  0x1a   : > { %p17067_p12 = scmp.lt.s32.totalorder %s17058_s12, %s17058_s12 }
  0x1b   : > { %p17945_p6 = pnand %p16331_p5, %p21019_p1 }
  0x1c   : > { %p17068_p13 = por %p17067_p12, %p17066_p11 }
  0x1d   : > { %s21086_s27 = scalar_select %p17945_p6, 1, 0 }
  0x1e   : > { %p17955_p7 = pneg %p17945_p6 }
  0x20   : > { %s21087_s30 = scalar_select %p17955_p7, 1, 0 }
  0x21   : > { %p17061_p9 = pnand %p17059_p8, %p17955_p7 }
  0x23   : > { %p17062_p10 = pneg %p17061_p9 }
  0x25   : > { %p17069_p0 = pnand %p17068_p13, %p17062_p10 }
  0x27   : > { %17072 = shalt.err (!%p17069_p0)
}
  0x28   : > { %s21017_s13 = smov 128   ;;  %s21018_s14 = smov 8  }
  0x29   : > { %s21088_s4 = sld [smem:[#allocation82_spill]]  ;;  %s17084_s21 = scalar_lea.vmem %s17949_s26, 55296 }
  0x2a   : > { %p17085_p2 = scmp.ne.s32.totalorder %s17949_s26, %s17084_s21  ;;  %p17092_p9 = scmp.lt.s32.totalorder %s17949_s26, %s17949_s26 }
  0x2b   : > { %p17093_p10 = scmp.lt.s32.totalorder %s17084_s21, %s17084_s21 }
  0x2c   : > { %p17087_p5 = pnand %p17085_p2, %p17955_p7 }
  0x2d   : > { %p17094_p11 = por %p17093_p10, %p17092_p9 }
  0x2e   : > { %p17088_p8 = pneg %p17087_p5 }
  0x2f   : > { %16337 = dma.hbm_to_vmem [thread:$0]  (!%p17945_p6), %s21088_s4, 2048, %s328_s22, [#allocation13], %s21017_s13, %s21017_s13, %s21018_s14  }
  0x30   : > { %p17095_p12 = pnand %p17094_p11, %p17088_p8 }
  0x32   : > { %17098 = shalt.err (!%p17095_p12)
}
  0x33   : > { %s21089_s5 = sld [smem:[#allocation83_spill]]  ;;  %s17110_s22 = scalar_lea.vmem %s17951_s29, 2048 }
  0x34   : > { %p17111_p13 = scmp.ne.s32.totalorder %s17951_s29, %s17110_s22  ;;  %p17118_p5 = scmp.lt.s32.totalorder %s17951_s29, %s17951_s29 }
  0x35   : > { %p17119_p8 = scmp.lt.s32.totalorder %s17110_s22, %s17110_s22 }
  0x36   : > { %p17113_p0 = pnand %p17111_p13, %p17955_p7 }
  0x37   : > { %p17120_p9 = por %p17119_p8, %p17118_p5 }
  0x38   : > { %p17114_p2 = pneg %p17113_p0 }
  0x39   : > { %16340 = dma.hbm_to_vmem [thread:$0]  (!%p17945_p6), %s21089_s5, 55296, %s17949_s26, [#allocation16], %s21017_s13, %s21017_s13, %s21018_s14  }
  0x3a   : > { %p17121_p10 = pnand %p17120_p9, %p17114_p2 }
  0x3c   : > { %17124 = shalt.err (!%p17121_p10)
}
  0x3d   : > { %s21090_s7 = sld [smem:[#allocation84_spill]]  ;;  %s17832_s26 = smov [#allocation21]  }
  0x3e   : > { %s392_s16 = sshll.u32 %s17832_s26, 4  ;;  %s393_s16 = int_to_ptr.vmem [resolvable:$true] %s392_s16 }
  0x3f   : > { %s17136_s21 = scalar_lea.vmem %s393_s16, 2048  ;;  %p17144_p0 = scmp.lt.s32.totalorder %s393_s16, %s393_s16 }
  0x40   : > { %p17137_p11 = scmp.ne.s32.totalorder %s393_s16, %s17136_s21  ;;  %p17145_p2 = scmp.lt.s32.totalorder %s17136_s21, %s17136_s21 }
  0x42   : > { %p17139_p12 = pnand %p17137_p11, %p17955_p7  ;;  %p17146_p5 = por %p17145_p2, %p17144_p0 }
  0x43   : > { %16346 = dma.hbm_to_vmem [thread:$0]  (!%p17945_p6), %s21090_s7, 2048, %s17951_s29, [#allocation19], %s21017_s13, %s21017_s13, %s21018_s14  }
  0x44   : > { %p17140_p13 = pneg %p17139_p12 }
  0x46   : > { %p17147_p8 = pnand %p17146_p5, %p17140_p13 }
  0x48   : > { %17150 = shalt.err (!%p17147_p8)
}
  0x49   : > { %s21091_s9 = sld [smem:[#allocation85_spill]]  ;;  %s18010_s28 = sadd.s32 1, %s17625_s20  }
  0x4a   : > { %s60_s22 = sadd.s32 1, %s17621_s19  ;;  %s57_s12 = ssub.s32 %s17625_s20, %s18010_s28 }
  0x4b   : > { %p67_p9 = scmp.ne.s32.totalorder %s17621_s19, %s17617_s18  ;;  %p58_p10 = scmp.eq.s32.totalorder %s57_s12, 0 }
  0x4c   : > { %p68_p11 = scmp.eq.s32.totalorder %s17625_s20, 0  ;;  %p73_p12 = scmp.ne.s32.totalorder %s17617_s18, %s17613_s17 }
  0x4d   : > { %p16374_p13 = scmp.lt.s32.totalorder %s17625_s20, 8  ;;  %s421_s21 = sand.u32 1, %s17621_s19  }
  0x4e   : > { %s18022_s15 = scalar_select %p58_p10, %s17621_s19, %s60_s22  }
  0x4f   : > { %16352 = dma.hbm_to_vmem [thread:$0]  (!%p17945_p6), %s21091_s9, 2048, %s393_s16, [#allocation22], %s21017_s13, %s21017_s13, %s21018_s14  }
  0x50   : > { %21092 = sst [smem:[#allocation34_spill]] %s18022_s15  ;;  %p69_p0 = por %p68_p11, %p67_p9 }
  0x51   : > { %p18026_p2 = por %p21019_p1, %p73_p12  ;;  %s18032_s25 = sshll.u32 %s421_s21, 12 }
  0x52   : > { %s18035_s29 = sshll.u32 %s17625_s20, 16  ;;  %s21094_s1 = sld [smem:[#allocation81_spill]] }
  0x53   : > { %s21093_s26 = scalar_select %p18026_p2, 1, 0 }
  0x54   : > { %s423_s22 = scalar_lea.vmem [#allocation9], %s18032_s25  ;;  %p18046_p5 = pnand %p16374_p13, %p69_p0 }
  0x55   : > { %s430_s14 = sshll.u32 %s423_s22, 4  ;;  %s21096_s21 = sand.u32 1, %s17625_s20   ;;  %s18044_s14 = int_to_ptr.vmem [resolvable:$true] %s430_s14 }
  0x56   : > { %s21095_s16 = scalar_select %p18046_p5, 1, 0 }
  0x57   : > { %s18052_s4 = scalar_lea.sflag [#allocation10], %s21096_s21  ;;  %p18058_p9 = pneg %p18046_p5 }
  0x58   : > { %s18041_s17 = scalar_lea.hbm %s21094_s1, %s18035_s29  ;;  %s17156_s7 = scalar_lea.hbm %s21094_s1, 524288 }
  0x59   : > { %s17151_s5 = scalar_lea.hbm %s18041_s17, 65536  ;;  %p17157_p12 = scmp.lt.s32.totalorder %s18041_s17, %s21094_s1 }
  0x5a   : > { %p17152_p8 = scmp.ne.s32.totalorder %s18041_s17, %s17151_s5  ;;  %p17158_p13 = scmp.lt.s32.totalorder %s17156_s7, %s17151_s5 }
  0x5b   : > { %s21097_s13 = scalar_select %p18058_p9, 1, 0 }
  0x5c   : > { %p17154_p10 = pnand %p18058_p9, %p17152_p8  ;;  %p17159_p0 = por %p17158_p13, %p17157_p12 }
  0x5e   : > { %p17155_p11 = pneg %p17154_p10 }
  0x60   : > { %p17160_p3 = pnand %p17159_p0, %p17155_p11 }
  0x62   : > { %17163 = shalt.err (!%p17160_p3)
}
  0x63   : > { %s17164_s21 = scalar_lea.vmem %s18044_s14, 65536  ;;  %s17833_s19 = smov [#allocation9]  }
  0x64   : > { %p17165_p1 = scmp.ne.s32.totalorder %s18044_s14, %s17164_s21  ;;  %s17169_s12 = sshll.u32 %s17833_s19, 4  ;;  %s17170_s12 = int_to_ptr.vmem [resolvable:$false] %s17169_s12 }
  0x65   : > { %s17171_s22 = scalar_lea.vmem %s17170_s12, 131072  ;;  %p17172_p2 = scmp.lt.s32.totalorder %s18044_s14, %s17170_s12 }
  0x66   : > { %p17167_p8 = pnand %p17165_p1, %p18058_p9  ;;  %p17173_p4 = scmp.lt.s32.totalorder %s17171_s22, %s17164_s21 }
  0x68   : > { %p17168_p10 = pneg %p17167_p8  ;;  %p17174_p6 = por %p17173_p4, %p17172_p2 }
  0x6a   : > { %p17175_p7 = pnand %p17174_p6, %p17168_p10 }
  0x6c   : > { %17178 = shalt.err (!%p17175_p7)
}
  0x6d   : > { %s21031_s5 = smov 512   ;;  %s21033_s7 = smov 32  }
  0x6e   : > { %16359 = dma.hbm_to_vmem [thread:$0]  (!%p18046_p5), %s18041_s17, 65536, %s18044_s14, %s18052_s4, %s21031_s5, %s21031_s5, %s21033_s7  }
  0x6f   : > { %s17836_s9 = smov [#allocation6]   ;;  %s17837_s15 = smov [#allocation17]  }
  0x70   : > { %s317_s19 = sshll.u32 %s17836_s9, 4  ;;  %s353_s12 = sshll.u32 %s17837_s15, 4  ;;  %s318_s19 = int_to_ptr.vmem [resolvable:$true] %s317_s19  ;;  %s354_s12 = int_to_ptr.vmem [resolvable:$true] %s353_s12 }
  0x71   : > { %s17190_s21 = scalar_lea.vmem %s318_s19, 256  ;;  %p21098_p3 = scmp.ne.s32.totalorder %s21087_s30, 0 }
  0x72   : > { %p17191_p1 = scmp.ne.s32.totalorder %s318_s19, %s17190_s21  ;;  %p17198_p7 = scmp.lt.s32.totalorder %s318_s19, %s318_s19 }
  0x73   : > { %p17199_p2 = scmp.lt.s32.totalorder %s17190_s21, %s17190_s21 }
  0x74   : > { %p17193_p4 = pnand %p17191_p1, %p21098_p3 }
  0x75   : > { %p17200_p11 = por %p17199_p2, %p17198_p7 }
  0x76   : > { %p17194_p6 = pneg %p17193_p4 }
  0x78   : > { %p17201_p12 = pnand %p17200_p11, %p17194_p6 }
  0x7a   : > { %17204 = shalt.err (!%p17201_p12)
}
  0x7b   : > { %p21099_p13 = scmp.ne.s32.totalorder %s21086_s27, 0  ;;  %s21100_s0 = sld [smem:[#allocation80_spill]] }
  0x7c   : > { %s17216_s17 = scalar_lea.vmem %s354_s12, 27648  ;;  %p17224_p5 = scmp.lt.s32.totalorder %s354_s12, %s354_s12 }
  0x7d   : > { %p17217_p0 = scmp.ne.s32.totalorder %s354_s12, %s17216_s17  ;;  %p17225_p1 = scmp.lt.s32.totalorder %s17216_s17, %s17216_s17 }
  0x7f   : > { %p17219_p8 = pnand %p17217_p0, %p21098_p3  ;;  %p17226_p4 = por %p17225_p1, %p17224_p5 }
  0x81   : > { %16334 = dma.hbm_to_vmem [thread:$0]  (!%p21099_p13), %s21100_s0, 256, %s318_s19, [#allocation7]  }
  0x82   : > { %p17220_p10 = pneg %p17219_p8 }
  0x84   : > { %p17227_p9 = pnand %p17226_p4, %p17220_p10 }
  0x86   : > { %17230 = shalt.err (!%p17227_p9)
}
  0x87   : > { %s17838_s9 = smov 64   ;;  %s17839_s15 = smov 4  }
  0x88   : > { %16343 = dma.hbm_to_vmem [thread:$0]  (!%p21099_p13), %s21011_s6, 27648, %s354_s12, [#allocation16], %s17838_s9, %s17838_s9, %s17839_s15  }
  0x89   : > { %s17840_s22 = smov [#allocation20]   ;;  %s17841_s5 = smov [#allocation23]  }
  0x8a   : > { %s379_s14 = sshll.u32 %s17840_s22, 4  ;;  %s405_s7 = sshll.u32 %s17841_s5, 4  ;;  %s380_s14 = int_to_ptr.vmem [resolvable:$true] %s379_s14  ;;  %s406_s7 = int_to_ptr.vmem [resolvable:$true] %s405_s7 }
  0x8b   : > { %s17242_s17 = scalar_lea.vmem %s380_s14, 2048  ;;  %p17250_p7 = scmp.lt.s32.totalorder %s380_s14, %s380_s14 }
  0x8c   : > { %p17243_p5 = scmp.ne.s32.totalorder %s380_s14, %s17242_s17  ;;  %p17251_p2 = scmp.lt.s32.totalorder %s17242_s17, %s17242_s17 }
  0x8e   : > { %p17245_p9 = pnand %p17243_p5, %p21098_p3  ;;  %p17252_p11 = por %p17251_p2, %p17250_p7 }
  0x90   : > { %p17246_p6 = pneg %p17245_p9 }
  0x92   : > { %p17253_p12 = pnand %p17252_p11, %p17246_p6 }
  0x94   : > { %17256 = shalt.err (!%p17253_p12)
}
  0x95   : > { %s21101_s21 = smov 8   ;;  %s21102_s12 = smov 128  }
  0x96   : > { %16349 = dma.hbm_to_vmem [thread:$0]  (!%p21099_p13), %s21013_s8, 2048, %s380_s14, [#allocation19], %s21102_s12, %s21102_s12, %s21101_s21  }
  0x97   : > { %s17268_s5 = scalar_lea.vmem %s406_s7, 27648  ;;  %p17276_p1 = scmp.lt.s32.totalorder %s406_s7, %s406_s7 }
  0x98   : > { %p17269_p0 = scmp.ne.s32.totalorder %s406_s7, %s17268_s5  ;;  %p17277_p4 = scmp.lt.s32.totalorder %s17268_s5, %s17268_s5 }
  0x9a   : > { %p17271_p8 = pnand %p17269_p0, %p21098_p3  ;;  %p17278_p5 = por %p17277_p4, %p17276_p1 }
  0x9c   : > { %p17272_p10 = pneg %p17271_p8 }
  0x9e   : > { %p17279_p9 = pnand %p17278_p5, %p17272_p10 }
  0xa0   : > { %17282 = shalt.err (!%p17279_p9)
}
  0xa1   : > { %16355 = dma.hbm_to_vmem [thread:$0]  (!%p21099_p13), %s21015_s10, 27648, %s406_s7, [#allocation22], %s17838_s9, %s17838_s9, %s17839_s15  }
  0xa2   : > { %s18125_s21 = scalar_lea.hbm %s21007_s2, %s18035_s29  ;;  %s444_s27 = scalar_lea.vmem [#allocation11], %s18032_s25 }
  0xa3   : > { %s451_s12 = sshll.u32 %s444_s27, 4  ;;  %s18134_s0 = scalar_lea.hbm %s21008_s3, %s18035_s29  ;;  %s18128_s12 = int_to_ptr.vmem [resolvable:$true] %s451_s12 }
  0xa4   : > { %s17283_s5 = scalar_lea.hbm %s18125_s21, 65536  ;;  %p21103_p13 = scmp.ne.s32.totalorder %s21097_s13, 0 }
  0xa5   : > { %p17284_p3 = scmp.ne.s32.totalorder %s18125_s21, %s17283_s5  ;;  %s17288_s15 = scalar_lea.hbm %s21007_s2, 524288 }
  0xa6   : > { %p17289_p2 = scmp.lt.s32.totalorder %s18125_s21, %s21007_s2  ;;  %p17290_p11 = scmp.lt.s32.totalorder %s17288_s15, %s17283_s5 }
  0xa7   : > { %p17286_p6 = pnand %p17284_p3, %p21103_p13 }
  0xa8   : > { %p17291_p12 = por %p17290_p11, %p17289_p2 }
  0xa9   : > { %p17287_p7 = pneg %p17286_p6 }
  0xab   : > { %p17292_p0 = pnand %p17291_p12, %p17287_p7 }
  0xad   : > { %17295 = shalt.err (!%p17292_p0)
}
  0xae   : > { %s17296_s29 = scalar_lea.vmem %s18128_s12, 65536  ;;  %s17842_s14 = smov [#allocation11]  }
  0xaf   : > { %p17297_p8 = scmp.ne.s32.totalorder %s18128_s12, %s17296_s29  ;;  %s17301_s27 = sshll.u32 %s17842_s14, 4  ;;  %s17302_s27 = int_to_ptr.vmem [resolvable:$false] %s17301_s27 }
  0xb0   : > { %s17303_s19 = scalar_lea.vmem %s17302_s27, 131072  ;;  %p17304_p4 = scmp.lt.s32.totalorder %s18128_s12, %s17302_s27 }
  0xb1   : > { %p17299_p10 = pnand %p17297_p8, %p21103_p13  ;;  %p17305_p5 = scmp.lt.s32.totalorder %s17303_s19, %s17296_s29 }
  0xb3   : > { %p17300_p1 = pneg %p17299_p10  ;;  %p17306_p9 = por %p17305_p5, %p17304_p4 }
  0xb5   : > { %p17307_p3 = pnand %p17306_p9, %p17300_p1 }
  0xb7   : > { %17310 = shalt.err (!%p17307_p3)
}
  0xb8   : > { %p21104_p6 = scmp.ne.s32.totalorder %s21095_s16, 0  ;;  %s21105_s22 = smov 32  }
  0xb9   : > { %s21106_s5 = smov 512   ;;  %s465_s7 = scalar_lea.vmem [#allocation12], %s18032_s25 }
  0xba   : > { %16362 = dma.hbm_to_vmem [thread:$0]  (!%p21104_p6), %s18125_s21, 65536, %s18128_s12, %s18052_s4, %s21106_s5, %s21106_s5, %s21105_s22  }
  0xbb   : > { %s472_s9 = sshll.u32 %s465_s7, 4  ;;  %s21107_s15 = sand.u32 1, %s17625_s20   ;;  %s18161_s9 = int_to_ptr.vmem [resolvable:$true] %s472_s9 }
  0xbc   : > { %s462_s17 = scalar_lea.sflag [#allocation13], %s21107_s15  ;;  %s17311_s30 = scalar_lea.hbm %s18134_s0, 65536 }
  0xbd   : > { %p17312_p7 = scmp.ne.s32.totalorder %s18134_s0, %s17311_s30  ;;  %s17316_s27 = scalar_lea.hbm %s21008_s3, 524288 }
  0xbe   : > { %p17317_p12 = scmp.lt.s32.totalorder %s18134_s0, %s21008_s3  ;;  %p17318_p0 = scmp.lt.s32.totalorder %s17316_s27, %s17311_s30 }
  0xbf   : > { %p17314_p2 = pnand %p17312_p7, %p21103_p13 }
  0xc0   : > { %p17319_p8 = por %p17318_p0, %p17317_p12 }
  0xc1   : > { %p17315_p11 = pneg %p17314_p2 }
  0xc3   : > { %p17320_p10 = pnand %p17319_p8, %p17315_p11 }
  0xc5   : > { %17323 = shalt.err (!%p17320_p10)
}
  0xc6   : > { %s17324_s4 = scalar_lea.vmem %s18161_s9, 65536  ;;  %s17843_s20 = smov [#allocation12]  }
  0xc7   : > { %p17325_p1 = scmp.ne.s32.totalorder %s18161_s9, %s17324_s4  ;;  %s17329_s25 = sshll.u32 %s17843_s20, 4  ;;  %s17330_s25 = int_to_ptr.vmem [resolvable:$false] %s17329_s25 }
  0xc8   : > { %s17331_s21 = scalar_lea.vmem %s17330_s25, 131072  ;;  %p17332_p9 = scmp.lt.s32.totalorder %s18161_s9, %s17330_s25 }
  0xc9   : > { %p17327_p4 = pnand %p17325_p1, %p21103_p13  ;;  %p17333_p3 = scmp.lt.s32.totalorder %s17331_s21, %s17324_s4 }
  0xcb   : > { %p17328_p5 = pneg %p17327_p4  ;;  %p17334_p7 = por %p17333_p3, %p17332_p9 }
  0xcd   : > { %p17335_p2 = pnand %p17334_p7, %p17328_p5 }
  0xcf   : > { %17338 = shalt.err (!%p17335_p2)
}
  0xd0   : > { %16365 = dma.hbm_to_vmem [thread:$0]  (!%p21104_p6), %s18134_s0, 65536, %s18161_s9, %s462_s17, %s21106_s5, %s21106_s5, %s21105_s22  }
  0xd1   : > { %p21108_p13 = scmp.ne.s32.totalorder %s21085_s24, 0 }
  0xd2   : > { %p21109_p11 = scmp.eq.s32.totalorder (!%p21108_p13), %s17931_s23, 0 }
  0xd3   : > { %484 = sbr.rel (%p21108_p13) target bundleno = 3108 (0xc24), region = 64 }
  0xd8   : > { %17580 = dma.done.wait (%p21109_p11), [#allocation7], 256   ;;  %p21110_p12 = pmov %p21109_p11 }
  0xd9   : > { %s490_s1 = sand.u32 1, %s17931_s23   ;;  %s492_s16 = sand.u32 1, %s17617_s18  }
  0xda   : > { %17582 = vsyncadd (%p21110_p12), [#allocation7], 4294967040  ;;  %s14379_s13 = sshll.u32 %s492_s16, 12  ;;  %s491_s12 = scalar_lea.sflag [#allocation10], %s490_s1 }
  0xdb   : > { %s18196_s7 = scalar_lea.vmem [#allocation9], %s14379_s13  ;;  %p21111_p0 = scmp.ne.s32.totalorder %s21093_s26, 0 }
  0xdd   : > { %17584 = dma.done.wait (%p21111_p0), %s491_s12, 131072  }
  0xde   : > { %17586 = vsyncadd (%p21111_p0), %s491_s12, 4294836224  ;;  %s18202_s24 = scalar_lea.vmem [#allocation11], %s14379_s13  ;;  %s509_s0 = scalar_lea.sflag [#allocation13], %s490_s1 }
  0xdf   : > { %s18204_s22 = scalar_lea.vmem [#allocation12], %s14379_s13 }
  0xe0   : > { %17588 = dma.done.wait (%p21111_p0), %s509_s0, 65536  }
  0xe1   : > { %17590 = vsyncadd (%p21111_p0), %s509_s0, 4294901760  ;;  %p21112_p6 = pmov %p21109_p11 }
  0xe3   : > { %17592 = dma.done.wait (%p21112_p6), [#allocation13], 2048   ;;  %p21113_p8 = pmov %p21112_p6 }
  0xe4   : > { %p21114_p10 = pmov %p21112_p6 }
  0xe5   : > { %17594 = vsyncadd (%p21113_p8), [#allocation13], 4294965248 }
  0xe6   : > { %17596 = dma.done.wait (%p21114_p10), [#allocation16], 82944   ;;  %p21115_p1 = pmov %p21112_p6 }
  0xe8   : > { %17598 = vsyncadd (%p21115_p1), [#allocation16], 4294884352  ;;  %p21116_p4 = pmov %p21115_p1 }
  0xe9   : > { %p21117_p5 = pmov %p21115_p1 }
  0xea   : > { %17600 = dma.done.wait (%p21116_p4), [#allocation19], 4096  }
  0xeb   : > { %17602 = vsyncadd (%p21117_p5), [#allocation19], 4294963200  ;;  %p21118_p9 = pmov %p21115_p1 }
  0xec   : > { %p21119_p3 = pmov %p21115_p1 }
  0xed   : > { %17604 = dma.done.wait (%p21118_p9), [#allocation22], 29696  }
  0xee   : > { %17606 = vsyncadd (%p21119_p3), [#allocation22], 4294937600  ;;  %v695_v0 = vld [vmem:[%s18196_s7 + $0x1c0] sm:$0xff]  ;;  %v17844_v32 = vmov 1983009808   ;;  %v593_v34 = vlaneseq  ;;  %v585_v59 = vld [vmem:[#allocation6] sm:$0xff] }
  0xef   : > { %v699_v1 = vld [vmem:[%s18196_s7 + $0x1e0] sm:$0xff]  ;;  %v591_v33 = vunpack.c.l.s4 %v17844_v32  ;;  %s18642_s26 = sshll.u32 %s17931_s23, 3  ;;  %p21120_p7 = scmp.ne.s32.totalorder %s17931_s23, 0 }
  0xf0   : > { %v823_v2 = vld [vmem:[%s18196_s7 + $0x5c0] sm:$0xff]  ;;  %v14446_v3 = vcombine.high %v695_v0, %v699_v1  ;;  %v14445_v5 = vcombine.low %v695_v0, %v699_v1  ;;  %v18248_v44 = vshrl.u32 %v593_v34, 7  ;;  %v589_v0 = vcombine.high %v585_v59, %v585_v59  ;;  %s18653_s5 = scalar_lea.vmem [#allocation2], %s18642_s26  ;;  %s19272_s9 = scalar_lea.vmem [#allocation3], %s18642_s26 }
  0xf1   : > { %v827_v4 = vld [vmem:[%s18196_s7 + $0x5e0] sm:$0xff]  ;;  %v592_v43 = vunpack.c.0.s8 %v591_v33  ;;  %s19891_s15 = scalar_lea.vmem [#allocation4], %s18642_s26 }
  0xf2   : > { %v687_v6 = vld [vmem:[%s18196_s7 + $0x180] sm:$0xff]  ;;  %v14574_v8 = vcombine.high %v823_v2, %v827_v4  ;;  %v14573_v9 = vcombine.low %v823_v2, %v827_v4  ;;  %3711 = vmatprep.subr.bf16.mxu0 %v14446_v3 }
  0xf3   : > { %v691_v7 = vld [vmem:[%s18196_s7 + $0x1a0] sm:$0xff]  ;;  %3712 = vmatpush1.bf16.msra.mxu0 %v14445_v5  ;;  %v18255_v53 = vsub.s32 %v592_v43, %v18248_v44 }
  0xf4   : > { %v14438_v10 = vcombine.high %v687_v6, %v691_v7  ;;  %v815_v11 = vld [vmem:[%s18196_s7 + $0x580] sm:$0xff]  ;;  %3752 = vmatprep.subr.bf16.mxu1 %v14574_v8  ;;  %v14437_v18 = vcombine.low %v687_v6, %v691_v7 }
  0xf5   : > { %v819_v12 = vld [vmem:[%s18196_s7 + $0x5a0] sm:$0xff]  ;;  %3753 = vmatpush1.bf16.msra.mxu1 %v14573_v9  ;;  %v18262_v63 = vrot.slane %v585_v59, %v18255_v53  ;;  %v18269_v5 = vrot.slane %v589_v0, %v18255_v53 }
  0xf6   : > { %v679_v13 = vld [vmem:[%s18196_s7 + $0x140] sm:$0xff]  ;;  %v14566_v14 = vcombine.high %v815_v11, %v819_v12  ;;  %3713 = vmatprep.subr.bf16.mxu0 %v14438_v10  ;;  %v14565_v19 = vcombine.low %v815_v11, %v819_v12 }
  0xf7   : > { %v683_v15 = vld [vmem:[%s18196_s7 + $0x160] sm:$0xff]  ;;  %3714 = vmatpush1.bf16.msra.mxu0 %v14437_v18  ;;  %v604_v4 = vcombine.high %v18262_v63, %v18262_v63  ;;  %v605_v12 = vcombine.high %v18269_v5, %v18269_v5 }
  0xf8   : > { %v807_v16 = vld [vmem:[%s18196_s7 + $0x540] sm:$0xff]  ;;  %v14430_v20 = vcombine.high %v679_v13, %v683_v15  ;;  %3754 = vmatprep.subr.bf16.mxu1 %v14566_v14  ;;  %v14429_v26 = vcombine.low %v679_v13, %v683_v15 }
  0xf9   : > { %v811_v17 = vld [vmem:[%s18196_s7 + $0x560] sm:$0xff]  ;;  %3755 = vmatpush1.bf16.msra.mxu1 %v14565_v19  ;;  %v18273_v11 = vpack.c.bf16 %v604_v4, %v604_v4  ;;  %v586_v4 = vld [vmem:[#allocation6 + $0x8] sm:$0xff] }
  0xfa   : > { %v14558_v21 = vcombine.high %v807_v16, %v811_v17  ;;  %v671_v22 = vld [vmem:[%s18196_s7 + $0x100] sm:$0xff]  ;;  %3715 = vmatprep.subr.bf16.mxu0 %v14430_v20  ;;  %v14557_v27 = vcombine.low %v807_v16, %v811_v17  ;;  %v18280_v16 = vpack.c.bf16 %v605_v12, %v605_v12 }
  0xfb   : > { %v675_v23 = vld [vmem:[%s18196_s7 + $0x120] sm:$0xff]  ;;  %3716 = vmatpush1.bf16.msra.mxu0 %v14429_v26  ;;  %3743 = vmatprep.mubr.bf16.mxu0 %v18273_v11 }
  0xfc   : > { %v799_v24 = vld [vmem:[%s18196_s7 + $0x500] sm:$0xff]  ;;  %v14422_v28 = vcombine.high %v671_v22, %v675_v23  ;;  %3756 = vmatprep.subr.bf16.mxu1 %v14558_v21  ;;  %v14421_v37 = vcombine.low %v671_v22, %v675_v23  ;;  %3784 = vmatprep.mubr.bf16.mxu1 %v18280_v16 }
  0xfd   : > { %v803_v25 = vld [vmem:[%s18196_s7 + $0x520] sm:$0xff]  ;;  %3757 = vmatpush1.bf16.msra.mxu1 %v14557_v27 }
  0xfe   : > { %v14550_v29 = vcombine.high %v799_v24, %v803_v25  ;;  %v663_v30 = vld [vmem:[%s18196_s7 + $0xc0] sm:$0xff]  ;;  %3717 = vmatprep.subr.bf16.mxu0 %v14422_v28  ;;  %v14549_v38 = vcombine.low %v799_v24, %v803_v25 }
  0xff   : > { %v667_v31 = vld [vmem:[%s18196_s7 + $0xe0] sm:$0xff]  ;;  %3718 = vmatpush1.bf16.msra.mxu0 %v14421_v37 }
 0x100   : > { %v791_v35 = vld [vmem:[%s18196_s7 + $0x4c0] sm:$0xff]  ;;  %v14414_v39 = vcombine.high %v663_v30, %v667_v31  ;;  %3758 = vmatprep.subr.bf16.mxu1 %v14550_v29  ;;  %v14413_v47 = vcombine.low %v663_v30, %v667_v31 }
 0x101   : > { %v795_v36 = vld [vmem:[%s18196_s7 + $0x4e0] sm:$0xff]  ;;  %3759 = vmatpush1.bf16.msra.mxu1 %v14549_v38 }
 0x102   : > { %v14542_v40 = vcombine.high %v791_v35, %v795_v36  ;;  %v655_v41 = vld [vmem:[%s18196_s7 + $0x80] sm:$0xff]  ;;  %3719 = vmatprep.subr.bf16.mxu0 %v14414_v39  ;;  %v14541_v48 = vcombine.low %v791_v35, %v795_v36 }
 0x103   : > { %v659_v42 = vld [vmem:[%s18196_s7 + $0xa0] sm:$0xff]  ;;  %3720 = vmatpush1.bf16.msra.mxu0 %v14413_v47 }
 0x104   : > { %v783_v45 = vld [vmem:[%s18196_s7 + $0x480] sm:$0xff]  ;;  %v14406_v49 = vcombine.high %v655_v41, %v659_v42  ;;  %3760 = vmatprep.subr.bf16.mxu1 %v14542_v40  ;;  %v14405_v56 = vcombine.low %v655_v41, %v659_v42 }
 0x105   : > { %v787_v46 = vld [vmem:[%s18196_s7 + $0x4a0] sm:$0xff]  ;;  %3761 = vmatpush1.bf16.msra.mxu1 %v14541_v48 }
 0x106   : > { %v14534_v50 = vcombine.high %v783_v45, %v787_v46  ;;  %v647_v51 = vld [vmem:[%s18196_s7 + $0x40] sm:$0xff]  ;;  %3721 = vmatprep.subr.bf16.mxu0 %v14406_v49  ;;  %v14533_v57 = vcombine.low %v783_v45, %v787_v46 }
 0x107   : > { %v651_v52 = vld [vmem:[%s18196_s7 + $0x60] sm:$0xff]  ;;  %3722 = vmatpush1.bf16.msra.mxu0 %v14405_v56 }
 0x108   : > { %v775_v54 = vld [vmem:[%s18196_s7 + $0x440] sm:$0xff]  ;;  %v14398_v58 = vcombine.high %v647_v51, %v651_v52  ;;  %3762 = vmatprep.subr.bf16.mxu1 %v14534_v50  ;;  %v14397_v3 = vcombine.low %v647_v51, %v651_v52 }
 0x109   : > { %v779_v55 = vld [vmem:[%s18196_s7 + $0x460] sm:$0xff]  ;;  %3763 = vmatpush1.bf16.msra.mxu1 %v14533_v57 }
 0x10a   : > { %v14526_v60 = vcombine.high %v775_v54, %v779_v55  ;;  %v639_v61 = vld [vmem:[%s18196_s7] sm:$0xff]  ;;  %3723 = vmatprep.subr.bf16.mxu0 %v14398_v58  ;;  %v14525_v6 = vcombine.low %v775_v54, %v779_v55 }
 0x10b   : > { %v643_v62 = vld [vmem:[%s18196_s7 + $0x20] sm:$0xff]  ;;  %3724 = vmatpush1.bf16.msra.mxu0 %v14397_v3 }
 0x10c   : > { %v767_v1 = vld [vmem:[%s18196_s7 + $0x400] sm:$0xff]  ;;  %v14390_v7 = vcombine.high %v639_v61, %v643_v62  ;;  %3764 = vmatprep.subr.bf16.mxu1 %v14526_v60  ;;  %v14389_v15 = vcombine.low %v639_v61, %v643_v62 }
 0x10d   : > { %v771_v2 = vld [vmem:[%s18196_s7 + $0x420] sm:$0xff]  ;;  %3765 = vmatpush1.bf16.msra.mxu1 %v14525_v6 }
 0x10e   : > { %v14518_v8 = vcombine.high %v767_v1, %v771_v2  ;;  %v759_v9 = vld [vmem:[%s18196_s7 + $0x3c0] sm:$0xff]  ;;  %3725 = vmatprep.subr.bf16.mxu0 %v14390_v7  ;;  %v14517_v17 = vcombine.low %v767_v1, %v771_v2 }
 0x10f   : > { %v763_v10 = vld [vmem:[%s18196_s7 + $0x3e0] sm:$0xff]  ;;  %3726 = vmatpush1.bf16.msra.mxu0 %v14389_v15 }
 0x110   : > { %v887_v13 = vld [vmem:[%s18196_s7 + $0x7c0] sm:$0xff]  ;;  %v14510_v18 = vcombine.high %v759_v9, %v763_v10  ;;  %3766 = vmatprep.subr.bf16.mxu1 %v14518_v8  ;;  %v14509_v24 = vcombine.low %v759_v9, %v763_v10 }
 0x111   : > { %v891_v14 = vld [vmem:[%s18196_s7 + $0x7e0] sm:$0xff]  ;;  %3767 = vmatpush1.bf16.msra.mxu1 %v14517_v17 }
 0x112   : > { %v14638_v19 = vcombine.high %v887_v13, %v891_v14  ;;  %v751_v20 = vld [vmem:[%s18196_s7 + $0x380] sm:$0xff]  ;;  %3727 = vmatprep.subr.bf16.mxu0 %v14510_v18  ;;  %v14637_v25 = vcombine.low %v887_v13, %v891_v14  ;;  %v606_v14 = vcombine.high %v586_v4, %v586_v4 }
 0x113   : > { %v755_v21 = vld [vmem:[%s18196_s7 + $0x3a0] sm:$0xff]  ;;  %3728 = vmatpush2.bf16.msra.mxu0 %v14509_v24 }
 0x114   : > { %v879_v22 = vld [vmem:[%s18196_s7 + $0x780] sm:$0xff]  ;;  %v14502_v26 = vcombine.high %v751_v20, %v755_v21  ;;  %3768 = vmatprep.subr.bf16.mxu1 %v14638_v19  ;;  %v14501_v32 = vcombine.low %v751_v20, %v755_v21 }
 0x115   : > { %v883_v23 = vld [vmem:[%s18196_s7 + $0x7a0] sm:$0xff]  ;;  %3769 = vmatpush2.bf16.msra.mxu1 %v14637_v25  ;;  %v18319_v25 = vrot.slane %v606_v14, %v18255_v53 }
 0x116   : > { %v14630_v27 = vcombine.high %v879_v22, %v883_v23  ;;  %v743_v28 = vld [vmem:[%s18196_s7 + $0x340] sm:$0xff]  ;;  %3729 = vmatprep.subr.bf16.mxu0 %v14502_v26  ;;  %v14629_v33 = vcombine.low %v879_v22, %v883_v23  ;;  %v18314_v22 = vrot.slane %v586_v4, %v18255_v53 }
 0x117   : > { %v747_v29 = vld [vmem:[%s18196_s7 + $0x360] sm:$0xff]  ;;  %3730 = vmatpush2.bf16.msra.mxu0 %v14501_v32 }
 0x118   : > { %v871_v30 = vld [vmem:[%s18196_s7 + $0x740] sm:$0xff]  ;;  %v14494_v34 = vcombine.high %v743_v28, %v747_v29  ;;  %3770 = vmatprep.subr.bf16.mxu1 %v14630_v27  ;;  %v14493_v40 = vcombine.low %v743_v28, %v747_v29  ;;  %v621_v32 = vcombine.high %v18314_v22, %v18314_v22 }
 0x119   : > { %v875_v31 = vld [vmem:[%s18196_s7 + $0x760] sm:$0xff]  ;;  %3771 = vmatpush2.bf16.msra.mxu1 %v14629_v33  ;;  %v18327_v33 = vpack.c.bf16 %v18262_v63, %v18262_v63 }
 0x11a   : > { %v14622_v35 = vcombine.high %v871_v30, %v875_v31  ;;  %v735_v36 = vld [vmem:[%s18196_s7 + $0x300] sm:$0xff]  ;;  %3731 = vmatprep.subr.bf16.mxu0 %v14494_v34  ;;  %v14621_v41 = vcombine.low %v871_v30, %v875_v31 }
 0x11b   : > { %v739_v37 = vld [vmem:[%s18196_s7 + $0x320] sm:$0xff]  ;;  %3732 = vmatpush2.bf16.msra.mxu0 %v14493_v40 }
 0x11c   : > { %v863_v38 = vld [vmem:[%s18196_s7 + $0x700] sm:$0xff]  ;;  %v14486_v42 = vcombine.high %v735_v36, %v739_v37  ;;  %3772 = vmatprep.subr.bf16.mxu1 %v14622_v35  ;;  %v14485_v49 = vcombine.low %v735_v36, %v739_v37  ;;  %v622_v35 = vcombine.high %v18319_v25, %v18319_v25  ;;  %v18335_v36 = vpack.c.bf16 %v18269_v5, %v18269_v5 }
 0x11d   : > { %v867_v39 = vld [vmem:[%s18196_s7 + $0x720] sm:$0xff]  ;;  %3773 = vmatpush2.bf16.msra.mxu1 %v14621_v41 }
 0x11e   : > { %v14614_v43 = vcombine.high %v863_v38, %v867_v39  ;;  %v727_v45 = vld [vmem:[%s18196_s7 + $0x2c0] sm:$0xff]  ;;  %3733 = vmatprep.subr.bf16.mxu0 %v14486_v42  ;;  %v14613_v50 = vcombine.low %v863_v38, %v867_v39  ;;  %v18339_v42 = vpack.c.bf16 %v621_v32, %v621_v32 }
 0x11f   : > { %v731_v46 = vld [vmem:[%s18196_s7 + $0x2e0] sm:$0xff]  ;;  %3734 = vmatpush2.bf16.msra.mxu0 %v14485_v49 }
 0x120   : > { %v855_v47 = vld [vmem:[%s18196_s7 + $0x6c0] sm:$0xff]  ;;  %v14478_v51 = vcombine.high %v727_v45, %v731_v46  ;;  %3774 = vmatprep.subr.bf16.mxu1 %v14614_v43  ;;  %v14477_v58 = vcombine.low %v727_v45, %v731_v46  ;;  %v18344_v45 = vpack.c.bf16 %v622_v35, %v622_v35 }
 0x121   : > { %v859_v48 = vld [vmem:[%s18196_s7 + $0x6e0] sm:$0xff]  ;;  %3775 = vmatpush2.bf16.msra.mxu1 %v14613_v50 }
 0x122   : > { %v14606_v52 = vcombine.high %v855_v47, %v859_v48  ;;  %v719_v54 = vld [vmem:[%s18196_s7 + $0x280] sm:$0xff]  ;;  %3735 = vmatprep.subr.bf16.mxu0 %v14478_v51  ;;  %v14605_v59 = vcombine.low %v855_v47, %v859_v48 }
 0x123   : > { %v723_v55 = vld [vmem:[%s18196_s7 + $0x2a0] sm:$0xff]  ;;  %3736 = vmatpush2.bf16.msra.mxu0 %v14477_v58 }
 0x124   : > { %v847_v56 = vld [vmem:[%s18196_s7 + $0x680] sm:$0xff]  ;;  %v14470_v60 = vcombine.high %v719_v54, %v723_v55  ;;  %3776 = vmatprep.subr.bf16.mxu1 %v14606_v52  ;;  %v14469_v3 = vcombine.low %v719_v54, %v723_v55 }
 0x125   : > { %v851_v57 = vld [vmem:[%s18196_s7 + $0x6a0] sm:$0xff]  ;;  %3777 = vmatpush2.bf16.msra.mxu1 %v14605_v59 }
 0x126   : > { %v14598_v61 = vcombine.high %v847_v56, %v851_v57  ;;  %v711_v62 = vld [vmem:[%s18196_s7 + $0x240] sm:$0xff]  ;;  %3737 = vmatprep.subr.bf16.mxu0 %v14470_v60  ;;  %v14597_v6 = vcombine.low %v847_v56, %v851_v57 }
 0x127   : > { %v715_v0 = vld [vmem:[%s18196_s7 + $0x260] sm:$0xff]  ;;  %3738 = vmatpush2.bf16.msra.mxu0 %v14469_v3 }
 0x128   : > { %v839_v1 = vld [vmem:[%s18196_s7 + $0x640] sm:$0xff]  ;;  %v14462_v7 = vcombine.high %v711_v62, %v715_v0  ;;  %3778 = vmatprep.subr.bf16.mxu1 %v14598_v61  ;;  %v14461_v15 = vcombine.low %v711_v62, %v715_v0 }
 0x129   : > { %v843_v2 = vld [vmem:[%s18196_s7 + $0x660] sm:$0xff]  ;;  %3779 = vmatpush2.bf16.msra.mxu1 %v14597_v6 }
 0x12a   : > { %v14590_v8 = vcombine.high %v839_v1, %v843_v2  ;;  %v703_v9 = vld [vmem:[%s18196_s7 + $0x200] sm:$0xff]  ;;  %3739 = vmatprep.subr.bf16.mxu0 %v14462_v7  ;;  %v14589_v17 = vcombine.low %v839_v1, %v843_v2 }
 0x12b   : > { %v707_v10 = vld [vmem:[%s18196_s7 + $0x220] sm:$0xff]  ;;  %3740 = vmatpush2.bf16.msra.mxu0 %v14461_v15 }
 0x12c   : > { %v831_v12 = vld [vmem:[%s18196_s7 + $0x600] sm:$0xff]  ;;  %v14454_v18 = vcombine.high %v703_v9, %v707_v10  ;;  %3780 = vmatprep.subr.bf16.mxu1 %v14590_v8  ;;  %v14453_v26 = vcombine.low %v703_v9, %v707_v10 }
 0x12d   : > { %v835_v13 = vld [vmem:[%s18196_s7 + $0x620] sm:$0xff]  ;;  %3781 = vmatpush2.bf16.msra.mxu1 %v14589_v17 }
 0x12e   : > { %v14582_v19 = vcombine.high %v831_v12, %v835_v13  ;;  %v951_v20 = vld [vmem:[%s18196_s7 + $0x9c0] sm:$0xff]  ;;  %3741 = vmatprep.subr.bf16.mxu0 %v14454_v18  ;;  %v14581_v27 = vcombine.low %v831_v12, %v835_v13 }
 0x12f   : > { %v955_v21 = vld [vmem:[%s18196_s7 + $0x9e0] sm:$0xff]  ;;  %3742 = vmatpush2.bf16.msra.mxu0 %v14453_v26 }
 0x130   : > { %v1079_v23 = vld [vmem:[%s18196_s7 + $0xdc0] sm:$0xff]  ;;  %v14702_v28 = vcombine.high %v951_v20, %v955_v21  ;;  %3782 = vmatprep.subr.bf16.mxu1 %v14582_v19  ;;  %v14701_v37 = vcombine.low %v951_v20, %v955_v21 }
 0x131   : > { %v1083_v24 = vld [vmem:[%s18196_s7 + $0xde0] sm:$0xff]  ;;  %3783 = vmatpush2.bf16.msra.mxu1 %v14581_v27 }
 0x132   : > { %v14830_v29 = vcombine.high %v1079_v23, %v1083_v24  ;;  %v943_v30 = vld [vmem:[%s18196_s7 + $0x980] sm:$0xff]  ;;  %3793 = vmatprep.subr.bf16.mxu0 %v14702_v28  ;;  %v14829_v38 = vcombine.low %v1079_v23, %v1083_v24  ;;  %3744 = vmatmul.mubr.bf16.vlgmr.msra.gmra.mxu0 %v18327_v33 }
 0x133   : > { %v947_v31 = vld [vmem:[%s18196_s7 + $0x9a0] sm:$0xff]  ;;  %3794 = vmatpush1.bf16.msra.mxu0 %v14701_v37  ;;  %3825 = vmatprep.mubr.bf16.mxu0 %v18339_v42 }
 0x134   : > { %v1071_v53 = vld [vmem:[%s18196_s7 + $0xd80] sm:$0xff]  ;;  %v14694_v39 = vcombine.high %v943_v30, %v947_v31  ;;  %3834 = vmatprep.subr.bf16.mxu1 %v14830_v29  ;;  %3785 = vmatmul.mubr.bf16.vlgmr.msra.gmra.mxu1 %v18335_v36  ;;  %v14693_v46 = vcombine.low %v943_v30, %v947_v31 }
 0x135   : > { %v1075_v34 = vld [vmem:[%s18196_s7 + $0xda0] sm:$0xff]  ;;  %3835 = vmatpush1.bf16.msra.mxu1 %v14829_v38  ;;  %3866 = vmatprep.mubr.bf16.mxu1 %v18344_v45 }
 0x136   : > { %v14822_v63 = vcombine.high %v1071_v53, %v1075_v34  ;;  %v935_v40 = vld [vmem:[%s18196_s7 + $0x940] sm:$0xff]  ;;  %3795 = vmatprep.subr.bf16.mxu0 %v14694_v39  ;;  %v14821_v47 = vcombine.low %v1071_v53, %v1075_v34 }
 0x137   : > { %v939_v41 = vld [vmem:[%s18196_s7 + $0x960] sm:$0xff]  ;;  %3796 = vmatpush1.bf16.msra.mxu0 %v14693_v46 }
 0x138   : > { %v1063_v43 = vld [vmem:[%s18196_s7 + $0xd40] sm:$0xff]  ;;  %v14686_v48 = vcombine.high %v935_v40, %v939_v41  ;;  %3836 = vmatprep.subr.bf16.mxu1 %v14822_v63  ;;  %v14685_v55 = vcombine.low %v935_v40, %v939_v41 }
 0x139   : > { %v1067_v5 = vld [vmem:[%s18196_s7 + $0xd60] sm:$0xff]  ;;  %3837 = vmatpush1.bf16.msra.mxu1 %v14821_v47 }
 0x13a   : > { %v14814_v49 = vcombine.high %v1063_v43, %v1067_v5  ;;  %v927_v50 = vld [vmem:[%s18196_s7 + $0x900] sm:$0xff]  ;;  %3797 = vmatprep.subr.bf16.mxu0 %v14686_v48  ;;  %v14813_v56 = vcombine.low %v1063_v43, %v1067_v5 }
 0x13b   : > { %v931_v51 = vld [vmem:[%s18196_s7 + $0x920] sm:$0xff]  ;;  %3798 = vmatpush1.bf16.msra.mxu0 %v14685_v55 }
 0x13c   : > { %v1055_v52 = vld [vmem:[%s18196_s7 + $0xd00] sm:$0xff]  ;;  %v14678_v57 = vcombine.high %v927_v50, %v931_v51  ;;  %3838 = vmatprep.subr.bf16.mxu1 %v14814_v49  ;;  %v14677_v0 = vcombine.low %v927_v50, %v931_v51 }
 0x13d   : > { %v1059_v54 = vld [vmem:[%s18196_s7 + $0xd20] sm:$0xff]  ;;  %3839 = vmatpush1.bf16.msra.mxu1 %v14813_v56 }
 0x13e   : > { %v14806_v58 = vcombine.high %v1055_v52, %v1059_v54  ;;  %v919_v59 = vld [vmem:[%s18196_s7 + $0x8c0] sm:$0xff]  ;;  %3799 = vmatprep.subr.bf16.mxu0 %v14678_v57  ;;  %v14805_v1 = vcombine.low %v1055_v52, %v1059_v54 }
 0x13f   : > { %v923_v60 = vld [vmem:[%s18196_s7 + $0x8e0] sm:$0xff]  ;;  %3800 = vmatpush1.bf16.msra.mxu0 %v14677_v0 }
 0x140   : > { %v1047_v61 = vld [vmem:[%s18196_s7 + $0xcc0] sm:$0xff]  ;;  %v14670_v2 = vcombine.high %v919_v59, %v923_v60  ;;  %3840 = vmatprep.subr.bf16.mxu1 %v14806_v58  ;;  %v14669_v9 = vcombine.low %v919_v59, %v923_v60 }
 0x141   : > { %v1051_v62 = vld [vmem:[%s18196_s7 + $0xce0] sm:$0xff]  ;;  %3841 = vmatpush1.bf16.msra.mxu1 %v14805_v1 }
 0x142   : > { %v14798_v3 = vcombine.high %v1047_v61, %v1051_v62  ;;  %v911_v4 = vld [vmem:[%s18196_s7 + $0x880] sm:$0xff]  ;;  %3801 = vmatprep.subr.bf16.mxu0 %v14670_v2  ;;  %v14797_v10 = vcombine.low %v1047_v61, %v1051_v62 }
 0x143   : > { %v915_v6 = vld [vmem:[%s18196_s7 + $0x8a0] sm:$0xff]  ;;  %3802 = vmatpush1.bf16.msra.mxu0 %v14669_v9 }
 0x144   : > { %v1039_v7 = vld [vmem:[%s18196_s7 + $0xc80] sm:$0xff]  ;;  %v14662_v12 = vcombine.high %v911_v4, %v915_v6  ;;  %3842 = vmatprep.subr.bf16.mxu1 %v14798_v3  ;;  %v14661_v19 = vcombine.low %v911_v4, %v915_v6 }
 0x145   : > { %v1043_v8 = vld [vmem:[%s18196_s7 + $0xca0] sm:$0xff]  ;;  %3843 = vmatpush1.bf16.msra.mxu1 %v14797_v10 }
 0x146   : > { %v14790_v13 = vcombine.high %v1039_v7, %v1043_v8  ;;  %v903_v14 = vld [vmem:[%s18196_s7 + $0x840] sm:$0xff]  ;;  %3803 = vmatprep.subr.bf16.mxu0 %v14662_v12  ;;  %v14789_v20 = vcombine.low %v1039_v7, %v1043_v8 }
 0x147   : > { %v907_v15 = vld [vmem:[%s18196_s7 + $0x860] sm:$0xff]  ;;  %3804 = vmatpush1.bf16.msra.mxu0 %v14661_v19 }
 0x148   : > { %v1031_v17 = vld [vmem:[%s18196_s7 + $0xc40] sm:$0xff]  ;;  %v14654_v21 = vcombine.high %v903_v14, %v907_v15  ;;  %3844 = vmatprep.subr.bf16.mxu1 %v14790_v13  ;;  %v14653_v29 = vcombine.low %v903_v14, %v907_v15 }
 0x149   : > { %v1035_v18 = vld [vmem:[%s18196_s7 + $0xc60] sm:$0xff]  ;;  %3845 = vmatpush1.bf16.msra.mxu1 %v14789_v20 }
 0x14a   : > { %v14782_v23 = vcombine.high %v1031_v17, %v1035_v18  ;;  %v895_v24 = vld [vmem:[%s18196_s7 + $0x800] sm:$0xff]  ;;  %3805 = vmatprep.subr.bf16.mxu0 %v14654_v21  ;;  %v14781_v30 = vcombine.low %v1031_v17, %v1035_v18 }
 0x14b   : > { %v899_v26 = vld [vmem:[%s18196_s7 + $0x820] sm:$0xff]  ;;  %3806 = vmatpush1.bf16.msra.mxu0 %v14653_v29 }
 0x14c   : > { %v1023_v27 = vld [vmem:[%s18196_s7 + $0xc00] sm:$0xff]  ;;  %v14646_v31 = vcombine.high %v895_v24, %v899_v26  ;;  %3846 = vmatprep.subr.bf16.mxu1 %v14782_v23  ;;  %v14645_v38 = vcombine.low %v895_v24, %v899_v26 }
 0x14d   : > { %v1027_v28 = vld [vmem:[%s18196_s7 + $0xc20] sm:$0xff]  ;;  %3847 = vmatpush1.bf16.msra.mxu1 %v14781_v30 }
 0x14e   : > { %v14774_v32 = vcombine.high %v1023_v27, %v1027_v28  ;;  %v1015_v53 = vld [vmem:[%s18196_s7 + $0xbc0] sm:$0xff]  ;;  %3807 = vmatprep.subr.bf16.mxu0 %v14646_v31  ;;  %v14773_v39 = vcombine.low %v1023_v27, %v1027_v28 }
 0x14f   : > { %v1019_v34 = vld [vmem:[%s18196_s7 + $0xbe0] sm:$0xff]  ;;  %3808 = vmatpush1.bf16.msra.mxu0 %v14645_v38 }
 0x150   : > { %v1143_v35 = vld [vmem:[%s18196_s7 + $0xfc0] sm:$0xff]  ;;  %v14766_v63 = vcombine.high %v1015_v53, %v1019_v34  ;;  %3848 = vmatprep.subr.bf16.mxu1 %v14774_v32  ;;  %v14765_v47 = vcombine.low %v1015_v53, %v1019_v34 }
 0x151   : > { %v1147_v37 = vld [vmem:[%s18196_s7 + $0xfe0] sm:$0xff]  ;;  %3849 = vmatpush1.bf16.msra.mxu1 %v14773_v39 }
 0x152   : > { %v14894_v40 = vcombine.high %v1143_v35, %v1147_v37  ;;  %v1007_v41 = vld [vmem:[%s18196_s7 + $0xb80] sm:$0xff]  ;;  %3809 = vmatprep.subr.bf16.mxu0 %v14766_v63  ;;  %v14893_v48 = vcombine.low %v1143_v35, %v1147_v37 }
 0x153   : > { %v1011_v43 = vld [vmem:[%s18196_s7 + $0xba0] sm:$0xff]  ;;  %3810 = vmatpush2.bf16.msra.mxu0 %v14765_v47  ;;  %v828_v47 = vld [vmem:[%s18196_s7 + $0x5e8] sm:$0xff] }
 0x154   : > { %v1135_v5 = vld [vmem:[%s18196_s7 + $0xf80] sm:$0xff]  ;;  %v14758_v49 = vcombine.high %v1007_v41, %v1011_v43  ;;  %3850 = vmatprep.subr.bf16.mxu1 %v14894_v40  ;;  %v14757_v56 = vcombine.low %v1007_v41, %v1011_v43  ;;  %v696_v43 = vld [vmem:[%s18196_s7 + $0x1c8] sm:$0xff] }
 0x155   : > { %v1139_v46 = vld [vmem:[%s18196_s7 + $0xfa0] sm:$0xff]  ;;  %3851 = vmatpush2.bf16.msra.mxu1 %v14893_v48 }
 0x156   : > { %v14886_v50 = vcombine.high %v1135_v5, %v1139_v46  ;;  %v999_v51 = vld [vmem:[%s18196_s7 + $0xb40] sm:$0xff]  ;;  %3811 = vmatprep.subr.bf16.mxu0 %v14758_v49  ;;  %v14885_v57 = vcombine.low %v1135_v5, %v1139_v46  ;;  %v700_v5 = vld [vmem:[%s18196_s7 + $0x1e8] sm:$0xff] }
 0x157   : > { %v1003_v52 = vld [vmem:[%s18196_s7 + $0xb60] sm:$0xff]  ;;  %3812 = vmatpush2.bf16.msra.mxu0 %v14757_v56  ;;  %v824_v46 = vld [vmem:[%s18196_s7 + $0x5c8] sm:$0xff] }
 0x158   : > { %v1127_v54 = vld [vmem:[%s18196_s7 + $0xf40] sm:$0xff]  ;;  %v14750_v58 = vcombine.high %v999_v51, %v1003_v52  ;;  %3852 = vmatprep.subr.bf16.mxu1 %v14886_v50  ;;  %v14749_v1 = vcombine.low %v999_v51, %v1003_v52  ;;  %v14448_v50 = vcombine.high %v696_v43, %v700_v5  ;;  %v14576_v51 = vcombine.high %v824_v46, %v828_v47  ;;  %v688_v52 = vld [vmem:[%s18196_s7 + $0x188] sm:$0xff] }
 0x159   : > { %v1131_v55 = vld [vmem:[%s18196_s7 + $0xf60] sm:$0xff]  ;;  %3853 = vmatpush2.bf16.msra.mxu1 %v14885_v57  ;;  %v816_v56 = vld [vmem:[%s18196_s7 + $0x588] sm:$0xff] }
 0x15a   : > { %v14878_v59 = vcombine.high %v1127_v54, %v1131_v55  ;;  %v991_v60 = vld [vmem:[%s18196_s7 + $0xb00] sm:$0xff]  ;;  %3813 = vmatprep.subr.bf16.mxu0 %v14750_v58  ;;  %v14877_v2 = vcombine.low %v1127_v54, %v1131_v55  ;;  %v692_v54 = vld [vmem:[%s18196_s7 + $0x1a8] sm:$0xff]  ;;  %v18409_v55 = vpack.c.bf16 %v18314_v22, %v18314_v22  ;;  %v18415_v58 = vpack.c.bf16 %v18319_v25, %v18319_v25 }
 0x15b   : > { %v995_v61 = vld [vmem:[%s18196_s7 + $0xb20] sm:$0xff]  ;;  %3814 = vmatpush2.bf16.msra.mxu0 %v14749_v1  ;;  %v820_v57 = vld [vmem:[%s18196_s7 + $0x5a8] sm:$0xff]  ;;  %v14439_v25 = vcombine.low %v688_v52, %v692_v54 }
 0x15c   : > { %v1119_v62 = vld [vmem:[%s18196_s7 + $0xf00] sm:$0xff]  ;;  %v14742_v3 = vcombine.high %v991_v60, %v995_v61  ;;  %3854 = vmatprep.subr.bf16.mxu1 %v14878_v59  ;;  %v14741_v10 = vcombine.low %v991_v60, %v995_v61  ;;  %v14447_v59 = vcombine.low %v696_v43, %v700_v5  ;;  %v14575_v60 = vcombine.low %v824_v46, %v828_v47  ;;  %v684_v22 = vld [vmem:[%s18196_s7 + $0x168] sm:$0xff] }
 0x15d   : > { %v1123_v0 = vld [vmem:[%s18196_s7 + $0xf20] sm:$0xff]  ;;  %3855 = vmatpush2.bf16.msra.mxu1 %v14877_v2  ;;  %v14440_v61 = vcombine.high %v688_v52, %v692_v54  ;;  %v808_v1 = vld [vmem:[%s18196_s7 + $0x548] sm:$0xff] }
 0x15e   : > { %v14870_v4 = vcombine.high %v1119_v62, %v1123_v0  ;;  %v983_v6 = vld [vmem:[%s18196_s7 + $0xac0] sm:$0xff]  ;;  %3815 = vmatprep.subr.bf16.mxu0 %v14742_v3  ;;  %v14869_v12 = vcombine.low %v1119_v62, %v1123_v0  ;;  %v14568_v62 = vcombine.high %v816_v56, %v820_v57  ;;  %v680_v0 = vld [vmem:[%s18196_s7 + $0x148] sm:$0xff]  ;;  %v14567_v3 = vcombine.low %v816_v56, %v820_v57 }
 0x15f   : > { %v987_v7 = vld [vmem:[%s18196_s7 + $0xae0] sm:$0xff]  ;;  %3816 = vmatpush2.bf16.msra.mxu0 %v14741_v10  ;;  %v812_v2 = vld [vmem:[%s18196_s7 + $0x568] sm:$0xff] }
 0x160   : > { %v1111_v8 = vld [vmem:[%s18196_s7 + $0xec0] sm:$0xff]  ;;  %v14734_v13 = vcombine.high %v983_v6, %v987_v7  ;;  %3856 = vmatprep.subr.bf16.mxu1 %v14870_v4  ;;  %v14733_v20 = vcombine.low %v983_v6, %v987_v7  ;;  %v14432_v4 = vcombine.high %v680_v0, %v684_v22  ;;  %v14560_v6 = vcombine.high %v808_v1, %v812_v2  ;;  %v672_v7 = vld [vmem:[%s18196_s7 + $0x108] sm:$0xff] }
 0x161   : > { %v1115_v9 = vld [vmem:[%s18196_s7 + $0xee0] sm:$0xff]  ;;  %3857 = vmatpush2.bf16.msra.mxu1 %v14869_v12  ;;  %v804_v10 = vld [vmem:[%s18196_s7 + $0x528] sm:$0xff]  ;;  %v14431_v12 = vcombine.low %v680_v0, %v684_v22 }
 0x162   : > { %v14862_v14 = vcombine.high %v1111_v8, %v1115_v9  ;;  %v975_v15 = vld [vmem:[%s18196_s7 + $0xa80] sm:$0xff]  ;;  %3817 = vmatprep.subr.bf16.mxu0 %v14734_v13  ;;  %v14861_v21 = vcombine.low %v1111_v8, %v1115_v9  ;;  %v676_v8 = vld [vmem:[%s18196_s7 + $0x128] sm:$0xff]  ;;  %v14559_v13 = vcombine.low %v808_v1, %v812_v2 }
 0x163   : > { %v979_v17 = vld [vmem:[%s18196_s7 + $0xaa0] sm:$0xff]  ;;  %3818 = vmatpush2.bf16.msra.mxu0 %v14733_v20  ;;  %v800_v9 = vld [vmem:[%s18196_s7 + $0x508] sm:$0xff] }
 0x164   : > { %v1103_v18 = vld [vmem:[%s18196_s7 + $0xe80] sm:$0xff]  ;;  %v14726_v23 = vcombine.high %v975_v15, %v979_v17  ;;  %3858 = vmatprep.subr.bf16.mxu1 %v14862_v14  ;;  %v14725_v30 = vcombine.low %v975_v15, %v979_v17  ;;  %v14424_v14 = vcombine.high %v672_v7, %v676_v8  ;;  %v14552_v15 = vcombine.high %v800_v9, %v804_v10  ;;  %v664_v17 = vld [vmem:[%s18196_s7 + $0xc8] sm:$0xff] }
 0x165   : > { %v1107_v19 = vld [vmem:[%s18196_s7 + $0xea0] sm:$0xff]  ;;  %3859 = vmatpush2.bf16.msra.mxu1 %v14861_v21  ;;  %v796_v20 = vld [vmem:[%s18196_s7 + $0x4e8] sm:$0xff]  ;;  %v14423_v21 = vcombine.low %v672_v7, %v676_v8 }
 0x166   : > { %v14854_v24 = vcombine.high %v1103_v18, %v1107_v19  ;;  %v967_v26 = vld [vmem:[%s18196_s7 + $0xa40] sm:$0xff]  ;;  %3819 = vmatprep.subr.bf16.mxu0 %v14726_v23  ;;  %v14853_v31 = vcombine.low %v1103_v18, %v1107_v19  ;;  %v668_v18 = vld [vmem:[%s18196_s7 + $0xe8] sm:$0xff]  ;;  %v14551_v23 = vcombine.low %v800_v9, %v804_v10 }
 0x167   : > { %v971_v27 = vld [vmem:[%s18196_s7 + $0xa60] sm:$0xff]  ;;  %3820 = vmatpush2.bf16.msra.mxu0 %v14725_v30  ;;  %v792_v19 = vld [vmem:[%s18196_s7 + $0x4c8] sm:$0xff] }
 0x168   : > { %v1095_v28 = vld [vmem:[%s18196_s7 + $0xe40] sm:$0xff]  ;;  %v14718_v32 = vcombine.high %v967_v26, %v971_v27  ;;  %3860 = vmatprep.subr.bf16.mxu1 %v14854_v24  ;;  %v14717_v39 = vcombine.low %v967_v26, %v971_v27  ;;  %v14416_v24 = vcombine.high %v664_v17, %v668_v18  ;;  %v14544_v26 = vcombine.high %v792_v19, %v796_v20  ;;  %v656_v27 = vld [vmem:[%s18196_s7 + $0x88] sm:$0xff] }
 0x169   : > { %v1099_v29 = vld [vmem:[%s18196_s7 + $0xe60] sm:$0xff]  ;;  %3861 = vmatpush2.bf16.msra.mxu1 %v14853_v31  ;;  %v788_v30 = vld [vmem:[%s18196_s7 + $0x4a8] sm:$0xff]  ;;  %v14415_v31 = vcombine.low %v664_v17, %v668_v18 }
 0x16a   : > { %v14846_v53 = vcombine.high %v1095_v28, %v1099_v29  ;;  %v959_v34 = vld [vmem:[%s18196_s7 + $0xa00] sm:$0xff]  ;;  %3821 = vmatprep.subr.bf16.mxu0 %v14718_v32  ;;  %v14845_v63 = vcombine.low %v1095_v28, %v1099_v29  ;;  %v660_v28 = vld [vmem:[%s18196_s7 + $0xa8] sm:$0xff]  ;;  %v14543_v32 = vcombine.low %v792_v19, %v796_v20 }
 0x16b   : > { %v963_v35 = vld [vmem:[%s18196_s7 + $0xa20] sm:$0xff]  ;;  %3822 = vmatpush2.bf16.msra.mxu0 %v14717_v39  ;;  %v784_v29 = vld [vmem:[%s18196_s7 + $0x488] sm:$0xff] }
 0x16c   : > { %v1087_v37 = vld [vmem:[%s18196_s7 + $0xe00] sm:$0xff]  ;;  %v14710_v40 = vcombine.high %v959_v34, %v963_v35  ;;  %3862 = vmatprep.subr.bf16.mxu1 %v14846_v53  ;;  %v14709_v48 = vcombine.low %v959_v34, %v963_v35  ;;  %v14408_v53 = vcombine.high %v656_v27, %v660_v28  ;;  %v14536_v34 = vcombine.high %v784_v29, %v788_v30  ;;  %v648_v35 = vld [vmem:[%s18196_s7 + $0x48] sm:$0xff] }
 0x16d   : > { %v1091_v38 = vld [vmem:[%s18196_s7 + $0xe20] sm:$0xff]  ;;  %3863 = vmatpush2.bf16.msra.mxu1 %v14845_v63  ;;  %v780_v39 = vld [vmem:[%s18196_s7 + $0x468] sm:$0xff]  ;;  %v14407_v63 = vcombine.low %v656_v27, %v660_v28 }
 0x16e   : > { %v14838_v41 = vcombine.high %v1087_v37, %v1091_v38  ;;  %3823 = vmatprep.subr.bf16.mxu0 %v14710_v40  ;;  %v14837_v49 = vcombine.low %v1087_v37, %v1091_v38  ;;  %v652_v37 = vld [vmem:[%s18196_s7 + $0x68] sm:$0xff]  ;;  %v14535_v40 = vcombine.low %v784_v29, %v788_v30 }
 0x16f   : > { %3824 = vmatpush2.bf16.msra.mxu0 %v14709_v48  ;;  %v776_v38 = vld [vmem:[%s18196_s7 + $0x448] sm:$0xff] }
 0x170   : > { %3864 = vmatprep.subr.bf16.mxu1 %v14838_v41  ;;  %3875 = vmatprep.subr.bf16.mxu0 %v14448_v50  ;;  %v14400_v41 = vcombine.high %v648_v35, %v652_v37  ;;  %v14528_v43 = vcombine.high %v776_v38, %v780_v39  ;;  %v640_v5 = vld [vmem:[%s18196_s7 + $0x8] sm:$0xff]  ;;  %v14527_v50 = vcombine.low %v776_v38, %v780_v39 }
 0x171   : > { %3865 = vmatpush2.bf16.msra.mxu1 %v14837_v49  ;;  %v644_v46 = vld [vmem:[%s18196_s7 + $0x28] sm:$0xff]  ;;  %v14399_v49 = vcombine.low %v648_v35, %v652_v37 }
 0x172   : > { %3916 = vmatprep.subr.bf16.mxu1 %v14576_v51  ;;  %3826 = vmatmul.mubr.bf16.vlgmr.msra.gmra.mxu0 %v18409_v55  ;;  %v768_v47 = vld [vmem:[%s18196_s7 + $0x408] sm:$0xff]  ;;  %v14392_v51 = vcombine.high %v640_v5, %v644_v46 }
 0x173   : > { %3876 = vmatpush1.bf16.msra.mxu0 %v14447_v59  ;;  %3907 = vmatprep.mubr.bf16.mxu0 %v18273_v11  ;;  %v772_v48 = vld [vmem:[%s18196_s7 + $0x428] sm:$0xff] }
 0x174   : > { %3867 = vmatmul.mubr.bf16.vlgmr.msra.gmra.mxu1 %v18415_v58  ;;  %3877 = vmatprep.subr.bf16.mxu0 %v14440_v61  ;;  %v14520_v52 = vcombine.high %v768_v47, %v772_v48  ;;  %v760_v54 = vld [vmem:[%s18196_s7 + $0x3c8] sm:$0xff]  ;;  %v14519_v61 = vcombine.low %v768_v47, %v772_v48 }
 0x175   : > { %3917 = vmatpush1.bf16.msra.mxu1 %v14575_v60  ;;  %3948 = vmatprep.mubr.bf16.mxu1 %v18280_v16  ;;  %v764_v56 = vld [vmem:[%s18196_s7 + $0x3e8] sm:$0xff]  ;;  %v14391_v60 = vcombine.low %v640_v5, %v644_v46 }
 0x176   : > { %3918 = vmatprep.subr.bf16.mxu1 %v14568_v62  ;;  %v888_v57 = vld [vmem:[%s18196_s7 + $0x7c8] sm:$0xff]  ;;  %v14512_v62 = vcombine.high %v760_v54, %v764_v56 }
 0x177   : > { %3878 = vmatpush1.bf16.msra.mxu0 %v14439_v25  ;;  %v892_v59 = vld [vmem:[%s18196_s7 + $0x7e8] sm:$0xff] }
 0x178   : > { %3879 = vmatprep.subr.bf16.mxu0 %v14432_v4  ;;  %v14640_v0 = vcombine.high %v888_v57, %v892_v59  ;;  %v752_v22 = vld [vmem:[%s18196_s7 + $0x388] sm:$0xff]  ;;  %v14639_v4 = vcombine.low %v888_v57, %v892_v59 }
 0x179   : > { %3919 = vmatpush1.bf16.msra.mxu1 %v14567_v3  ;;  %v756_v1 = vld [vmem:[%s18196_s7 + $0x3a8] sm:$0xff]  ;;  %v14511_v3 = vcombine.low %v760_v54, %v764_v56 }
 0x17a   : > { %3920 = vmatprep.subr.bf16.mxu1 %v14560_v6  ;;  %v880_v2 = vld [vmem:[%s18196_s7 + $0x788] sm:$0xff]  ;;  %v14504_v6 = vcombine.high %v752_v22, %v756_v1 }
 0x17b   : > { %3880 = vmatpush1.bf16.msra.mxu0 %v14431_v12  ;;  %v884_v25 = vld [vmem:[%s18196_s7 + $0x7a8] sm:$0xff] }
 0x17c   : > { %3881 = vmatprep.subr.bf16.mxu0 %v14424_v14  ;;  %v14632_v7 = vcombine.high %v880_v2, %v884_v25  ;;  %v744_v8 = vld [vmem:[%s18196_s7 + $0x348] sm:$0xff]  ;;  %v14631_v14 = vcombine.low %v880_v2, %v884_v25 }
 0x17d   : > { %3921 = vmatpush1.bf16.msra.mxu1 %v14559_v13  ;;  %v748_v9 = vld [vmem:[%s18196_s7 + $0x368] sm:$0xff]  ;;  %v14503_v13 = vcombine.low %v752_v22, %v756_v1 }
 0x17e   : > { %3922 = vmatprep.subr.bf16.mxu1 %v14552_v15  ;;  %v872_v10 = vld [vmem:[%s18196_s7 + $0x748] sm:$0xff]  ;;  %v14496_v15 = vcombine.high %v744_v8, %v748_v9 }
 0x17f   : > { %3882 = vmatpush1.bf16.msra.mxu0 %v14423_v21  ;;  %v876_v12 = vld [vmem:[%s18196_s7 + $0x768] sm:$0xff] }
 0x180   : > { %3883 = vmatprep.subr.bf16.mxu0 %v14416_v24  ;;  %v14624_v17 = vcombine.high %v872_v10, %v876_v12  ;;  %v736_v18 = vld [vmem:[%s18196_s7 + $0x308] sm:$0xff]  ;;  %v14623_v24 = vcombine.low %v872_v10, %v876_v12 }
 0x181   : > { %3923 = vmatpush1.bf16.msra.mxu1 %v14551_v23  ;;  %v740_v19 = vld [vmem:[%s18196_s7 + $0x328] sm:$0xff]  ;;  %v14495_v23 = vcombine.low %v744_v8, %v748_v9 }
 0x182   : > { %3924 = vmatprep.subr.bf16.mxu1 %v14544_v26  ;;  %v864_v20 = vld [vmem:[%s18196_s7 + $0x708] sm:$0xff]  ;;  %v14488_v26 = vcombine.high %v736_v18, %v740_v19 }
 0x183   : > { %3884 = vmatpush1.bf16.msra.mxu0 %v14415_v31  ;;  %v868_v21 = vld [vmem:[%s18196_s7 + $0x728] sm:$0xff] }
 0x184   : > { %3885 = vmatprep.subr.bf16.mxu0 %v14408_v53  ;;  %v14616_v27 = vcombine.high %v864_v20, %v868_v21  ;;  %v728_v28 = vld [vmem:[%s18196_s7 + $0x2c8] sm:$0xff]  ;;  %v14615_v53 = vcombine.low %v864_v20, %v868_v21 }
 0x185   : > { %3925 = vmatpush1.bf16.msra.mxu1 %v14543_v32  ;;  %v732_v29 = vld [vmem:[%s18196_s7 + $0x2e8] sm:$0xff]  ;;  %v14487_v32 = vcombine.low %v736_v18, %v740_v19 }
 0x186   : > { %3926 = vmatprep.subr.bf16.mxu1 %v14536_v34  ;;  %v856_v30 = vld [vmem:[%s18196_s7 + $0x6c8] sm:$0xff]  ;;  %v14480_v34 = vcombine.high %v728_v28, %v732_v29 }
 0x187   : > { %3886 = vmatpush1.bf16.msra.mxu0 %v14407_v63  ;;  %v860_v31 = vld [vmem:[%s18196_s7 + $0x6e8] sm:$0xff] }
 0x188   : > { %3887 = vmatprep.subr.bf16.mxu0 %v14400_v41  ;;  %v14608_v35 = vcombine.high %v856_v30, %v860_v31  ;;  %v720_v37 = vld [vmem:[%s18196_s7 + $0x288] sm:$0xff]  ;;  %v14607_v41 = vcombine.low %v856_v30, %v860_v31 }
 0x189   : > { %3927 = vmatpush1.bf16.msra.mxu1 %v14535_v40  ;;  %v724_v38 = vld [vmem:[%s18196_s7 + $0x2a8] sm:$0xff]  ;;  %v14479_v40 = vcombine.low %v728_v28, %v732_v29 }
 0x18a   : > { %3928 = vmatprep.subr.bf16.mxu1 %v14528_v43  ;;  %v848_v39 = vld [vmem:[%s18196_s7 + $0x688] sm:$0xff]  ;;  %v14472_v43 = vcombine.high %v720_v37, %v724_v38 }
 0x18b   : > { %3888 = vmatpush1.bf16.msra.mxu0 %v14399_v49  ;;  %v852_v63 = vld [vmem:[%s18196_s7 + $0x6a8] sm:$0xff] }
 0x18c   : > { %3889 = vmatprep.subr.bf16.mxu0 %v14392_v51  ;;  %v14600_v5 = vcombine.high %v848_v39, %v852_v63  ;;  %v712_v46 = vld [vmem:[%s18196_s7 + $0x248] sm:$0xff]  ;;  %v14599_v51 = vcombine.low %v848_v39, %v852_v63 }
 0x18d   : > { %3929 = vmatpush1.bf16.msra.mxu1 %v14527_v50  ;;  %v716_v47 = vld [vmem:[%s18196_s7 + $0x268] sm:$0xff]  ;;  %v14471_v50 = vcombine.low %v720_v37, %v724_v38 }
 0x18e   : > { %3930 = vmatprep.subr.bf16.mxu1 %v14520_v52  ;;  %v840_v48 = vld [vmem:[%s18196_s7 + $0x648] sm:$0xff]  ;;  %v14464_v52 = vcombine.high %v712_v46, %v716_v47 }
 0x18f   : > { %3890 = vmatpush1.bf16.msra.mxu0 %v14391_v60  ;;  %v844_v49 = vld [vmem:[%s18196_s7 + $0x668] sm:$0xff] }
 0x190   : > { %3891 = vmatprep.subr.bf16.mxu0 %v14512_v62  ;;  %v14592_v54 = vcombine.high %v840_v48, %v844_v49  ;;  %v704_v56 = vld [vmem:[%s18196_s7 + $0x208] sm:$0xff]  ;;  %v14591_v62 = vcombine.low %v840_v48, %v844_v49 }
 0x191   : > { %3931 = vmatpush1.bf16.msra.mxu1 %v14519_v61  ;;  %v708_v57 = vld [vmem:[%s18196_s7 + $0x228] sm:$0xff]  ;;  %v14463_v61 = vcombine.low %v712_v46, %v716_v47 }
 0x192   : > { %3932 = vmatprep.subr.bf16.mxu1 %v14640_v0  ;;  %v832_v59 = vld [vmem:[%s18196_s7 + $0x608] sm:$0xff]  ;;  %v14456_v0 = vcombine.high %v704_v56, %v708_v57 }
 0x193   : > { %3892 = vmatpush2.bf16.msra.mxu0 %v14511_v3  ;;  %v836_v60 = vld [vmem:[%s18196_s7 + $0x628] sm:$0xff] }
 0x194   : > { %3893 = vmatprep.subr.bf16.mxu0 %v14504_v6  ;;  %v14584_v22 = vcombine.high %v832_v59, %v836_v60  ;;  %v952_v1 = vld [vmem:[%s18196_s7 + $0x9c8] sm:$0xff]  ;;  %v14583_v6 = vcombine.low %v832_v59, %v836_v60 }
 0x195   : > { %3933 = vmatpush2.bf16.msra.mxu1 %v14639_v4  ;;  %v956_v2 = vld [vmem:[%s18196_s7 + $0x9e8] sm:$0xff]  ;;  %v14455_v4 = vcombine.low %v704_v56, %v708_v57 }
 0x196   : > { %3934 = vmatprep.subr.bf16.mxu1 %v14632_v7  ;;  %v1080_v25 = vld [vmem:[%s18196_s7 + $0xdc8] sm:$0xff]  ;;  %v14704_v7 = vcombine.high %v952_v1, %v956_v2 }
 0x197   : > { %3894 = vmatpush2.bf16.msra.mxu0 %v14503_v13  ;;  %v1084_v3 = vld [vmem:[%s18196_s7 + $0xde8] sm:$0xff] }
 0x198   : > { %3895 = vmatprep.subr.bf16.mxu0 %v14496_v15  ;;  %v14832_v8 = vcombine.high %v1080_v25, %v1084_v3  ;;  %v944_v9 = vld [vmem:[%s18196_s7 + $0x988] sm:$0xff]  ;;  %v14831_v15 = vcombine.low %v1080_v25, %v1084_v3 }
 0x199   : > { %3935 = vmatpush2.bf16.msra.mxu1 %v14631_v14  ;;  %v948_v10 = vld [vmem:[%s18196_s7 + $0x9a8] sm:$0xff]  ;;  %v14703_v14 = vcombine.low %v952_v1, %v956_v2 }
 0x19a   : > { %3936 = vmatprep.subr.bf16.mxu1 %v14624_v17  ;;  %v1072_v12 = vld [vmem:[%s18196_s7 + $0xd88] sm:$0xff]  ;;  %v14696_v17 = vcombine.high %v944_v9, %v948_v10 }
 0x19b   : > { %3896 = vmatpush2.bf16.msra.mxu0 %v14495_v23  ;;  %v1076_v13 = vld [vmem:[%s18196_s7 + $0xda8] sm:$0xff] }
 0x19c   : > { %3897 = vmatprep.subr.bf16.mxu0 %v14488_v26  ;;  %v14824_v18 = vcombine.high %v1072_v12, %v1076_v13  ;;  %v936_v19 = vld [vmem:[%s18196_s7 + $0x948] sm:$0xff]  ;;  %v14823_v26 = vcombine.low %v1072_v12, %v1076_v13 }
 0x19d   : > { %3937 = vmatpush2.bf16.msra.mxu1 %v14623_v24  ;;  %v940_v20 = vld [vmem:[%s18196_s7 + $0x968] sm:$0xff]  ;;  %v14695_v24 = vcombine.low %v944_v9, %v948_v10 }
 0x19e   : > { %3938 = vmatprep.subr.bf16.mxu1 %v14616_v27  ;;  %v1064_v21 = vld [vmem:[%s18196_s7 + $0xd48] sm:$0xff]  ;;  %v14688_v27 = vcombine.high %v936_v19, %v940_v20 }
 0x19f   : > { %3898 = vmatpush2.bf16.msra.mxu0 %v14487_v32  ;;  %v1068_v23 = vld [vmem:[%s18196_s7 + $0xd68] sm:$0xff] }
 0x1a0   : > { %3899 = vmatprep.subr.bf16.mxu0 %v14480_v34  ;;  %v14816_v28 = vcombine.high %v1064_v21, %v1068_v23  ;;  %v928_v29 = vld [vmem:[%s18196_s7 + $0x908] sm:$0xff]  ;;  %v14815_v34 = vcombine.low %v1064_v21, %v1068_v23 }
 0x1a1   : > { %3939 = vmatpush2.bf16.msra.mxu1 %v14615_v53  ;;  %v932_v30 = vld [vmem:[%s18196_s7 + $0x928] sm:$0xff]  ;;  %v14687_v53 = vcombine.low %v936_v19, %v940_v20 }
 0x1a2   : > { %3940 = vmatprep.subr.bf16.mxu1 %v14608_v35  ;;  %v1056_v31 = vld [vmem:[%s18196_s7 + $0xd08] sm:$0xff]  ;;  %v14680_v35 = vcombine.high %v928_v29, %v932_v30 }
 0x1a3   : > { %3900 = vmatpush2.bf16.msra.mxu0 %v14479_v40  ;;  %v1060_v32 = vld [vmem:[%s18196_s7 + $0xd28] sm:$0xff] }
 0x1a4   : > { %3901 = vmatprep.subr.bf16.mxu0 %v14472_v43  ;;  %v14808_v37 = vcombine.high %v1056_v31, %v1060_v32  ;;  %v920_v38 = vld [vmem:[%s18196_s7 + $0x8c8] sm:$0xff]  ;;  %v14807_v43 = vcombine.low %v1056_v31, %v1060_v32 }
 0x1a5   : > { %3941 = vmatpush2.bf16.msra.mxu1 %v14607_v41  ;;  %v924_v39 = vld [vmem:[%s18196_s7 + $0x8e8] sm:$0xff]  ;;  %v14679_v41 = vcombine.low %v928_v29, %v932_v30 }
 0x1a6   : > { %3942 = vmatprep.subr.bf16.mxu1 %v14600_v5  ;;  %v1048_v63 = vld [vmem:[%s18196_s7 + $0xcc8] sm:$0xff]  ;;  %v14672_v5 = vcombine.high %v920_v38, %v924_v39 }
 0x1a7   : > { %3902 = vmatpush2.bf16.msra.mxu0 %v14471_v50  ;;  %v1052_v40 = vld [vmem:[%s18196_s7 + $0xce8] sm:$0xff] }
 0x1a8   : > { %3903 = vmatprep.subr.bf16.mxu0 %v14464_v52  ;;  %v14800_v46 = vcombine.high %v1048_v63, %v1052_v40  ;;  %v912_v47 = vld [vmem:[%s18196_s7 + $0x888] sm:$0xff]  ;;  %v14799_v52 = vcombine.low %v1048_v63, %v1052_v40 }
 0x1a9   : > { %3943 = vmatpush2.bf16.msra.mxu1 %v14599_v51  ;;  %v916_v48 = vld [vmem:[%s18196_s7 + $0x8a8] sm:$0xff]  ;;  %v14671_v51 = vcombine.low %v920_v38, %v924_v39 }
 0x1aa   : > { %3944 = vmatprep.subr.bf16.mxu1 %v14592_v54  ;;  %v1040_v49 = vld [vmem:[%s18196_s7 + $0xc88] sm:$0xff]  ;;  %v14664_v54 = vcombine.high %v912_v47, %v916_v48 }
 0x1ab   : > { %3904 = vmatpush2.bf16.msra.mxu0 %v14463_v61  ;;  %v1044_v50 = vld [vmem:[%s18196_s7 + $0xca8] sm:$0xff] }
 0x1ac   : > { %3905 = vmatprep.subr.bf16.mxu0 %v14456_v0  ;;  %v14792_v56 = vcombine.high %v1040_v49, %v1044_v50  ;;  %v904_v57 = vld [vmem:[%s18196_s7 + $0x848] sm:$0xff]  ;;  %v14791_v0 = vcombine.low %v1040_v49, %v1044_v50 }
 0x1ad   : > { %3945 = vmatpush2.bf16.msra.mxu1 %v14591_v62  ;;  %v908_v59 = vld [vmem:[%s18196_s7 + $0x868] sm:$0xff]  ;;  %v14663_v62 = vcombine.low %v912_v47, %v916_v48 }
 0x1ae   : > { %3946 = vmatprep.subr.bf16.mxu1 %v14584_v22  ;;  %v1032_v60 = vld [vmem:[%s18196_s7 + $0xc48] sm:$0xff]  ;;  %v14656_v22 = vcombine.high %v904_v57, %v908_v59 }
 0x1af   : > { %3906 = vmatpush2.bf16.msra.mxu0 %v14455_v4  ;;  %v1036_v61 = vld [vmem:[%s18196_s7 + $0xc68] sm:$0xff] }
 0x1b0   : > { %3957 = vmatprep.subr.bf16.mxu0 %v14704_v7  ;;  %v14784_v1 = vcombine.high %v1032_v60, %v1036_v61  ;;  %v896_v2 = vld [vmem:[%s18196_s7 + $0x808] sm:$0xff]  ;;  %v14783_v7 = vcombine.low %v1032_v60, %v1036_v61 }
 0x1b1   : > { %3947 = vmatpush2.bf16.msra.mxu1 %v14583_v6  ;;  %v900_v25 = vld [vmem:[%s18196_s7 + $0x828] sm:$0xff]  ;;  %v14655_v6 = vcombine.low %v904_v57, %v908_v59 }
 0x1b2   : > { %3998 = vmatprep.subr.bf16.mxu1 %v14832_v8  ;;  %3908 = vmatmul.mubr.bf16.vlgmr.msra.gmra.mxu0 %v18327_v33  ;;  %v1024_v3 = vld [vmem:[%s18196_s7 + $0xc08] sm:$0xff]  ;;  %v14648_v8 = vcombine.high %v896_v2, %v900_v25 }
 0x1b3   : > { %3958 = vmatpush1.bf16.msra.mxu0 %v14703_v14  ;;  %3989 = vmatprep.mubr.bf16.mxu0 %v18339_v42  ;;  %v1028_v4 = vld [vmem:[%s18196_s7 + $0xc28] sm:$0xff] }
 0x1b4   : > { %3949 = vmatmul.mubr.bf16.vlgmr.msra.gmra.mxu1 %v18335_v36  ;;  %3959 = vmatprep.subr.bf16.mxu0 %v14696_v17  ;;  %v14776_v9 = vcombine.high %v1024_v3, %v1028_v4  ;;  %v1016_v10 = vld [vmem:[%s18196_s7 + $0xbc8] sm:$0xff]  ;;  %v14775_v17 = vcombine.low %v1024_v3, %v1028_v4 }
 0x1b5   : > { %3999 = vmatpush1.bf16.msra.mxu1 %v14831_v15  ;;  %4030 = vmatprep.mubr.bf16.mxu1 %v18344_v45  ;;  %v1020_v12 = vld [vmem:[%s18196_s7 + $0xbe8] sm:$0xff]  ;;  %v14647_v15 = vcombine.low %v896_v2, %v900_v25 }
 0x1b6   : > { %4000 = vmatprep.subr.bf16.mxu1 %v14824_v18  ;;  %v1144_v13 = vld [vmem:[%s18196_s7 + $0xfc8] sm:$0xff]  ;;  %v14768_v18 = vcombine.high %v1016_v10, %v1020_v12 }
 0x1b7   : > { %3960 = vmatpush1.bf16.msra.mxu0 %v14695_v24  ;;  %v1148_v14 = vld [vmem:[%s18196_s7 + $0xfe8] sm:$0xff] }
 0x1b8   : > { %3961 = vmatprep.subr.bf16.mxu0 %v14688_v27  ;;  %v14896_v19 = vcombine.high %v1144_v13, %v1148_v14  ;;  %v1008_v20 = vld [vmem:[%s18196_s7 + $0xb88] sm:$0xff]  ;;  %v14895_v27 = vcombine.low %v1144_v13, %v1148_v14 }
 0x1b9   : > { %4001 = vmatpush1.bf16.msra.mxu1 %v14823_v26  ;;  %v1012_v21 = vld [vmem:[%s18196_s7 + $0xba8] sm:$0xff]  ;;  %v14767_v26 = vcombine.low %v1016_v10, %v1020_v12 }
 0x1ba   : > { %4002 = vmatprep.subr.bf16.mxu1 %v14816_v28  ;;  %v1136_v23 = vld [vmem:[%s18196_s7 + $0xf88] sm:$0xff]  ;;  %v14760_v28 = vcombine.high %v1008_v20, %v1012_v21 }
 0x1bb   : > { %3962 = vmatpush1.bf16.msra.mxu0 %v14687_v53  ;;  %v1140_v24 = vld [vmem:[%s18196_s7 + $0xfa8] sm:$0xff] }
 0x1bc   : > { %3963 = vmatprep.subr.bf16.mxu0 %v14680_v35  ;;  %v14888_v29 = vcombine.high %v1136_v23, %v1140_v24  ;;  %v1000_v30 = vld [vmem:[%s18196_s7 + $0xb48] sm:$0xff]  ;;  %v14887_v35 = vcombine.low %v1136_v23, %v1140_v24  ;;  %v701_v23 = vld [vmem:[%s18196_s7 + $0x1f0] sm:$0xff] }
 0x1bd   : > { %4003 = vmatpush1.bf16.msra.mxu1 %v14815_v34  ;;  %v1004_v31 = vld [vmem:[%s18196_s7 + $0xb68] sm:$0xff]  ;;  %v14759_v34 = vcombine.low %v1008_v20, %v1012_v21  ;;  %v697_v21 = vld [vmem:[%s18196_s7 + $0x1d0] sm:$0xff] }
 0x1be   : > { %4004 = vmatprep.subr.bf16.mxu1 %v14808_v37  ;;  %v1128_v32 = vld [vmem:[%s18196_s7 + $0xf48] sm:$0xff]  ;;  %v14752_v37 = vcombine.high %v1000_v30, %v1004_v31  ;;  %v825_v24 = vld [vmem:[%s18196_s7 + $0x5d0] sm:$0xff] }
 0x1bf   : > { %3964 = vmatpush1.bf16.msra.mxu0 %v14679_v41  ;;  %v1132_v53 = vld [vmem:[%s18196_s7 + $0xf68] sm:$0xff] }
 0x1c0   : > { %3965 = vmatprep.subr.bf16.mxu0 %v14672_v5  ;;  %v14880_v38 = vcombine.high %v1128_v32, %v1132_v53  ;;  %v992_v39 = vld [vmem:[%s18196_s7 + $0xb08] sm:$0xff]  ;;  %v14879_v5 = vcombine.low %v1128_v32, %v1132_v53  ;;  %v693_v32 = vld [vmem:[%s18196_s7 + $0x1b0] sm:$0xff] }
 0x1c1   : > { %4005 = vmatpush1.bf16.msra.mxu1 %v14807_v43  ;;  %v996_v63 = vld [vmem:[%s18196_s7 + $0xb28] sm:$0xff]  ;;  %v14751_v43 = vcombine.low %v1000_v30, %v1004_v31  ;;  %v689_v31 = vld [vmem:[%s18196_s7 + $0x190] sm:$0xff] }
 0x1c2   : > { %4006 = vmatprep.subr.bf16.mxu1 %v14800_v46  ;;  %v1120_v40 = vld [vmem:[%s18196_s7 + $0xf08] sm:$0xff]  ;;  %v14744_v46 = vcombine.high %v992_v39, %v996_v63  ;;  %v817_v53 = vld [vmem:[%s18196_s7 + $0x590] sm:$0xff] }
 0x1c3   : > { %3966 = vmatpush1.bf16.msra.mxu0 %v14671_v51  ;;  %v1124_v41 = vld [vmem:[%s18196_s7 + $0xf28] sm:$0xff] }
 0x1c4   : > { %3967 = vmatprep.subr.bf16.mxu0 %v14664_v54  ;;  %v14872_v47 = vcombine.high %v1120_v40, %v1124_v41  ;;  %v984_v48 = vld [vmem:[%s18196_s7 + $0xac8] sm:$0xff]  ;;  %v14871_v54 = vcombine.low %v1120_v40, %v1124_v41  ;;  %v685_v40 = vld [vmem:[%s18196_s7 + $0x170] sm:$0xff] }
 0x1c5   : > { %4007 = vmatpush1.bf16.msra.mxu1 %v14799_v52  ;;  %v988_v49 = vld [vmem:[%s18196_s7 + $0xae8] sm:$0xff]  ;;  %v14743_v52 = vcombine.low %v992_v39, %v996_v63  ;;  %v681_v63 = vld [vmem:[%s18196_s7 + $0x150] sm:$0xff] }
 0x1c6   : > { %4008 = vmatprep.subr.bf16.mxu1 %v14792_v56  ;;  %v1112_v50 = vld [vmem:[%s18196_s7 + $0xec8] sm:$0xff]  ;;  %v14736_v56 = vcombine.high %v984_v48, %v988_v49 }
 0x1c7   : > { %3968 = vmatpush1.bf16.msra.mxu0 %v14663_v62  ;;  %v1116_v51 = vld [vmem:[%s18196_s7 + $0xee8] sm:$0xff] }
 0x1c8   : > { %3969 = vmatprep.subr.bf16.mxu0 %v14656_v22  ;;  %v14864_v57 = vcombine.high %v1112_v50, %v1116_v51  ;;  %v976_v59 = vld [vmem:[%s18196_s7 + $0xa88] sm:$0xff]  ;;  %v14863_v22 = vcombine.low %v1112_v50, %v1116_v51  ;;  %v14434_v50 = vcombine.high %v681_v63, %v685_v40 }
 0x1c9   : > { %4009 = vmatpush1.bf16.msra.mxu1 %v14791_v0  ;;  %v980_v60 = vld [vmem:[%s18196_s7 + $0xaa8] sm:$0xff]  ;;  %v14735_v0 = vcombine.low %v984_v48, %v988_v49 }
 0x1ca   : > { %4010 = vmatprep.subr.bf16.mxu1 %v14784_v1  ;;  %v1104_v61 = vld [vmem:[%s18196_s7 + $0xe88] sm:$0xff]  ;;  %v14728_v1 = vcombine.high %v976_v59, %v980_v60 }
 0x1cb   : > { %3970 = vmatpush1.bf16.msra.mxu0 %v14655_v6  ;;  %v1108_v62 = vld [vmem:[%s18196_s7 + $0xea8] sm:$0xff] }
 0x1cc   : > { %3971 = vmatprep.subr.bf16.mxu0 %v14648_v8  ;;  %v14856_v2 = vcombine.high %v1104_v61, %v1108_v62  ;;  %v968_v25 = vld [vmem:[%s18196_s7 + $0xa48] sm:$0xff]  ;;  %v14855_v8 = vcombine.low %v1104_v61, %v1108_v62  ;;  %v14433_v62 = vcombine.low %v681_v63, %v685_v40  ;;  %v761_v40 = vld [vmem:[%s18196_s7 + $0x3d0] sm:$0xff] }
 0x1cd   : > { %4011 = vmatpush1.bf16.msra.mxu1 %v14783_v7  ;;  %v972_v3 = vld [vmem:[%s18196_s7 + $0xa68] sm:$0xff]  ;;  %v14727_v7 = vcombine.low %v976_v59, %v980_v60  ;;  %v801_v59 = vld [vmem:[%s18196_s7 + $0x510] sm:$0xff] }
 0x1ce   : > { %4012 = vmatprep.subr.bf16.mxu1 %v14776_v9  ;;  %v1096_v4 = vld [vmem:[%s18196_s7 + $0xe48] sm:$0xff]  ;;  %v14720_v9 = vcombine.high %v968_v25, %v972_v3  ;;  %v805_v60 = vld [vmem:[%s18196_s7 + $0x530] sm:$0xff] }
 0x1cf   : > { %3972 = vmatpush1.bf16.msra.mxu0 %v14647_v15  ;;  %v1100_v6 = vld [vmem:[%s18196_s7 + $0xe68] sm:$0xff] }
 0x1d0   : > { %3973 = vmatprep.subr.bf16.mxu0 %v14768_v18  ;;  %v14848_v10 = vcombine.high %v1096_v4, %v1100_v6  ;;  %v960_v12 = vld [vmem:[%s18196_s7 + $0xa08] sm:$0xff]  ;;  %v14847_v18 = vcombine.low %v1096_v4, %v1100_v6  ;;  %v669_v4 = vld [vmem:[%s18196_s7 + $0xf0] sm:$0xff] }
 0x1d1   : > { %4013 = vmatpush1.bf16.msra.mxu1 %v14775_v17  ;;  %v964_v13 = vld [vmem:[%s18196_s7 + $0xa28] sm:$0xff]  ;;  %v14719_v17 = vcombine.low %v968_v25, %v972_v3  ;;  %v14554_v25 = vcombine.high %v801_v59, %v805_v60  ;;  %v665_v3 = vld [vmem:[%s18196_s7 + $0xd0] sm:$0xff] }
 0x1d2   : > { %4014 = vmatprep.subr.bf16.mxu1 %v14896_v19  ;;  %v1088_v14 = vld [vmem:[%s18196_s7 + $0xe08] sm:$0xff]  ;;  %v14712_v19 = vcombine.high %v960_v12, %v964_v13  ;;  %v793_v6 = vld [vmem:[%s18196_s7 + $0x4d0] sm:$0xff] }
 0x1d3   : > { %3974 = vmatpush2.bf16.msra.mxu0 %v14767_v26  ;;  %v1092_v15 = vld [vmem:[%s18196_s7 + $0xe28] sm:$0xff]  ;;  %v829_v26 = vld [vmem:[%s18196_s7 + $0x5f0] sm:$0xff] }
 0x1d4   : > { %3975 = vmatprep.subr.bf16.mxu0 %v14760_v28  ;;  %v14840_v20 = vcombine.high %v1088_v14, %v1092_v15  ;;  %v14839_v28 = vcombine.low %v1088_v14, %v1092_v15  ;;  %v14578_v30 = vcombine.high %v825_v24, %v829_v26  ;;  %v661_v14 = vld [vmem:[%s18196_s7 + $0xb0] sm:$0xff] }
 0x1d5   : > { %4015 = vmatpush2.bf16.msra.mxu1 %v14895_v27  ;;  %v14711_v27 = vcombine.low %v960_v12, %v964_v13  ;;  %v657_v13 = vld [vmem:[%s18196_s7 + $0x90] sm:$0xff] }
 0x1d6   : > { %4016 = vmatprep.subr.bf16.mxu1 %v14888_v29  ;;  %v14450_v29 = vcombine.high %v697_v21, %v701_v23  ;;  %v785_v15 = vld [vmem:[%s18196_s7 + $0x490] sm:$0xff] }
 0x1d7   : > { %3976 = vmatpush2.bf16.msra.mxu0 %v14759_v34  ;;  %v821_v34 = vld [vmem:[%s18196_s7 + $0x5b0] sm:$0xff] }
 0x1d8   : > { %3977 = vmatprep.subr.bf16.mxu0 %v14752_v37  ;;  %v14577_v37 = vcombine.low %v825_v24, %v829_v26  ;;  %v14570_v39 = vcombine.high %v817_v53, %v821_v34  ;;  %v14569_v49 = vcombine.low %v817_v53, %v821_v34  ;;  %v653_v24 = vld [vmem:[%s18196_s7 + $0x70] sm:$0xff] }
 0x1d9   : > { %4017 = vmatpush2.bf16.msra.mxu1 %v14887_v35  ;;  %v14449_v35 = vcombine.low %v697_v21, %v701_v23  ;;  %v649_v23 = vld [vmem:[%s18196_s7 + $0x50] sm:$0xff] }
 0x1da   : > { %4018 = vmatprep.subr.bf16.mxu1 %v14880_v38  ;;  %v14442_v38 = vcombine.high %v689_v31, %v693_v32  ;;  %v777_v26 = vld [vmem:[%s18196_s7 + $0x450] sm:$0xff] }
 0x1db   : > { %3978 = vmatpush2.bf16.msra.mxu0 %v14751_v43  ;;  %v809_v43 = vld [vmem:[%s18196_s7 + $0x550] sm:$0xff] }
 0x1dc   : > { %3979 = vmatprep.subr.bf16.mxu0 %v14744_v46  ;;  %v645_v53 = vld [vmem:[%s18196_s7 + $0x30] sm:$0xff] }
 0x1dd   : > { %4019 = vmatpush2.bf16.msra.mxu1 %v14879_v5  ;;  %v813_v5 = vld [vmem:[%s18196_s7 + $0x570] sm:$0xff] }
 0x1de   : > { %4020 = vmatprep.subr.bf16.mxu1 %v14872_v47  ;;  %v14441_v47 = vcombine.low %v689_v31, %v693_v32  ;;  %v641_v32 = vld [vmem:[%s18196_s7 + $0x10] sm:$0xff] }
 0x1df   : > { %3980 = vmatpush2.bf16.msra.mxu0 %v14743_v52  ;;  %v14562_v52 = vcombine.high %v809_v43, %v813_v5  ;;  %v769_v34 = vld [vmem:[%s18196_s7 + $0x410] sm:$0xff] }
 0x1e0   : > { %3981 = vmatprep.subr.bf16.mxu0 %v14736_v56  ;;  %v677_v56 = vld [vmem:[%s18196_s7 + $0x130] sm:$0xff] }
 0x1e1   : > { %4021 = vmatpush2.bf16.msra.mxu1 %v14871_v54  ;;  %v673_v54 = vld [vmem:[%s18196_s7 + $0x110] sm:$0xff] }
 0x1e2   : > { %4022 = vmatprep.subr.bf16.mxu1 %v14864_v57 }
 0x1e3   : > { %3982 = vmatpush2.bf16.msra.mxu0 %v14735_v0 }
 0x1e4   : > { %3983 = vmatprep.subr.bf16.mxu0 %v14728_v1  ;;  %v14426_v1 = vcombine.high %v673_v54, %v677_v56 }
 0x1e5   : > { %4023 = vmatpush2.bf16.msra.mxu1 %v14863_v22  ;;  %v14561_v22 = vcombine.low %v809_v43, %v813_v5  ;;  %v765_v43 = vld [vmem:[%s18196_s7 + $0x3f0] sm:$0xff] }
 0x1e6   : > { %4024 = vmatprep.subr.bf16.mxu1 %v14856_v2  ;;  %v889_v5 = vld [vmem:[%s18196_s7 + $0x7d0] sm:$0xff] }
 0x1e7   : > { %3984 = vmatpush2.bf16.msra.mxu0 %v14727_v7  ;;  %v797_v7 = vld [vmem:[%s18196_s7 + $0x4f0] sm:$0xff] }
 0x1e8   : > { %3985 = vmatprep.subr.bf16.mxu0 %v14720_v9  ;;  %v14553_v9 = vcombine.low %v801_v59, %v805_v60  ;;  %v14546_v12 = vcombine.high %v793_v6, %v797_v7  ;;  %v881_v59 = vld [vmem:[%s18196_s7 + $0x790] sm:$0xff] }
 0x1e9   : > { %4025 = vmatpush2.bf16.msra.mxu1 %v14855_v8  ;;  %v14425_v8 = vcombine.low %v673_v54, %v677_v56  ;;  %v753_v56 = vld [vmem:[%s18196_s7 + $0x390] sm:$0xff] }
 0x1ea   : > { %4026 = vmatprep.subr.bf16.mxu1 %v14848_v10  ;;  %v14418_v10 = vcombine.high %v665_v3, %v669_v4  ;;  %v885_v60 = vld [vmem:[%s18196_s7 + $0x7b0] sm:$0xff] }
 0x1eb   : > { %3986 = vmatpush2.bf16.msra.mxu0 %v14719_v17  ;;  %v789_v17 = vld [vmem:[%s18196_s7 + $0x4b0] sm:$0xff] }
 0x1ec   : > { %3987 = vmatprep.subr.bf16.mxu0 %v14712_v19  ;;  %v14545_v19 = vcombine.low %v793_v6, %v797_v7  ;;  %v14538_v21 = vcombine.high %v785_v15, %v789_v17  ;;  %v14633_v6 = vcombine.low %v881_v59, %v885_v60 }
 0x1ed   : > { %4027 = vmatpush2.bf16.msra.mxu1 %v14847_v18  ;;  %v14417_v18 = vcombine.low %v665_v3, %v669_v4  ;;  %v877_v3 = vld [vmem:[%s18196_s7 + $0x770] sm:$0xff] }
 0x1ee   : > { %4028 = vmatprep.subr.bf16.mxu1 %v14840_v20  ;;  %v14410_v20 = vcombine.high %v657_v13, %v661_v14 }
 0x1ef   : > { %3988 = vmatpush2.bf16.msra.mxu0 %v14711_v27  ;;  %v781_v27 = vld [vmem:[%s18196_s7 + $0x470] sm:$0xff] }
 0x1f0   : > { %4039 = vmatprep.subr.bf16.mxu0 %v14450_v29  ;;  %v14537_v29 = vcombine.low %v785_v15, %v789_v17  ;;  %v14530_v31 = vcombine.high %v777_v26, %v781_v27 }
 0x1f1   : > { %4029 = vmatpush2.bf16.msra.mxu1 %v14839_v28  ;;  %v14409_v28 = vcombine.low %v657_v13, %v661_v14  ;;  %v869_v13 = vld [vmem:[%s18196_s7 + $0x730] sm:$0xff] }
 0x1f2   : > { %4080 = vmatprep.subr.bf16.mxu1 %v14578_v30  ;;  %v18555_v41 = vpop.f32.mrf.mxu0  ;;  %3990 = vmatmul.mubr.bf16.vlgmr.msra.gmra.mxu0 %v18409_v55  ;;  %v14402_v30 = vcombine.high %v649_v23, %v653_v24 }
 0x1f3   : > { %4040 = vmatpush1.bf16.msra.mxu0 %v14449_v35  ;;  %4071 = vmatprep.mubr.bf16.mxu0 %v18273_v11  ;;  %v773_v35 = vld [vmem:[%s18196_s7 + $0x430] sm:$0xff] }
 0x1f4   : > { %v18560_v46 = vpop.f32.mrf.mxu1  ;;  %4031 = vmatmul.mubr.bf16.vlgmr.msra.gmra.mxu1 %v18415_v58  ;;  %v18563_v48 = vpop.f32.mrf.mxu0  ;;  %4041 = vmatprep.subr.bf16.mxu0 %v14442_v38  ;;  %v14529_v38 = vcombine.low %v777_v26, %v781_v27  ;;  %v14522_v63 = vcombine.high %v769_v34, %v773_v35 }
 0x1f5   : > { %4081 = vmatpush1.bf16.msra.mxu1 %v14577_v37  ;;  %4112 = vmatprep.mubr.bf16.mxu1 %v18280_v16  ;;  %v14401_v37 = vcombine.low %v649_v23, %v653_v24  ;;  %v861_v23 = vld [vmem:[%s18196_s7 + $0x6f0] sm:$0xff] }
 0x1f6   : > { %v18565_v51 = vpop.f32.mrf.mxu1  ;;  %4082 = vmatprep.subr.bf16.mxu1 %v14570_v39  ;;  %v3749_v57 = vpop.f32.mrf.mxu0  ;;  %v14394_v39 = vcombine.high %v641_v32, %v645_v53 }
 0x1f7   : > { %4042 = vmatpush1.bf16.msra.mxu0 %v14441_v47  ;;  %v893_v47 = vld [vmem:[%s18196_s7 + $0x7f0] sm:$0xff] }
 0x1f8   : > { %v3790_v61 = vpop.f32.mrf.mxu1  ;;  %v3750_v0 = vpop.f32.mrf.mxu0  ;;  %4043 = vmatprep.subr.bf16.mxu0 %v14434_v50  ;;  %v14521_v50 = vcombine.low %v769_v34, %v773_v35  ;;  %v14642_v54 = vcombine.high %v889_v5, %v893_v47  ;;  %v757_v57 = vld [vmem:[%s18196_s7 + $0x3b0] sm:$0xff] }
 0x1f9   : > { %4083 = vmatpush1.bf16.msra.mxu1 %v14569_v49  ;;  %v14393_v49 = vcombine.low %v641_v32, %v645_v53  ;;  %v14513_v61 = vcombine.low %v761_v40, %v765_v43  ;;  %v14506_v0 = vcombine.high %v753_v56, %v757_v57  ;;  %v14505_v4 = vcombine.low %v753_v56, %v757_v57  ;;  %v853_v32 = vld [vmem:[%s18196_s7 + $0x6b0] sm:$0xff] }
 0x1fa   : > { %v3791_v2 = vpop.f32.mrf.mxu1  ;;  %4084 = vmatprep.subr.bf16.mxu1 %v14562_v52  ;;  %v14514_v52 = vcombine.high %v761_v40, %v765_v43  ;;  %v845_v40 = vld [vmem:[%s18196_s7 + $0x670] sm:$0xff] }
 0x1fb   : > { %4044 = vmatpush1.bf16.msra.mxu0 %v14433_v62  ;;  %v14641_v62 = vcombine.low %v889_v5, %v893_v47  ;;  %v749_v2 = vld [vmem:[%s18196_s7 + $0x370] sm:$0xff] }
 0x1fc   : > { %4045 = vmatprep.subr.bf16.mxu0 %v14426_v1  ;;  %v745_v1 = vld [vmem:[%s18196_s7 + $0x350] sm:$0xff] }
 0x1fd   : > { %4085 = vmatpush1.bf16.msra.mxu1 %v14561_v22  ;;  %v14634_v22 = vcombine.high %v881_v59, %v885_v60  ;;  %v14498_v7 = vcombine.high %v745_v1, %v749_v2  ;;  %v14497_v14 = vcombine.low %v745_v1, %v749_v2  ;;  %v837_v56 = vld [vmem:[%s18196_s7 + $0x630] sm:$0xff] }
 0x1fe   : > { %4086 = vmatprep.subr.bf16.mxu1 %v14554_v25  ;;  %v873_v25 = vld [vmem:[%s18196_s7 + $0x750] sm:$0xff] }
 0x1ff   : > { %4046 = vmatpush1.bf16.msra.mxu0 %v14425_v8  ;;  %v14626_v8 = vcombine.high %v873_v25, %v877_v3  ;;  %v14625_v15 = vcombine.low %v873_v25, %v877_v3  ;;  %v1081_v2 = vld [vmem:[%s18196_s7 + $0xdd0] sm:$0xff] }
 0x200   : > { %4047 = vmatprep.subr.bf16.mxu0 %v14418_v10  ;;  %v741_v10 = vld [vmem:[%s18196_s7 + $0x330] sm:$0xff] }
 0x201   : > { %4087 = vmatpush1.bf16.msra.mxu1 %v14553_v9  ;;  %v737_v9 = vld [vmem:[%s18196_s7 + $0x310] sm:$0xff] }
 0x202   : > { %4088 = vmatprep.subr.bf16.mxu1 %v14546_v12  ;;  %v865_v12 = vld [vmem:[%s18196_s7 + $0x710] sm:$0xff]  ;;  %v14490_v17 = vcombine.high %v737_v9, %v741_v10  ;;  %v14489_v24 = vcombine.low %v737_v9, %v741_v10 }
 0x203   : > { %4048 = vmatpush1.bf16.msra.mxu0 %v14417_v18  ;;  %v14618_v18 = vcombine.high %v865_v12, %v869_v13  ;;  %v14617_v26 = vcombine.low %v865_v12, %v869_v13  ;;  %v1085_v25 = vld [vmem:[%s18196_s7 + $0xdf0] sm:$0xff] }
 0x204   : > { %4049 = vmatprep.subr.bf16.mxu0 %v14410_v20  ;;  %v733_v20 = vld [vmem:[%s18196_s7 + $0x2f0] sm:$0xff] }
 0x205   : > { %4089 = vmatpush1.bf16.msra.mxu1 %v14545_v19  ;;  %v729_v19 = vld [vmem:[%s18196_s7 + $0x2d0] sm:$0xff] }
 0x206   : > { %4090 = vmatprep.subr.bf16.mxu1 %v14538_v21  ;;  %v857_v21 = vld [vmem:[%s18196_s7 + $0x6d0] sm:$0xff]  ;;  %v14482_v27 = vcombine.high %v729_v19, %v733_v20  ;;  %v14481_v53 = vcombine.low %v729_v19, %v733_v20 }
 0x207   : > { %4050 = vmatpush1.bf16.msra.mxu0 %v14409_v28  ;;  %v14610_v28 = vcombine.high %v857_v21, %v861_v23  ;;  %v14609_v34 = vcombine.low %v857_v21, %v861_v23  ;;  %v949_v9 = vld [vmem:[%s18196_s7 + $0x9b0] sm:$0xff] }
 0x208   : > { %4051 = vmatprep.subr.bf16.mxu0 %v14402_v30  ;;  %v725_v30 = vld [vmem:[%s18196_s7 + $0x2b0] sm:$0xff] }
 0x209   : > { %4091 = vmatpush1.bf16.msra.mxu1 %v14537_v29  ;;  %v721_v29 = vld [vmem:[%s18196_s7 + $0x290] sm:$0xff] }
 0x20a   : > { %4092 = vmatprep.subr.bf16.mxu1 %v14530_v31  ;;  %v849_v31 = vld [vmem:[%s18196_s7 + $0x690] sm:$0xff]  ;;  %v14474_v35 = vcombine.high %v721_v29, %v725_v30  ;;  %v14473_v43 = vcombine.low %v721_v29, %v725_v30 }
 0x20b   : > { %4052 = vmatpush1.bf16.msra.mxu0 %v14401_v37  ;;  %v14602_v37 = vcombine.high %v849_v31, %v853_v32  ;;  %v14601_v5 = vcombine.low %v849_v31, %v853_v32  ;;  %v1073_v12 = vld [vmem:[%s18196_s7 + $0xd90] sm:$0xff] }
 0x20c   : > { %4053 = vmatprep.subr.bf16.mxu0 %v14394_v39  ;;  %v717_v39 = vld [vmem:[%s18196_s7 + $0x270] sm:$0xff] }
 0x20d   : > { %4093 = vmatpush1.bf16.msra.mxu1 %v14529_v38  ;;  %v713_v38 = vld [vmem:[%s18196_s7 + $0x250] sm:$0xff] }
 0x20e   : > { %4094 = vmatprep.subr.bf16.mxu1 %v14522_v63  ;;  %v841_v63 = vld [vmem:[%s18196_s7 + $0x650] sm:$0xff]  ;;  %v14466_v47 = vcombine.high %v713_v38, %v717_v39  ;;  %v14465_v57 = vcombine.low %v713_v38, %v717_v39 }
 0x20f   : > { %4054 = vmatpush1.bf16.msra.mxu0 %v14393_v49  ;;  %v14594_v49 = vcombine.high %v841_v63, %v845_v40  ;;  %v14593_v59 = vcombine.low %v841_v63, %v845_v40  ;;  %v1077_v13 = vld [vmem:[%s18196_s7 + $0xdb0] sm:$0xff] }
 0x210   : > { %4055 = vmatprep.subr.bf16.mxu0 %v14514_v52  ;;  %v709_v52 = vld [vmem:[%s18196_s7 + $0x230] sm:$0xff]  ;;  %v14826_v19 = vcombine.high %v1073_v12, %v1077_v13 }
 0x211   : > { %4095 = vmatpush1.bf16.msra.mxu1 %v14521_v50  ;;  %v705_v50 = vld [vmem:[%s18196_s7 + $0x210] sm:$0xff] }
 0x212   : > { %4096 = vmatprep.subr.bf16.mxu1 %v14642_v54  ;;  %v833_v54 = vld [vmem:[%s18196_s7 + $0x610] sm:$0xff]  ;;  %v14458_v60 = vcombine.high %v705_v50, %v709_v52  ;;  %v14457_v3 = vcombine.low %v705_v50, %v709_v52 }
 0x213   : > { %4056 = vmatpush2.bf16.msra.mxu0 %v14513_v61  ;;  %v14586_v61 = vcombine.high %v833_v54, %v837_v56  ;;  %v937_v20 = vld [vmem:[%s18196_s7 + $0x950] sm:$0xff] }
 0x214   : > { %4057 = vmatprep.subr.bf16.mxu0 %v14506_v0  ;;  %v957_v0 = vld [vmem:[%s18196_s7 + $0x9f0] sm:$0xff] }
 0x215   : > { %4097 = vmatpush2.bf16.msra.mxu1 %v14641_v62  ;;  %v953_v62 = vld [vmem:[%s18196_s7 + $0x9d0] sm:$0xff] }
 0x216   : > { %4098 = vmatprep.subr.bf16.mxu1 %v14634_v22  ;;  %v17845_v22 = vmov 1966171168   ;;  %v941_v21 = vld [vmem:[%s18196_s7 + $0x970] sm:$0xff] }
 0x217   : > { %4058 = vmatpush2.bf16.msra.mxu0 %v14505_v4  ;;  %v4370_v1 = vunpack.c.l.s4 %v17845_v22  ;;  %v14585_v4 = vcombine.low %v833_v54, %v837_v56  ;;  %v14690_v31 = vcombine.high %v937_v20, %v941_v21  ;;  %v1057_v38 = vld [vmem:[%s18196_s7 + $0xd10] sm:$0xff] }
 0x218   : > { %4059 = vmatprep.subr.bf16.mxu0 %v14498_v7  ;;  %v14834_v7 = vcombine.high %v1081_v2, %v1085_v25  ;;  %v1061_v39 = vld [vmem:[%s18196_s7 + $0xd30] sm:$0xff] }
 0x219   : > { %4099 = vmatpush2.bf16.msra.mxu1 %v14633_v6  ;;  %v14706_v6 = vcombine.high %v953_v62, %v957_v0  ;;  %v4371_v10 = vunpack.c.0.s8 %v4370_v1  ;;  %v14809_v1 = vcombine.low %v1057_v38, %v1061_v39 }
 0x21a   : > { %4100 = vmatprep.subr.bf16.mxu1 %v14626_v8  ;;  %v945_v8 = vld [vmem:[%s18196_s7 + $0x990] sm:$0xff] }
 0x21b   : > { %4060 = vmatpush2.bf16.msra.mxu0 %v14497_v14  ;;  %v14705_v14 = vcombine.low %v953_v62, %v957_v0  ;;  %v18634_v23 = vsub.s32 %v4371_v10, %v18248_v44  ;;  %v14697_v44 = vcombine.low %v945_v8, %v949_v9  ;;  %v1053_v62 = vld [vmem:[%s18196_s7 + $0xcf0] sm:$0xff] }
 0x21c   : > { %4061 = vmatprep.subr.bf16.mxu0 %v14490_v17  ;;  %v14698_v17 = vcombine.high %v945_v8, %v949_v9 }
 0x21d   : > { %4101 = vmatpush2.bf16.msra.mxu1 %v14625_v15  ;;  %v14833_v15 = vcombine.low %v1081_v2, %v1085_v25 }
 0x21e   : > { %4102 = vmatprep.subr.bf16.mxu1 %v14618_v18  ;;  %v3787_v18 = vadd.f32 %v18560_v46, %v18555_v41  ;;  %v14825_v46 = vcombine.low %v1073_v12, %v1077_v13  ;;  %v905_v13 = vld [vmem:[%s18196_s7 + $0x850] sm:$0xff] }
 0x21f   : > { %4062 = vmatpush2.bf16.msra.mxu0 %v14489_v24 }
 0x220   : > { %4063 = vmatprep.subr.bf16.mxu0 %v14482_v27  ;;  %v1069_v27 = vld [vmem:[%s18196_s7 + $0xd70] sm:$0xff] }
 0x221   : > { %4103 = vmatpush2.bf16.msra.mxu1 %v14617_v26  ;;  %v1065_v26 = vld [vmem:[%s18196_s7 + $0xd50] sm:$0xff] }
 0x222   : > { %4104 = vmatprep.subr.bf16.mxu1 %v14610_v28  ;;  %v3789_v28 = vadd.f32 %v18565_v51, %v18563_v48  ;;  %v14818_v51 = vcombine.high %v1065_v26, %v1069_v27 }
 0x223   : > { %4064 = vmatpush2.bf16.msra.mxu0 %v14481_v53 }
 0x224   : > { %4065 = vmatprep.subr.bf16.mxu0 %v14474_v35  ;;  %v933_v35 = vld [vmem:[%s18196_s7 + $0x930] sm:$0xff] }
 0x225   : > { %4105 = vmatpush2.bf16.msra.mxu1 %v14609_v34  ;;  %v929_v34 = vld [vmem:[%s18196_s7 + $0x910] sm:$0xff] }
 0x226   : > { %4106 = vmatprep.subr.bf16.mxu1 %v14602_v37  ;;  %v14682_v50 = vcombine.high %v929_v34, %v933_v35  ;;  %v14681_v22 = vcombine.low %v929_v34, %v933_v35 }
 0x227   : > { %4066 = vmatpush2.bf16.msra.mxu0 %v14473_v43 }
 0x228   : > { %4067 = vmatprep.subr.bf16.mxu0 %v14466_v47 }
 0x229   : > { %4107 = vmatpush2.bf16.msra.mxu1 %v14601_v5  ;;  %v14689_v5 = vcombine.low %v937_v20, %v941_v21 }
 0x22a   : > { %4108 = vmatprep.subr.bf16.mxu1 %v14594_v49  ;;  %v14817_v49 = vcombine.low %v1065_v26, %v1069_v27  ;;  %v901_v26 = vld [vmem:[%s18196_s7 + $0x830] sm:$0xff] }
 0x22b   : > { %4068 = vmatpush2.bf16.msra.mxu0 %v14465_v57  ;;  %v14810_v57 = vcombine.high %v1057_v38, %v1061_v39  ;;  %v1025_v27 = vld [vmem:[%s18196_s7 + $0xc10] sm:$0xff] }
 0x22c   : > { %4069 = vmatprep.subr.bf16.mxu0 %v14458_v60  ;;  %v925_v60 = vld [vmem:[%s18196_s7 + $0x8f0] sm:$0xff] }
 0x22d   : > { %4109 = vmatpush2.bf16.msra.mxu1 %v14593_v59  ;;  %v921_v59 = vld [vmem:[%s18196_s7 + $0x8d0] sm:$0xff] }
 0x22e   : > { %4110 = vmatprep.subr.bf16.mxu1 %v14586_v61  ;;  %v1049_v61 = vld [vmem:[%s18196_s7 + $0xcd0] sm:$0xff]  ;;  %v14674_v2 = vcombine.high %v921_v59, %v925_v60  ;;  %v14673_v8 = vcombine.low %v921_v59, %v925_v60 }
 0x22f   : > { %4070 = vmatpush2.bf16.msra.mxu0 %v14457_v3  ;;  %v14802_v25 = vcombine.high %v1049_v61, %v1053_v62  ;;  %v913_v3 = vld [vmem:[%s18196_s7 + $0x890] sm:$0xff]  ;;  %v14801_v9 = vcombine.low %v1049_v61, %v1053_v62 }
 0x230   : > { %4121 = vmatprep.subr.bf16.mxu0 %v14706_v6  ;;  %v1041_v6 = vld [vmem:[%s18196_s7 + $0xc90] sm:$0xff] }
 0x231   : > { %4111 = vmatpush2.bf16.msra.mxu1 %v14585_v4  ;;  %v917_v4 = vld [vmem:[%s18196_s7 + $0x8b0] sm:$0xff] }
 0x232   : > { %4162 = vmatprep.subr.bf16.mxu1 %v14834_v7  ;;  %v3827_v24 = vpop.f32.mrf.mxu0  ;;  %4072 = vmatmul.mubr.bf16.vlgmr.msra.gmra.mxu0 %v18327_v33  ;;  %v1045_v7 = vld [vmem:[%s18196_s7 + $0xcb0] sm:$0xff]  ;;  %v14666_v10 = vcombine.high %v913_v3, %v917_v4 }
 0x233   : > { %v3828_v29 = vadd.f32 %v3827_v24, %v3787_v18  ;;  %4122 = vmatpush1.bf16.msra.mxu0 %v14705_v14  ;;  %4153 = vmatprep.mubr.bf16.mxu0 %v18339_v42  ;;  %v14794_v12 = vcombine.high %v1041_v6, %v1045_v7  ;;  %v909_v14 = vld [vmem:[%s18196_s7 + $0x870] sm:$0xff]  ;;  %v14665_v18 = vcombine.low %v913_v3, %v917_v4 }
 0x234   : > { %v3868_v30 = vpop.f32.mrf.mxu1  ;;  %4113 = vmatmul.mubr.bf16.vlgmr.msra.gmra.mxu1 %v18335_v36  ;;  %v3829_v41 = vpop.f32.mrf.mxu0  ;;  %4123 = vmatprep.subr.bf16.mxu0 %v14698_v17  ;;  %v1037_v17 = vld [vmem:[%s18196_s7 + $0xc70] sm:$0xff]  ;;  %v14658_v20 = vcombine.high %v905_v13, %v909_v14 }
 0x235   : > { %4163 = vmatpush1.bf16.msra.mxu1 %v14833_v15  ;;  %v3869_v32 = vadd.f32 %v3868_v30, %v3828_v29  ;;  %v3830_v53 = vadd.f32 %v3829_v41, %v3789_v28  ;;  %4194 = vmatprep.mubr.bf16.mxu1 %v18344_v45  ;;  %v1033_v15 = vld [vmem:[%s18196_s7 + $0xc50] sm:$0xff]  ;;  %v14657_v29 = vcombine.low %v905_v13, %v909_v14 }
 0x236   : > { %v3870_v48 = vpop.f32.mrf.mxu1  ;;  %4164 = vmatprep.subr.bf16.mxu1 %v14826_v19  ;;  %v3831_v37 = vpop.f32.mrf.mxu0  ;;  %v14793_v19 = vcombine.low %v1041_v6, %v1045_v7  ;;  %v14786_v21 = vcombine.high %v1033_v15, %v1037_v17  ;;  %v897_v24 = vld [vmem:[%s18196_s7 + $0x810] sm:$0xff]  ;;  %v14785_v30 = vcombine.low %v1033_v15, %v1037_v17 }
 0x237   : > { %v4375_v63 = vrot.slane %v3869_v32, %v18634_v23  ;;  %v3871_v40 = vadd.f32 %v3870_v48, %v3830_v53  ;;  %4124 = vmatpush1.bf16.msra.mxu0 %v14697_v44  ;;  %v1029_v28 = vld [vmem:[%s18196_s7 + $0xc30] sm:$0xff]  ;;  %v14650_v44 = vcombine.high %v897_v24, %v901_v26  ;;  %v14649_v48 = vcombine.low %v897_v24, %v901_v26 }
 0x238   : > { %v3872_v43 = vpop.f32.mrf.mxu1  ;;  %v3832_v47 = vpop.f32.mrf.mxu0  ;;  %4125 = vmatprep.subr.bf16.mxu0 %v14690_v31  ;;  %v14778_v41 = vcombine.high %v1025_v27, %v1029_v28  ;;  %v1021_v31 = vld [vmem:[%s18196_s7 + $0xbf0] sm:$0xff] }
 0x239   : > { %4165 = vmatpush1.bf16.msra.mxu1 %v14825_v46  ;;  %v4376_v52 = vcombine.high %v4375_v63, %v4375_v63  ;;  %14902 = vst.sshfl [vmem:[%s18653_s5] sm:$0x1 pattern:$0x73625140] %v4375_v63  ;;  %v4404_v54 = vrot.slane %v3871_v40, %v18634_v23  ;;  %v1017_v46 = vld [vmem:[%s18196_s7 + $0xbd0] sm:$0xff] }
 0x23a   : > { %v3873_v56 = vpop.f32.mrf.mxu1  ;;  %4166 = vmatprep.subr.bf16.mxu1 %v14818_v51  ;;  %v1145_v32 = vld [vmem:[%s18196_s7 + $0xfd0] sm:$0xff]  ;;  %v14777_v51 = vcombine.low %v1025_v27, %v1029_v28  ;;  %v14770_v34 = vcombine.high %v1017_v46, %v1021_v31  ;;  %v14769_v40 = vcombine.low %v1017_v46, %v1021_v31 }
 0x23b   : > { %14903 = vst.sshfl [vmem:[%s18653_s5 + $0x40] sm:$0x1 pattern:$0x73625140] %v4376_v52  ;;  %v4405_v0 = vcombine.high %v4404_v54, %v4404_v54  ;;  %4126 = vmatpush1.bf16.msra.mxu0 %v14689_v5  ;;  %v1149_v53 = vld [vmem:[%s18196_s7 + $0xff0] sm:$0xff] }
 0x23c   : > { %16083 = vst.sshfl [vmem:[%s18653_s5 + $0x1] sm:$0x1 pattern:$0x73625140] %v4404_v54  ;;  %4127 = vmatprep.subr.bf16.mxu0 %v14682_v50  ;;  %v14898_v35 = vcombine.high %v1145_v32, %v1149_v53  ;;  %v1009_v37 = vld [vmem:[%s18196_s7 + $0xb90] sm:$0xff]  ;;  %v14897_v43 = vcombine.low %v1145_v32, %v1149_v53 }
 0x23d   : > { %4167 = vmatpush1.bf16.msra.mxu1 %v14817_v49  ;;  %16084 = vst.sshfl [vmem:[%s18653_s5 + $0x41] sm:$0x1 pattern:$0x73625140] %v4405_v0  ;;  %v1013_v38 = vld [vmem:[%s18196_s7 + $0xbb0] sm:$0xff] }
 0x23e   : > { %4168 = vmatprep.subr.bf16.mxu1 %v14810_v57  ;;  %v1137_v39 = vld [vmem:[%s18196_s7 + $0xf90] sm:$0xff]  ;;  %v14762_v5 = vcombine.high %v1009_v37, %v1013_v38  ;;  %v14761_v56 = vcombine.low %v1009_v37, %v1013_v38  ;;  %v698_v38 = vld [vmem:[%s18196_s7 + $0x1d8] sm:$0xff] }
 0x23f   : > { %4128 = vmatpush1.bf16.msra.mxu0 %v14681_v22  ;;  %v1141_v63 = vld [vmem:[%s18196_s7 + $0xfb0] sm:$0xff] }
 0x240   : > { %4129 = vmatprep.subr.bf16.mxu0 %v14674_v2  ;;  %v14890_v47 = vcombine.high %v1137_v39, %v1141_v63  ;;  %v1001_v49 = vld [vmem:[%s18196_s7 + $0xb50] sm:$0xff]  ;;  %v14889_v57 = vcombine.low %v1137_v39, %v1141_v63  ;;  %v702_v39 = vld [vmem:[%s18196_s7 + $0x1f8] sm:$0xff] }
 0x241   : > { %4169 = vmatpush1.bf16.msra.mxu1 %v14809_v1  ;;  %v1005_v50 = vld [vmem:[%s18196_s7 + $0xb70] sm:$0xff]  ;;  %v826_v63 = vld [vmem:[%s18196_s7 + $0x5d8] sm:$0xff] }
 0x242   : > { %4170 = vmatprep.subr.bf16.mxu1 %v14802_v25  ;;  %v1129_v52 = vld [vmem:[%s18196_s7 + $0xf50] sm:$0xff]  ;;  %v14754_v59 = vcombine.high %v1001_v49, %v1005_v50  ;;  %v14753_v1 = vcombine.low %v1001_v49, %v1005_v50  ;;  %v690_v50 = vld [vmem:[%s18196_s7 + $0x198] sm:$0xff] }
 0x243   : > { %4130 = vmatpush1.bf16.msra.mxu0 %v14673_v8  ;;  %v1133_v54 = vld [vmem:[%s18196_s7 + $0xf70] sm:$0xff] }
 0x244   : > { %4131 = vmatprep.subr.bf16.mxu0 %v14666_v10  ;;  %v14882_v60 = vcombine.high %v1129_v52, %v1133_v54  ;;  %v993_v61 = vld [vmem:[%s18196_s7 + $0xb10] sm:$0xff]  ;;  %v14881_v2 = vcombine.low %v1129_v52, %v1133_v54  ;;  %v694_v52 = vld [vmem:[%s18196_s7 + $0x1b8] sm:$0xff] }
 0x245   : > { %4171 = vmatpush1.bf16.msra.mxu1 %v14801_v9  ;;  %v997_v62 = vld [vmem:[%s18196_s7 + $0xb30] sm:$0xff]  ;;  %v818_v54 = vld [vmem:[%s18196_s7 + $0x598] sm:$0xff] }
 0x246   : > { %4172 = vmatprep.subr.bf16.mxu1 %v14794_v12  ;;  %v1121_v0 = vld [vmem:[%s18196_s7 + $0xf10] sm:$0xff]  ;;  %v14746_v25 = vcombine.high %v993_v61, %v997_v62  ;;  %v14745_v9 = vcombine.low %v993_v61, %v997_v62  ;;  %v682_v62 = vld [vmem:[%s18196_s7 + $0x158] sm:$0xff] }
 0x247   : > { %4132 = vmatpush1.bf16.msra.mxu0 %v14665_v18  ;;  %v1125_v22 = vld [vmem:[%s18196_s7 + $0xf30] sm:$0xff] }
 0x248   : > { %4133 = vmatprep.subr.bf16.mxu0 %v14658_v20  ;;  %v14874_v3 = vcombine.high %v1121_v0, %v1125_v22  ;;  %v985_v4 = vld [vmem:[%s18196_s7 + $0xad0] sm:$0xff]  ;;  %v14873_v10 = vcombine.low %v1121_v0, %v1125_v22  ;;  %v686_v0 = vld [vmem:[%s18196_s7 + $0x178] sm:$0xff] }
 0x249   : > { %4173 = vmatpush1.bf16.msra.mxu1 %v14793_v19  ;;  %v989_v6 = vld [vmem:[%s18196_s7 + $0xaf0] sm:$0xff] }
 0x24a   : > { %4174 = vmatprep.subr.bf16.mxu1 %v14786_v21  ;;  %v1113_v7 = vld [vmem:[%s18196_s7 + $0xed0] sm:$0xff]  ;;  %v14738_v12 = vcombine.high %v985_v4, %v989_v6  ;;  %v14737_v19 = vcombine.low %v985_v4, %v989_v6 }
 0x24b   : > { %4134 = vmatpush1.bf16.msra.mxu0 %v14657_v29  ;;  %v1117_v8 = vld [vmem:[%s18196_s7 + $0xef0] sm:$0xff] }
 0x24c   : > { %4135 = vmatprep.subr.bf16.mxu0 %v14650_v44  ;;  %v14866_v13 = vcombine.high %v1113_v7, %v1117_v8  ;;  %v977_v14 = vld [vmem:[%s18196_s7 + $0xa90] sm:$0xff]  ;;  %v14865_v20 = vcombine.low %v1113_v7, %v1117_v8  ;;  %v14436_v7 = vcombine.high %v682_v62, %v686_v0 }
 0x24d   : > { %4175 = vmatpush1.bf16.msra.mxu1 %v14785_v30  ;;  %v981_v15 = vld [vmem:[%s18196_s7 + $0xab0] sm:$0xff] }
 0x24e   : > { %4176 = vmatprep.subr.bf16.mxu1 %v14778_v41  ;;  %v1105_v17 = vld [vmem:[%s18196_s7 + $0xe90] sm:$0xff]  ;;  %v14730_v21 = vcombine.high %v977_v14, %v981_v15  ;;  %v14729_v30 = vcombine.low %v977_v14, %v981_v15  ;;  %v802_v14 = vld [vmem:[%s18196_s7 + $0x518] sm:$0xff] }
 0x24f   : > { %4136 = vmatpush1.bf16.msra.mxu0 %v14649_v48  ;;  %v1109_v18 = vld [vmem:[%s18196_s7 + $0xeb0] sm:$0xff]  ;;  %v806_v15 = vld [vmem:[%s18196_s7 + $0x538] sm:$0xff] }
 0x250   : > { %4137 = vmatprep.subr.bf16.mxu0 %v14770_v34  ;;  %v14858_v24 = vcombine.high %v1105_v17, %v1109_v18  ;;  %v969_v26 = vld [vmem:[%s18196_s7 + $0xa50] sm:$0xff]  ;;  %v14857_v44 = vcombine.low %v1105_v17, %v1109_v18  ;;  %v14435_v18 = vcombine.low %v682_v62, %v686_v0  ;;  %v762_v0 = vld [vmem:[%s18196_s7 + $0x3d8] sm:$0xff] }
 0x251   : > { %4177 = vmatpush1.bf16.msra.mxu1 %v14777_v51  ;;  %v973_v27 = vld [vmem:[%s18196_s7 + $0xa70] sm:$0xff] }
 0x252   : > { %4178 = vmatprep.subr.bf16.mxu1 %v14898_v35  ;;  %v1097_v28 = vld [vmem:[%s18196_s7 + $0xe50] sm:$0xff]  ;;  %v14722_v41 = vcombine.high %v969_v26, %v973_v27  ;;  %v14721_v51 = vcombine.low %v969_v26, %v973_v27  ;;  %v14556_v26 = vcombine.high %v802_v14, %v806_v15  ;;  %v666_v27 = vld [vmem:[%s18196_s7 + $0xd8] sm:$0xff] }
 0x253   : > { %4138 = vmatpush2.bf16.msra.mxu0 %v14769_v40  ;;  %v1101_v29 = vld [vmem:[%s18196_s7 + $0xe70] sm:$0xff]  ;;  %v830_v40 = vld [vmem:[%s18196_s7 + $0x5f8] sm:$0xff] }
 0x254   : > { %4139 = vmatprep.subr.bf16.mxu0 %v14762_v5  ;;  %v14850_v46 = vcombine.high %v1097_v28, %v1101_v29  ;;  %v961_v31 = vld [vmem:[%s18196_s7 + $0xa10] sm:$0xff]  ;;  %v14849_v34 = vcombine.low %v1097_v28, %v1101_v29  ;;  %v14580_v49 = vcombine.high %v826_v63, %v830_v40  ;;  %v670_v28 = vld [vmem:[%s18196_s7 + $0xf8] sm:$0xff] }
 0x255   : > { %4179 = vmatpush2.bf16.msra.mxu1 %v14897_v43  ;;  %v965_v32 = vld [vmem:[%s18196_s7 + $0xa30] sm:$0xff]  ;;  %v794_v29 = vld [vmem:[%s18196_s7 + $0x4d8] sm:$0xff] }
 0x256   : > { %4180 = vmatprep.subr.bf16.mxu1 %v14890_v47  ;;  %v1089_v53 = vld [vmem:[%s18196_s7 + $0xe10] sm:$0xff]  ;;  %v14714_v35 = vcombine.high %v961_v31, %v965_v32  ;;  %v14713_v43 = vcombine.low %v961_v31, %v965_v32  ;;  %v14452_v47 = vcombine.high %v698_v38, %v702_v39  ;;  %v658_v32 = vld [vmem:[%s18196_s7 + $0x98] sm:$0xff] }
 0x257   : > { %4140 = vmatpush2.bf16.msra.mxu0 %v14761_v56  ;;  %v1093_v48 = vld [vmem:[%s18196_s7 + $0xe30] sm:$0xff]  ;;  %v822_v56 = vld [vmem:[%s18196_s7 + $0x5b8] sm:$0xff] }
 0x258   : > { %4141 = vmatprep.subr.bf16.mxu0 %v14754_v59  ;;  %v14842_v37 = vcombine.high %v1089_v53, %v1093_v48  ;;  %v14841_v5 = vcombine.low %v1089_v53, %v1093_v48  ;;  %v14579_v59 = vcombine.low %v826_v63, %v830_v40  ;;  %v14572_v61 = vcombine.high %v818_v54, %v822_v56  ;;  %v662_v53 = vld [vmem:[%s18196_s7 + $0xb8] sm:$0xff] }
 0x259   : > { %4181 = vmatpush2.bf16.msra.mxu1 %v14889_v57  ;;  %v14451_v57 = vcombine.low %v698_v38, %v702_v39  ;;  %v14571_v6 = vcombine.low %v818_v54, %v822_v56  ;;  %v786_v48 = vld [vmem:[%s18196_s7 + $0x498] sm:$0xff] }
 0x25a   : > { %4182 = vmatprep.subr.bf16.mxu1 %v14882_v60  ;;  %v14444_v60 = vcombine.high %v690_v50, %v694_v52  ;;  %v650_v39 = vld [vmem:[%s18196_s7 + $0x58] sm:$0xff] }
 0x25b   : > { %4142 = vmatpush2.bf16.msra.mxu0 %v14753_v1  ;;  %v810_v1 = vld [vmem:[%s18196_s7 + $0x558] sm:$0xff] }
 0x25c   : > { %4143 = vmatprep.subr.bf16.mxu0 %v14746_v25  ;;  %v654_v63 = vld [vmem:[%s18196_s7 + $0x78] sm:$0xff] }
 0x25d   : > { %4183 = vmatpush2.bf16.msra.mxu1 %v14881_v2  ;;  %v814_v2 = vld [vmem:[%s18196_s7 + $0x578] sm:$0xff] }
 0x25e   : > { %4184 = vmatprep.subr.bf16.mxu1 %v14874_v3  ;;  %v14443_v3 = vcombine.low %v690_v50, %v694_v52  ;;  %v778_v40 = vld [vmem:[%s18196_s7 + $0x458] sm:$0xff] }
 0x25f   : > { %4144 = vmatpush2.bf16.msra.mxu0 %v14745_v9  ;;  %v14564_v9 = vcombine.high %v810_v1, %v814_v2  ;;  %v642_v52 = vld [vmem:[%s18196_s7 + $0x18] sm:$0xff] }
 0x260   : > { %4145 = vmatprep.subr.bf16.mxu0 %v14738_v12  ;;  %v678_v12 = vld [vmem:[%s18196_s7 + $0x138] sm:$0xff] }
 0x261   : > { %4185 = vmatpush2.bf16.msra.mxu1 %v14873_v10  ;;  %v674_v10 = vld [vmem:[%s18196_s7 + $0x118] sm:$0xff] }
 0x262   : > { %4186 = vmatprep.subr.bf16.mxu1 %v14866_v13  ;;  %v646_v54 = vld [vmem:[%s18196_s7 + $0x38] sm:$0xff] }
 0x263   : > { %4146 = vmatpush2.bf16.msra.mxu0 %v14737_v19  ;;  %v770_v56 = vld [vmem:[%s18196_s7 + $0x418] sm:$0xff] }
 0x264   : > { %4147 = vmatprep.subr.bf16.mxu0 %v14730_v21  ;;  %v14428_v21 = vcombine.high %v674_v10, %v678_v12 }
 0x265   : > { %4187 = vmatpush2.bf16.msra.mxu1 %v14865_v20  ;;  %v14563_v20 = vcombine.low %v810_v1, %v814_v2  ;;  %v766_v1 = vld [vmem:[%s18196_s7 + $0x3f8] sm:$0xff] }
 0x266   : > { %4188 = vmatprep.subr.bf16.mxu1 %v14858_v24  ;;  %v890_v2 = vld [vmem:[%s18196_s7 + $0x7d8] sm:$0xff] }
 0x267   : > { %4148 = vmatpush2.bf16.msra.mxu0 %v14729_v30  ;;  %v798_v30 = vld [vmem:[%s18196_s7 + $0x4f8] sm:$0xff] }
 0x268   : > { %4149 = vmatprep.subr.bf16.mxu0 %v14722_v41  ;;  %v14555_v41 = vcombine.low %v802_v14, %v806_v15  ;;  %v14548_v31 = vcombine.high %v794_v29, %v798_v30  ;;  %v882_v14 = vld [vmem:[%s18196_s7 + $0x798] sm:$0xff] }
 0x269   : > { %4189 = vmatpush2.bf16.msra.mxu1 %v14857_v44  ;;  %v14427_v44 = vcombine.low %v674_v10, %v678_v12  ;;  %v754_v12 = vld [vmem:[%s18196_s7 + $0x398] sm:$0xff] }
 0x26a   : > { %4190 = vmatprep.subr.bf16.mxu1 %v14850_v46  ;;  %v14420_v46 = vcombine.high %v666_v27, %v670_v28  ;;  %v886_v15 = vld [vmem:[%s18196_s7 + $0x7b8] sm:$0xff] }
 0x26b   : > { %4150 = vmatpush2.bf16.msra.mxu0 %v14721_v51  ;;  %v790_v51 = vld [vmem:[%s18196_s7 + $0x4b8] sm:$0xff] }
 0x26c   : > { %4151 = vmatprep.subr.bf16.mxu0 %v14714_v35  ;;  %v14547_v35 = vcombine.low %v794_v29, %v798_v30  ;;  %v14540_v38 = vcombine.high %v786_v48, %v790_v51  ;;  %v14635_v29 = vcombine.low %v882_v14, %v886_v15 }
 0x26d   : > { %4191 = vmatpush2.bf16.msra.mxu1 %v14849_v34  ;;  %v14419_v34 = vcombine.low %v666_v27, %v670_v28  ;;  %v878_v27 = vld [vmem:[%s18196_s7 + $0x778] sm:$0xff] }
 0x26e   : > { %4192 = vmatprep.subr.bf16.mxu1 %v14842_v37  ;;  %v14412_v37 = vcombine.high %v658_v32, %v662_v53 }
 0x26f   : > { %4152 = vmatpush2.bf16.msra.mxu0 %v14713_v43  ;;  %v782_v43 = vld [vmem:[%s18196_s7 + $0x478] sm:$0xff] }
 0x270   : > { %4203 = vmatprep.subr.bf16.mxu0 %v14452_v47  ;;  %v14539_v47 = vcombine.low %v786_v48, %v790_v51  ;;  %v14532_v50 = vcombine.high %v778_v40, %v782_v43 }
 0x271   : > { %4193 = vmatpush2.bf16.msra.mxu1 %v14841_v5  ;;  %v14411_v5 = vcombine.low %v658_v32, %v662_v53  ;;  %v870_v32 = vld [vmem:[%s18196_s7 + $0x738] sm:$0xff] }
 0x272   : > { %4244 = vmatprep.subr.bf16.mxu1 %v14580_v49  ;;  %v18718_v22 = vpop.f32.mrf.mxu0  ;;  %4154 = vmatmul.mubr.bf16.vlgmr.msra.gmra.mxu0 %v18409_v55  ;;  %v14404_v49 = vcombine.high %v650_v39, %v654_v63 }
 0x273   : > { %4204 = vmatpush1.bf16.msra.mxu0 %v14451_v57  ;;  %4235 = vmatprep.mubr.bf16.mxu0 %v18273_v11  ;;  %v774_v57 = vld [vmem:[%s18196_s7 + $0x438] sm:$0xff] }
 0x274   : > { %v18723_v25 = vpop.f32.mrf.mxu1  ;;  %4195 = vmatmul.mubr.bf16.vlgmr.msra.gmra.mxu1 %v18415_v58  ;;  %v18726_v4 = vpop.f32.mrf.mxu0  ;;  %4205 = vmatprep.subr.bf16.mxu0 %v14444_v60  ;;  %v14531_v60 = vcombine.low %v778_v40, %v782_v43  ;;  %v14524_v62 = vcombine.high %v770_v56, %v774_v57 }
 0x275   : > { %4245 = vmatpush1.bf16.msra.mxu1 %v14579_v59  ;;  %4276 = vmatprep.mubr.bf16.mxu1 %v18280_v16  ;;  %v14403_v59 = vcombine.low %v650_v39, %v654_v63  ;;  %v862_v39 = vld [vmem:[%s18196_s7 + $0x6f8] sm:$0xff] }
 0x276   : > { %v18728_v8 = vpop.f32.mrf.mxu1  ;;  %4246 = vmatprep.subr.bf16.mxu1 %v14572_v61  ;;  %v3913_v13 = vpop.f32.mrf.mxu0  ;;  %v14396_v61 = vcombine.high %v642_v52, %v646_v54 }
 0x277   : > { %4206 = vmatpush1.bf16.msra.mxu0 %v14443_v3  ;;  %v894_v3 = vld [vmem:[%s18196_s7 + $0x7f8] sm:$0xff] }
 0x278   : > { %v3954_v17 = vpop.f32.mrf.mxu1  ;;  %v3914_v19 = vpop.f32.mrf.mxu0  ;;  %4207 = vmatprep.subr.bf16.mxu0 %v14436_v7  ;;  %v14523_v7 = vcombine.low %v770_v56, %v774_v57  ;;  %v14644_v10 = vcombine.high %v890_v2, %v894_v3  ;;  %v758_v13 = vld [vmem:[%s18196_s7 + $0x3b8] sm:$0xff] }
 0x279   : > { %4247 = vmatpush1.bf16.msra.mxu1 %v14571_v6  ;;  %v14395_v6 = vcombine.low %v642_v52, %v646_v54  ;;  %v14515_v17 = vcombine.low %v762_v0, %v766_v1  ;;  %v14508_v19 = vcombine.high %v754_v12, %v758_v13  ;;  %v14507_v28 = vcombine.low %v754_v12, %v758_v13  ;;  %v854_v52 = vld [vmem:[%s18196_s7 + $0x6b8] sm:$0xff] }
 0x27a   : > { %v3955_v24 = vpop.f32.mrf.mxu1  ;;  %4248 = vmatprep.subr.bf16.mxu1 %v14564_v9  ;;  %v14516_v9 = vcombine.high %v762_v0, %v766_v1  ;;  %v846_v0 = vld [vmem:[%s18196_s7 + $0x678] sm:$0xff] }
 0x27b   : > { %4208 = vmatpush1.bf16.msra.mxu0 %v14435_v18  ;;  %v14643_v18 = vcombine.low %v890_v2, %v894_v3  ;;  %v750_v24 = vld [vmem:[%s18196_s7 + $0x378] sm:$0xff] }
 0x27c   : > { %4209 = vmatprep.subr.bf16.mxu0 %v14428_v21  ;;  %v746_v21 = vld [vmem:[%s18196_s7 + $0x358] sm:$0xff] }
 0x27d   : > { %4249 = vmatpush1.bf16.msra.mxu1 %v14563_v20  ;;  %v14636_v20 = vcombine.high %v882_v14, %v886_v15  ;;  %v14500_v30 = vcombine.high %v746_v21, %v750_v24  ;;  %v14499_v53 = vcombine.low %v746_v21, %v750_v24  ;;  %v838_v12 = vld [vmem:[%s18196_s7 + $0x638] sm:$0xff] }
 0x27e   : > { %4250 = vmatprep.subr.bf16.mxu1 %v14556_v26  ;;  %v874_v26 = vld [vmem:[%s18196_s7 + $0x758] sm:$0xff] }
 0x27f   : > { %4210 = vmatpush1.bf16.msra.mxu0 %v14427_v44  ;;  %v14628_v44 = vcombine.high %v874_v26, %v878_v27  ;;  %v14627_v48 = vcombine.low %v874_v26, %v878_v27  ;;  %v1086_v21 = vld [vmem:[%s18196_s7 + $0xdf8] sm:$0xff] }
 0x280   : > { %4211 = vmatprep.subr.bf16.mxu0 %v14420_v46  ;;  %v742_v46 = vld [vmem:[%s18196_s7 + $0x338] sm:$0xff] }
 0x281   : > { %4251 = vmatpush1.bf16.msra.mxu1 %v14555_v41  ;;  %v738_v41 = vld [vmem:[%s18196_s7 + $0x318] sm:$0xff] }
 0x282   : > { %4252 = vmatprep.subr.bf16.mxu1 %v14548_v31  ;;  %v866_v31 = vld [vmem:[%s18196_s7 + $0x718] sm:$0xff]  ;;  %v14492_v51 = vcombine.high %v738_v41, %v742_v46  ;;  %v14491_v63 = vcombine.low %v738_v41, %v742_v46 }
 0x283   : > { %4212 = vmatpush1.bf16.msra.mxu0 %v14419_v34  ;;  %v14620_v34 = vcombine.high %v866_v31, %v870_v32  ;;  %v14619_v40 = vcombine.low %v866_v31, %v870_v32  ;;  %v1078_v41 = vld [vmem:[%s18196_s7 + $0xdb8] sm:$0xff] }
 0x284   : > { %4213 = vmatprep.subr.bf16.mxu0 %v14412_v37  ;;  %v734_v37 = vld [vmem:[%s18196_s7 + $0x2f8] sm:$0xff] }
 0x285   : > { %4253 = vmatpush1.bf16.msra.mxu1 %v14547_v35  ;;  %v730_v35 = vld [vmem:[%s18196_s7 + $0x2d8] sm:$0xff] }
 0x286   : > { %4254 = vmatprep.subr.bf16.mxu1 %v14540_v38  ;;  %v858_v38 = vld [vmem:[%s18196_s7 + $0x6d8] sm:$0xff]  ;;  %v14484_v43 = vcombine.high %v730_v35, %v734_v37  ;;  %v14483_v54 = vcombine.low %v730_v35, %v734_v37 }
 0x287   : > { %4214 = vmatpush1.bf16.msra.mxu0 %v14411_v5  ;;  %v14612_v5 = vcombine.high %v858_v38, %v862_v39  ;;  %v14611_v56 = vcombine.low %v858_v38, %v862_v39  ;;  %v1066_v37 = vld [vmem:[%s18196_s7 + $0xd58] sm:$0xff]  ;;  %v3953_v39 = vadd.f32 %v18728_v8, %v18726_v4 }
 0x288   : > { %4215 = vmatprep.subr.bf16.mxu0 %v14404_v49  ;;  %v726_v49 = vld [vmem:[%s18196_s7 + $0x2b8] sm:$0xff] }
 0x289   : > { %4255 = vmatpush1.bf16.msra.mxu1 %v14539_v47  ;;  %v722_v47 = vld [vmem:[%s18196_s7 + $0x298] sm:$0xff] }
 0x28a   : > { %4256 = vmatprep.subr.bf16.mxu1 %v14532_v50  ;;  %v850_v50 = vld [vmem:[%s18196_s7 + $0x698] sm:$0xff]  ;;  %v14476_v57 = vcombine.high %v722_v47, %v726_v49  ;;  %v14475_v1 = vcombine.low %v722_v47, %v726_v49 }
 0x28b   : > { %4216 = vmatpush1.bf16.msra.mxu0 %v14403_v59  ;;  %v14604_v59 = vcombine.high %v850_v50, %v854_v52  ;;  %v14603_v2 = vcombine.low %v850_v50, %v854_v52  ;;  %v1070_v38 = vld [vmem:[%s18196_s7 + $0xd78] sm:$0xff] }
 0x28c   : > { %4217 = vmatprep.subr.bf16.mxu0 %v14396_v61  ;;  %v718_v61 = vld [vmem:[%s18196_s7 + $0x278] sm:$0xff]  ;;  %v14820_v4 = vcombine.high %v1066_v37, %v1070_v38 }
 0x28d   : > { %4257 = vmatpush1.bf16.msra.mxu1 %v14531_v60  ;;  %v714_v60 = vld [vmem:[%s18196_s7 + $0x258] sm:$0xff] }
 0x28e   : > { %4258 = vmatprep.subr.bf16.mxu1 %v14524_v62  ;;  %v842_v62 = vld [vmem:[%s18196_s7 + $0x658] sm:$0xff]  ;;  %v14468_v3 = vcombine.high %v714_v60, %v718_v61  ;;  %v14467_v13 = vcombine.low %v714_v60, %v718_v61 }
 0x28f   : > { %4218 = vmatpush1.bf16.msra.mxu0 %v14395_v6  ;;  %v14596_v6 = vcombine.high %v842_v62, %v846_v0  ;;  %v14595_v14 = vcombine.low %v842_v62, %v846_v0  ;;  %v930_v8 = vld [vmem:[%s18196_s7 + $0x918] sm:$0xff] }
 0x290   : > { %4219 = vmatprep.subr.bf16.mxu0 %v14516_v9  ;;  %v710_v9 = vld [vmem:[%s18196_s7 + $0x238] sm:$0xff] }
 0x291   : > { %4259 = vmatpush1.bf16.msra.mxu1 %v14523_v7  ;;  %v706_v7 = vld [vmem:[%s18196_s7 + $0x218] sm:$0xff] }
 0x292   : > { %4260 = vmatprep.subr.bf16.mxu1 %v14644_v10  ;;  %v834_v10 = vld [vmem:[%s18196_s7 + $0x618] sm:$0xff]  ;;  %v14460_v15 = vcombine.high %v706_v7, %v710_v9  ;;  %v14459_v24 = vcombine.low %v706_v7, %v710_v9 }
 0x293   : > { %4220 = vmatpush2.bf16.msra.mxu0 %v14515_v17  ;;  %v14588_v17 = vcombine.high %v834_v10, %v838_v12  ;;  %v14587_v26 = vcombine.low %v834_v10, %v838_v12  ;;  %v934_v52 = vld [vmem:[%s18196_s7 + $0x938] sm:$0xff] }
 0x294   : > { %4221 = vmatprep.subr.bf16.mxu0 %v14508_v19  ;;  %v958_v19 = vld [vmem:[%s18196_s7 + $0x9f8] sm:$0xff] }
 0x295   : > { %4261 = vmatpush2.bf16.msra.mxu1 %v14643_v18  ;;  %v954_v18 = vld [vmem:[%s18196_s7 + $0x9d8] sm:$0xff] }
 0x296   : > { %4262 = vmatprep.subr.bf16.mxu1 %v14636_v20  ;;  %v1082_v20 = vld [vmem:[%s18196_s7 + $0xdd8] sm:$0xff]  ;;  %v14708_v27 = vcombine.high %v954_v18, %v958_v19  ;;  %v14707_v46 = vcombine.low %v954_v18, %v958_v19 }
 0x297   : > { %4222 = vmatpush2.bf16.msra.mxu0 %v14507_v28  ;;  %v14836_v28 = vcombine.high %v1082_v20, %v1086_v21  ;;  %v14835_v31 = vcombine.low %v1082_v20, %v1086_v21  ;;  %v922_v10 = vld [vmem:[%s18196_s7 + $0x8d8] sm:$0xff] }
 0x298   : > { %4223 = vmatprep.subr.bf16.mxu0 %v14500_v30  ;;  %v950_v30 = vld [vmem:[%s18196_s7 + $0x9b8] sm:$0xff] }
 0x299   : > { %4263 = vmatpush2.bf16.msra.mxu1 %v14635_v29  ;;  %v946_v29 = vld [vmem:[%s18196_s7 + $0x998] sm:$0xff] }
 0x29a   : > { %4264 = vmatprep.subr.bf16.mxu1 %v14628_v44  ;;  %v1074_v44 = vld [vmem:[%s18196_s7 + $0xd98] sm:$0xff]  ;;  %v14700_v32 = vcombine.high %v946_v29, %v950_v30 }
 0x29b   : > { %4224 = vmatpush2.bf16.msra.mxu0 %v14499_v53  ;;  %v3951_v53 = vadd.f32 %v18723_v25, %v18718_v22  ;;  %v14699_v22 = vcombine.low %v946_v29, %v950_v30  ;;  %v926_v12 = vld [vmem:[%s18196_s7 + $0x8f8] sm:$0xff] }
 0x29c   : > { %4225 = vmatprep.subr.bf16.mxu0 %v14492_v51  ;;  %v938_v51 = vld [vmem:[%s18196_s7 + $0x958] sm:$0xff]  ;;  %v14676_v19 = vcombine.high %v922_v10, %v926_v12 }
 0x29d   : > { %4265 = vmatpush2.bf16.msra.mxu1 %v14627_v48  ;;  %v14828_v48 = vcombine.high %v1074_v44, %v1078_v41  ;;  %v914_v21 = vld [vmem:[%s18196_s7 + $0x898] sm:$0xff] }
 0x29e   : > { %4266 = vmatprep.subr.bf16.mxu1 %v14620_v34  ;;  %v942_v34 = vld [vmem:[%s18196_s7 + $0x978] sm:$0xff] }
 0x29f   : > { %4226 = vmatpush2.bf16.msra.mxu0 %v14491_v63  ;;  %v14691_v62 = vcombine.low %v938_v51, %v942_v34 }
 0x2a0   : > { %4227 = vmatprep.subr.bf16.mxu0 %v14484_v43  ;;  %v14827_v43 = vcombine.low %v1074_v44, %v1078_v41  ;;  %v906_v41 = vld [vmem:[%s18196_s7 + $0x858] sm:$0xff] }
 0x2a1   : > { %4267 = vmatpush2.bf16.msra.mxu1 %v14619_v40 }
 0x2a2   : > { %4268 = vmatprep.subr.bf16.mxu1 %v14612_v5  ;;  %v14692_v5 = vcombine.high %v938_v51, %v942_v34 }
 0x2a3   : > { %4228 = vmatpush2.bf16.msra.mxu0 %v14483_v54 }
 0x2a4   : > { %4229 = vmatprep.subr.bf16.mxu0 %v14476_v57  ;;  %v1062_v57 = vld [vmem:[%s18196_s7 + $0xd38] sm:$0xff] }
 0x2a5   : > { %4269 = vmatpush2.bf16.msra.mxu1 %v14611_v56  ;;  %v1058_v56 = vld [vmem:[%s18196_s7 + $0xd18] sm:$0xff] }
 0x2a6   : > { %4270 = vmatprep.subr.bf16.mxu1 %v14604_v59  ;;  %v14812_v9 = vcombine.high %v1058_v56, %v1062_v57  ;;  %v14811_v18 = vcombine.low %v1058_v56, %v1062_v57  ;;  %v1014_v56 = vld [vmem:[%s18196_s7 + $0xbb8] sm:$0xff] }
 0x2a7   : > { %4230 = vmatpush2.bf16.msra.mxu0 %v14475_v1  ;;  %v14819_v1 = vcombine.low %v1066_v37, %v1070_v38  ;;  %v902_v37 = vld [vmem:[%s18196_s7 + $0x838] sm:$0xff] }
 0x2a8   : > { %4231 = vmatprep.subr.bf16.mxu0 %v14468_v3  ;;  %v1026_v38 = vld [vmem:[%s18196_s7 + $0xc18] sm:$0xff] }
 0x2a9   : > { %4271 = vmatpush2.bf16.msra.mxu1 %v14603_v2  ;;  %v14684_v2 = vcombine.high %v930_v8, %v934_v52  ;;  %v1138_v57 = vld [vmem:[%s18196_s7 + $0xf98] sm:$0xff] }
 0x2aa   : > { %4272 = vmatprep.subr.bf16.mxu1 %v14596_v6 }
 0x2ab   : > { %4232 = vmatpush2.bf16.msra.mxu0 %v14467_v13  ;;  %v1050_v13 = vld [vmem:[%s18196_s7 + $0xcd8] sm:$0xff] }
 0x2ac   : > { %4233 = vmatprep.subr.bf16.mxu0 %v14460_v15 }
 0x2ad   : > { %4273 = vmatpush2.bf16.msra.mxu1 %v14595_v14  ;;  %v1054_v14 = vld [vmem:[%s18196_s7 + $0xcf8] sm:$0xff] }
 0x2ae   : > { %4274 = vmatprep.subr.bf16.mxu1 %v14588_v17  ;;  %v14683_v17 = vcombine.low %v930_v8, %v934_v52  ;;  %v14804_v20 = vcombine.high %v1050_v13, %v1054_v14  ;;  %v14803_v29 = vcombine.low %v1050_v13, %v1054_v14  ;;  %v994_v13 = vld [vmem:[%s18196_s7 + $0xb18] sm:$0xff] }
 0x2af   : > { %4234 = vmatpush2.bf16.msra.mxu0 %v14459_v24  ;;  %v918_v24 = vld [vmem:[%s18196_s7 + $0x8b8] sm:$0xff] }
 0x2b0   : > { %4285 = vmatprep.subr.bf16.mxu0 %v14708_v27  ;;  %v1046_v27 = vld [vmem:[%s18196_s7 + $0xcb8] sm:$0xff]  ;;  %v14668_v30 = vcombine.high %v914_v21, %v918_v24 }
 0x2b1   : > { %4275 = vmatpush2.bf16.msra.mxu1 %v14587_v26  ;;  %v1042_v26 = vld [vmem:[%s18196_s7 + $0xc98] sm:$0xff] }
 0x2b2   : > { %4326 = vmatprep.subr.bf16.mxu1 %v14836_v28  ;;  %v3991_v35 = vpop.f32.mrf.mxu0  ;;  %4236 = vmatmul.mubr.bf16.vlgmr.msra.gmra.mxu0 %v18327_v33  ;;  %v14675_v28 = vcombine.low %v922_v10, %v926_v12  ;;  %v14796_v44 = vcombine.high %v1042_v26, %v1046_v27  ;;  %v998_v14 = vld [vmem:[%s18196_s7 + $0xb38] sm:$0xff] }
 0x2b3   : > { %v3992_v63 = vadd.f32 %v3991_v35, %v3951_v53  ;;  %4286 = vmatpush1.bf16.msra.mxu0 %v14707_v46  ;;  %4317 = vmatprep.mubr.bf16.mxu0 %v18339_v42  ;;  %v910_v46 = vld [vmem:[%s18196_s7 + $0x878] sm:$0xff]  ;;  %v14667_v53 = vcombine.low %v914_v21, %v918_v24 }
 0x2b4   : > { %v4032_v40 = vpop.f32.mrf.mxu1  ;;  %4277 = vmatmul.mubr.bf16.vlgmr.msra.gmra.mxu1 %v18335_v36  ;;  %v3993_v25 = vpop.f32.mrf.mxu0  ;;  %4287 = vmatprep.subr.bf16.mxu0 %v14700_v32  ;;  %v1038_v32 = vld [vmem:[%s18196_s7 + $0xc78] sm:$0xff]  ;;  %v14660_v51 = vcombine.high %v906_v41, %v910_v46 }
 0x2b5   : > { %4327 = vmatpush1.bf16.msra.mxu1 %v14835_v31  ;;  %v4033_v47 = vadd.f32 %v4032_v40, %v3992_v63  ;;  %v3994_v49 = vadd.f32 %v3993_v25, %v3953_v39  ;;  %4358 = vmatprep.mubr.bf16.mxu1 %v18344_v45  ;;  %v1034_v31 = vld [vmem:[%s18196_s7 + $0xc58] sm:$0xff]  ;;  %v14659_v63 = vcombine.low %v906_v41, %v910_v46 }
 0x2b6   : > { %v4034_v50 = vpop.f32.mrf.mxu1  ;;  %4328 = vmatprep.subr.bf16.mxu1 %v14828_v48  ;;  %v3995_v54 = vpop.f32.mrf.mxu0  ;;  %v14795_v48 = vcombine.low %v1042_v26, %v1046_v27  ;;  %v14788_v34 = vcombine.high %v1034_v31, %v1038_v32  ;;  %v898_v35 = vld [vmem:[%s18196_s7 + $0x818] sm:$0xff]  ;;  %v14787_v40 = vcombine.low %v1034_v31, %v1038_v32 }
 0x2b7   : > { %v4433_v59 = vrot.slane %v4033_v47, %v18634_v23  ;;  %v4035_v60 = vadd.f32 %v4034_v50, %v3994_v49  ;;  %4288 = vmatpush1.bf16.msra.mxu0 %v14699_v22  ;;  %v1030_v39 = vld [vmem:[%s18196_s7 + $0xc38] sm:$0xff]  ;;  %v14652_v22 = vcombine.high %v898_v35, %v902_v37  ;;  %v14651_v50 = vcombine.low %v898_v35, %v902_v37 }
 0x2b8   : > { %v4036_v61 = vpop.f32.mrf.mxu1  ;;  %v3996_v0 = vpop.f32.mrf.mxu0  ;;  %4289 = vmatprep.subr.bf16.mxu0 %v14692_v5  ;;  %v14780_v25 = vcombine.high %v1026_v38, %v1030_v39  ;;  %v1022_v5 = vld [vmem:[%s18196_s7 + $0xbf8] sm:$0xff] }
 0x2b9   : > { %4329 = vmatpush1.bf16.msra.mxu1 %v14827_v43  ;;  %v4434_v3 = vcombine.high %v4433_v59, %v4433_v59  ;;  %16085 = vst.sshfl [vmem:[%s18653_s5 + $0x2] sm:$0x1 pattern:$0x73625140] %v4433_v59  ;;  %v4462_v6 = vrot.slane %v4035_v60, %v18634_v23  ;;  %v1018_v43 = vld [vmem:[%s18196_s7 + $0xbd8] sm:$0xff] }
 0x2ba   : > { %v4037_v7 = vpop.f32.mrf.mxu1  ;;  %4330 = vmatprep.subr.bf16.mxu1 %v14820_v4  ;;  %v1146_v47 = vld [vmem:[%s18196_s7 + $0xfd8] sm:$0xff]  ;;  %v14779_v4 = vcombine.low %v1026_v38, %v1030_v39  ;;  %v14772_v8 = vcombine.high %v1018_v43, %v1022_v5  ;;  %v14771_v60 = vcombine.low %v1018_v43, %v1022_v5 }
 0x2bb   : > { %16086 = vst.sshfl [vmem:[%s18653_s5 + $0x42] sm:$0x1 pattern:$0x73625140] %v4434_v3  ;;  %v4463_v15 = vcombine.high %v4462_v6, %v4462_v6  ;;  %4290 = vmatpush1.bf16.msra.mxu0 %v14691_v62  ;;  %v1150_v49 = vld [vmem:[%s18196_s7 + $0xff8] sm:$0xff] }
 0x2bc   : > { %16087 = vst.sshfl [vmem:[%s18653_s5 + $0x3] sm:$0x1 pattern:$0x73625140] %v4462_v6  ;;  %4291 = vmatprep.subr.bf16.mxu0 %v14684_v2  ;;  %v14900_v52 = vcombine.high %v1146_v47, %v1150_v49  ;;  %v1010_v54 = vld [vmem:[%s18196_s7 + $0xb98] sm:$0xff]  ;;  %v14899_v61 = vcombine.low %v1146_v47, %v1150_v49 }
 0x2bd   : > { %4331 = vmatpush1.bf16.msra.mxu1 %v14819_v1  ;;  %16088 = vst.sshfl [vmem:[%s18653_s5 + $0x43] sm:$0x1 pattern:$0x73625140] %v4463_v15  ;;  %v1142_v59 = vld [vmem:[%s18196_s7 + $0xfb8] sm:$0xff]  ;;  %v14764_v62 = vcombine.high %v1010_v54, %v1014_v56  ;;  %v14763_v7 = vcombine.low %v1010_v54, %v1014_v56  ;;  %v4655_v56 = vld [vmem:[%s18202_s24 + $0x1c0] sm:$0xff] }
 0x2be   : > { %4332 = vmatprep.subr.bf16.mxu1 %v14812_v9  ;;  %v14892_v0 = vcombine.high %v1138_v57, %v1142_v59  ;;  %v1002_v1 = vld [vmem:[%s18196_s7 + $0xb58] sm:$0xff]  ;;  %v14891_v9 = vcombine.low %v1138_v57, %v1142_v59  ;;  %v4659_v57 = vld [vmem:[%s18202_s24 + $0x1e0] sm:$0xff] }
 0x2bf   : > { %4292 = vmatpush1.bf16.msra.mxu0 %v14683_v17  ;;  %v1006_v2 = vld [vmem:[%s18196_s7 + $0xb78] sm:$0xff]  ;;  %v4783_v59 = vld [vmem:[%s18202_s24 + $0x5c0] sm:$0xff] }
 0x2c0   : > { %4293 = vmatprep.subr.bf16.mxu0 %v14676_v19  ;;  %v1130_v3 = vld [vmem:[%s18196_s7 + $0xf58] sm:$0xff]  ;;  %v14756_v10 = vcombine.high %v1002_v1, %v1006_v2 }
 0x2c1   : > { %4333 = vmatpush1.bf16.msra.mxu1 %v14811_v18  ;;  %v1134_v6 = vld [vmem:[%s18196_s7 + $0xf78] sm:$0xff]  ;;  %v14755_v18 = vcombine.low %v1002_v1, %v1006_v2  ;;  %v4647_v2 = vld [vmem:[%s18202_s24 + $0x180] sm:$0xff] }
 0x2c2   : > { %4334 = vmatprep.subr.bf16.mxu1 %v14804_v20  ;;  %v14884_v12 = vcombine.high %v1130_v3, %v1134_v6  ;;  %v1122_v15 = vld [vmem:[%s18196_s7 + $0xf18] sm:$0xff]  ;;  %v14883_v19 = vcombine.low %v1130_v3, %v1134_v6  ;;  %v14748_v20 = vcombine.high %v994_v13, %v998_v14  ;;  %v4651_v3 = vld [vmem:[%s18202_s24 + $0x1a0] sm:$0xff] }
 0x2c3   : > { %4294 = vmatpush1.bf16.msra.mxu0 %v14675_v28  ;;  %v1126_v17 = vld [vmem:[%s18196_s7 + $0xf38] sm:$0xff]  ;;  %v4775_v6 = vld [vmem:[%s18202_s24 + $0x580] sm:$0xff] }
 0x2c4   : > { %4295 = vmatprep.subr.bf16.mxu0 %v14668_v30  ;;  %v14876_v21 = vcombine.high %v1122_v15, %v1126_v17  ;;  %v986_v24 = vld [vmem:[%s18196_s7 + $0xad8] sm:$0xff]  ;;  %v14875_v30 = vcombine.low %v1122_v15, %v1126_v17  ;;  %v4643_v15 = vld [vmem:[%s18202_s24 + $0x160] sm:$0xff] }
 0x2c5   : > { %4335 = vmatpush1.bf16.msra.mxu1 %v14803_v29  ;;  %v990_v26 = vld [vmem:[%s18196_s7 + $0xaf8] sm:$0xff]  ;;  %v14747_v29 = vcombine.low %v994_v13, %v998_v14  ;;  %v4639_v14 = vld [vmem:[%s18202_s24 + $0x140] sm:$0xff] }
 0x2c6   : > { %4336 = vmatprep.subr.bf16.mxu1 %v14796_v44  ;;  %v1114_v27 = vld [vmem:[%s18196_s7 + $0xed8] sm:$0xff]  ;;  %v14740_v44 = vcombine.high %v986_v24, %v990_v26 }
 0x2c7   : > { %4296 = vmatpush1.bf16.msra.mxu0 %v14667_v53  ;;  %v1118_v28 = vld [vmem:[%s18196_s7 + $0xef8] sm:$0xff] }
 0x2c8   : > { %4297 = vmatprep.subr.bf16.mxu0 %v14660_v51  ;;  %v14868_v41 = vcombine.high %v1114_v27, %v1118_v28  ;;  %v978_v46 = vld [vmem:[%s18196_s7 + $0xa98] sm:$0xff]  ;;  %v14867_v51 = vcombine.low %v1114_v27, %v1118_v28  ;;  %v14966_v27 = vcombine.high %v4639_v14, %v4643_v15 }
 0x2c9   : > { %4337 = vmatpush1.bf16.msra.mxu1 %v14795_v48  ;;  %v982_v31 = vld [vmem:[%s18196_s7 + $0xab8] sm:$0xff]  ;;  %v14739_v48 = vcombine.low %v986_v24, %v990_v26 }
 0x2ca   : > { %4338 = vmatprep.subr.bf16.mxu1 %v14788_v34  ;;  %v1106_v32 = vld [vmem:[%s18196_s7 + $0xe98] sm:$0xff]  ;;  %v14732_v34 = vcombine.high %v978_v46, %v982_v31 }
 0x2cb   : > { %4298 = vmatpush1.bf16.msra.mxu0 %v14659_v63  ;;  %v1110_v53 = vld [vmem:[%s18196_s7 + $0xeb8] sm:$0xff] }
 0x2cc   : > { %4299 = vmatprep.subr.bf16.mxu0 %v14652_v22  ;;  %v14860_v35 = vcombine.high %v1106_v32, %v1110_v53  ;;  %v970_v37 = vld [vmem:[%s18196_s7 + $0xa58] sm:$0xff]  ;;  %v14859_v22 = vcombine.low %v1106_v32, %v1110_v53  ;;  %v14965_v53 = vcombine.low %v4639_v14, %v4643_v15  ;;  %v4719_v15 = vld [vmem:[%s18202_s24 + $0x3c0] sm:$0xff] }
 0x2cd   : > { %4339 = vmatpush1.bf16.msra.mxu1 %v14787_v40  ;;  %v974_v38 = vld [vmem:[%s18196_s7 + $0xa78] sm:$0xff]  ;;  %v14731_v40 = vcombine.low %v978_v46, %v982_v31  ;;  %v4759_v46 = vld [vmem:[%s18202_s24 + $0x500] sm:$0xff] }
 0x2ce   : > { %4340 = vmatprep.subr.bf16.mxu1 %v14780_v25  ;;  %v1098_v39 = vld [vmem:[%s18196_s7 + $0xe58] sm:$0xff]  ;;  %v14724_v25 = vcombine.high %v970_v37, %v974_v38  ;;  %v4763_v31 = vld [vmem:[%s18202_s24 + $0x520] sm:$0xff] }
 0x2cf   : > { %4300 = vmatpush1.bf16.msra.mxu0 %v14651_v50  ;;  %v1102_v63 = vld [vmem:[%s18196_s7 + $0xe78] sm:$0xff] }
 0x2d0   : > { %4301 = vmatprep.subr.bf16.mxu0 %v14772_v8  ;;  %v14852_v43 = vcombine.high %v1098_v39, %v1102_v63  ;;  %v962_v5 = vld [vmem:[%s18196_s7 + $0xa18] sm:$0xff]  ;;  %v14851_v8 = vcombine.low %v1098_v39, %v1102_v63  ;;  %v4627_v39 = vld [vmem:[%s18202_s24 + $0xe0] sm:$0xff] }
 0x2d1   : > { %4341 = vmatpush1.bf16.msra.mxu1 %v14779_v4  ;;  %v966_v47 = vld [vmem:[%s18196_s7 + $0xa38] sm:$0xff]  ;;  %v14723_v4 = vcombine.low %v970_v37, %v974_v38  ;;  %v15086_v37 = vcombine.high %v4759_v46, %v4763_v31  ;;  %v4623_v38 = vld [vmem:[%s18202_s24 + $0xc0] sm:$0xff] }
 0x2d2   : > { %4342 = vmatprep.subr.bf16.mxu1 %v14900_v52  ;;  %v1090_v49 = vld [vmem:[%s18196_s7 + $0xe18] sm:$0xff]  ;;  %v14716_v52 = vcombine.high %v962_v5, %v966_v47  ;;  %v4751_v63 = vld [vmem:[%s18202_s24 + $0x4c0] sm:$0xff] }
 0x2d3   : > { %4302 = vmatpush2.bf16.msra.mxu0 %v14771_v60  ;;  %v1094_v50 = vld [vmem:[%s18196_s7 + $0xe38] sm:$0xff]  ;;  %v4787_v60 = vld [vmem:[%s18202_s24 + $0x5e0] sm:$0xff] }
 0x2d4   : > { %4303 = vmatprep.subr.bf16.mxu0 %v14764_v62  ;;  %v14844_v54 = vcombine.high %v1090_v49, %v1094_v50  ;;  %v14843_v62 = vcombine.low %v1090_v49, %v1094_v50  ;;  %v15110_v1 = vcombine.high %v4783_v59, %v4787_v60  ;;  %v4619_v49 = vld [vmem:[%s18202_s24 + $0xa0] sm:$0xff] }
 0x2d5   : > { %4343 = vmatpush2.bf16.msra.mxu1 %v14899_v61  ;;  %v14715_v61 = vcombine.low %v962_v5, %v966_v47  ;;  %v4615_v47 = vld [vmem:[%s18202_s24 + $0x80] sm:$0xff] }
 0x2d6   : > { %4344 = vmatprep.subr.bf16.mxu1 %v14892_v0  ;;  %v14982_v0 = vcombine.high %v4655_v56, %v4659_v57  ;;  %v4743_v50 = vld [vmem:[%s18202_s24 + $0x480] sm:$0xff] }
 0x2d7   : > { %4304 = vmatpush2.bf16.msra.mxu0 %v14763_v7  ;;  %v4779_v7 = vld [vmem:[%s18202_s24 + $0x5a0] sm:$0xff] }
 0x2d8   : > { %4305 = vmatprep.subr.bf16.mxu0 %v14756_v10  ;;  %v15109_v10 = vcombine.low %v4783_v59, %v4787_v60  ;;  %v15102_v13 = vcombine.high %v4775_v6, %v4779_v7  ;;  %v15101_v26 = vcombine.low %v4775_v6, %v4779_v7  ;;  %v4611_v59 = vld [vmem:[%s18202_s24 + $0x60] sm:$0xff] }
 0x2d9   : > { %4345 = vmatpush2.bf16.msra.mxu1 %v14891_v9  ;;  %v14981_v9 = vcombine.low %v4655_v56, %v4659_v57  ;;  %v4607_v57 = vld [vmem:[%s18202_s24 + $0x40] sm:$0xff] }
 0x2da   : > { %4346 = vmatprep.subr.bf16.mxu1 %v14884_v12  ;;  %v14974_v12 = vcombine.high %v4647_v2, %v4651_v3  ;;  %v4735_v60 = vld [vmem:[%s18202_s24 + $0x440] sm:$0xff] }
 0x2db   : > { %4306 = vmatpush2.bf16.msra.mxu0 %v14755_v18  ;;  %v4767_v18 = vld [vmem:[%s18202_s24 + $0x540] sm:$0xff] }
 0x2dc   : > { %4307 = vmatprep.subr.bf16.mxu0 %v14748_v20  ;;  %v4603_v6 = vld [vmem:[%s18202_s24 + $0x20] sm:$0xff] }
 0x2dd   : > { %4347 = vmatpush2.bf16.msra.mxu1 %v14883_v19  ;;  %v4771_v19 = vld [vmem:[%s18202_s24 + $0x560] sm:$0xff] }
 0x2de   : > { %4348 = vmatprep.subr.bf16.mxu1 %v14876_v21  ;;  %v14973_v21 = vcombine.low %v4647_v2, %v4651_v3  ;;  %v4599_v3 = vld [vmem:[%s18202_s24] sm:$0xff] }
 0x2df   : > { %4308 = vmatpush2.bf16.msra.mxu0 %v14747_v29  ;;  %v15094_v29 = vcombine.high %v4767_v18, %v4771_v19  ;;  %v4727_v7 = vld [vmem:[%s18202_s24 + $0x400] sm:$0xff] }
 0x2e0   : > { %4309 = vmatprep.subr.bf16.mxu0 %v14740_v44  ;;  %v4635_v44 = vld [vmem:[%s18202_s24 + $0x120] sm:$0xff] }
 0x2e1   : > { %4349 = vmatpush2.bf16.msra.mxu1 %v14875_v30  ;;  %v4631_v30 = vld [vmem:[%s18202_s24 + $0x100] sm:$0xff] }
 0x2e2   : > { %4350 = vmatprep.subr.bf16.mxu1 %v14868_v41 }
 0x2e3   : > { %4310 = vmatpush2.bf16.msra.mxu0 %v14739_v48 }
 0x2e4   : > { %4311 = vmatprep.subr.bf16.mxu0 %v14732_v34  ;;  %v14958_v34 = vcombine.high %v4631_v30, %v4635_v44 }
 0x2e5   : > { %4351 = vmatpush2.bf16.msra.mxu1 %v14867_v51  ;;  %v15093_v51 = vcombine.low %v4767_v18, %v4771_v19  ;;  %v4723_v18 = vld [vmem:[%s18202_s24 + $0x3e0] sm:$0xff] }
 0x2e6   : > { %4352 = vmatprep.subr.bf16.mxu1 %v14860_v35  ;;  %v4847_v19 = vld [vmem:[%s18202_s24 + $0x7c0] sm:$0xff] }
 0x2e7   : > { %4312 = vmatpush2.bf16.msra.mxu0 %v14731_v40  ;;  %v4755_v40 = vld [vmem:[%s18202_s24 + $0x4e0] sm:$0xff] }
 0x2e8   : > { %4313 = vmatprep.subr.bf16.mxu0 %v14724_v25  ;;  %v15085_v25 = vcombine.low %v4759_v46, %v4763_v31  ;;  %v15078_v5 = vcombine.high %v4751_v63, %v4755_v40  ;;  %v4839_v46 = vld [vmem:[%s18202_s24 + $0x780] sm:$0xff] }
 0x2e9   : > { %4353 = vmatpush2.bf16.msra.mxu1 %v14859_v22  ;;  %v14957_v22 = vcombine.low %v4631_v30, %v4635_v44  ;;  %v4711_v44 = vld [vmem:[%s18202_s24 + $0x380] sm:$0xff] }
 0x2ea   : > { %4354 = vmatprep.subr.bf16.mxu1 %v14852_v43  ;;  %v14950_v43 = vcombine.high %v4623_v38, %v4627_v39  ;;  %v4843_v31 = vld [vmem:[%s18202_s24 + $0x7a0] sm:$0xff] }
 0x2eb   : > { %4314 = vmatpush2.bf16.msra.mxu0 %v14723_v4  ;;  %v4747_v4 = vld [vmem:[%s18202_s24 + $0x4a0] sm:$0xff] }
 0x2ec   : > { %4315 = vmatprep.subr.bf16.mxu0 %v14716_v52  ;;  %v15077_v52 = vcombine.low %v4751_v63, %v4755_v40  ;;  %v15070_v56 = vcombine.high %v4743_v50, %v4747_v4  ;;  %v15165_v63 = vcombine.low %v4839_v46, %v4843_v31 }
 0x2ed   : > { %4355 = vmatpush2.bf16.msra.mxu1 %v14851_v8  ;;  %v14949_v8 = vcombine.low %v4623_v38, %v4627_v39  ;;  %v4835_v38 = vld [vmem:[%s18202_s24 + $0x760] sm:$0xff] }
 0x2ee   : > { %4356 = vmatprep.subr.bf16.mxu1 %v14844_v54  ;;  %v14942_v54 = vcombine.high %v4615_v47, %v4619_v49 }
 0x2ef   : > { %4316 = vmatpush2.bf16.msra.mxu0 %v14715_v61  ;;  %v4739_v61 = vld [vmem:[%s18202_s24 + $0x460] sm:$0xff] }
 0x2f0   : > { %7671 = vmatprep.subr.bf16.mxu0 %v14982_v0  ;;  %v15069_v0 = vcombine.low %v4743_v50, %v4747_v4  ;;  %v15062_v2 = vcombine.high %v4735_v60, %v4739_v61 }
 0x2f1   : > { %4357 = vmatpush2.bf16.msra.mxu1 %v14843_v62  ;;  %v14941_v62 = vcombine.low %v4615_v47, %v4619_v49  ;;  %v4827_v47 = vld [vmem:[%s18202_s24 + $0x720] sm:$0xff] }
 0x2f2   : > { %7712 = vmatprep.subr.bf16.mxu1 %v15110_v1  ;;  %v18872_v17 = vpop.f32.mrf.mxu0  ;;  %4318 = vmatmul.mubr.bf16.vlgmr.msra.gmra.mxu0 %v18409_v55  ;;  %v14934_v1 = vcombine.high %v4607_v57, %v4611_v59 }
 0x2f3   : > { %7672 = vmatpush1.bf16.msra.mxu0 %v14981_v9  ;;  %7703 = vmatprep.mubr.bf16.mxu0 %v18273_v11  ;;  %v4731_v9 = vld [vmem:[%s18202_s24 + $0x420] sm:$0xff] }
 0x2f4   : > { %v18877_v20 = vpop.f32.mrf.mxu1  ;;  %4359 = vmatmul.mubr.bf16.vlgmr.msra.gmra.mxu1 %v18415_v58  ;;  %v18880_v24 = vpop.f32.mrf.mxu0  ;;  %7673 = vmatprep.subr.bf16.mxu0 %v14974_v12  ;;  %v15061_v12 = vcombine.low %v4735_v60, %v4739_v61  ;;  %v15054_v14 = vcombine.high %v4727_v7, %v4731_v9 }
 0x2f5   : > { %7713 = vmatpush1.bf16.msra.mxu1 %v15109_v10  ;;  %7744 = vmatprep.mubr.bf16.mxu1 %v18280_v16  ;;  %v14933_v10 = vcombine.low %v4607_v57, %v4611_v59  ;;  %v4819_v57 = vld [vmem:[%s18202_s24 + $0x6e0] sm:$0xff] }
 0x2f6   : > { %v18882_v28 = vpop.f32.mrf.mxu1  ;;  %7714 = vmatprep.subr.bf16.mxu1 %v15102_v13  ;;  %v4077_v41 = vpop.f32.mrf.mxu0  ;;  %v14926_v13 = vcombine.high %v4599_v3, %v4603_v6 }
 0x2f7   : > { %7674 = vmatpush1.bf16.msra.mxu0 %v14973_v21  ;;  %v4851_v21 = vld [vmem:[%s18202_s24 + $0x7e0] sm:$0xff] }
 0x2f8   : > { %v4118_v32 = vpop.f32.mrf.mxu1  ;;  %v4078_v48 = vpop.f32.mrf.mxu0  ;;  %7675 = vmatprep.subr.bf16.mxu0 %v14966_v27  ;;  %v15053_v27 = vcombine.low %v4727_v7, %v4731_v9  ;;  %v15174_v30 = vcombine.high %v4847_v19, %v4851_v21  ;;  %v4715_v41 = vld [vmem:[%s18202_s24 + $0x3a0] sm:$0xff] }
 0x2f9   : > { %7715 = vmatpush1.bf16.msra.mxu1 %v15101_v26  ;;  %v14925_v26 = vcombine.low %v4599_v3, %v4603_v6  ;;  %v15045_v32 = vcombine.low %v4719_v15, %v4723_v18  ;;  %v15038_v48 = vcombine.high %v4711_v44, %v4715_v41  ;;  %v15037_v39 = vcombine.low %v4711_v44, %v4715_v41  ;;  %v4811_v3 = vld [vmem:[%s18202_s24 + $0x6a0] sm:$0xff] }
 0x2fa   : > { %v4119_v35 = vpop.f32.mrf.mxu1  ;;  %7716 = vmatprep.subr.bf16.mxu1 %v15094_v29  ;;  %v15046_v29 = vcombine.high %v4719_v15, %v4723_v18  ;;  %v4803_v15 = vld [vmem:[%s18202_s24 + $0x660] sm:$0xff] }
 0x2fb   : > { %7676 = vmatpush1.bf16.msra.mxu0 %v14965_v53  ;;  %v15173_v53 = vcombine.low %v4847_v19, %v4851_v21  ;;  %v4707_v35 = vld [vmem:[%s18202_s24 + $0x360] sm:$0xff] }
 0x2fc   : > { %7677 = vmatprep.subr.bf16.mxu0 %v14958_v34  ;;  %v4703_v34 = vld [vmem:[%s18202_s24 + $0x340] sm:$0xff] }
 0x2fd   : > { %7717 = vmatpush1.bf16.msra.mxu1 %v15093_v51  ;;  %v15166_v51 = vcombine.high %v4839_v46, %v4843_v31  ;;  %v15030_v40 = vcombine.high %v4703_v34, %v4707_v35  ;;  %v15029_v49 = vcombine.low %v4703_v34, %v4707_v35  ;;  %v4795_v44 = vld [vmem:[%s18202_s24 + $0x620] sm:$0xff] }
 0x2fe   : > { %7718 = vmatprep.subr.bf16.mxu1 %v15086_v37  ;;  %v4831_v37 = vld [vmem:[%s18202_s24 + $0x740] sm:$0xff] }
 0x2ff   : > { %7678 = vmatpush1.bf16.msra.mxu0 %v14957_v22  ;;  %v15158_v22 = vcombine.high %v4831_v37, %v4835_v38  ;;  %v15157_v50 = vcombine.low %v4831_v37, %v4835_v38  ;;  %v5043_v34 = vld [vmem:[%s18202_s24 + $0xde0] sm:$0xff] }
 0x300   : > { %7679 = vmatprep.subr.bf16.mxu0 %v14950_v43  ;;  %v4699_v43 = vld [vmem:[%s18202_s24 + $0x320] sm:$0xff] }
 0x301   : > { %7719 = vmatpush1.bf16.msra.mxu1 %v15085_v25  ;;  %v4695_v25 = vld [vmem:[%s18202_s24 + $0x300] sm:$0xff] }
 0x302   : > { %7720 = vmatprep.subr.bf16.mxu1 %v15078_v5  ;;  %v4823_v5 = vld [vmem:[%s18202_s24 + $0x700] sm:$0xff]  ;;  %v15022_v4 = vcombine.high %v4695_v25, %v4699_v43  ;;  %v15021_v59 = vcombine.low %v4695_v25, %v4699_v43 }
 0x303   : > { %7680 = vmatpush1.bf16.msra.mxu0 %v14949_v8  ;;  %v15150_v8 = vcombine.high %v4823_v5, %v4827_v47  ;;  %v15149_v60 = vcombine.low %v4823_v5, %v4827_v47  ;;  %v5035_v25 = vld [vmem:[%s18202_s24 + $0xda0] sm:$0xff] }
 0x304   : > { %7681 = vmatprep.subr.bf16.mxu0 %v14942_v54  ;;  %v4691_v54 = vld [vmem:[%s18202_s24 + $0x2e0] sm:$0xff] }
 0x305   : > { %7721 = vmatpush1.bf16.msra.mxu1 %v15077_v52  ;;  %v4687_v52 = vld [vmem:[%s18202_s24 + $0x2c0] sm:$0xff] }
 0x306   : > { %7722 = vmatprep.subr.bf16.mxu1 %v15070_v56  ;;  %v4815_v56 = vld [vmem:[%s18202_s24 + $0x6c0] sm:$0xff]  ;;  %v15014_v61 = vcombine.high %v4687_v52, %v4691_v54  ;;  %v15013_v6 = vcombine.low %v4687_v52, %v4691_v54 }
 0x307   : > { %7682 = vmatpush1.bf16.msra.mxu0 %v14941_v62  ;;  %v15142_v62 = vcombine.high %v4815_v56, %v4819_v57  ;;  %v15141_v7 = vcombine.low %v4815_v56, %v4819_v57  ;;  %v5023_v54 = vld [vmem:[%s18202_s24 + $0xd40] sm:$0xff]  ;;  %v4117_v57 = vadd.f32 %v18882_v28, %v18880_v24 }
 0x308   : > { %7683 = vmatprep.subr.bf16.mxu0 %v14934_v1  ;;  %v4683_v1 = vld [vmem:[%s18202_s24 + $0x2a0] sm:$0xff] }
 0x309   : > { %7723 = vmatpush1.bf16.msra.mxu1 %v15069_v0  ;;  %v4679_v0 = vld [vmem:[%s18202_s24 + $0x280] sm:$0xff] }
 0x30a   : > { %7724 = vmatprep.subr.bf16.mxu1 %v15062_v2  ;;  %v4807_v2 = vld [vmem:[%s18202_s24 + $0x680] sm:$0xff]  ;;  %v15006_v9 = vcombine.high %v4679_v0, %v4683_v1  ;;  %v15005_v18 = vcombine.low %v4679_v0, %v4683_v1 }
 0x30b   : > { %7684 = vmatpush1.bf16.msra.mxu0 %v14933_v10  ;;  %v15134_v10 = vcombine.high %v4807_v2, %v4811_v3  ;;  %v15133_v19 = vcombine.low %v4807_v2, %v4811_v3  ;;  %v5027_v56 = vld [vmem:[%s18202_s24 + $0xd60] sm:$0xff] }
 0x30c   : > { %7685 = vmatprep.subr.bf16.mxu0 %v14926_v13  ;;  %v4675_v13 = vld [vmem:[%s18202_s24 + $0x260] sm:$0xff]  ;;  %v15350_v24 = vcombine.high %v5023_v54, %v5027_v56 }
 0x30d   : > { %7725 = vmatpush1.bf16.msra.mxu1 %v15061_v12  ;;  %v4671_v12 = vld [vmem:[%s18202_s24 + $0x240] sm:$0xff] }
 0x30e   : > { %7726 = vmatprep.subr.bf16.mxu1 %v15054_v14  ;;  %v4799_v14 = vld [vmem:[%s18202_s24 + $0x640] sm:$0xff]  ;;  %v14998_v21 = vcombine.high %v4671_v12, %v4675_v13  ;;  %v14997_v41 = vcombine.low %v4671_v12, %v4675_v13 }
 0x30f   : > { %7686 = vmatpush1.bf16.msra.mxu0 %v14925_v26  ;;  %v15126_v26 = vcombine.high %v4799_v14, %v4803_v15  ;;  %v15125_v46 = vcombine.low %v4799_v14, %v4803_v15  ;;  %v4887_v28 = vld [vmem:[%s18202_s24 + $0x900] sm:$0xff] }
 0x310   : > { %7687 = vmatprep.subr.bf16.mxu0 %v15046_v29  ;;  %v4667_v29 = vld [vmem:[%s18202_s24 + $0x220] sm:$0xff] }
 0x311   : > { %7727 = vmatpush1.bf16.msra.mxu1 %v15053_v27  ;;  %v4663_v27 = vld [vmem:[%s18202_s24 + $0x200] sm:$0xff] }
 0x312   : > { %7728 = vmatprep.subr.bf16.mxu1 %v15174_v30  ;;  %v4791_v30 = vld [vmem:[%s18202_s24 + $0x600] sm:$0xff]  ;;  %v14990_v31 = vcombine.high %v4663_v27, %v4667_v29  ;;  %v14989_v35 = vcombine.low %v4663_v27, %v4667_v29 }
 0x313   : > { %7688 = vmatpush2.bf16.msra.mxu0 %v15045_v32  ;;  %v15118_v32 = vcombine.high %v4791_v30, %v4795_v44  ;;  %v15117_v37 = vcombine.low %v4791_v30, %v4795_v44  ;;  %v4891_v3 = vld [vmem:[%s18202_s24 + $0x920] sm:$0xff] }
 0x314   : > { %7689 = vmatprep.subr.bf16.mxu0 %v15038_v48  ;;  %v4915_v48 = vld [vmem:[%s18202_s24 + $0x9e0] sm:$0xff] }
 0x315   : > { %7729 = vmatpush2.bf16.msra.mxu1 %v15173_v53  ;;  %v4911_v53 = vld [vmem:[%s18202_s24 + $0x9c0] sm:$0xff] }
 0x316   : > { %7730 = vmatprep.subr.bf16.mxu1 %v15166_v51  ;;  %v5039_v51 = vld [vmem:[%s18202_s24 + $0xdc0] sm:$0xff]  ;;  %v15238_v38 = vcombine.high %v4911_v53, %v4915_v48  ;;  %v15237_v43 = vcombine.low %v4911_v53, %v4915_v48 }
 0x317   : > { %7690 = vmatpush2.bf16.msra.mxu0 %v15037_v39  ;;  %v15366_v39 = vcombine.high %v5039_v51, %v5043_v34  ;;  %v15365_v5 = vcombine.low %v5039_v51, %v5043_v34  ;;  %v4879_v30 = vld [vmem:[%s18202_s24 + $0x8c0] sm:$0xff] }
 0x318   : > { %7691 = vmatprep.subr.bf16.mxu0 %v15030_v40  ;;  %v4907_v40 = vld [vmem:[%s18202_s24 + $0x9a0] sm:$0xff] }
 0x319   : > { %7731 = vmatpush2.bf16.msra.mxu1 %v15165_v63  ;;  %v4903_v63 = vld [vmem:[%s18202_s24 + $0x980] sm:$0xff] }
 0x31a   : > { %7732 = vmatprep.subr.bf16.mxu1 %v15158_v22  ;;  %v5031_v22 = vld [vmem:[%s18202_s24 + $0xd80] sm:$0xff]  ;;  %v15230_v47 = vcombine.high %v4903_v63, %v4907_v40 }
 0x31b   : > { %7692 = vmatpush2.bf16.msra.mxu0 %v15029_v49  ;;  %v4115_v49 = vadd.f32 %v18877_v20, %v18872_v17  ;;  %v15229_v17 = vcombine.low %v4903_v63, %v4907_v40  ;;  %v4883_v44 = vld [vmem:[%s18202_s24 + $0x8e0] sm:$0xff] }
 0x31c   : > { %7693 = vmatprep.subr.bf16.mxu0 %v15022_v4  ;;  %v4895_v4 = vld [vmem:[%s18202_s24 + $0x940] sm:$0xff]  ;;  %v15206_v48 = vcombine.high %v4879_v30, %v4883_v44 }
 0x31d   : > { %7733 = vmatpush2.bf16.msra.mxu1 %v15157_v50  ;;  %v15358_v50 = vcombine.high %v5031_v22, %v5035_v25  ;;  %v4871_v34 = vld [vmem:[%s18202_s24 + $0x880] sm:$0xff] }
 0x31e   : > { %7734 = vmatprep.subr.bf16.mxu1 %v15150_v8  ;;  %v4899_v8 = vld [vmem:[%s18202_s24 + $0x960] sm:$0xff] }
 0x31f   : > { %7694 = vmatpush2.bf16.msra.mxu0 %v15021_v59  ;;  %v15221_v14 = vcombine.low %v4895_v4, %v4899_v8 }
 0x320   : > { %7695 = vmatprep.subr.bf16.mxu0 %v15014_v61  ;;  %v15357_v61 = vcombine.low %v5031_v22, %v5035_v25  ;;  %v4863_v25 = vld [vmem:[%s18202_s24 + $0x840] sm:$0xff] }
 0x321   : > { %7735 = vmatpush2.bf16.msra.mxu1 %v15149_v60 }
 0x322   : > { %7736 = vmatprep.subr.bf16.mxu1 %v15142_v62  ;;  %v15222_v62 = vcombine.high %v4895_v4, %v4899_v8 }
 0x323   : > { %7696 = vmatpush2.bf16.msra.mxu0 %v15013_v6 }
 0x324   : > { %7697 = vmatprep.subr.bf16.mxu0 %v15006_v9  ;;  %v5019_v9 = vld [vmem:[%s18202_s24 + $0xd20] sm:$0xff] }
 0x325   : > { %7737 = vmatpush2.bf16.msra.mxu1 %v15141_v7  ;;  %v5015_v7 = vld [vmem:[%s18202_s24 + $0xd00] sm:$0xff] }
 0x326   : > { %7738 = vmatprep.subr.bf16.mxu1 %v15134_v10  ;;  %v15342_v29 = vcombine.high %v5015_v7, %v5019_v9  ;;  %v15341_v53 = vcombine.low %v5015_v7, %v5019_v9  ;;  %v4971_v7 = vld [vmem:[%s18202_s24 + $0xba0] sm:$0xff] }
 0x327   : > { %7698 = vmatpush2.bf16.msra.mxu0 %v15005_v18  ;;  %v15349_v18 = vcombine.low %v5023_v54, %v5027_v56  ;;  %v4859_v54 = vld [vmem:[%s18202_s24 + $0x820] sm:$0xff] }
 0x328   : > { %7699 = vmatprep.subr.bf16.mxu0 %v14998_v21  ;;  %v4983_v56 = vld [vmem:[%s18202_s24 + $0xc00] sm:$0xff] }
 0x329   : > { %7739 = vmatpush2.bf16.msra.mxu1 %v15133_v19  ;;  %v15214_v19 = vcombine.high %v4887_v28, %v4891_v3  ;;  %v5095_v9 = vld [vmem:[%s18202_s24 + $0xf80] sm:$0xff] }
 0x32a   : > { %7740 = vmatprep.subr.bf16.mxu1 %v15126_v26 }
 0x32b   : > { %7700 = vmatpush2.bf16.msra.mxu0 %v14997_v41  ;;  %v5007_v41 = vld [vmem:[%s18202_s24 + $0xcc0] sm:$0xff] }
 0x32c   : > { %7701 = vmatprep.subr.bf16.mxu0 %v14990_v31 }
 0x32d   : > { %7741 = vmatpush2.bf16.msra.mxu1 %v15125_v46  ;;  %v5011_v46 = vld [vmem:[%s18202_s24 + $0xce0] sm:$0xff] }
 0x32e   : > { %7742 = vmatprep.subr.bf16.mxu1 %v15118_v32  ;;  %v15213_v32 = vcombine.low %v4887_v28, %v4891_v3  ;;  %v15334_v51 = vcombine.high %v5007_v41, %v5011_v46  ;;  %v15333_v63 = vcombine.low %v5007_v41, %v5011_v46  ;;  %v4951_v41 = vld [vmem:[%s18202_s24 + $0xb00] sm:$0xff] }
 0x32f   : > { %7702 = vmatpush2.bf16.msra.mxu0 %v14989_v35  ;;  %v4875_v35 = vld [vmem:[%s18202_s24 + $0x8a0] sm:$0xff] }
 0x330   : > { %7753 = vmatprep.subr.bf16.mxu0 %v15238_v38  ;;  %v5003_v38 = vld [vmem:[%s18202_s24 + $0xca0] sm:$0xff]  ;;  %v15198_v40 = vcombine.high %v4871_v34, %v4875_v35 }
 0x331   : > { %7743 = vmatpush2.bf16.msra.mxu1 %v15117_v37  ;;  %v4999_v37 = vld [vmem:[%s18202_s24 + $0xc80] sm:$0xff] }
 0x332   : > { %7794 = vmatprep.subr.bf16.mxu1 %v15366_v39  ;;  %v4155_v52 = vpop.f32.mrf.mxu0  ;;  %7704 = vmatmul.mubr.bf16.vlgmr.msra.gmra.mxu0 %v18327_v33  ;;  %v15205_v39 = vcombine.low %v4879_v30, %v4883_v44  ;;  %v15326_v22 = vcombine.high %v4999_v37, %v5003_v38  ;;  %v4955_v46 = vld [vmem:[%s18202_s24 + $0xb20] sm:$0xff] }
 0x333   : > { %v4156_v59 = vadd.f32 %v4155_v52, %v4115_v49  ;;  %7754 = vmatpush1.bf16.msra.mxu0 %v15237_v43  ;;  %7785 = vmatprep.mubr.bf16.mxu0 %v18339_v42  ;;  %v4867_v43 = vld [vmem:[%s18202_s24 + $0x860] sm:$0xff]  ;;  %v15197_v49 = vcombine.low %v4871_v34, %v4875_v35 }
 0x334   : > { %v4196_v60 = vpop.f32.mrf.mxu1  ;;  %7745 = vmatmul.mubr.bf16.vlgmr.msra.gmra.mxu1 %v18335_v36  ;;  %v4157_v20 = vpop.f32.mrf.mxu0  ;;  %7755 = vmatprep.subr.bf16.mxu0 %v15230_v47  ;;  %v4995_v47 = vld [vmem:[%s18202_s24 + $0xc60] sm:$0xff]  ;;  %v15190_v4 = vcombine.high %v4863_v25, %v4867_v43 }
 0x335   : > { %7795 = vmatpush1.bf16.msra.mxu1 %v15365_v5  ;;  %v4197_v0 = vadd.f32 %v4196_v60, %v4156_v59  ;;  %v4158_v1 = vadd.f32 %v4157_v20, %v4117_v57  ;;  %7826 = vmatprep.mubr.bf16.mxu1 %v18344_v45  ;;  %v4991_v5 = vld [vmem:[%s18202_s24 + $0xc40] sm:$0xff]  ;;  %v15189_v59 = vcombine.low %v4863_v25, %v4867_v43 }
 0x336   : > { %v4198_v2 = vpop.f32.mrf.mxu1  ;;  %7796 = vmatprep.subr.bf16.mxu1 %v15358_v50  ;;  %v4159_v6 = vpop.f32.mrf.mxu0  ;;  %v15325_v50 = vcombine.low %v4999_v37, %v5003_v38  ;;  %v15318_v8 = vcombine.high %v4991_v5, %v4995_v47  ;;  %v4855_v52 = vld [vmem:[%s18202_s24 + $0x800] sm:$0xff]  ;;  %v15317_v60 = vcombine.low %v4991_v5, %v4995_v47 }
 0x337   : > { %v4491_v10 = vrot.slane %v4197_v0, %v18634_v23  ;;  %v4199_v12 = vadd.f32 %v4198_v2, %v4158_v1  ;;  %7756 = vmatpush1.bf16.msra.mxu0 %v15229_v17  ;;  %v4987_v57 = vld [vmem:[%s18202_s24 + $0xc20] sm:$0xff]  ;;  %v15182_v17 = vcombine.high %v4855_v52, %v4859_v54  ;;  %v15181_v2 = vcombine.low %v4855_v52, %v4859_v54 }
 0x338   : > { %v4200_v13 = vpop.f32.mrf.mxu1  ;;  %v4160_v15 = vpop.f32.mrf.mxu0  ;;  %7757 = vmatprep.subr.bf16.mxu0 %v15222_v62  ;;  %v15310_v20 = vcombine.high %v4983_v56, %v4987_v57  ;;  %v4979_v62 = vld [vmem:[%s18202_s24 + $0xbe0] sm:$0xff] }
 0x339   : > { %7797 = vmatpush1.bf16.msra.mxu1 %v15357_v61  ;;  %v4492_v21 = vcombine.high %v4491_v10, %v4491_v10  ;;  %16089 = vst.sshfl [vmem:[%s18653_s5 + $0x4] sm:$0x1 pattern:$0x73625140] %v4491_v10  ;;  %v4520_v26 = vrot.slane %v4199_v12, %v18634_v23  ;;  %v4975_v61 = vld [vmem:[%s18202_s24 + $0xbc0] sm:$0xff] }
 0x33a   : > { %v4201_v27 = vpop.f32.mrf.mxu1  ;;  %7798 = vmatprep.subr.bf16.mxu1 %v15350_v24  ;;  %v5103_v0 = vld [vmem:[%s18202_s24 + $0xfc0] sm:$0xff]  ;;  %v15309_v24 = vcombine.low %v4983_v56, %v4987_v57  ;;  %v15302_v28 = vcombine.high %v4975_v61, %v4979_v62  ;;  %v15301_v12 = vcombine.low %v4975_v61, %v4979_v62 }
 0x33b   : > { %16090 = vst.sshfl [vmem:[%s18653_s5 + $0x44] sm:$0x1 pattern:$0x73625140] %v4492_v21  ;;  %v4521_v31 = vcombine.high %v4520_v26, %v4520_v26  ;;  %7758 = vmatpush1.bf16.msra.mxu0 %v15221_v14  ;;  %v5107_v1 = vld [vmem:[%s18202_s24 + $0xfe0] sm:$0xff] }
 0x33c   : > { %16091 = vst.sshfl [vmem:[%s18653_s5 + $0x5] sm:$0x1 pattern:$0x73625140] %v4520_v26  ;;  %7759 = vmatprep.subr.bf16.mxu0 %v15214_v19  ;;  %v15430_v3 = vcombine.high %v5103_v0, %v5107_v1  ;;  %v4967_v6 = vld [vmem:[%s18202_s24 + $0xb80] sm:$0xff]  ;;  %v15429_v13 = vcombine.low %v5103_v0, %v5107_v1 }
 0x33d   : > { %7799 = vmatpush1.bf16.msra.mxu1 %v15349_v18  ;;  %16092 = vst.sshfl [vmem:[%s18653_s5 + $0x45] sm:$0x1 pattern:$0x73625140] %v4521_v31  ;;  %v5099_v10 = vld [vmem:[%s18202_s24 + $0xfa0] sm:$0xff]  ;;  %v15294_v14 = vcombine.high %v4967_v6, %v4971_v7  ;;  %v15293_v27 = vcombine.low %v4967_v6, %v4971_v7  ;;  %v4656_v7 = vld [vmem:[%s18202_s24 + $0x1c8] sm:$0xff] }
 0x33e   : > { %7800 = vmatprep.subr.bf16.mxu1 %v15342_v29  ;;  %v15422_v15 = vcombine.high %v5095_v9, %v5099_v10  ;;  %v4959_v18 = vld [vmem:[%s18202_s24 + $0xb40] sm:$0xff]  ;;  %v15421_v29 = vcombine.low %v5095_v9, %v5099_v10  ;;  %v4660_v9 = vld [vmem:[%s18202_s24 + $0x1e8] sm:$0xff] }
 0x33f   : > { %7760 = vmatpush1.bf16.msra.mxu0 %v15213_v32  ;;  %v4963_v19 = vld [vmem:[%s18202_s24 + $0xb60] sm:$0xff]  ;;  %v4784_v10 = vld [vmem:[%s18202_s24 + $0x5c8] sm:$0xff] }
 0x340   : > { %7761 = vmatprep.subr.bf16.mxu0 %v15206_v48  ;;  %v5087_v21 = vld [vmem:[%s18202_s24 + $0xf40] sm:$0xff]  ;;  %v15286_v30 = vcombine.high %v4959_v18, %v4963_v19 }
 0x341   : > { %7801 = vmatpush1.bf16.msra.mxu1 %v15341_v53  ;;  %v5091_v26 = vld [vmem:[%s18202_s24 + $0xf60] sm:$0xff]  ;;  %v15285_v53 = vcombine.low %v4959_v18, %v4963_v19  ;;  %v4648_v19 = vld [vmem:[%s18202_s24 + $0x188] sm:$0xff] }
 0x342   : > { %7802 = vmatprep.subr.bf16.mxu1 %v15334_v51  ;;  %v15414_v44 = vcombine.high %v5087_v21, %v5091_v26  ;;  %v5079_v31 = vld [vmem:[%s18202_s24 + $0xf00] sm:$0xff]  ;;  %v15413_v48 = vcombine.low %v5087_v21, %v5091_v26  ;;  %v15278_v51 = vcombine.high %v4951_v41, %v4955_v46  ;;  %v4652_v21 = vld [vmem:[%s18202_s24 + $0x1a8] sm:$0xff] }
 0x343   : > { %7762 = vmatpush1.bf16.msra.mxu0 %v15205_v39  ;;  %v5083_v32 = vld [vmem:[%s18202_s24 + $0xf20] sm:$0xff]  ;;  %v4776_v26 = vld [vmem:[%s18202_s24 + $0x588] sm:$0xff] }
 0x344   : > { %7763 = vmatprep.subr.bf16.mxu0 %v15198_v40  ;;  %v15406_v34 = vcombine.high %v5079_v31, %v5083_v32  ;;  %v4943_v35 = vld [vmem:[%s18202_s24 + $0xac0] sm:$0xff]  ;;  %v15405_v40 = vcombine.low %v5079_v31, %v5083_v32  ;;  %v4644_v31 = vld [vmem:[%s18202_s24 + $0x168] sm:$0xff] }
 0x345   : > { %7803 = vmatpush1.bf16.msra.mxu1 %v15333_v63  ;;  %v4947_v37 = vld [vmem:[%s18202_s24 + $0xae0] sm:$0xff]  ;;  %v15277_v63 = vcombine.low %v4951_v41, %v4955_v46  ;;  %v4640_v46 = vld [vmem:[%s18202_s24 + $0x148] sm:$0xff] }
 0x346   : > { %7804 = vmatprep.subr.bf16.mxu1 %v15326_v22  ;;  %v5071_v38 = vld [vmem:[%s18202_s24 + $0xec0] sm:$0xff]  ;;  %v15270_v22 = vcombine.high %v4943_v35, %v4947_v37 }
 0x347   : > { %7764 = vmatpush1.bf16.msra.mxu0 %v15197_v49  ;;  %v5075_v39 = vld [vmem:[%s18202_s24 + $0xee0] sm:$0xff] }
 0x348   : > { %7765 = vmatprep.subr.bf16.mxu0 %v15190_v4  ;;  %v15398_v25 = vcombine.high %v5071_v38, %v5075_v39  ;;  %v4935_v43 = vld [vmem:[%s18202_s24 + $0xa80] sm:$0xff]  ;;  %v15397_v4 = vcombine.low %v5071_v38, %v5075_v39  ;;  %v14968_v38 = vcombine.high %v4640_v46, %v4644_v31 }
 0x349   : > { %7805 = vmatpush1.bf16.msra.mxu1 %v15325_v50  ;;  %v4939_v5 = vld [vmem:[%s18202_s24 + $0xaa0] sm:$0xff]  ;;  %v15269_v50 = vcombine.low %v4943_v35, %v4947_v37 }
 0x34a   : > { %7806 = vmatprep.subr.bf16.mxu1 %v15318_v8  ;;  %v5063_v47 = vld [vmem:[%s18202_s24 + $0xe80] sm:$0xff]  ;;  %v15262_v8 = vcombine.high %v4935_v43, %v4939_v5 }
 0x34b   : > { %7766 = vmatpush1.bf16.msra.mxu0 %v15189_v59  ;;  %v5067_v49 = vld [vmem:[%s18202_s24 + $0xea0] sm:$0xff] }
 0x34c   : > { %7767 = vmatprep.subr.bf16.mxu0 %v15182_v17  ;;  %v15390_v52 = vcombine.high %v5063_v47, %v5067_v49  ;;  %v4927_v54 = vld [vmem:[%s18202_s24 + $0xa40] sm:$0xff]  ;;  %v15389_v17 = vcombine.low %v5063_v47, %v5067_v49  ;;  %v14967_v49 = vcombine.low %v4640_v46, %v4644_v31  ;;  %v4720_v31 = vld [vmem:[%s18202_s24 + $0x3c8] sm:$0xff] }
 0x34d   : > { %7807 = vmatpush1.bf16.msra.mxu1 %v15317_v60  ;;  %v4931_v56 = vld [vmem:[%s18202_s24 + $0xa60] sm:$0xff]  ;;  %v15261_v60 = vcombine.low %v4935_v43, %v4939_v5  ;;  %v4760_v43 = vld [vmem:[%s18202_s24 + $0x508] sm:$0xff] }
 0x34e   : > { %7808 = vmatprep.subr.bf16.mxu1 %v15310_v20  ;;  %v5055_v57 = vld [vmem:[%s18202_s24 + $0xe40] sm:$0xff]  ;;  %v15254_v20 = vcombine.high %v4927_v54, %v4931_v56  ;;  %v4764_v5 = vld [vmem:[%s18202_s24 + $0x528] sm:$0xff] }
 0x34f   : > { %7768 = vmatpush1.bf16.msra.mxu0 %v15181_v2  ;;  %v5059_v59 = vld [vmem:[%s18202_s24 + $0xe60] sm:$0xff] }
 0x350   : > { %7769 = vmatprep.subr.bf16.mxu0 %v15302_v28  ;;  %v15382_v61 = vcombine.high %v5055_v57, %v5059_v59  ;;  %v4919_v62 = vld [vmem:[%s18202_s24 + $0xa00] sm:$0xff]  ;;  %v15381_v28 = vcombine.low %v5055_v57, %v5059_v59  ;;  %v4628_v57 = vld [vmem:[%s18202_s24 + $0xe8] sm:$0xff] }
 0x351   : > { %7809 = vmatpush1.bf16.msra.mxu1 %v15309_v24  ;;  %v4923_v0 = vld [vmem:[%s18202_s24 + $0xa20] sm:$0xff]  ;;  %v15253_v24 = vcombine.low %v4927_v54, %v4931_v56  ;;  %v15088_v54 = vcombine.high %v4760_v43, %v4764_v5  ;;  %v4624_v56 = vld [vmem:[%s18202_s24 + $0xc8] sm:$0xff] }
 0x352   : > { %7810 = vmatprep.subr.bf16.mxu1 %v15430_v3  ;;  %v5047_v1 = vld [vmem:[%s18202_s24 + $0xe00] sm:$0xff]  ;;  %v15246_v3 = vcombine.high %v4919_v62, %v4923_v0  ;;  %v4752_v59 = vld [vmem:[%s18202_s24 + $0x4c8] sm:$0xff] }
 0x353   : > { %7770 = vmatpush2.bf16.msra.mxu0 %v15301_v12  ;;  %v5051_v2 = vld [vmem:[%s18202_s24 + $0xe20] sm:$0xff]  ;;  %v4788_v12 = vld [vmem:[%s18202_s24 + $0x5e8] sm:$0xff] }
 0x354   : > { %7771 = vmatprep.subr.bf16.mxu0 %v15294_v14  ;;  %v15374_v6 = vcombine.high %v5047_v1, %v5051_v2  ;;  %v15373_v14 = vcombine.low %v5047_v1, %v5051_v2  ;;  %v15112_v18 = vcombine.high %v4784_v10, %v4788_v12  ;;  %v4620_v1 = vld [vmem:[%s18202_s24 + $0xa8] sm:$0xff] }
 0x355   : > { %7811 = vmatpush2.bf16.msra.mxu1 %v15429_v13  ;;  %v15245_v13 = vcombine.low %v4919_v62, %v4923_v0  ;;  %v4616_v0 = vld [vmem:[%s18202_s24 + $0x88] sm:$0xff] }
 0x356   : > { %7812 = vmatprep.subr.bf16.mxu1 %v15422_v15  ;;  %v14984_v15 = vcombine.high %v4656_v7, %v4660_v9  ;;  %v4744_v2 = vld [vmem:[%s18202_s24 + $0x488] sm:$0xff] }
 0x357   : > { %7772 = vmatpush2.bf16.msra.mxu0 %v15293_v27  ;;  %v4780_v27 = vld [vmem:[%s18202_s24 + $0x5a8] sm:$0xff] }
 0x358   : > { %7773 = vmatprep.subr.bf16.mxu0 %v15286_v30  ;;  %v15111_v30 = vcombine.low %v4784_v10, %v4788_v12  ;;  %v15104_v41 = vcombine.high %v4776_v26, %v4780_v27  ;;  %v15103_v37 = vcombine.low %v4776_v26, %v4780_v27  ;;  %v4612_v10 = vld [vmem:[%s18202_s24 + $0x68] sm:$0xff] }
 0x359   : > { %7813 = vmatpush2.bf16.msra.mxu1 %v15421_v29  ;;  %v14983_v29 = vcombine.low %v4656_v7, %v4660_v9  ;;  %v4608_v9 = vld [vmem:[%s18202_s24 + $0x48] sm:$0xff] }
 0x35a   : > { %7814 = vmatprep.subr.bf16.mxu1 %v15414_v44  ;;  %v14976_v44 = vcombine.high %v4648_v19, %v4652_v21  ;;  %v4736_v12 = vld [vmem:[%s18202_s24 + $0x448] sm:$0xff] }
 0x35b   : > { %7774 = vmatpush2.bf16.msra.mxu0 %v15285_v53  ;;  %v4768_v53 = vld [vmem:[%s18202_s24 + $0x548] sm:$0xff] }
 0x35c   : > { %7775 = vmatprep.subr.bf16.mxu0 %v15278_v51  ;;  %v4604_v26 = vld [vmem:[%s18202_s24 + $0x28] sm:$0xff] }
 0x35d   : > { %7815 = vmatpush2.bf16.msra.mxu1 %v15413_v48  ;;  %v4772_v48 = vld [vmem:[%s18202_s24 + $0x568] sm:$0xff] }
 0x35e   : > { %7816 = vmatprep.subr.bf16.mxu1 %v15406_v34  ;;  %v14975_v34 = vcombine.low %v4648_v19, %v4652_v21  ;;  %v4600_v21 = vld [vmem:[%s18202_s24 + $0x8] sm:$0xff] }
 0x35f   : > { %7776 = vmatpush2.bf16.msra.mxu0 %v15277_v63  ;;  %v15096_v63 = vcombine.high %v4768_v53, %v4772_v48  ;;  %v4728_v27 = vld [vmem:[%s18202_s24 + $0x408] sm:$0xff] }
 0x360   : > { %7777 = vmatprep.subr.bf16.mxu0 %v15270_v22  ;;  %v4636_v22 = vld [vmem:[%s18202_s24 + $0x128] sm:$0xff] }
 0x361   : > { %7817 = vmatpush2.bf16.msra.mxu1 %v15405_v40  ;;  %v4632_v40 = vld [vmem:[%s18202_s24 + $0x108] sm:$0xff] }
 0x362   : > { %7818 = vmatprep.subr.bf16.mxu1 %v15398_v25 }
 0x363   : > { %7778 = vmatpush2.bf16.msra.mxu0 %v15269_v50 }
 0x364   : > { %7779 = vmatprep.subr.bf16.mxu0 %v15262_v8  ;;  %v14960_v8 = vcombine.high %v4632_v40, %v4636_v22 }
 0x365   : > { %7819 = vmatpush2.bf16.msra.mxu1 %v15397_v4  ;;  %v15095_v4 = vcombine.low %v4768_v53, %v4772_v48  ;;  %v4724_v53 = vld [vmem:[%s18202_s24 + $0x3e8] sm:$0xff] }
 0x366   : > { %7820 = vmatprep.subr.bf16.mxu1 %v15390_v52  ;;  %v4848_v48 = vld [vmem:[%s18202_s24 + $0x7c8] sm:$0xff] }
 0x367   : > { %7780 = vmatpush2.bf16.msra.mxu0 %v15261_v60  ;;  %v4756_v60 = vld [vmem:[%s18202_s24 + $0x4e8] sm:$0xff] }
 0x368   : > { %7781 = vmatprep.subr.bf16.mxu0 %v15254_v20  ;;  %v15087_v20 = vcombine.low %v4760_v43, %v4764_v5  ;;  %v15080_v62 = vcombine.high %v4752_v59, %v4756_v60  ;;  %v4840_v43 = vld [vmem:[%s18202_s24 + $0x788] sm:$0xff] }
 0x369   : > { %7821 = vmatpush2.bf16.msra.mxu1 %v15389_v17  ;;  %v14959_v17 = vcombine.low %v4632_v40, %v4636_v22  ;;  %v4712_v22 = vld [vmem:[%s18202_s24 + $0x388] sm:$0xff] }
 0x36a   : > { %7822 = vmatprep.subr.bf16.mxu1 %v15382_v61  ;;  %v14952_v61 = vcombine.high %v4624_v56, %v4628_v57  ;;  %v4844_v5 = vld [vmem:[%s18202_s24 + $0x7a8] sm:$0xff] }
 0x36b   : > { %7782 = vmatpush2.bf16.msra.mxu0 %v15253_v24  ;;  %v4748_v24 = vld [vmem:[%s18202_s24 + $0x4a8] sm:$0xff] }
 0x36c   : > { %7783 = vmatprep.subr.bf16.mxu0 %v15246_v3  ;;  %v15079_v3 = vcombine.low %v4752_v59, %v4756_v60  ;;  %v15072_v7 = vcombine.high %v4744_v2, %v4748_v24  ;;  %v15167_v59 = vcombine.low %v4840_v43, %v4844_v5 }
 0x36d   : > { %7823 = vmatpush2.bf16.msra.mxu1 %v15381_v28  ;;  %v14951_v28 = vcombine.low %v4624_v56, %v4628_v57  ;;  %v4836_v56 = vld [vmem:[%s18202_s24 + $0x768] sm:$0xff] }
 0x36e   : > { %7824 = vmatprep.subr.bf16.mxu1 %v15374_v6  ;;  %v14944_v6 = vcombine.high %v4616_v0, %v4620_v1 }
 0x36f   : > { %7784 = vmatpush2.bf16.msra.mxu0 %v15245_v13  ;;  %v4740_v13 = vld [vmem:[%s18202_s24 + $0x468] sm:$0xff] }
 0x370   : > { %7835 = vmatprep.subr.bf16.mxu0 %v14984_v15  ;;  %v15071_v15 = vcombine.low %v4744_v2, %v4748_v24  ;;  %v15064_v19 = vcombine.high %v4736_v12, %v4740_v13 }
 0x371   : > { %7825 = vmatpush2.bf16.msra.mxu1 %v15373_v14  ;;  %v14943_v14 = vcombine.low %v4616_v0, %v4620_v1  ;;  %v4828_v0 = vld [vmem:[%s18202_s24 + $0x728] sm:$0xff] }
 0x372   : > { %7876 = vmatprep.subr.bf16.mxu1 %v15112_v18  ;;  %v19026_v32 = vpop.f32.mrf.mxu0  ;;  %7786 = vmatmul.mubr.bf16.vlgmr.msra.gmra.mxu0 %v18409_v55  ;;  %v14936_v18 = vcombine.high %v4608_v9, %v4612_v10 }
 0x373   : > { %7836 = vmatpush1.bf16.msra.mxu0 %v14983_v29  ;;  %7867 = vmatprep.mubr.bf16.mxu0 %v18273_v11  ;;  %v4732_v29 = vld [vmem:[%s18202_s24 + $0x428] sm:$0xff] }
 0x374   : > { %v19031_v51 = vpop.f32.mrf.mxu1  ;;  %7827 = vmatmul.mubr.bf16.vlgmr.msra.gmra.mxu1 %v18415_v58  ;;  %v19034_v35 = vpop.f32.mrf.mxu0  ;;  %7837 = vmatprep.subr.bf16.mxu0 %v14976_v44  ;;  %v15063_v44 = vcombine.low %v4736_v12, %v4740_v13  ;;  %v15056_v46 = vcombine.high %v4728_v27, %v4732_v29 }
 0x375   : > { %7877 = vmatpush1.bf16.msra.mxu1 %v15111_v30  ;;  %7908 = vmatprep.mubr.bf16.mxu1 %v18280_v16  ;;  %v14935_v30 = vcombine.low %v4608_v9, %v4612_v10  ;;  %v4820_v9 = vld [vmem:[%s18202_s24 + $0x6e8] sm:$0xff] }
 0x376   : > { %v19036_v39 = vpop.f32.mrf.mxu1  ;;  %7878 = vmatprep.subr.bf16.mxu1 %v15104_v41  ;;  %v4241_v25 = vpop.f32.mrf.mxu0  ;;  %v14928_v41 = vcombine.high %v4600_v21, %v4604_v26 }
 0x377   : > { %7838 = vmatpush1.bf16.msra.mxu0 %v14975_v34  ;;  %v4852_v34 = vld [vmem:[%s18202_s24 + $0x7e8] sm:$0xff] }
 0x378   : > { %v4282_v47 = vpop.f32.mrf.mxu1  ;;  %v4242_v50 = vpop.f32.mrf.mxu0  ;;  %7839 = vmatprep.subr.bf16.mxu0 %v14968_v38  ;;  %v15055_v38 = vcombine.low %v4728_v27, %v4732_v29  ;;  %v15176_v40 = vcombine.high %v4848_v48, %v4852_v34  ;;  %v4716_v25 = vld [vmem:[%s18202_s24 + $0x3a8] sm:$0xff] }
 0x379   : > { %7879 = vmatpush1.bf16.msra.mxu1 %v15103_v37  ;;  %v14927_v37 = vcombine.low %v4600_v21, %v4604_v26  ;;  %v15047_v47 = vcombine.low %v4720_v31, %v4724_v53  ;;  %v15040_v50 = vcombine.high %v4712_v22, %v4716_v25  ;;  %v15039_v57 = vcombine.low %v4712_v22, %v4716_v25  ;;  %v4812_v21 = vld [vmem:[%s18202_s24 + $0x6a8] sm:$0xff] }
 0x37a   : > { %v4283_v52 = vpop.f32.mrf.mxu1  ;;  %7880 = vmatprep.subr.bf16.mxu1 %v15096_v63  ;;  %v15048_v63 = vcombine.high %v4720_v31, %v4724_v53  ;;  %v4804_v31 = vld [vmem:[%s18202_s24 + $0x668] sm:$0xff] }
 0x37b   : > { %7840 = vmatpush1.bf16.msra.mxu0 %v14967_v49  ;;  %v15175_v49 = vcombine.low %v4848_v48, %v4852_v34  ;;  %v4708_v52 = vld [vmem:[%s18202_s24 + $0x368] sm:$0xff] }
 0x37c   : > { %7841 = vmatprep.subr.bf16.mxu0 %v14960_v8  ;;  %v4704_v8 = vld [vmem:[%s18202_s24 + $0x348] sm:$0xff] }
 0x37d   : > { %7881 = vmatpush1.bf16.msra.mxu1 %v15095_v4  ;;  %v15168_v4 = vcombine.high %v4840_v43, %v4844_v5  ;;  %v15032_v60 = vcombine.high %v4704_v8, %v4708_v52  ;;  %v15031_v1 = vcombine.low %v4704_v8, %v4708_v52  ;;  %v4796_v22 = vld [vmem:[%s18202_s24 + $0x628] sm:$0xff] }
 0x37e   : > { %7882 = vmatprep.subr.bf16.mxu1 %v15088_v54  ;;  %v4832_v54 = vld [vmem:[%s18202_s24 + $0x748] sm:$0xff] }
 0x37f   : > { %7842 = vmatpush1.bf16.msra.mxu0 %v14959_v17  ;;  %v15160_v17 = vcombine.high %v4832_v54, %v4836_v56  ;;  %v15159_v2 = vcombine.low %v4832_v54, %v4836_v56  ;;  %v5044_v8 = vld [vmem:[%s18202_s24 + $0xde8] sm:$0xff] }
 0x380   : > { %7843 = vmatprep.subr.bf16.mxu0 %v14952_v61  ;;  %v4700_v61 = vld [vmem:[%s18202_s24 + $0x328] sm:$0xff] }
 0x381   : > { %7883 = vmatpush1.bf16.msra.mxu1 %v15087_v20  ;;  %v4696_v20 = vld [vmem:[%s18202_s24 + $0x308] sm:$0xff] }
 0x382   : > { %7884 = vmatprep.subr.bf16.mxu1 %v15080_v62  ;;  %v4824_v62 = vld [vmem:[%s18202_s24 + $0x708] sm:$0xff]  ;;  %v15024_v24 = vcombine.high %v4696_v20, %v4700_v61  ;;  %v15023_v10 = vcombine.low %v4696_v20, %v4700_v61 }
 0x383   : > { %7844 = vmatpush1.bf16.msra.mxu0 %v14951_v28  ;;  %v15152_v28 = vcombine.high %v4824_v62, %v4828_v0  ;;  %v15151_v12 = vcombine.low %v4824_v62, %v4828_v0  ;;  %v5036_v20 = vld [vmem:[%s18202_s24 + $0xda8] sm:$0xff] }
 0x384   : > { %7845 = vmatprep.subr.bf16.mxu0 %v14944_v6  ;;  %v4692_v6 = vld [vmem:[%s18202_s24 + $0x2e8] sm:$0xff] }
 0x385   : > { %7885 = vmatpush1.bf16.msra.mxu1 %v15079_v3  ;;  %v4688_v3 = vld [vmem:[%s18202_s24 + $0x2c8] sm:$0xff] }
 0x386   : > { %7886 = vmatprep.subr.bf16.mxu1 %v15072_v7  ;;  %v4816_v7 = vld [vmem:[%s18202_s24 + $0x6c8] sm:$0xff]  ;;  %v15016_v13 = vcombine.high %v4688_v3, %v4692_v6  ;;  %v15015_v26 = vcombine.low %v4688_v3, %v4692_v6 }
 0x387   : > { %7846 = vmatpush1.bf16.msra.mxu0 %v14943_v14  ;;  %v15144_v14 = vcombine.high %v4816_v7, %v4820_v9  ;;  %v15143_v27 = vcombine.low %v4816_v7, %v4820_v9  ;;  %v5024_v6 = vld [vmem:[%s18202_s24 + $0xd48] sm:$0xff]  ;;  %v4281_v9 = vadd.f32 %v19036_v39, %v19034_v35 }
 0x388   : > { %7847 = vmatprep.subr.bf16.mxu0 %v14936_v18  ;;  %v4684_v18 = vld [vmem:[%s18202_s24 + $0x2a8] sm:$0xff] }
 0x389   : > { %7887 = vmatpush1.bf16.msra.mxu1 %v15071_v15  ;;  %v4680_v15 = vld [vmem:[%s18202_s24 + $0x288] sm:$0xff] }
 0x38a   : > { %7888 = vmatprep.subr.bf16.mxu1 %v15064_v19  ;;  %v4808_v19 = vld [vmem:[%s18202_s24 + $0x688] sm:$0xff]  ;;  %v15008_v29 = vcombine.high %v4680_v15, %v4684_v18  ;;  %v15007_v53 = vcombine.low %v4680_v15, %v4684_v18 }
 0x38b   : > { %7848 = vmatpush1.bf16.msra.mxu0 %v14935_v30  ;;  %v15136_v30 = vcombine.high %v4808_v19, %v4812_v21  ;;  %v15135_v48 = vcombine.low %v4808_v19, %v4812_v21  ;;  %v5028_v7 = vld [vmem:[%s18202_s24 + $0xd68] sm:$0xff] }
 0x38c   : > { %7849 = vmatprep.subr.bf16.mxu0 %v14928_v41  ;;  %v4676_v41 = vld [vmem:[%s18202_s24 + $0x268] sm:$0xff]  ;;  %v15352_v35 = vcombine.high %v5024_v6, %v5028_v7 }
 0x38d   : > { %7889 = vmatpush1.bf16.msra.mxu1 %v15063_v44  ;;  %v4672_v44 = vld [vmem:[%s18202_s24 + $0x248] sm:$0xff] }
 0x38e   : > { %7890 = vmatprep.subr.bf16.mxu1 %v15056_v46  ;;  %v4800_v46 = vld [vmem:[%s18202_s24 + $0x648] sm:$0xff]  ;;  %v15000_v34 = vcombine.high %v4672_v44, %v4676_v41  ;;  %v14999_v25 = vcombine.low %v4672_v44, %v4676_v41 }
 0x38f   : > { %7850 = vmatpush1.bf16.msra.mxu0 %v14927_v37  ;;  %v15128_v37 = vcombine.high %v4800_v46, %v4804_v31  ;;  %v15127_v43 = vcombine.low %v4800_v46, %v4804_v31  ;;  %v4888_v39 = vld [vmem:[%s18202_s24 + $0x908] sm:$0xff] }
 0x390   : > { %7851 = vmatprep.subr.bf16.mxu0 %v15048_v63  ;;  %v4668_v63 = vld [vmem:[%s18202_s24 + $0x228] sm:$0xff] }
 0x391   : > { %7891 = vmatpush1.bf16.msra.mxu1 %v15055_v38  ;;  %v4664_v38 = vld [vmem:[%s18202_s24 + $0x208] sm:$0xff] }
 0x392   : > { %7892 = vmatprep.subr.bf16.mxu1 %v15176_v40  ;;  %v4792_v40 = vld [vmem:[%s18202_s24 + $0x608] sm:$0xff]  ;;  %v14992_v5 = vcombine.high %v4664_v38, %v4668_v63  ;;  %v14991_v52 = vcombine.low %v4664_v38, %v4668_v63 }
 0x393   : > { %7852 = vmatpush2.bf16.msra.mxu0 %v15047_v47  ;;  %v15120_v47 = vcombine.high %v4792_v40, %v4796_v22  ;;  %v15119_v54 = vcombine.low %v4792_v40, %v4796_v22  ;;  %v4892_v21 = vld [vmem:[%s18202_s24 + $0x928] sm:$0xff] }
 0x394   : > { %7853 = vmatprep.subr.bf16.mxu0 %v15040_v50  ;;  %v4916_v50 = vld [vmem:[%s18202_s24 + $0x9e8] sm:$0xff] }
 0x395   : > { %7893 = vmatpush2.bf16.msra.mxu1 %v15175_v49  ;;  %v4912_v49 = vld [vmem:[%s18202_s24 + $0x9c8] sm:$0xff] }
 0x396   : > { %7894 = vmatprep.subr.bf16.mxu1 %v15168_v4  ;;  %v5040_v4 = vld [vmem:[%s18202_s24 + $0xdc8] sm:$0xff]  ;;  %v15240_v56 = vcombine.high %v4912_v49, %v4916_v50  ;;  %v15239_v61 = vcombine.low %v4912_v49, %v4916_v50 }
 0x397   : > { %7854 = vmatpush2.bf16.msra.mxu0 %v15039_v57  ;;  %v15368_v57 = vcombine.high %v5040_v4, %v5044_v8  ;;  %v15367_v62 = vcombine.low %v5040_v4, %v5044_v8  ;;  %v4880_v40 = vld [vmem:[%s18202_s24 + $0x8c8] sm:$0xff] }
 0x398   : > { %7855 = vmatprep.subr.bf16.mxu0 %v15032_v60  ;;  %v4908_v60 = vld [vmem:[%s18202_s24 + $0x9a8] sm:$0xff] }
 0x399   : > { %7895 = vmatpush2.bf16.msra.mxu1 %v15167_v59  ;;  %v4904_v59 = vld [vmem:[%s18202_s24 + $0x988] sm:$0xff] }
 0x39a   : > { %7896 = vmatprep.subr.bf16.mxu1 %v15160_v17  ;;  %v5032_v17 = vld [vmem:[%s18202_s24 + $0xd88] sm:$0xff]  ;;  %v15232_v0 = vcombine.high %v4904_v59, %v4908_v60 }
 0x39b   : > { %7856 = vmatpush2.bf16.msra.mxu0 %v15031_v1  ;;  %v4279_v1 = vadd.f32 %v19031_v51, %v19026_v32  ;;  %v15231_v32 = vcombine.low %v4904_v59, %v4908_v60  ;;  %v4884_v22 = vld [vmem:[%s18202_s24 + $0x8e8] sm:$0xff] }
 0x39c   : > { %7857 = vmatprep.subr.bf16.mxu0 %v15024_v24  ;;  %v4896_v24 = vld [vmem:[%s18202_s24 + $0x948] sm:$0xff]  ;;  %v15208_v50 = vcombine.high %v4880_v40, %v4884_v22 }
 0x39d   : > { %7897 = vmatpush2.bf16.msra.mxu1 %v15159_v2  ;;  %v15360_v2 = vcombine.high %v5032_v17, %v5036_v20  ;;  %v4872_v8 = vld [vmem:[%s18202_s24 + $0x888] sm:$0xff] }
 0x39e   : > { %7898 = vmatprep.subr.bf16.mxu1 %v15152_v28  ;;  %v4900_v28 = vld [vmem:[%s18202_s24 + $0x968] sm:$0xff] }
 0x39f   : > { %7858 = vmatpush2.bf16.msra.mxu0 %v15023_v10  ;;  %v15223_v46 = vcombine.low %v4896_v24, %v4900_v28 }
 0x3a0   : > { %7859 = vmatprep.subr.bf16.mxu0 %v15016_v13  ;;  %v15359_v13 = vcombine.low %v5032_v17, %v5036_v20  ;;  %v4864_v20 = vld [vmem:[%s18202_s24 + $0x848] sm:$0xff] }
 0x3a1   : > { %7899 = vmatpush2.bf16.msra.mxu1 %v15151_v12 }
 0x3a2   : > { %7900 = vmatprep.subr.bf16.mxu1 %v15144_v14  ;;  %v15224_v14 = vcombine.high %v4896_v24, %v4900_v28 }
 0x3a3   : > { %7860 = vmatpush2.bf16.msra.mxu0 %v15015_v26 }
 0x3a4   : > { %7861 = vmatprep.subr.bf16.mxu0 %v15008_v29  ;;  %v5020_v29 = vld [vmem:[%s18202_s24 + $0xd28] sm:$0xff] }
 0x3a5   : > { %7901 = vmatpush2.bf16.msra.mxu1 %v15143_v27  ;;  %v5016_v27 = vld [vmem:[%s18202_s24 + $0xd08] sm:$0xff] }
 0x3a6   : > { %7902 = vmatprep.subr.bf16.mxu1 %v15136_v30  ;;  %v15344_v63 = vcombine.high %v5016_v27, %v5020_v29  ;;  %v15343_v49 = vcombine.low %v5016_v27, %v5020_v29  ;;  %v4972_v27 = vld [vmem:[%s18202_s24 + $0xba8] sm:$0xff] }
 0x3a7   : > { %7862 = vmatpush2.bf16.msra.mxu0 %v15007_v53  ;;  %v15351_v53 = vcombine.low %v5024_v6, %v5028_v7  ;;  %v4860_v6 = vld [vmem:[%s18202_s24 + $0x828] sm:$0xff] }
 0x3a8   : > { %7863 = vmatprep.subr.bf16.mxu0 %v15000_v34  ;;  %v4984_v7 = vld [vmem:[%s18202_s24 + $0xc08] sm:$0xff] }
 0x3a9   : > { %7903 = vmatpush2.bf16.msra.mxu1 %v15135_v48  ;;  %v15216_v48 = vcombine.high %v4888_v39, %v4892_v21  ;;  %v5096_v29 = vld [vmem:[%s18202_s24 + $0xf88] sm:$0xff] }
 0x3aa   : > { %7904 = vmatprep.subr.bf16.mxu1 %v15128_v37 }
 0x3ab   : > { %7864 = vmatpush2.bf16.msra.mxu0 %v14999_v25  ;;  %v5008_v25 = vld [vmem:[%s18202_s24 + $0xcc8] sm:$0xff] }
 0x3ac   : > { %7865 = vmatprep.subr.bf16.mxu0 %v14992_v5 }
 0x3ad   : > { %7905 = vmatpush2.bf16.msra.mxu1 %v15127_v43  ;;  %v5012_v43 = vld [vmem:[%s18202_s24 + $0xce8] sm:$0xff] }
 0x3ae   : > { %7906 = vmatprep.subr.bf16.mxu1 %v15120_v47  ;;  %v15215_v47 = vcombine.low %v4888_v39, %v4892_v21  ;;  %v15336_v4 = vcombine.high %v5008_v25, %v5012_v43  ;;  %v15335_v59 = vcombine.low %v5008_v25, %v5012_v43  ;;  %v4952_v25 = vld [vmem:[%s18202_s24 + $0xb08] sm:$0xff] }
 0x3af   : > { %7866 = vmatpush2.bf16.msra.mxu0 %v14991_v52  ;;  %v4876_v52 = vld [vmem:[%s18202_s24 + $0x8a8] sm:$0xff] }
 0x3b0   : > { %7917 = vmatprep.subr.bf16.mxu0 %v15240_v56  ;;  %v5004_v56 = vld [vmem:[%s18202_s24 + $0xca8] sm:$0xff]  ;;  %v15200_v60 = vcombine.high %v4872_v8, %v4876_v52 }
 0x3b1   : > { %7907 = vmatpush2.bf16.msra.mxu1 %v15119_v54  ;;  %v5000_v54 = vld [vmem:[%s18202_s24 + $0xc88] sm:$0xff] }
 0x3b2   : > { %7958 = vmatprep.subr.bf16.mxu1 %v15368_v57  ;;  %v4319_v3 = vpop.f32.mrf.mxu0  ;;  %7868 = vmatmul.mubr.bf16.vlgmr.msra.gmra.mxu0 %v18327_v33  ;;  %v15207_v57 = vcombine.low %v4880_v40, %v4884_v22  ;;  %v15328_v17 = vcombine.high %v5000_v54, %v5004_v56  ;;  %v4956_v43 = vld [vmem:[%s18202_s24 + $0xb28] sm:$0xff] }
 0x3b3   : > { %v4320_v10 = vadd.f32 %v4319_v3, %v4279_v1  ;;  %7918 = vmatpush1.bf16.msra.mxu0 %v15239_v61  ;;  %7949 = vmatprep.mubr.bf16.mxu0 %v18339_v42  ;;  %v4868_v61 = vld [vmem:[%s18202_s24 + $0x868] sm:$0xff]  ;;  %v15199_v1 = vcombine.low %v4872_v8, %v4876_v52 }
 0x3b4   : > { %v4360_v12 = vpop.f32.mrf.mxu1  ;;  %7909 = vmatmul.mubr.bf16.vlgmr.msra.gmra.mxu1 %v18335_v36  ;;  %v4321_v51 = vpop.f32.mrf.mxu0  ;;  %7919 = vmatprep.subr.bf16.mxu0 %v15232_v0  ;;  %v4996_v0 = vld [vmem:[%s18202_s24 + $0xc68] sm:$0xff]  ;;  %v15192_v24 = vcombine.high %v4864_v20, %v4868_v61 }
 0x3b5   : > { %7959 = vmatpush1.bf16.msra.mxu1 %v15367_v62  ;;  %v4361_v15 = vadd.f32 %v4360_v12, %v4320_v10  ;;  %v4322_v18 = vadd.f32 %v4321_v51, %v4281_v9  ;;  %7990 = vmatprep.mubr.bf16.mxu1 %v18344_v45  ;;  %v4992_v62 = vld [vmem:[%s18202_s24 + $0xc48] sm:$0xff]  ;;  %v15191_v10 = vcombine.low %v4864_v20, %v4868_v61 }
 0x3b6   : > { %v4362_v19 = vpop.f32.mrf.mxu1  ;;  %7960 = vmatprep.subr.bf16.mxu1 %v15360_v2  ;;  %v4323_v26 = vpop.f32.mrf.mxu0  ;;  %v15327_v2 = vcombine.low %v5000_v54, %v5004_v56  ;;  %v15320_v28 = vcombine.high %v4992_v62, %v4996_v0  ;;  %v4856_v3 = vld [vmem:[%s18202_s24 + $0x808] sm:$0xff]  ;;  %v15319_v12 = vcombine.low %v4992_v62, %v4996_v0 }
 0x3b7   : > { %v4549_v30 = vrot.slane %v4361_v15, %v18634_v23  ;;  %v4363_v44 = vadd.f32 %v4362_v19, %v4322_v18  ;;  %7920 = vmatpush1.bf16.msra.mxu0 %v15231_v32  ;;  %v4988_v9 = vld [vmem:[%s18202_s24 + $0xc28] sm:$0xff]  ;;  %v15184_v32 = vcombine.high %v4856_v3, %v4860_v6  ;;  %v15183_v19 = vcombine.low %v4856_v3, %v4860_v6 }
 0x3b8   : > { %v4364_v41 = vpop.f32.mrf.mxu1  ;;  %v4324_v31 = vpop.f32.mrf.mxu0  ;;  %7921 = vmatprep.subr.bf16.mxu0 %v15224_v14  ;;  %v15312_v51 = vcombine.high %v4984_v7, %v4988_v9  ;;  %v4980_v14 = vld [vmem:[%s18202_s24 + $0xbe8] sm:$0xff] }
 0x3b9   : > { %7961 = vmatpush1.bf16.msra.mxu1 %v15359_v13  ;;  %v4550_v34 = vcombine.high %v4549_v30, %v4549_v30  ;;  %16093 = vst.sshfl [vmem:[%s18653_s5 + $0x6] sm:$0x1 pattern:$0x73625140] %v4549_v30  ;;  %v4578_v37 = vrot.slane %v4363_v44, %v18634_v23  ;;  %v4976_v13 = vld [vmem:[%s18202_s24 + $0xbc8] sm:$0xff] }
 0x3ba   : > { %v4365_v38 = vpop.f32.mrf.mxu1  ;;  %7962 = vmatprep.subr.bf16.mxu1 %v15352_v35  ;;  %v5104_v15 = vld [vmem:[%s18202_s24 + $0xfc8] sm:$0xff]  ;;  %v15311_v35 = vcombine.low %v4984_v7, %v4988_v9  ;;  %v15304_v39 = vcombine.high %v4976_v13, %v4980_v14  ;;  %v15303_v44 = vcombine.low %v4976_v13, %v4980_v14 }
 0x3bb   : > { %16094 = vst.sshfl [vmem:[%s18653_s5 + $0x46] sm:$0x1 pattern:$0x73625140] %v4550_v34  ;;  %v4579_v5 = vcombine.high %v4578_v37, %v4578_v37  ;;  %7922 = vmatpush1.bf16.msra.mxu0 %v15223_v46  ;;  %v5108_v18 = vld [vmem:[%s18202_s24 + $0xfe8] sm:$0xff] }
 0x3bc   : > { %16095 = vst.sshfl [vmem:[%s18653_s5 + $0x7] sm:$0x1 pattern:$0x73625140] %v4578_v37  ;;  %7923 = vmatprep.subr.bf16.mxu0 %v15216_v48  ;;  %v15432_v21 = vcombine.high %v5104_v15, %v5108_v18  ;;  %v4968_v26 = vld [vmem:[%s18202_s24 + $0xb88] sm:$0xff]  ;;  %v15431_v41 = vcombine.low %v5104_v15, %v5108_v18 }
 0x3bd   : > { %7963 = vmatpush1.bf16.msra.mxu1 %v15351_v53  ;;  %16096 = vst.sshfl [vmem:[%s18653_s5 + $0x47] sm:$0x1 pattern:$0x73625140] %v4579_v5  ;;  %v5100_v30 = vld [vmem:[%s18202_s24 + $0xfa8] sm:$0xff]  ;;  %v15296_v46 = vcombine.high %v4968_v26, %v4972_v27  ;;  %v15295_v38 = vcombine.low %v4968_v26, %v4972_v27  ;;  %v4657_v27 = vld [vmem:[%s18202_s24 + $0x1d0] sm:$0xff] }
 0x3be   : > { %7964 = vmatprep.subr.bf16.mxu1 %v15344_v63  ;;  %v15424_v31 = vcombine.high %v5096_v29, %v5100_v30  ;;  %v4960_v53 = vld [vmem:[%s18202_s24 + $0xb48] sm:$0xff]  ;;  %v15423_v63 = vcombine.low %v5096_v29, %v5100_v30  ;;  %v4661_v29 = vld [vmem:[%s18202_s24 + $0x1f0] sm:$0xff] }
 0x3bf   : > { %7924 = vmatpush1.bf16.msra.mxu0 %v15215_v47  ;;  %v4964_v48 = vld [vmem:[%s18202_s24 + $0xb68] sm:$0xff]  ;;  %v4785_v30 = vld [vmem:[%s18202_s24 + $0x5d0] sm:$0xff] }
 0x3c0   : > { %7925 = vmatprep.subr.bf16.mxu0 %v15208_v50  ;;  %v5088_v34 = vld [vmem:[%s18202_s24 + $0xf48] sm:$0xff]  ;;  %v15288_v40 = vcombine.high %v4960_v53, %v4964_v48 }
 0x3c1   : > { %7965 = vmatpush1.bf16.msra.mxu1 %v15343_v49  ;;  %v5092_v37 = vld [vmem:[%s18202_s24 + $0xf68] sm:$0xff]  ;;  %v15287_v49 = vcombine.low %v4960_v53, %v4964_v48  ;;  %v4649_v48 = vld [vmem:[%s18202_s24 + $0x190] sm:$0xff] }
 0x3c2   : > { %7966 = vmatprep.subr.bf16.mxu1 %v15336_v4  ;;  %v15416_v22 = vcombine.high %v5088_v34, %v5092_v37  ;;  %v5080_v5 = vld [vmem:[%s18202_s24 + $0xf08] sm:$0xff]  ;;  %v15415_v50 = vcombine.low %v5088_v34, %v5092_v37  ;;  %v15280_v4 = vcombine.high %v4952_v25, %v4956_v43  ;;  %v4653_v34 = vld [vmem:[%s18202_s24 + $0x1b0] sm:$0xff] }
 0x3c3   : > { %7926 = vmatpush1.bf16.msra.mxu0 %v15207_v57  ;;  %v5084_v47 = vld [vmem:[%s18202_s24 + $0xf28] sm:$0xff]  ;;  %v4777_v37 = vld [vmem:[%s18202_s24 + $0x590] sm:$0xff] }
 0x3c4   : > { %7927 = vmatprep.subr.bf16.mxu0 %v15200_v60  ;;  %v15408_v8 = vcombine.high %v5080_v5, %v5084_v47  ;;  %v4944_v52 = vld [vmem:[%s18202_s24 + $0xac8] sm:$0xff]  ;;  %v15407_v60 = vcombine.low %v5080_v5, %v5084_v47  ;;  %v4645_v5 = vld [vmem:[%s18202_s24 + $0x170] sm:$0xff] }
 0x3c5   : > { %7967 = vmatpush1.bf16.msra.mxu1 %v15335_v59  ;;  %v4948_v54 = vld [vmem:[%s18202_s24 + $0xae8] sm:$0xff]  ;;  %v15279_v59 = vcombine.low %v4952_v25, %v4956_v43  ;;  %v4641_v43 = vld [vmem:[%s18202_s24 + $0x150] sm:$0xff] }
 0x3c6   : > { %7968 = vmatprep.subr.bf16.mxu1 %v15328_v17  ;;  %v5072_v56 = vld [vmem:[%s18202_s24 + $0xec8] sm:$0xff]  ;;  %v15272_v17 = vcombine.high %v4944_v52, %v4948_v54 }
 0x3c7   : > { %7928 = vmatpush1.bf16.msra.mxu0 %v15199_v1  ;;  %v5076_v57 = vld [vmem:[%s18202_s24 + $0xee8] sm:$0xff] }
 0x3c8   : > { %7929 = vmatprep.subr.bf16.mxu0 %v15192_v24  ;;  %v15400_v20 = vcombine.high %v5072_v56, %v5076_v57  ;;  %v4936_v61 = vld [vmem:[%s18202_s24 + $0xa88] sm:$0xff]  ;;  %v15399_v24 = vcombine.low %v5072_v56, %v5076_v57  ;;  %v14970_v56 = vcombine.high %v4641_v43, %v4645_v5 }
 0x3c9   : > { %7969 = vmatpush1.bf16.msra.mxu1 %v15327_v2  ;;  %v4940_v62 = vld [vmem:[%s18202_s24 + $0xaa8] sm:$0xff]  ;;  %v15271_v2 = vcombine.low %v4944_v52, %v4948_v54 }
 0x3ca   : > { %7970 = vmatprep.subr.bf16.mxu1 %v15320_v28  ;;  %v5064_v0 = vld [vmem:[%s18202_s24 + $0xe88] sm:$0xff]  ;;  %v15264_v28 = vcombine.high %v4936_v61, %v4940_v62 }
 0x3cb   : > { %7930 = vmatpush1.bf16.msra.mxu0 %v15191_v10  ;;  %v5068_v1 = vld [vmem:[%s18202_s24 + $0xea8] sm:$0xff] }
 0x3cc   : > { %7931 = vmatprep.subr.bf16.mxu0 %v15184_v32  ;;  %v15392_v3 = vcombine.high %v5064_v0, %v5068_v1  ;;  %v4928_v6 = vld [vmem:[%s18202_s24 + $0xa48] sm:$0xff]  ;;  %v15391_v32 = vcombine.low %v5064_v0, %v5068_v1  ;;  %v14969_v1 = vcombine.low %v4641_v43, %v4645_v5  ;;  %v4721_v5 = vld [vmem:[%s18202_s24 + $0x3d0] sm:$0xff] }
 0x3cd   : > { %7971 = vmatpush1.bf16.msra.mxu1 %v15319_v12  ;;  %v4932_v7 = vld [vmem:[%s18202_s24 + $0xa68] sm:$0xff]  ;;  %v15263_v12 = vcombine.low %v4936_v61, %v4940_v62  ;;  %v4761_v61 = vld [vmem:[%s18202_s24 + $0x510] sm:$0xff] }
 0x3ce   : > { %7972 = vmatprep.subr.bf16.mxu1 %v15312_v51  ;;  %v5056_v9 = vld [vmem:[%s18202_s24 + $0xe48] sm:$0xff]  ;;  %v15256_v51 = vcombine.high %v4928_v6, %v4932_v7  ;;  %v4765_v62 = vld [vmem:[%s18202_s24 + $0x530] sm:$0xff] }
 0x3cf   : > { %7932 = vmatpush1.bf16.msra.mxu0 %v15183_v19  ;;  %v5060_v10 = vld [vmem:[%s18202_s24 + $0xe68] sm:$0xff] }
 0x3d0   : > { %7933 = vmatprep.subr.bf16.mxu0 %v15304_v39  ;;  %v15384_v13 = vcombine.high %v5056_v9, %v5060_v10  ;;  %v4920_v14 = vld [vmem:[%s18202_s24 + $0xa08] sm:$0xff]  ;;  %v15383_v39 = vcombine.low %v5056_v9, %v5060_v10  ;;  %v4629_v9 = vld [vmem:[%s18202_s24 + $0xf0] sm:$0xff] }
 0x3d1   : > { %7973 = vmatpush1.bf16.msra.mxu1 %v15311_v35  ;;  %v4924_v15 = vld [vmem:[%s18202_s24 + $0xa28] sm:$0xff]  ;;  %v15255_v35 = vcombine.low %v4928_v6, %v4932_v7  ;;  %v15090_v6 = vcombine.high %v4761_v61, %v4765_v62  ;;  %v4625_v7 = vld [vmem:[%s18202_s24 + $0xd0] sm:$0xff] }
 0x3d2   : > { %7974 = vmatprep.subr.bf16.mxu1 %v15432_v21  ;;  %v5048_v18 = vld [vmem:[%s18202_s24 + $0xe08] sm:$0xff]  ;;  %v15248_v21 = vcombine.high %v4920_v14, %v4924_v15  ;;  %v4753_v10 = vld [vmem:[%s18202_s24 + $0x4d0] sm:$0xff] }
 0x3d3   : > { %7934 = vmatpush2.bf16.msra.mxu0 %v15303_v44  ;;  %v5052_v19 = vld [vmem:[%s18202_s24 + $0xe28] sm:$0xff]  ;;  %v4789_v44 = vld [vmem:[%s18202_s24 + $0x5f0] sm:$0xff] }
 0x3d4   : > { %7935 = vmatprep.subr.bf16.mxu0 %v15296_v46  ;;  %v15376_v26 = vcombine.high %v5048_v18, %v5052_v19  ;;  %v15375_v46 = vcombine.low %v5048_v18, %v5052_v19  ;;  %v15114_v53 = vcombine.high %v4785_v30, %v4789_v44  ;;  %v4621_v18 = vld [vmem:[%s18202_s24 + $0xb0] sm:$0xff] }
 0x3d5   : > { %7975 = vmatpush2.bf16.msra.mxu1 %v15431_v41  ;;  %v15247_v41 = vcombine.low %v4920_v14, %v4924_v15  ;;  %v4617_v15 = vld [vmem:[%s18202_s24 + $0x90] sm:$0xff] }
 0x3d6   : > { %7976 = vmatprep.subr.bf16.mxu1 %v15424_v31  ;;  %v14986_v31 = vcombine.high %v4657_v27, %v4661_v29  ;;  %v4745_v19 = vld [vmem:[%s18202_s24 + $0x490] sm:$0xff] }
 0x3d7   : > { %7936 = vmatpush2.bf16.msra.mxu0 %v15295_v38  ;;  %v4781_v38 = vld [vmem:[%s18202_s24 + $0x5b0] sm:$0xff] }
 0x3d8   : > { %7937 = vmatprep.subr.bf16.mxu0 %v15288_v40  ;;  %v15113_v40 = vcombine.low %v4785_v30, %v4789_v44  ;;  %v15106_v25 = vcombine.high %v4777_v37, %v4781_v38  ;;  %v15105_v54 = vcombine.low %v4777_v37, %v4781_v38  ;;  %v4613_v30 = vld [vmem:[%s18202_s24 + $0x70] sm:$0xff] }
 0x3d9   : > { %7977 = vmatpush2.bf16.msra.mxu1 %v15423_v63  ;;  %v14985_v63 = vcombine.low %v4657_v27, %v4661_v29  ;;  %v4609_v29 = vld [vmem:[%s18202_s24 + $0x50] sm:$0xff] }
 0x3da   : > { %7978 = vmatprep.subr.bf16.mxu1 %v15416_v22  ;;  %v14978_v22 = vcombine.high %v4649_v48, %v4653_v34  ;;  %v4737_v44 = vld [vmem:[%s18202_s24 + $0x450] sm:$0xff] }
 0x3db   : > { %7938 = vmatpush2.bf16.msra.mxu0 %v15287_v49  ;;  %v4769_v49 = vld [vmem:[%s18202_s24 + $0x550] sm:$0xff] }
 0x3dc   : > { %7939 = vmatprep.subr.bf16.mxu0 %v15280_v4  ;;  %v4605_v37 = vld [vmem:[%s18202_s24 + $0x30] sm:$0xff] }
 0x3dd   : > { %7979 = vmatpush2.bf16.msra.mxu1 %v15415_v50  ;;  %v4773_v50 = vld [vmem:[%s18202_s24 + $0x570] sm:$0xff] }
 0x3de   : > { %7980 = vmatprep.subr.bf16.mxu1 %v15408_v8  ;;  %v14977_v8 = vcombine.low %v4649_v48, %v4653_v34  ;;  %v4601_v34 = vld [vmem:[%s18202_s24 + $0x10] sm:$0xff] }
 0x3df   : > { %7940 = vmatpush2.bf16.msra.mxu0 %v15279_v59  ;;  %v15098_v59 = vcombine.high %v4769_v49, %v4773_v50  ;;  %v4729_v38 = vld [vmem:[%s18202_s24 + $0x410] sm:$0xff] }
 0x3e0   : > { %7941 = vmatprep.subr.bf16.mxu0 %v15272_v17  ;;  %v4637_v17 = vld [vmem:[%s18202_s24 + $0x130] sm:$0xff] }
 0x3e1   : > { %7981 = vmatpush2.bf16.msra.mxu1 %v15407_v60  ;;  %v4633_v60 = vld [vmem:[%s18202_s24 + $0x110] sm:$0xff] }
 0x3e2   : > { %7982 = vmatprep.subr.bf16.mxu1 %v15400_v20 }
 0x3e3   : > { %7942 = vmatpush2.bf16.msra.mxu0 %v15271_v2 }
 0x3e4   : > { %7943 = vmatprep.subr.bf16.mxu0 %v15264_v28  ;;  %v14962_v28 = vcombine.high %v4633_v60, %v4637_v17 }
 0x3e5   : > { %7983 = vmatpush2.bf16.msra.mxu1 %v15399_v24  ;;  %v15097_v24 = vcombine.low %v4769_v49, %v4773_v50  ;;  %v4725_v49 = vld [vmem:[%s18202_s24 + $0x3f0] sm:$0xff] }
 0x3e6   : > { %7984 = vmatprep.subr.bf16.mxu1 %v15392_v3  ;;  %v4849_v50 = vld [vmem:[%s18202_s24 + $0x7d0] sm:$0xff] }
 0x3e7   : > { %7944 = vmatpush2.bf16.msra.mxu0 %v15263_v12  ;;  %v4757_v12 = vld [vmem:[%s18202_s24 + $0x4f0] sm:$0xff] }
 0x3e8   : > { %7945 = vmatprep.subr.bf16.mxu0 %v15256_v51  ;;  %v15089_v51 = vcombine.low %v4761_v61, %v4765_v62  ;;  %v15082_v14 = vcombine.high %v4753_v10, %v4757_v12  ;;  %v4841_v61 = vld [vmem:[%s18202_s24 + $0x790] sm:$0xff] }
 0x3e9   : > { %7985 = vmatpush2.bf16.msra.mxu1 %v15391_v32  ;;  %v14961_v32 = vcombine.low %v4633_v60, %v4637_v17  ;;  %v4713_v17 = vld [vmem:[%s18202_s24 + $0x390] sm:$0xff] }
 0x3ea   : > { %7986 = vmatprep.subr.bf16.mxu1 %v15384_v13  ;;  %v14954_v13 = vcombine.high %v4625_v7, %v4629_v9  ;;  %v4845_v62 = vld [vmem:[%s18202_s24 + $0x7b0] sm:$0xff] }
 0x3eb   : > { %7946 = vmatpush2.bf16.msra.mxu0 %v15255_v35  ;;  %v4749_v35 = vld [vmem:[%s18202_s24 + $0x4b0] sm:$0xff] }
 0x3ec   : > { %7947 = vmatprep.subr.bf16.mxu0 %v15248_v21  ;;  %v15081_v21 = vcombine.low %v4753_v10, %v4757_v12  ;;  %v15074_v27 = vcombine.high %v4745_v19, %v4749_v35  ;;  %v15169_v10 = vcombine.low %v4841_v61, %v4845_v62 }
 0x3ed   : > { %7987 = vmatpush2.bf16.msra.mxu1 %v15383_v39  ;;  %v14953_v39 = vcombine.low %v4625_v7, %v4629_v9  ;;  %v4837_v7 = vld [vmem:[%s18202_s24 + $0x770] sm:$0xff] }
 0x3ee   : > { %7988 = vmatprep.subr.bf16.mxu1 %v15376_v26  ;;  %v14946_v26 = vcombine.high %v4617_v15, %v4621_v18 }
 0x3ef   : > { %7948 = vmatpush2.bf16.msra.mxu0 %v15247_v41  ;;  %v4741_v41 = vld [vmem:[%s18202_s24 + $0x470] sm:$0xff] }
 0x3f0   : > { %7999 = vmatprep.subr.bf16.mxu0 %v14986_v31  ;;  %v15073_v31 = vcombine.low %v4745_v19, %v4749_v35  ;;  %v15066_v48 = vcombine.high %v4737_v44, %v4741_v41 }
 0x3f1   : > { %7989 = vmatpush2.bf16.msra.mxu1 %v15375_v46  ;;  %v14945_v46 = vcombine.low %v4617_v15, %v4621_v18  ;;  %v4829_v15 = vld [vmem:[%s18202_s24 + $0x730] sm:$0xff] }
 0x3f2   : > { %8040 = vmatprep.subr.bf16.mxu1 %v15114_v53  ;;  %v19180_v47 = vpop.f32.mrf.mxu0  ;;  %7950 = vmatmul.mubr.bf16.vlgmr.msra.gmra.mxu0 %v18409_v55  ;;  %v14938_v53 = vcombine.high %v4609_v29, %v4613_v30 }
 0x3f3   : > { %8000 = vmatpush1.bf16.msra.mxu0 %v14985_v63  ;;  %8031 = vmatprep.mubr.bf16.mxu0 %v18273_v11  ;;  %v4733_v63 = vld [vmem:[%s18202_s24 + $0x430] sm:$0xff] }
 0x3f4   : > { %v19185_v4 = vpop.f32.mrf.mxu1  ;;  %7991 = vmatmul.mubr.bf16.vlgmr.msra.gmra.mxu1 %v18415_v58  ;;  %v19188_v52 = vpop.f32.mrf.mxu0  ;;  %8001 = vmatprep.subr.bf16.mxu0 %v14978_v22  ;;  %v15065_v22 = vcombine.low %v4737_v44, %v4741_v41  ;;  %v15058_v43 = vcombine.high %v4729_v38, %v4733_v63 }
 0x3f5   : > { %8041 = vmatpush1.bf16.msra.mxu1 %v15113_v40  ;;  %8072 = vmatprep.mubr.bf16.mxu1 %v18280_v16  ;;  %v14937_v40 = vcombine.low %v4609_v29, %v4613_v30  ;;  %v4821_v29 = vld [vmem:[%s18202_s24 + $0x6f0] sm:$0xff] }
 0x3f6   : > { %v19190_v57 = vpop.f32.mrf.mxu1  ;;  %8042 = vmatprep.subr.bf16.mxu1 %v15106_v25  ;;  %v7709_v20 = vpop.f32.mrf.mxu0  ;;  %v14930_v25 = vcombine.high %v4601_v34, %v4605_v37 }
 0x3f7   : > { %8002 = vmatpush1.bf16.msra.mxu0 %v14977_v8  ;;  %v4853_v8 = vld [vmem:[%s18202_s24 + $0x7f0] sm:$0xff] }
 0x3f8   : > { %v7750_v0 = vpop.f32.mrf.mxu1  ;;  %v7710_v2 = vpop.f32.mrf.mxu0  ;;  %8003 = vmatprep.subr.bf16.mxu0 %v14970_v56  ;;  %v15057_v56 = vcombine.low %v4729_v38, %v4733_v63  ;;  %v15178_v60 = vcombine.high %v4849_v50, %v4853_v8  ;;  %v4717_v20 = vld [vmem:[%s18202_s24 + $0x3b0] sm:$0xff] }
 0x3f9   : > { %8043 = vmatpush1.bf16.msra.mxu1 %v15105_v54  ;;  %v14929_v54 = vcombine.low %v4601_v34, %v4605_v37  ;;  %v15049_v0 = vcombine.low %v4721_v5, %v4725_v49  ;;  %v15042_v2 = vcombine.high %v4713_v17, %v4717_v20  ;;  %v15041_v9 = vcombine.low %v4713_v17, %v4717_v20  ;;  %v4813_v34 = vld [vmem:[%s18202_s24 + $0x6b0] sm:$0xff] }
 0x3fa   : > { %v7751_v3 = vpop.f32.mrf.mxu1  ;;  %8044 = vmatprep.subr.bf16.mxu1 %v15098_v59  ;;  %v15050_v59 = vcombine.high %v4721_v5, %v4725_v49  ;;  %v4805_v5 = vld [vmem:[%s18202_s24 + $0x670] sm:$0xff] }
 0x3fb   : > { %8004 = vmatpush1.bf16.msra.mxu0 %v14969_v1  ;;  %v15177_v1 = vcombine.low %v4849_v50, %v4853_v8  ;;  %v4709_v3 = vld [vmem:[%s18202_s24 + $0x370] sm:$0xff] }
 0x3fc   : > { %8005 = vmatprep.subr.bf16.mxu0 %v14962_v28  ;;  %v4705_v28 = vld [vmem:[%s18202_s24 + $0x350] sm:$0xff] }
 0x3fd   : > { %8045 = vmatpush1.bf16.msra.mxu1 %v15097_v24  ;;  %v15170_v24 = vcombine.high %v4841_v61, %v4845_v62  ;;  %v15034_v12 = vcombine.high %v4705_v28, %v4709_v3  ;;  %v15033_v18 = vcombine.low %v4705_v28, %v4709_v3  ;;  %v4797_v17 = vld [vmem:[%s18202_s24 + $0x630] sm:$0xff] }
 0x3fe   : > { %8046 = vmatprep.subr.bf16.mxu1 %v15090_v6  ;;  %v4833_v6 = vld [vmem:[%s18202_s24 + $0x750] sm:$0xff] }
 0x3ff   : > { %8006 = vmatpush1.bf16.msra.mxu0 %v14961_v32  ;;  %v15162_v32 = vcombine.high %v4833_v6, %v4837_v7  ;;  %v15161_v19 = vcombine.low %v4833_v6, %v4837_v7  ;;  %v5045_v28 = vld [vmem:[%s18202_s24 + $0xdf0] sm:$0xff] }
 0x400   : > { %8007 = vmatprep.subr.bf16.mxu0 %v14954_v13  ;;  %v4701_v13 = vld [vmem:[%s18202_s24 + $0x330] sm:$0xff] }
 0x401   : > { %8047 = vmatpush1.bf16.msra.mxu1 %v15089_v51  ;;  %v4697_v51 = vld [vmem:[%s18202_s24 + $0x310] sm:$0xff] }
 0x402   : > { %8048 = vmatprep.subr.bf16.mxu1 %v15082_v14  ;;  %v4825_v14 = vld [vmem:[%s18202_s24 + $0x710] sm:$0xff]  ;;  %v15026_v35 = vcombine.high %v4697_v51, %v4701_v13  ;;  %v15025_v30 = vcombine.low %v4697_v51, %v4701_v13 }
 0x403   : > { %8008 = vmatpush1.bf16.msra.mxu0 %v14953_v39  ;;  %v15154_v39 = vcombine.high %v4825_v14, %v4829_v15  ;;  %v15153_v44 = vcombine.low %v4825_v14, %v4829_v15  ;;  %v5037_v51 = vld [vmem:[%s18202_s24 + $0xdb0] sm:$0xff] }
 0x404   : > { %8009 = vmatprep.subr.bf16.mxu0 %v14946_v26  ;;  %v4693_v26 = vld [vmem:[%s18202_s24 + $0x2f0] sm:$0xff] }
 0x405   : > { %8049 = vmatpush1.bf16.msra.mxu1 %v15081_v21  ;;  %v4689_v21 = vld [vmem:[%s18202_s24 + $0x2d0] sm:$0xff] }
 0x406   : > { %8050 = vmatprep.subr.bf16.mxu1 %v15074_v27  ;;  %v4817_v27 = vld [vmem:[%s18202_s24 + $0x6d0] sm:$0xff]  ;;  %v15018_v41 = vcombine.high %v4689_v21, %v4693_v26  ;;  %v15017_v37 = vcombine.low %v4689_v21, %v4693_v26 }
 0x407   : > { %8010 = vmatpush1.bf16.msra.mxu0 %v14945_v46  ;;  %v15146_v46 = vcombine.high %v4817_v27, %v4821_v29  ;;  %v15145_v38 = vcombine.low %v4817_v27, %v4821_v29  ;;  %v5025_v26 = vld [vmem:[%s18202_s24 + $0xd50] sm:$0xff]  ;;  %v7749_v29 = vadd.f32 %v19190_v57, %v19188_v52 }
 0x408   : > { %8011 = vmatprep.subr.bf16.mxu0 %v14938_v53  ;;  %v4685_v53 = vld [vmem:[%s18202_s24 + $0x2b0] sm:$0xff] }
 0x409   : > { %8051 = vmatpush1.bf16.msra.mxu1 %v15073_v31  ;;  %v4681_v31 = vld [vmem:[%s18202_s24 + $0x290] sm:$0xff] }
 0x40a   : > { %8052 = vmatprep.subr.bf16.mxu1 %v15066_v48  ;;  %v4809_v48 = vld [vmem:[%s18202_s24 + $0x690] sm:$0xff]  ;;  %v15010_v63 = vcombine.high %v4681_v31, %v4685_v53  ;;  %v15009_v49 = vcombine.low %v4681_v31, %v4685_v53 }
 0x40b   : > { %8012 = vmatpush1.bf16.msra.mxu0 %v14937_v40  ;;  %v15138_v40 = vcombine.high %v4809_v48, %v4813_v34  ;;  %v15137_v50 = vcombine.low %v4809_v48, %v4813_v34  ;;  %v5029_v27 = vld [vmem:[%s18202_s24 + $0xd70] sm:$0xff] }
 0x40c   : > { %8013 = vmatprep.subr.bf16.mxu0 %v14930_v25  ;;  %v4677_v25 = vld [vmem:[%s18202_s24 + $0x270] sm:$0xff]  ;;  %v15354_v52 = vcombine.high %v5025_v26, %v5029_v27 }
 0x40d   : > { %8053 = vmatpush1.bf16.msra.mxu1 %v15065_v22  ;;  %v4673_v22 = vld [vmem:[%s18202_s24 + $0x250] sm:$0xff] }
 0x40e   : > { %8054 = vmatprep.subr.bf16.mxu1 %v15058_v43  ;;  %v4801_v43 = vld [vmem:[%s18202_s24 + $0x650] sm:$0xff]  ;;  %v15002_v8 = vcombine.high %v4673_v22, %v4677_v25  ;;  %v15001_v20 = vcombine.low %v4673_v22, %v4677_v25 }
 0x40f   : > { %8014 = vmatpush1.bf16.msra.mxu0 %v14929_v54  ;;  %v15130_v54 = vcombine.high %v4801_v43, %v4805_v5  ;;  %v15129_v61 = vcombine.low %v4801_v43, %v4805_v5  ;;  %v4889_v57 = vld [vmem:[%s18202_s24 + $0x910] sm:$0xff] }
 0x410   : > { %8015 = vmatprep.subr.bf16.mxu0 %v15050_v59  ;;  %v4669_v59 = vld [vmem:[%s18202_s24 + $0x230] sm:$0xff] }
 0x411   : > { %8055 = vmatpush1.bf16.msra.mxu1 %v15057_v56  ;;  %v4665_v56 = vld [vmem:[%s18202_s24 + $0x210] sm:$0xff] }
 0x412   : > { %8056 = vmatprep.subr.bf16.mxu1 %v15178_v60  ;;  %v4793_v60 = vld [vmem:[%s18202_s24 + $0x610] sm:$0xff]  ;;  %v14994_v62 = vcombine.high %v4665_v56, %v4669_v59  ;;  %v14993_v3 = vcombine.low %v4665_v56, %v4669_v59 }
 0x413   : > { %8016 = vmatpush2.bf16.msra.mxu0 %v15049_v0  ;;  %v15122_v0 = vcombine.high %v4793_v60, %v4797_v17  ;;  %v15121_v6 = vcombine.low %v4793_v60, %v4797_v17  ;;  %v4893_v34 = vld [vmem:[%s18202_s24 + $0x930] sm:$0xff] }
 0x414   : > { %8017 = vmatprep.subr.bf16.mxu0 %v15042_v2  ;;  %v4917_v2 = vld [vmem:[%s18202_s24 + $0x9f0] sm:$0xff] }
 0x415   : > { %8057 = vmatpush2.bf16.msra.mxu1 %v15177_v1  ;;  %v4913_v1 = vld [vmem:[%s18202_s24 + $0x9d0] sm:$0xff] }
 0x416   : > { %8058 = vmatprep.subr.bf16.mxu1 %v15170_v24  ;;  %v5041_v24 = vld [vmem:[%s18202_s24 + $0xdd0] sm:$0xff]  ;;  %v15242_v7 = vcombine.high %v4913_v1, %v4917_v2  ;;  %v15241_v13 = vcombine.low %v4913_v1, %v4917_v2 }
 0x417   : > { %8018 = vmatpush2.bf16.msra.mxu0 %v15041_v9  ;;  %v15370_v9 = vcombine.high %v5041_v24, %v5045_v28  ;;  %v15369_v14 = vcombine.low %v5041_v24, %v5045_v28  ;;  %v4881_v60 = vld [vmem:[%s18202_s24 + $0x8d0] sm:$0xff] }
 0x418   : > { %8019 = vmatprep.subr.bf16.mxu0 %v15034_v12  ;;  %v4909_v12 = vld [vmem:[%s18202_s24 + $0x9b0] sm:$0xff] }
 0x419   : > { %8059 = vmatpush2.bf16.msra.mxu1 %v15169_v10  ;;  %v4905_v10 = vld [vmem:[%s18202_s24 + $0x990] sm:$0xff] }
 0x41a   : > { %8060 = vmatprep.subr.bf16.mxu1 %v15162_v32  ;;  %v5033_v32 = vld [vmem:[%s18202_s24 + $0xd90] sm:$0xff]  ;;  %v15234_v15 = vcombine.high %v4905_v10, %v4909_v12 }
 0x41b   : > { %8020 = vmatpush2.bf16.msra.mxu0 %v15033_v18  ;;  %v7747_v18 = vadd.f32 %v19185_v4, %v19180_v47  ;;  %v15233_v47 = vcombine.low %v4905_v10, %v4909_v12  ;;  %v4885_v17 = vld [vmem:[%s18202_s24 + $0x8f0] sm:$0xff] }
 0x41c   : > { %8021 = vmatprep.subr.bf16.mxu0 %v15026_v35  ;;  %v4897_v35 = vld [vmem:[%s18202_s24 + $0x950] sm:$0xff]  ;;  %v15210_v2 = vcombine.high %v4881_v60, %v4885_v17 }
 0x41d   : > { %8061 = vmatpush2.bf16.msra.mxu1 %v15161_v19  ;;  %v15362_v19 = vcombine.high %v5033_v32, %v5037_v51  ;;  %v4873_v28 = vld [vmem:[%s18202_s24 + $0x890] sm:$0xff] }
 0x41e   : > { %8062 = vmatprep.subr.bf16.mxu1 %v15154_v39  ;;  %v4901_v39 = vld [vmem:[%s18202_s24 + $0x970] sm:$0xff] }
 0x41f   : > { %8022 = vmatpush2.bf16.msra.mxu0 %v15025_v30  ;;  %v15225_v43 = vcombine.low %v4897_v35, %v4901_v39 }
 0x420   : > { %8023 = vmatprep.subr.bf16.mxu0 %v15018_v41  ;;  %v15361_v41 = vcombine.low %v5033_v32, %v5037_v51  ;;  %v4865_v51 = vld [vmem:[%s18202_s24 + $0x850] sm:$0xff] }
 0x421   : > { %8063 = vmatpush2.bf16.msra.mxu1 %v15153_v44 }
 0x422   : > { %8064 = vmatprep.subr.bf16.mxu1 %v15146_v46  ;;  %v15226_v46 = vcombine.high %v4897_v35, %v4901_v39 }
 0x423   : > { %8024 = vmatpush2.bf16.msra.mxu0 %v15017_v37 }
 0x424   : > { %8025 = vmatprep.subr.bf16.mxu0 %v15010_v63  ;;  %v5021_v63 = vld [vmem:[%s18202_s24 + $0xd30] sm:$0xff] }
 0x425   : > { %8065 = vmatpush2.bf16.msra.mxu1 %v15145_v38  ;;  %v5017_v38 = vld [vmem:[%s18202_s24 + $0xd10] sm:$0xff] }
 0x426   : > { %8066 = vmatprep.subr.bf16.mxu1 %v15138_v40  ;;  %v15346_v59 = vcombine.high %v5017_v38, %v5021_v63  ;;  %v15345_v1 = vcombine.low %v5017_v38, %v5021_v63  ;;  %v4973_v38 = vld [vmem:[%s18202_s24 + $0xbb0] sm:$0xff] }
 0x427   : > { %8026 = vmatpush2.bf16.msra.mxu0 %v15009_v49  ;;  %v15353_v49 = vcombine.low %v5025_v26, %v5029_v27  ;;  %v4861_v26 = vld [vmem:[%s18202_s24 + $0x830] sm:$0xff] }
 0x428   : > { %8027 = vmatprep.subr.bf16.mxu0 %v15002_v8  ;;  %v4985_v27 = vld [vmem:[%s18202_s24 + $0xc10] sm:$0xff] }
 0x429   : > { %8067 = vmatpush2.bf16.msra.mxu1 %v15137_v50  ;;  %v15218_v50 = vcombine.high %v4889_v57, %v4893_v34  ;;  %v5097_v63 = vld [vmem:[%s18202_s24 + $0xf90] sm:$0xff] }
 0x42a   : > { %8068 = vmatprep.subr.bf16.mxu1 %v15130_v54 }
 0x42b   : > { %8028 = vmatpush2.bf16.msra.mxu0 %v15001_v20  ;;  %v5009_v20 = vld [vmem:[%s18202_s24 + $0xcd0] sm:$0xff] }
 0x42c   : > { %8029 = vmatprep.subr.bf16.mxu0 %v14994_v62 }
 0x42d   : > { %8069 = vmatpush2.bf16.msra.mxu1 %v15129_v61  ;;  %v5013_v61 = vld [vmem:[%s18202_s24 + $0xcf0] sm:$0xff] }
 0x42e   : > { %8070 = vmatprep.subr.bf16.mxu1 %v15122_v0  ;;  %v15217_v0 = vcombine.low %v4889_v57, %v4893_v34  ;;  %v15338_v24 = vcombine.high %v5009_v20, %v5013_v61  ;;  %v15337_v10 = vcombine.low %v5009_v20, %v5013_v61  ;;  %v4953_v20 = vld [vmem:[%s18202_s24 + $0xb10] sm:$0xff] }
 0x42f   : > { %8030 = vmatpush2.bf16.msra.mxu0 %v14993_v3  ;;  %v4877_v3 = vld [vmem:[%s18202_s24 + $0x8b0] sm:$0xff] }
 0x430   : > { %8081 = vmatprep.subr.bf16.mxu0 %v15242_v7  ;;  %v5005_v7 = vld [vmem:[%s18202_s24 + $0xcb0] sm:$0xff]  ;;  %v15202_v12 = vcombine.high %v4873_v28, %v4877_v3 }
 0x431   : > { %8071 = vmatpush2.bf16.msra.mxu1 %v15121_v6  ;;  %v5001_v6 = vld [vmem:[%s18202_s24 + $0xc90] sm:$0xff] }
 0x432   : > { %8122 = vmatprep.subr.bf16.mxu1 %v15370_v9  ;;  %v7787_v21 = vpop.f32.mrf.mxu0  ;;  %8032 = vmatmul.mubr.bf16.vlgmr.msra.gmra.mxu0 %v18327_v33  ;;  %v15209_v9 = vcombine.low %v4881_v60, %v4885_v17  ;;  %v15330_v32 = vcombine.high %v5001_v6, %v5005_v7  ;;  %v4957_v61 = vld [vmem:[%s18202_s24 + $0xb30] sm:$0xff] }
 0x433   : > { %v7788_v30 = vadd.f32 %v7787_v21, %v7747_v18  ;;  %8082 = vmatpush1.bf16.msra.mxu0 %v15241_v13  ;;  %8113 = vmatprep.mubr.bf16.mxu0 %v18339_v42  ;;  %v4869_v13 = vld [vmem:[%s18202_s24 + $0x870] sm:$0xff]  ;;  %v15201_v18 = vcombine.low %v4873_v28, %v4877_v3 }
 0x434   : > { %v7828_v44 = vpop.f32.mrf.mxu1  ;;  %8073 = vmatmul.mubr.bf16.vlgmr.msra.gmra.mxu1 %v18335_v36  ;;  %v7789_v4 = vpop.f32.mrf.mxu0  ;;  %8083 = vmatprep.subr.bf16.mxu0 %v15234_v15  ;;  %v4997_v15 = vld [vmem:[%s18202_s24 + $0xc70] sm:$0xff]  ;;  %v15194_v35 = vcombine.high %v4865_v51, %v4869_v13 }
 0x435   : > { %8123 = vmatpush1.bf16.msra.mxu1 %v15369_v14  ;;  %v7829_v31 = vadd.f32 %v7828_v44, %v7788_v30  ;;  %v7790_v53 = vadd.f32 %v7789_v4, %v7749_v29  ;;  %8154 = vmatprep.mubr.bf16.mxu1 %v18344_v45  ;;  %v4993_v14 = vld [vmem:[%s18202_s24 + $0xc50] sm:$0xff]  ;;  %v15193_v30 = vcombine.low %v4865_v51, %v4869_v13 }
 0x436   : > { %v7830_v48 = vpop.f32.mrf.mxu1  ;;  %8124 = vmatprep.subr.bf16.mxu1 %v15362_v19  ;;  %v7791_v37 = vpop.f32.mrf.mxu0  ;;  %v15329_v19 = vcombine.low %v5001_v6, %v5005_v7  ;;  %v15322_v39 = vcombine.high %v4993_v14, %v4997_v15  ;;  %v4857_v21 = vld [vmem:[%s18202_s24 + $0x810] sm:$0xff]  ;;  %v15321_v44 = vcombine.low %v4993_v14, %v4997_v15 }
 0x437   : > { %v8334_v40 = vrot.slane %v7829_v31, %v18634_v23  ;;  %v7831_v22 = vadd.f32 %v7830_v48, %v7790_v53  ;;  %8084 = vmatpush1.bf16.msra.mxu0 %v15233_v47  ;;  %v4989_v29 = vld [vmem:[%s18202_s24 + $0xc30] sm:$0xff]  ;;  %v15186_v47 = vcombine.high %v4857_v21, %v4861_v26  ;;  %v15185_v48 = vcombine.low %v4857_v21, %v4861_v26 }
 0x438   : > { %v7832_v25 = vpop.f32.mrf.mxu1  ;;  %v7792_v5 = vpop.f32.mrf.mxu0  ;;  %8085 = vmatprep.subr.bf16.mxu0 %v15226_v46  ;;  %v15314_v4 = vcombine.high %v4985_v27, %v4989_v29  ;;  %v4981_v46 = vld [vmem:[%s18202_s24 + $0xbf0] sm:$0xff] }
 0x439   : > { %8125 = vmatpush1.bf16.msra.mxu1 %v15361_v41  ;;  %v8335_v8 = vcombine.high %v8334_v40, %v8334_v40  ;;  %15437 = vst.sshfl [vmem:[%s19272_s9] sm:$0x1 pattern:$0x73625140] %v8334_v40  ;;  %v8362_v54 = vrot.slane %v7831_v22, %v18634_v23  ;;  %v4977_v41 = vld [vmem:[%s18202_s24 + $0xbd0] sm:$0xff] }
 0x43a   : > { %v7833_v56 = vpop.f32.mrf.mxu1  ;;  %8126 = vmatprep.subr.bf16.mxu1 %v15354_v52  ;;  %v5105_v31 = vld [vmem:[%s18202_s24 + $0xfd0] sm:$0xff]  ;;  %v15313_v52 = vcombine.low %v4985_v27, %v4989_v29  ;;  %v15306_v57 = vcombine.high %v4977_v41, %v4981_v46  ;;  %v15305_v22 = vcombine.low %v4977_v41, %v4981_v46 }
 0x43b   : > { %15438 = vst.sshfl [vmem:[%s19272_s9 + $0x40] sm:$0x1 pattern:$0x73625140] %v8335_v8  ;;  %v8363_v62 = vcombine.high %v8362_v54, %v8362_v54  ;;  %8086 = vmatpush1.bf16.msra.mxu0 %v15225_v43  ;;  %v5109_v53 = vld [vmem:[%s18202_s24 + $0xff0] sm:$0xff] }
 0x43c   : > { %16097 = vst.sshfl [vmem:[%s19272_s9 + $0x1] sm:$0x1 pattern:$0x73625140] %v8362_v54  ;;  %8087 = vmatprep.subr.bf16.mxu0 %v15218_v50  ;;  %v15434_v34 = vcombine.high %v5105_v31, %v5109_v53  ;;  %v4969_v37 = vld [vmem:[%s18202_s24 + $0xb90] sm:$0xff]  ;;  %v15433_v25 = vcombine.low %v5105_v31, %v5109_v53 }
 0x43d   : > { %8127 = vmatpush1.bf16.msra.mxu1 %v15353_v49  ;;  %16098 = vst.sshfl [vmem:[%s19272_s9 + $0x41] sm:$0x1 pattern:$0x73625140] %v8363_v62  ;;  %v5101_v40 = vld [vmem:[%s18202_s24 + $0xfb0] sm:$0xff]  ;;  %v15298_v43 = vcombine.high %v4969_v37, %v4973_v38  ;;  %v15297_v56 = vcombine.low %v4969_v37, %v4973_v38  ;;  %v4658_v38 = vld [vmem:[%s18202_s24 + $0x1d8] sm:$0xff] }
 0x43e   : > { %8128 = vmatprep.subr.bf16.mxu1 %v15346_v59  ;;  %v15426_v5 = vcombine.high %v5097_v63, %v5101_v40  ;;  %v4961_v49 = vld [vmem:[%s18202_s24 + $0xb50] sm:$0xff]  ;;  %v15425_v59 = vcombine.low %v5097_v63, %v5101_v40  ;;  %v4662_v63 = vld [vmem:[%s18202_s24 + $0x1f8] sm:$0xff] }
 0x43f   : > { %8088 = vmatpush1.bf16.msra.mxu0 %v15217_v0  ;;  %v4965_v50 = vld [vmem:[%s18202_s24 + $0xb70] sm:$0xff]  ;;  %v4786_v40 = vld [vmem:[%s18202_s24 + $0x5d8] sm:$0xff] }
 0x440   : > { %8089 = vmatprep.subr.bf16.mxu0 %v15210_v2  ;;  %v5089_v8 = vld [vmem:[%s18202_s24 + $0xf50] sm:$0xff]  ;;  %v15290_v60 = vcombine.high %v4961_v49, %v4965_v50 }
 0x441   : > { %8129 = vmatpush1.bf16.msra.mxu1 %v15345_v1  ;;  %v5093_v54 = vld [vmem:[%s18202_s24 + $0xf70] sm:$0xff]  ;;  %v15289_v1 = vcombine.low %v4961_v49, %v4965_v50  ;;  %v4650_v50 = vld [vmem:[%s18202_s24 + $0x198] sm:$0xff] }
 0x442   : > { %8130 = vmatprep.subr.bf16.mxu1 %v15338_v24  ;;  %v15418_v17 = vcombine.high %v5089_v8, %v5093_v54  ;;  %v5081_v62 = vld [vmem:[%s18202_s24 + $0xf10] sm:$0xff]  ;;  %v15417_v2 = vcombine.low %v5089_v8, %v5093_v54  ;;  %v15282_v24 = vcombine.high %v4953_v20, %v4957_v61  ;;  %v4654_v8 = vld [vmem:[%s18202_s24 + $0x1b8] sm:$0xff] }
 0x443   : > { %8090 = vmatpush1.bf16.msra.mxu0 %v15209_v9  ;;  %v5085_v0 = vld [vmem:[%s18202_s24 + $0xf30] sm:$0xff]  ;;  %v4778_v54 = vld [vmem:[%s18202_s24 + $0x598] sm:$0xff] }
 0x444   : > { %8091 = vmatprep.subr.bf16.mxu0 %v15202_v12  ;;  %v15410_v28 = vcombine.high %v5081_v62, %v5085_v0  ;;  %v4945_v3 = vld [vmem:[%s18202_s24 + $0xad0] sm:$0xff]  ;;  %v15409_v12 = vcombine.low %v5081_v62, %v5085_v0  ;;  %v4646_v62 = vld [vmem:[%s18202_s24 + $0x178] sm:$0xff] }
 0x445   : > { %8131 = vmatpush1.bf16.msra.mxu1 %v15337_v10  ;;  %v4949_v6 = vld [vmem:[%s18202_s24 + $0xaf0] sm:$0xff]  ;;  %v15281_v10 = vcombine.low %v4953_v20, %v4957_v61  ;;  %v4642_v61 = vld [vmem:[%s18202_s24 + $0x158] sm:$0xff] }
 0x446   : > { %8132 = vmatprep.subr.bf16.mxu1 %v15330_v32  ;;  %v5073_v7 = vld [vmem:[%s18202_s24 + $0xed0] sm:$0xff]  ;;  %v15274_v32 = vcombine.high %v4945_v3, %v4949_v6 }
 0x447   : > { %8092 = vmatpush1.bf16.msra.mxu0 %v15201_v18  ;;  %v5077_v9 = vld [vmem:[%s18202_s24 + $0xef0] sm:$0xff] }
 0x448   : > { %8093 = vmatprep.subr.bf16.mxu0 %v15194_v35  ;;  %v15402_v51 = vcombine.high %v5073_v7, %v5077_v9  ;;  %v4937_v13 = vld [vmem:[%s18202_s24 + $0xa90] sm:$0xff]  ;;  %v15401_v35 = vcombine.low %v5073_v7, %v5077_v9  ;;  %v14972_v7 = vcombine.high %v4642_v61, %v4646_v62 }
 0x449   : > { %8133 = vmatpush1.bf16.msra.mxu1 %v15329_v19  ;;  %v4941_v14 = vld [vmem:[%s18202_s24 + $0xab0] sm:$0xff]  ;;  %v15273_v19 = vcombine.low %v4945_v3, %v4949_v6 }
 0x44a   : > { %8134 = vmatprep.subr.bf16.mxu1 %v15322_v39  ;;  %v5065_v15 = vld [vmem:[%s18202_s24 + $0xe90] sm:$0xff]  ;;  %v15266_v39 = vcombine.high %v4937_v13, %v4941_v14 }
 0x44b   : > { %8094 = vmatpush1.bf16.msra.mxu0 %v15193_v30  ;;  %v5069_v18 = vld [vmem:[%s18202_s24 + $0xeb0] sm:$0xff] }
 0x44c   : > { %8095 = vmatprep.subr.bf16.mxu0 %v15186_v47  ;;  %v15394_v21 = vcombine.high %v5065_v15, %v5069_v18  ;;  %v4929_v26 = vld [vmem:[%s18202_s24 + $0xa50] sm:$0xff]  ;;  %v15393_v47 = vcombine.low %v5065_v15, %v5069_v18  ;;  %v14971_v18 = vcombine.low %v4642_v61, %v4646_v62  ;;  %v4722_v62 = vld [vmem:[%s18202_s24 + $0x3d8] sm:$0xff] }
 0x44d   : > { %8135 = vmatpush1.bf16.msra.mxu1 %v15321_v44  ;;  %v4933_v27 = vld [vmem:[%s18202_s24 + $0xa70] sm:$0xff]  ;;  %v15265_v44 = vcombine.low %v4937_v13, %v4941_v14  ;;  %v4762_v13 = vld [vmem:[%s18202_s24 + $0x518] sm:$0xff] }
 0x44e   : > { %8136 = vmatprep.subr.bf16.mxu1 %v15314_v4  ;;  %v5057_v29 = vld [vmem:[%s18202_s24 + $0xe50] sm:$0xff]  ;;  %v15258_v4 = vcombine.high %v4929_v26, %v4933_v27  ;;  %v4766_v14 = vld [vmem:[%s18202_s24 + $0x538] sm:$0xff] }
 0x44f   : > { %8096 = vmatpush1.bf16.msra.mxu0 %v15185_v48  ;;  %v5061_v30 = vld [vmem:[%s18202_s24 + $0xe70] sm:$0xff] }
 0x450   : > { %8097 = vmatprep.subr.bf16.mxu0 %v15306_v57  ;;  %v15386_v41 = vcombine.high %v5057_v29, %v5061_v30  ;;  %v4921_v46 = vld [vmem:[%s18202_s24 + $0xa10] sm:$0xff]  ;;  %v15385_v57 = vcombine.low %v5057_v29, %v5061_v30  ;;  %v4630_v29 = vld [vmem:[%s18202_s24 + $0xf8] sm:$0xff] }
 0x451   : > { %8137 = vmatpush1.bf16.msra.mxu1 %v15313_v52  ;;  %v4925_v31 = vld [vmem:[%s18202_s24 + $0xa30] sm:$0xff]  ;;  %v15257_v52 = vcombine.low %v4929_v26, %v4933_v27  ;;  %v15092_v26 = vcombine.high %v4762_v13, %v4766_v14  ;;  %v4626_v27 = vld [vmem:[%s18202_s24 + $0xd8] sm:$0xff] }
 0x452   : > { %8138 = vmatprep.subr.bf16.mxu1 %v15434_v34  ;;  %v5049_v53 = vld [vmem:[%s18202_s24 + $0xe10] sm:$0xff]  ;;  %v15250_v34 = vcombine.high %v4921_v46, %v4925_v31  ;;  %v4754_v30 = vld [vmem:[%s18202_s24 + $0x4d8] sm:$0xff] }
 0x453   : > { %8098 = vmatpush2.bf16.msra.mxu0 %v15305_v22  ;;  %v5053_v48 = vld [vmem:[%s18202_s24 + $0xe30] sm:$0xff]  ;;  %v4790_v22 = vld [vmem:[%s18202_s24 + $0x5f8] sm:$0xff] }
 0x454   : > { %8099 = vmatprep.subr.bf16.mxu0 %v15298_v43  ;;  %v15378_v37 = vcombine.high %v5049_v53, %v5053_v48  ;;  %v15377_v43 = vcombine.low %v5049_v53, %v5053_v48  ;;  %v15116_v49 = vcombine.high %v4786_v40, %v4790_v22  ;;  %v4622_v53 = vld [vmem:[%s18202_s24 + $0xb8] sm:$0xff] }
 0x455   : > { %8139 = vmatpush2.bf16.msra.mxu1 %v15433_v25  ;;  %v15249_v25 = vcombine.low %v4921_v46, %v4925_v31  ;;  %v4618_v31 = vld [vmem:[%s18202_s24 + $0x98] sm:$0xff] }
 0x456   : > { %8140 = vmatprep.subr.bf16.mxu1 %v15426_v5  ;;  %v14988_v5 = vcombine.high %v4658_v38, %v4662_v63  ;;  %v4746_v48 = vld [vmem:[%s18202_s24 + $0x498] sm:$0xff] }
 0x457   : > { %8100 = vmatpush2.bf16.msra.mxu0 %v15297_v56  ;;  %v4782_v56 = vld [vmem:[%s18202_s24 + $0x5b8] sm:$0xff] }
 0x458   : > { %8101 = vmatprep.subr.bf16.mxu0 %v15290_v60  ;;  %v15115_v60 = vcombine.low %v4786_v40, %v4790_v22  ;;  %v15108_v20 = vcombine.high %v4778_v54, %v4782_v56  ;;  %v15107_v6 = vcombine.low %v4778_v54, %v4782_v56  ;;  %v4614_v40 = vld [vmem:[%s18202_s24 + $0x78] sm:$0xff] }
 0x459   : > { %8141 = vmatpush2.bf16.msra.mxu1 %v15425_v59  ;;  %v14987_v59 = vcombine.low %v4658_v38, %v4662_v63  ;;  %v4610_v63 = vld [vmem:[%s18202_s24 + $0x58] sm:$0xff] }
 0x45a   : > { %8142 = vmatprep.subr.bf16.mxu1 %v15418_v17  ;;  %v14980_v17 = vcombine.high %v4650_v50, %v4654_v8  ;;  %v4738_v22 = vld [vmem:[%s18202_s24 + $0x458] sm:$0xff] }
 0x45b   : > { %8102 = vmatpush2.bf16.msra.mxu0 %v15289_v1  ;;  %v4770_v1 = vld [vmem:[%s18202_s24 + $0x558] sm:$0xff] }
 0x45c   : > { %8103 = vmatprep.subr.bf16.mxu0 %v15282_v24  ;;  %v4606_v54 = vld [vmem:[%s18202_s24 + $0x38] sm:$0xff] }
 0x45d   : > { %8143 = vmatpush2.bf16.msra.mxu1 %v15417_v2  ;;  %v4774_v2 = vld [vmem:[%s18202_s24 + $0x578] sm:$0xff] }
 0x45e   : > { %8144 = vmatprep.subr.bf16.mxu1 %v15410_v28  ;;  %v14979_v28 = vcombine.low %v4650_v50, %v4654_v8  ;;  %v4602_v8 = vld [vmem:[%s18202_s24 + $0x18] sm:$0xff] }
 0x45f   : > { %8104 = vmatpush2.bf16.msra.mxu0 %v15281_v10  ;;  %v15100_v10 = vcombine.high %v4770_v1, %v4774_v2  ;;  %v4730_v56 = vld [vmem:[%s18202_s24 + $0x418] sm:$0xff] }
 0x460   : > { %8105 = vmatprep.subr.bf16.mxu0 %v15274_v32  ;;  %v4638_v32 = vld [vmem:[%s18202_s24 + $0x138] sm:$0xff] }
 0x461   : > { %8145 = vmatpush2.bf16.msra.mxu1 %v15409_v12  ;;  %v4634_v12 = vld [vmem:[%s18202_s24 + $0x118] sm:$0xff] }
 0x462   : > { %8146 = vmatprep.subr.bf16.mxu1 %v15402_v51 }
 0x463   : > { %8106 = vmatpush2.bf16.msra.mxu0 %v15273_v19 }
 0x464   : > { %8107 = vmatprep.subr.bf16.mxu0 %v15266_v39  ;;  %v14964_v39 = vcombine.high %v4634_v12, %v4638_v32 }
 0x465   : > { %8147 = vmatpush2.bf16.msra.mxu1 %v15401_v35  ;;  %v15099_v35 = vcombine.low %v4770_v1, %v4774_v2  ;;  %v4726_v1 = vld [vmem:[%s18202_s24 + $0x3f8] sm:$0xff] }
 0x466   : > { %8148 = vmatprep.subr.bf16.mxu1 %v15394_v21  ;;  %v4850_v2 = vld [vmem:[%s18202_s24 + $0x7d8] sm:$0xff] }
 0x467   : > { %8108 = vmatpush2.bf16.msra.mxu0 %v15265_v44  ;;  %v4758_v44 = vld [vmem:[%s18202_s24 + $0x4f8] sm:$0xff] }
 0x468   : > { %8109 = vmatprep.subr.bf16.mxu0 %v15258_v4  ;;  %v15091_v4 = vcombine.low %v4762_v13, %v4766_v14  ;;  %v15084_v46 = vcombine.high %v4754_v30, %v4758_v44  ;;  %v4842_v13 = vld [vmem:[%s18202_s24 + $0x798] sm:$0xff] }
 0x469   : > { %8149 = vmatpush2.bf16.msra.mxu1 %v15393_v47  ;;  %v14963_v47 = vcombine.low %v4634_v12, %v4638_v32  ;;  %v4714_v32 = vld [vmem:[%s18202_s24 + $0x398] sm:$0xff] }
 0x46a   : > { %8150 = vmatprep.subr.bf16.mxu1 %v15386_v41  ;;  %v14956_v41 = vcombine.high %v4626_v27, %v4630_v29  ;;  %v4846_v14 = vld [vmem:[%s18202_s24 + $0x7b8] sm:$0xff] }
 0x46b   : > { %8110 = vmatpush2.bf16.msra.mxu0 %v15257_v52  ;;  %v4750_v52 = vld [vmem:[%s18202_s24 + $0x4b8] sm:$0xff] }
 0x46c   : > { %8111 = vmatprep.subr.bf16.mxu0 %v15250_v34  ;;  %v15083_v34 = vcombine.low %v4754_v30, %v4758_v44  ;;  %v15076_v38 = vcombine.high %v4746_v48, %v4750_v52  ;;  %v15171_v30 = vcombine.low %v4842_v13, %v4846_v14 }
 0x46d   : > { %8151 = vmatpush2.bf16.msra.mxu1 %v15385_v57  ;;  %v14955_v57 = vcombine.low %v4626_v27, %v4630_v29  ;;  %v4838_v27 = vld [vmem:[%s18202_s24 + $0x778] sm:$0xff] }
 0x46e   : > { %8152 = vmatprep.subr.bf16.mxu1 %v15378_v37  ;;  %v14948_v37 = vcombine.high %v4618_v31, %v4622_v53 }
 0x46f   : > { %8112 = vmatpush2.bf16.msra.mxu0 %v15249_v25  ;;  %v4742_v25 = vld [vmem:[%s18202_s24 + $0x478] sm:$0xff] }
 0x470   : > { %8163 = vmatprep.subr.bf16.mxu0 %v14988_v5  ;;  %v15075_v5 = vcombine.low %v4746_v48, %v4750_v52  ;;  %v15068_v50 = vcombine.high %v4738_v22, %v4742_v25 }
 0x471   : > { %8153 = vmatpush2.bf16.msra.mxu1 %v15377_v43  ;;  %v14947_v43 = vcombine.low %v4618_v31, %v4622_v53  ;;  %v4830_v31 = vld [vmem:[%s18202_s24 + $0x738] sm:$0xff] }
 0x472   : > { %8204 = vmatprep.subr.bf16.mxu1 %v15116_v49  ;;  %v19337_v0 = vpop.f32.mrf.mxu0  ;;  %8114 = vmatmul.mubr.bf16.vlgmr.msra.gmra.mxu0 %v18409_v55  ;;  %v14940_v49 = vcombine.high %v4610_v63, %v4614_v40 }
 0x473   : > { %8164 = vmatpush1.bf16.msra.mxu0 %v14987_v59  ;;  %8195 = vmatprep.mubr.bf16.mxu0 %v18273_v11  ;;  %v4734_v59 = vld [vmem:[%s18202_s24 + $0x438] sm:$0xff] }
 0x474   : > { %v19342_v24 = vpop.f32.mrf.mxu1  ;;  %8155 = vmatmul.mubr.bf16.vlgmr.msra.gmra.mxu1 %v18415_v58  ;;  %v19345_v3 = vpop.f32.mrf.mxu0  ;;  %8165 = vmatprep.subr.bf16.mxu0 %v14980_v17  ;;  %v15067_v17 = vcombine.low %v4738_v22, %v4742_v25  ;;  %v15060_v61 = vcombine.high %v4730_v56, %v4734_v59 }
 0x475   : > { %8205 = vmatpush1.bf16.msra.mxu1 %v15115_v60  ;;  %8236 = vmatprep.mubr.bf16.mxu1 %v18280_v16  ;;  %v14939_v60 = vcombine.low %v4610_v63, %v4614_v40  ;;  %v4822_v63 = vld [vmem:[%s18202_s24 + $0x6f8] sm:$0xff] }
 0x476   : > { %v19347_v9 = vpop.f32.mrf.mxu1  ;;  %8206 = vmatprep.subr.bf16.mxu1 %v15108_v20  ;;  %v7873_v51 = vpop.f32.mrf.mxu0  ;;  %v14932_v20 = vcombine.high %v4602_v8, %v4606_v54 }
 0x477   : > { %8166 = vmatpush1.bf16.msra.mxu0 %v14979_v28  ;;  %v4854_v28 = vld [vmem:[%s18202_s24 + $0x7f8] sm:$0xff] }
 0x478   : > { %v7914_v15 = vpop.f32.mrf.mxu1  ;;  %v7874_v19 = vpop.f32.mrf.mxu0  ;;  %8167 = vmatprep.subr.bf16.mxu0 %v14972_v7  ;;  %v15059_v7 = vcombine.low %v4730_v56, %v4734_v59  ;;  %v15180_v12 = vcombine.high %v4850_v2, %v4854_v28  ;;  %v4718_v51 = vld [vmem:[%s18202_s24 + $0x3b8] sm:$0xff] }
 0x479   : > { %8207 = vmatpush1.bf16.msra.mxu1 %v15107_v6  ;;  %v14931_v6 = vcombine.low %v4602_v8, %v4606_v54  ;;  %v15051_v15 = vcombine.low %v4722_v62, %v4726_v1  ;;  %v15044_v19 = vcombine.high %v4714_v32, %v4718_v51  ;;  %v15043_v29 = vcombine.low %v4714_v32, %v4718_v51  ;;  %v4814_v8 = vld [vmem:[%s18202_s24 + $0x6b8] sm:$0xff] }
 0x47a   : > { %v7915_v21 = vpop.f32.mrf.mxu1  ;;  %8208 = vmatprep.subr.bf16.mxu1 %v15100_v10  ;;  %v15052_v10 = vcombine.high %v4722_v62, %v4726_v1  ;;  %v4806_v62 = vld [vmem:[%s18202_s24 + $0x678] sm:$0xff] }
 0x47b   : > { %8168 = vmatpush1.bf16.msra.mxu0 %v14971_v18  ;;  %v15179_v18 = vcombine.low %v4850_v2, %v4854_v28  ;;  %v4710_v21 = vld [vmem:[%s18202_s24 + $0x378] sm:$0xff] }
 0x47c   : > { %8169 = vmatprep.subr.bf16.mxu0 %v14964_v39  ;;  %v4706_v39 = vld [vmem:[%s18202_s24 + $0x358] sm:$0xff] }
 0x47d   : > { %8209 = vmatpush1.bf16.msra.mxu1 %v15099_v35  ;;  %v15172_v35 = vcombine.high %v4842_v13, %v4846_v14  ;;  %v15036_v44 = vcombine.high %v4706_v39, %v4710_v21  ;;  %v15035_v53 = vcombine.low %v4706_v39, %v4710_v21  ;;  %v4798_v32 = vld [vmem:[%s18202_s24 + $0x638] sm:$0xff] }
 0x47e   : > { %8210 = vmatprep.subr.bf16.mxu1 %v15092_v26  ;;  %v4834_v26 = vld [vmem:[%s18202_s24 + $0x758] sm:$0xff] }
 0x47f   : > { %8170 = vmatpush1.bf16.msra.mxu0 %v14963_v47  ;;  %v15164_v47 = vcombine.high %v4834_v26, %v4838_v27  ;;  %v15163_v48 = vcombine.low %v4834_v26, %v4838_v27  ;;  %v5046_v39 = vld [vmem:[%s18202_s24 + $0xdf8] sm:$0xff] }
 0x480   : > { %8171 = vmatprep.subr.bf16.mxu0 %v14956_v41  ;;  %v4702_v41 = vld [vmem:[%s18202_s24 + $0x338] sm:$0xff] }
 0x481   : > { %8211 = vmatpush1.bf16.msra.mxu1 %v15091_v4  ;;  %v4698_v4 = vld [vmem:[%s18202_s24 + $0x318] sm:$0xff] }
 0x482   : > { %8212 = vmatprep.subr.bf16.mxu1 %v15084_v46  ;;  %v4826_v46 = vld [vmem:[%s18202_s24 + $0x718] sm:$0xff]  ;;  %v15028_v52 = vcombine.high %v4698_v4, %v4702_v41  ;;  %v15027_v40 = vcombine.low %v4698_v4, %v4702_v41 }
 0x483   : > { %8172 = vmatpush1.bf16.msra.mxu0 %v14955_v57  ;;  %v15156_v57 = vcombine.high %v4826_v46, %v4830_v31  ;;  %v15155_v22 = vcombine.low %v4826_v46, %v4830_v31  ;;  %v5038_v4 = vld [vmem:[%s18202_s24 + $0xdb8] sm:$0xff] }
 0x484   : > { %8173 = vmatprep.subr.bf16.mxu0 %v14948_v37  ;;  %v4694_v37 = vld [vmem:[%s18202_s24 + $0x2f8] sm:$0xff] }
 0x485   : > { %8213 = vmatpush1.bf16.msra.mxu1 %v15083_v34  ;;  %v4690_v34 = vld [vmem:[%s18202_s24 + $0x2d8] sm:$0xff] }
 0x486   : > { %8214 = vmatprep.subr.bf16.mxu1 %v15076_v38  ;;  %v4818_v38 = vld [vmem:[%s18202_s24 + $0x6d8] sm:$0xff]  ;;  %v15020_v25 = vcombine.high %v4690_v34, %v4694_v37  ;;  %v15019_v54 = vcombine.low %v4690_v34, %v4694_v37 }
 0x487   : > { %8174 = vmatpush1.bf16.msra.mxu0 %v14947_v43  ;;  %v15148_v43 = vcombine.high %v4818_v38, %v4822_v63  ;;  %v15147_v56 = vcombine.low %v4818_v38, %v4822_v63  ;;  %v5026_v37 = vld [vmem:[%s18202_s24 + $0xd58] sm:$0xff]  ;;  %v7913_v63 = vadd.f32 %v19347_v9, %v19345_v3 }
 0x488   : > { %8175 = vmatprep.subr.bf16.mxu0 %v14940_v49  ;;  %v4686_v49 = vld [vmem:[%s18202_s24 + $0x2b8] sm:$0xff] }
 0x489   : > { %8215 = vmatpush1.bf16.msra.mxu1 %v15075_v5  ;;  %v4682_v5 = vld [vmem:[%s18202_s24 + $0x298] sm:$0xff] }
 0x48a   : > { %8216 = vmatprep.subr.bf16.mxu1 %v15068_v50  ;;  %v4810_v50 = vld [vmem:[%s18202_s24 + $0x698] sm:$0xff]  ;;  %v15012_v59 = vcombine.high %v4682_v5, %v4686_v49  ;;  %v15011_v1 = vcombine.low %v4682_v5, %v4686_v49 }
 0x48b   : > { %8176 = vmatpush1.bf16.msra.mxu0 %v14939_v60  ;;  %v15140_v60 = vcombine.high %v4810_v50, %v4814_v8  ;;  %v15139_v2 = vcombine.low %v4810_v50, %v4814_v8  ;;  %v5030_v38 = vld [vmem:[%s18202_s24 + $0xd78] sm:$0xff] }
 0x48c   : > { %8177 = vmatprep.subr.bf16.mxu0 %v14932_v20  ;;  %v4678_v20 = vld [vmem:[%s18202_s24 + $0x278] sm:$0xff]  ;;  %v15356_v3 = vcombine.high %v5026_v37, %v5030_v38 }
 0x48d   : > { %8217 = vmatpush1.bf16.msra.mxu1 %v15067_v17  ;;  %v4674_v17 = vld [vmem:[%s18202_s24 + $0x258] sm:$0xff] }
 0x48e   : > { %8218 = vmatprep.subr.bf16.mxu1 %v15060_v61  ;;  %v4802_v61 = vld [vmem:[%s18202_s24 + $0x658] sm:$0xff]  ;;  %v15004_v28 = vcombine.high %v4674_v17, %v4678_v20  ;;  %v15003_v51 = vcombine.low %v4674_v17, %v4678_v20 }
 0x48f   : > { %8178 = vmatpush1.bf16.msra.mxu0 %v14931_v6  ;;  %v15132_v6 = vcombine.high %v4802_v61, %v4806_v62  ;;  %v15131_v13 = vcombine.low %v4802_v61, %v4806_v62  ;;  %v4890_v9 = vld [vmem:[%s18202_s24 + $0x918] sm:$0xff] }
 0x490   : > { %8179 = vmatprep.subr.bf16.mxu0 %v15052_v10  ;;  %v4670_v10 = vld [vmem:[%s18202_s24 + $0x238] sm:$0xff] }
 0x491   : > { %8219 = vmatpush1.bf16.msra.mxu1 %v15059_v7  ;;  %v4666_v7 = vld [vmem:[%s18202_s24 + $0x218] sm:$0xff] }
 0x492   : > { %8220 = vmatprep.subr.bf16.mxu1 %v15180_v12  ;;  %v4794_v12 = vld [vmem:[%s18202_s24 + $0x618] sm:$0xff]  ;;  %v14996_v14 = vcombine.high %v4666_v7, %v4670_v10  ;;  %v14995_v21 = vcombine.low %v4666_v7, %v4670_v10 }
 0x493   : > { %8180 = vmatpush2.bf16.msra.mxu0 %v15051_v15  ;;  %v15124_v15 = vcombine.high %v4794_v12, %v4798_v32  ;;  %v15123_v26 = vcombine.low %v4794_v12, %v4798_v32  ;;  %v4894_v8 = vld [vmem:[%s18202_s24 + $0x938] sm:$0xff] }
 0x494   : > { %8181 = vmatprep.subr.bf16.mxu0 %v15044_v19  ;;  %v4918_v19 = vld [vmem:[%s18202_s24 + $0x9f8] sm:$0xff] }
 0x495   : > { %8221 = vmatpush2.bf16.msra.mxu1 %v15179_v18  ;;  %v4914_v18 = vld [vmem:[%s18202_s24 + $0x9d8] sm:$0xff] }
 0x496   : > { %8222 = vmatprep.subr.bf16.mxu1 %v15172_v35  ;;  %v5042_v35 = vld [vmem:[%s18202_s24 + $0xdd8] sm:$0xff]  ;;  %v15244_v27 = vcombine.high %v4914_v18, %v4918_v19  ;;  %v15243_v41 = vcombine.low %v4914_v18, %v4918_v19 }
 0x497   : > { %8182 = vmatpush2.bf16.msra.mxu0 %v15043_v29  ;;  %v15372_v29 = vcombine.high %v5042_v35, %v5046_v39  ;;  %v15371_v46 = vcombine.low %v5042_v35, %v5046_v39  ;;  %v4882_v12 = vld [vmem:[%s18202_s24 + $0x8d8] sm:$0xff] }
 0x498   : > { %8183 = vmatprep.subr.bf16.mxu0 %v15036_v44  ;;  %v4910_v44 = vld [vmem:[%s18202_s24 + $0x9b8] sm:$0xff] }
 0x499   : > { %8223 = vmatpush2.bf16.msra.mxu1 %v15171_v30  ;;  %v4906_v30 = vld [vmem:[%s18202_s24 + $0x998] sm:$0xff] }
 0x49a   : > { %8224 = vmatprep.subr.bf16.mxu1 %v15164_v47  ;;  %v5034_v47 = vld [vmem:[%s18202_s24 + $0xd98] sm:$0xff]  ;;  %v15236_v31 = vcombine.high %v4906_v30, %v4910_v44 }
 0x49b   : > { %8184 = vmatpush2.bf16.msra.mxu0 %v15035_v53  ;;  %v7911_v53 = vadd.f32 %v19342_v24, %v19337_v0  ;;  %v15235_v0 = vcombine.low %v4906_v30, %v4910_v44  ;;  %v4886_v32 = vld [vmem:[%s18202_s24 + $0x8f8] sm:$0xff] }
 0x49c   : > { %8185 = vmatprep.subr.bf16.mxu0 %v15028_v52  ;;  %v4898_v52 = vld [vmem:[%s18202_s24 + $0x958] sm:$0xff]  ;;  %v15212_v19 = vcombine.high %v4882_v12, %v4886_v32 }
 0x49d   : > { %8225 = vmatpush2.bf16.msra.mxu1 %v15163_v48  ;;  %v15364_v48 = vcombine.high %v5034_v47, %v5038_v4  ;;  %v4874_v39 = vld [vmem:[%s18202_s24 + $0x898] sm:$0xff] }
 0x49e   : > { %8226 = vmatprep.subr.bf16.mxu1 %v15156_v57  ;;  %v4902_v57 = vld [vmem:[%s18202_s24 + $0x978] sm:$0xff] }
 0x49f   : > { %8186 = vmatpush2.bf16.msra.mxu0 %v15027_v40  ;;  %v15227_v61 = vcombine.low %v4898_v52, %v4902_v57 }
 0x4a0   : > { %8187 = vmatprep.subr.bf16.mxu0 %v15020_v25  ;;  %v15363_v25 = vcombine.low %v5034_v47, %v5038_v4  ;;  %v4866_v4 = vld [vmem:[%s18202_s24 + $0x858] sm:$0xff] }
 0x4a1   : > { %8227 = vmatpush2.bf16.msra.mxu1 %v15155_v22 }
 0x4a2   : > { %8228 = vmatprep.subr.bf16.mxu1 %v15148_v43  ;;  %v15228_v43 = vcombine.high %v4898_v52, %v4902_v57 }
 0x4a3   : > { %8188 = vmatpush2.bf16.msra.mxu0 %v15019_v54 }
 0x4a4   : > { %8189 = vmatprep.subr.bf16.mxu0 %v15012_v59  ;;  %v5022_v59 = vld [vmem:[%s18202_s24 + $0xd38] sm:$0xff] }
 0x4a5   : > { %8229 = vmatpush2.bf16.msra.mxu1 %v15147_v56  ;;  %v5018_v56 = vld [vmem:[%s18202_s24 + $0xd18] sm:$0xff] }
 0x4a6   : > { %8230 = vmatprep.subr.bf16.mxu1 %v15140_v60  ;;  %v15348_v10 = vcombine.high %v5018_v56, %v5022_v59  ;;  %v15347_v18 = vcombine.low %v5018_v56, %v5022_v59  ;;  %v4974_v56 = vld [vmem:[%s18202_s24 + $0xbb8] sm:$0xff] }
 0x4a7   : > { %8190 = vmatpush2.bf16.msra.mxu0 %v15011_v1  ;;  %v15355_v1 = vcombine.low %v5026_v37, %v5030_v38  ;;  %v4862_v37 = vld [vmem:[%s18202_s24 + $0x838] sm:$0xff] }
 0x4a8   : > { %8191 = vmatprep.subr.bf16.mxu0 %v15004_v28  ;;  %v4986_v38 = vld [vmem:[%s18202_s24 + $0xc18] sm:$0xff] }
 0x4a9   : > { %8231 = vmatpush2.bf16.msra.mxu1 %v15139_v2  ;;  %v15220_v2 = vcombine.high %v4890_v9, %v4894_v8  ;;  %v5098_v59 = vld [vmem:[%s18202_s24 + $0xf98] sm:$0xff] }
 0x4aa   : > { %8232 = vmatprep.subr.bf16.mxu1 %v15132_v6 }
 0x4ab   : > { %8192 = vmatpush2.bf16.msra.mxu0 %v15003_v51  ;;  %v5010_v51 = vld [vmem:[%s18202_s24 + $0xcd8] sm:$0xff] }
 0x4ac   : > { %8193 = vmatprep.subr.bf16.mxu0 %v14996_v14 }
 0x4ad   : > { %8233 = vmatpush2.bf16.msra.mxu1 %v15131_v13  ;;  %v5014_v13 = vld [vmem:[%s18202_s24 + $0xcf8] sm:$0xff] }
 0x4ae   : > { %8234 = vmatprep.subr.bf16.mxu1 %v15124_v15  ;;  %v15219_v15 = vcombine.low %v4890_v9, %v4894_v8  ;;  %v15340_v35 = vcombine.high %v5010_v51, %v5014_v13  ;;  %v15339_v30 = vcombine.low %v5010_v51, %v5014_v13  ;;  %v4954_v51 = vld [vmem:[%s18202_s24 + $0xb18] sm:$0xff] }
 0x4af   : > { %8194 = vmatpush2.bf16.msra.mxu0 %v14995_v21  ;;  %v4878_v21 = vld [vmem:[%s18202_s24 + $0x8b8] sm:$0xff] }
 0x4b0   : > { %8245 = vmatprep.subr.bf16.mxu0 %v15244_v27  ;;  %v5006_v27 = vld [vmem:[%s18202_s24 + $0xcb8] sm:$0xff]  ;;  %v15204_v44 = vcombine.high %v4874_v39, %v4878_v21 }
 0x4b1   : > { %8235 = vmatpush2.bf16.msra.mxu1 %v15123_v26  ;;  %v5002_v26 = vld [vmem:[%s18202_s24 + $0xc98] sm:$0xff] }
 0x4b2   : > { %8286 = vmatprep.subr.bf16.mxu1 %v15372_v29  ;;  %v7951_v34 = vpop.f32.mrf.mxu0  ;;  %8196 = vmatmul.mubr.bf16.vlgmr.msra.gmra.mxu0 %v18327_v33  ;;  %v15211_v29 = vcombine.low %v4882_v12, %v4886_v32  ;;  %v15332_v47 = vcombine.high %v5002_v26, %v5006_v27  ;;  %v4958_v13 = vld [vmem:[%s18202_s24 + $0xb38] sm:$0xff] }
 0x4b3   : > { %v7952_v40 = vadd.f32 %v7951_v34, %v7911_v53  ;;  %8246 = vmatpush1.bf16.msra.mxu0 %v15243_v41  ;;  %8277 = vmatprep.mubr.bf16.mxu0 %v18339_v42  ;;  %v4870_v41 = vld [vmem:[%s18202_s24 + $0x878] sm:$0xff]  ;;  %v15203_v53 = vcombine.low %v4874_v39, %v4878_v21 }
 0x4b4   : > { %v7992_v22 = vpop.f32.mrf.mxu1  ;;  %8237 = vmatmul.mubr.bf16.vlgmr.msra.gmra.mxu1 %v18335_v36  ;;  %v7953_v24 = vpop.f32.mrf.mxu0  ;;  %8247 = vmatprep.subr.bf16.mxu0 %v15236_v31  ;;  %v4998_v31 = vld [vmem:[%s18202_s24 + $0xc78] sm:$0xff]  ;;  %v15196_v52 = vcombine.high %v4866_v4, %v4870_v41 }
 0x4b5   : > { %8287 = vmatpush1.bf16.msra.mxu1 %v15371_v46  ;;  %v7993_v5 = vadd.f32 %v7992_v22, %v7952_v40  ;;  %v7954_v49 = vadd.f32 %v7953_v24, %v7913_v63  ;;  %8318 = vmatprep.mubr.bf16.mxu1 %v18344_v45  ;;  %v4994_v46 = vld [vmem:[%s18202_s24 + $0xc58] sm:$0xff]  ;;  %v15195_v40 = vcombine.low %v4866_v4, %v4870_v41 }
 0x4b6   : > { %v7994_v50 = vpop.f32.mrf.mxu1  ;;  %8288 = vmatprep.subr.bf16.mxu1 %v15364_v48  ;;  %v7955_v54 = vpop.f32.mrf.mxu0  ;;  %v15331_v48 = vcombine.low %v5002_v26, %v5006_v27  ;;  %v15324_v57 = vcombine.high %v4994_v46, %v4998_v31  ;;  %v4858_v34 = vld [vmem:[%s18202_s24 + $0x818] sm:$0xff]  ;;  %v15323_v22 = vcombine.low %v4994_v46, %v4998_v31 }
 0x4b7   : > { %v8390_v60 = vrot.slane %v7993_v5, %v18634_v23  ;;  %v7995_v17 = vadd.f32 %v7994_v50, %v7954_v49  ;;  %8248 = vmatpush1.bf16.msra.mxu0 %v15235_v0  ;;  %v4990_v63 = vld [vmem:[%s18202_s24 + $0xc38] sm:$0xff]  ;;  %v15188_v0 = vcombine.high %v4858_v34, %v4862_v37  ;;  %v15187_v50 = vcombine.low %v4858_v34, %v4862_v37 }
 0x4b8   : > { %v7996_v20 = vpop.f32.mrf.mxu1  ;;  %v7956_v62 = vpop.f32.mrf.mxu0  ;;  %8249 = vmatprep.subr.bf16.mxu0 %v15228_v43  ;;  %v15316_v24 = vcombine.high %v4986_v38, %v4990_v63  ;;  %v4982_v43 = vld [vmem:[%s18202_s24 + $0xbf8] sm:$0xff] }
 0x4b9   : > { %8289 = vmatpush1.bf16.msra.mxu1 %v15363_v25  ;;  %v8391_v28 = vcombine.high %v8390_v60, %v8390_v60  ;;  %16099 = vst.sshfl [vmem:[%s19272_s9 + $0x2] sm:$0x1 pattern:$0x73625140] %v8390_v60  ;;  %v8418_v6 = vrot.slane %v7995_v17, %v18634_v23  ;;  %v4978_v25 = vld [vmem:[%s18202_s24 + $0xbd8] sm:$0xff] }
 0x4ba   : > { %v7997_v7 = vpop.f32.mrf.mxu1  ;;  %8290 = vmatprep.subr.bf16.mxu1 %v15356_v3  ;;  %v5106_v5 = vld [vmem:[%s18202_s24 + $0xfd8] sm:$0xff]  ;;  %v15315_v3 = vcombine.low %v4986_v38, %v4990_v63  ;;  %v15308_v9 = vcombine.high %v4978_v25, %v4982_v43  ;;  %v15307_v17 = vcombine.low %v4978_v25, %v4982_v43 }
 0x4bb   : > { %16100 = vst.sshfl [vmem:[%s19272_s9 + $0x42] sm:$0x1 pattern:$0x73625140] %v8391_v28  ;;  %v8419_v14 = vcombine.high %v8418_v6, %v8418_v6  ;;  %8250 = vmatpush1.bf16.msra.mxu0 %v15227_v61  ;;  %v5110_v49 = vld [vmem:[%s18202_s24 + $0xff8] sm:$0xff] }
 0x4bc   : > { %16101 = vst.sshfl [vmem:[%s19272_s9 + $0x3] sm:$0x1 pattern:$0x73625140] %v8418_v6  ;;  %8251 = vmatprep.subr.bf16.mxu0 %v15220_v2  ;;  %v15436_v8 = vcombine.high %v5106_v5, %v5110_v49  ;;  %v4970_v54 = vld [vmem:[%s18202_s24 + $0xb98] sm:$0xff]  ;;  %v15435_v20 = vcombine.low %v5106_v5, %v5110_v49 }
 0x4bd   : > { %8291 = vmatpush1.bf16.msra.mxu1 %v15355_v1  ;;  %16102 = vst.sshfl [vmem:[%s19272_s9 + $0x43] sm:$0x1 pattern:$0x73625140] %v8419_v14  ;;  %v5102_v60 = vld [vmem:[%s18202_s24 + $0xfb8] sm:$0xff]  ;;  %v15300_v61 = vcombine.high %v4970_v54, %v4974_v56  ;;  %v15299_v7 = vcombine.low %v4970_v54, %v4974_v56  ;;  %v8607_v56 = vld [vmem:[%s18204_s22 + $0x1c0] sm:$0xff] }
 0x4be   : > { %8292 = vmatprep.subr.bf16.mxu1 %v15348_v10  ;;  %v15428_v62 = vcombine.high %v5098_v59, %v5102_v60  ;;  %v4962_v1 = vld [vmem:[%s18202_s24 + $0xb58] sm:$0xff]  ;;  %v15427_v10 = vcombine.low %v5098_v59, %v5102_v60  ;;  %v8611_v59 = vld [vmem:[%s18204_s22 + $0x1e0] sm:$0xff] }
 0x4bf   : > { %8252 = vmatpush1.bf16.msra.mxu0 %v15219_v15  ;;  %v4966_v2 = vld [vmem:[%s18202_s24 + $0xb78] sm:$0xff]  ;;  %v8735_v60 = vld [vmem:[%s18204_s22 + $0x5c0] sm:$0xff] }
 0x4c0   : > { %8253 = vmatprep.subr.bf16.mxu0 %v15212_v19  ;;  %v5090_v28 = vld [vmem:[%s18202_s24 + $0xf58] sm:$0xff]  ;;  %v15292_v12 = vcombine.high %v4962_v1, %v4966_v2 }
 0x4c1   : > { %8293 = vmatpush1.bf16.msra.mxu1 %v15347_v18  ;;  %v5094_v6 = vld [vmem:[%s18202_s24 + $0xf78] sm:$0xff]  ;;  %v15291_v18 = vcombine.low %v4962_v1, %v4966_v2  ;;  %v8599_v2 = vld [vmem:[%s18204_s22 + $0x180] sm:$0xff] }
 0x4c2   : > { %8294 = vmatprep.subr.bf16.mxu1 %v15340_v35  ;;  %v15420_v32 = vcombine.high %v5090_v28, %v5094_v6  ;;  %v5082_v14 = vld [vmem:[%s18202_s24 + $0xf18] sm:$0xff]  ;;  %v15419_v19 = vcombine.low %v5090_v28, %v5094_v6  ;;  %v15284_v35 = vcombine.high %v4954_v51, %v4958_v13  ;;  %v8603_v28 = vld [vmem:[%s18204_s22 + $0x1a0] sm:$0xff] }
 0x4c3   : > { %8254 = vmatpush1.bf16.msra.mxu0 %v15211_v29  ;;  %v5086_v15 = vld [vmem:[%s18202_s24 + $0xf38] sm:$0xff]  ;;  %v8727_v6 = vld [vmem:[%s18204_s22 + $0x580] sm:$0xff] }
 0x4c4   : > { %8255 = vmatprep.subr.bf16.mxu0 %v15204_v44  ;;  %v15412_v39 = vcombine.high %v5082_v14, %v5086_v15  ;;  %v4946_v21 = vld [vmem:[%s18202_s24 + $0xad8] sm:$0xff]  ;;  %v15411_v44 = vcombine.low %v5082_v14, %v5086_v15  ;;  %v8595_v14 = vld [vmem:[%s18204_s22 + $0x160] sm:$0xff] }
 0x4c5   : > { %8295 = vmatpush1.bf16.msra.mxu1 %v15339_v30  ;;  %v4950_v26 = vld [vmem:[%s18202_s24 + $0xaf8] sm:$0xff]  ;;  %v15283_v30 = vcombine.low %v4954_v51, %v4958_v13  ;;  %v8591_v13 = vld [vmem:[%s18204_s22 + $0x140] sm:$0xff] }
 0x4c6   : > { %8296 = vmatprep.subr.bf16.mxu1 %v15332_v47  ;;  %v5074_v27 = vld [vmem:[%s18202_s24 + $0xed8] sm:$0xff]  ;;  %v15276_v47 = vcombine.high %v4946_v21, %v4950_v26 }
 0x4c7   : > { %8256 = vmatpush1.bf16.msra.mxu0 %v15203_v53  ;;  %v5078_v29 = vld [vmem:[%s18202_s24 + $0xef8] sm:$0xff] }
 0x4c8   : > { %8257 = vmatprep.subr.bf16.mxu0 %v15196_v52  ;;  %v15404_v4 = vcombine.high %v5074_v27, %v5078_v29  ;;  %v4938_v41 = vld [vmem:[%s18202_s24 + $0xa98] sm:$0xff]  ;;  %v15403_v52 = vcombine.low %v5074_v27, %v5078_v29  ;;  %v15501_v27 = vcombine.high %v8591_v13, %v8595_v14 }
 0x4c9   : > { %8297 = vmatpush1.bf16.msra.mxu1 %v15331_v48  ;;  %v4942_v46 = vld [vmem:[%s18202_s24 + $0xab8] sm:$0xff]  ;;  %v15275_v48 = vcombine.low %v4946_v21, %v4950_v26 }
 0x4ca   : > { %8298 = vmatprep.subr.bf16.mxu1 %v15324_v57  ;;  %v5066_v31 = vld [vmem:[%s18202_s24 + $0xe98] sm:$0xff]  ;;  %v15268_v57 = vcombine.high %v4938_v41, %v4942_v46 }
 0x4cb   : > { %8258 = vmatpush1.bf16.msra.mxu0 %v15195_v40  ;;  %v5070_v53 = vld [vmem:[%s18202_s24 + $0xeb8] sm:$0xff] }
 0x4cc   : > { %8259 = vmatprep.subr.bf16.mxu0 %v15188_v0  ;;  %v15396_v34 = vcombine.high %v5066_v31, %v5070_v53  ;;  %v4930_v37 = vld [vmem:[%s18202_s24 + $0xa58] sm:$0xff]  ;;  %v15395_v0 = vcombine.low %v5066_v31, %v5070_v53  ;;  %v15500_v53 = vcombine.low %v8591_v13, %v8595_v14  ;;  %v8671_v14 = vld [vmem:[%s18204_s22 + $0x3c0] sm:$0xff] }
 0x4cd   : > { %8299 = vmatpush1.bf16.msra.mxu1 %v15323_v22  ;;  %v4934_v38 = vld [vmem:[%s18202_s24 + $0xa78] sm:$0xff]  ;;  %v15267_v22 = vcombine.low %v4938_v41, %v4942_v46  ;;  %v8711_v41 = vld [vmem:[%s18204_s22 + $0x500] sm:$0xff] }
 0x4ce   : > { %8300 = vmatprep.subr.bf16.mxu1 %v15316_v24  ;;  %v5058_v63 = vld [vmem:[%s18202_s24 + $0xe58] sm:$0xff]  ;;  %v15260_v24 = vcombine.high %v4930_v37, %v4934_v38  ;;  %v8715_v46 = vld [vmem:[%s18204_s22 + $0x520] sm:$0xff] }
 0x4cf   : > { %8260 = vmatpush1.bf16.msra.mxu0 %v15187_v50  ;;  %v5062_v40 = vld [vmem:[%s18202_s24 + $0xe78] sm:$0xff] }
 0x4d0   : > { %8261 = vmatprep.subr.bf16.mxu0 %v15308_v9  ;;  %v15388_v25 = vcombine.high %v5058_v63, %v5062_v40  ;;  %v4922_v43 = vld [vmem:[%s18202_s24 + $0xa18] sm:$0xff]  ;;  %v15387_v9 = vcombine.low %v5058_v63, %v5062_v40  ;;  %v8579_v63 = vld [vmem:[%s18204_s22 + $0xe0] sm:$0xff] }
 0x4d1   : > { %8301 = vmatpush1.bf16.msra.mxu1 %v15315_v3  ;;  %v4926_v5 = vld [vmem:[%s18202_s24 + $0xa38] sm:$0xff]  ;;  %v15259_v3 = vcombine.low %v4930_v37, %v4934_v38  ;;  %v15621_v37 = vcombine.high %v8711_v41, %v8715_v46  ;;  %v8575_v38 = vld [vmem:[%s18204_s22 + $0xc0] sm:$0xff] }
 0x4d2   : > { %8302 = vmatprep.subr.bf16.mxu1 %v15436_v8  ;;  %v5050_v49 = vld [vmem:[%s18202_s24 + $0xe18] sm:$0xff]  ;;  %v15252_v8 = vcombine.high %v4922_v43, %v4926_v5  ;;  %v8703_v40 = vld [vmem:[%s18204_s22 + $0x4c0] sm:$0xff] }
 0x4d3   : > { %8262 = vmatpush2.bf16.msra.mxu0 %v15307_v17  ;;  %v5054_v50 = vld [vmem:[%s18202_s24 + $0xe38] sm:$0xff]  ;;  %v8739_v17 = vld [vmem:[%s18204_s22 + $0x5e0] sm:$0xff] }
 0x4d4   : > { %8263 = vmatprep.subr.bf16.mxu0 %v15300_v61  ;;  %v15380_v54 = vcombine.high %v5050_v49, %v5054_v50  ;;  %v15379_v61 = vcombine.low %v5050_v49, %v5054_v50  ;;  %v15645_v1 = vcombine.high %v8735_v60, %v8739_v17  ;;  %v8571_v49 = vld [vmem:[%s18204_s22 + $0xa0] sm:$0xff] }
 0x4d5   : > { %8303 = vmatpush2.bf16.msra.mxu1 %v15435_v20  ;;  %v15251_v20 = vcombine.low %v4922_v43, %v4926_v5  ;;  %v8567_v5 = vld [vmem:[%s18204_s22 + $0x80] sm:$0xff] }
 0x4d6   : > { %8304 = vmatprep.subr.bf16.mxu1 %v15428_v62  ;;  %v15517_v62 = vcombine.high %v8607_v56, %v8611_v59  ;;  %v8695_v50 = vld [vmem:[%s18204_s22 + $0x480] sm:$0xff] }
 0x4d7   : > { %8264 = vmatpush2.bf16.msra.mxu0 %v15299_v7  ;;  %v8731_v7 = vld [vmem:[%s18204_s22 + $0x5a0] sm:$0xff] }
 0x4d8   : > { %8265 = vmatprep.subr.bf16.mxu0 %v15292_v12  ;;  %v15644_v12 = vcombine.low %v8735_v60, %v8739_v17  ;;  %v15637_v51 = vcombine.high %v8727_v6, %v8731_v7  ;;  %v15636_v26 = vcombine.low %v8727_v6, %v8731_v7  ;;  %v8563_v60 = vld [vmem:[%s18204_s22 + $0x60] sm:$0xff] }
 0x4d9   : > { %8305 = vmatpush2.bf16.msra.mxu1 %v15427_v10  ;;  %v15516_v10 = vcombine.low %v8607_v56, %v8611_v59  ;;  %v8559_v59 = vld [vmem:[%s18204_s22 + $0x40] sm:$0xff] }
 0x4da   : > { %8306 = vmatprep.subr.bf16.mxu1 %v15420_v32  ;;  %v15509_v32 = vcombine.high %v8599_v2, %v8603_v28  ;;  %v8687_v17 = vld [vmem:[%s18204_s22 + $0x440] sm:$0xff] }
 0x4db   : > { %8266 = vmatpush2.bf16.msra.mxu0 %v15291_v18  ;;  %v8719_v18 = vld [vmem:[%s18204_s22 + $0x540] sm:$0xff] }
 0x4dc   : > { %8267 = vmatprep.subr.bf16.mxu0 %v15284_v35  ;;  %v8555_v6 = vld [vmem:[%s18204_s22 + $0x20] sm:$0xff] }
 0x4dd   : > { %8307 = vmatpush2.bf16.msra.mxu1 %v15419_v19  ;;  %v8723_v19 = vld [vmem:[%s18204_s22 + $0x560] sm:$0xff] }
 0x4de   : > { %8308 = vmatprep.subr.bf16.mxu1 %v15412_v39  ;;  %v15508_v39 = vcombine.low %v8599_v2, %v8603_v28  ;;  %v8551_v28 = vld [vmem:[%s18204_s22] sm:$0xff] }
 0x4df   : > { %8268 = vmatpush2.bf16.msra.mxu0 %v15283_v30  ;;  %v15629_v30 = vcombine.high %v8719_v18, %v8723_v19  ;;  %v8679_v7 = vld [vmem:[%s18204_s22 + $0x400] sm:$0xff] }
 0x4e0   : > { %8269 = vmatprep.subr.bf16.mxu0 %v15276_v47  ;;  %v8587_v47 = vld [vmem:[%s18204_s22 + $0x120] sm:$0xff] }
 0x4e1   : > { %8309 = vmatpush2.bf16.msra.mxu1 %v15411_v44  ;;  %v8583_v44 = vld [vmem:[%s18204_s22 + $0x100] sm:$0xff] }
 0x4e2   : > { %8310 = vmatprep.subr.bf16.mxu1 %v15404_v4 }
 0x4e3   : > { %8270 = vmatpush2.bf16.msra.mxu0 %v15275_v48 }
 0x4e4   : > { %8271 = vmatprep.subr.bf16.mxu0 %v15268_v57  ;;  %v15493_v57 = vcombine.high %v8583_v44, %v8587_v47 }
 0x4e5   : > { %8311 = vmatpush2.bf16.msra.mxu1 %v15403_v52  ;;  %v15628_v52 = vcombine.low %v8719_v18, %v8723_v19  ;;  %v8675_v18 = vld [vmem:[%s18204_s22 + $0x3e0] sm:$0xff] }
 0x4e6   : > { %8312 = vmatprep.subr.bf16.mxu1 %v15396_v34  ;;  %v8799_v19 = vld [vmem:[%s18204_s22 + $0x7c0] sm:$0xff] }
 0x4e7   : > { %8272 = vmatpush2.bf16.msra.mxu0 %v15267_v22  ;;  %v8707_v22 = vld [vmem:[%s18204_s22 + $0x4e0] sm:$0xff] }
 0x4e8   : > { %8273 = vmatprep.subr.bf16.mxu0 %v15260_v24  ;;  %v15620_v24 = vcombine.low %v8711_v41, %v8715_v46  ;;  %v15613_v43 = vcombine.high %v8703_v40, %v8707_v22  ;;  %v8791_v41 = vld [vmem:[%s18204_s22 + $0x780] sm:$0xff] }
 0x4e9   : > { %8313 = vmatpush2.bf16.msra.mxu1 %v15395_v0  ;;  %v15492_v0 = vcombine.low %v8583_v44, %v8587_v47  ;;  %v8663_v47 = vld [vmem:[%s18204_s22 + $0x380] sm:$0xff] }
 0x4ea   : > { %8314 = vmatprep.subr.bf16.mxu1 %v15388_v25  ;;  %v15485_v25 = vcombine.high %v8575_v38, %v8579_v63  ;;  %v8795_v46 = vld [vmem:[%s18204_s22 + $0x7a0] sm:$0xff] }
 0x4eb   : > { %8274 = vmatpush2.bf16.msra.mxu0 %v15259_v3  ;;  %v8699_v3 = vld [vmem:[%s18204_s22 + $0x4a0] sm:$0xff] }
 0x4ec   : > { %8275 = vmatprep.subr.bf16.mxu0 %v15252_v8  ;;  %v15612_v8 = vcombine.low %v8703_v40, %v8707_v22  ;;  %v15605_v56 = vcombine.high %v8695_v50, %v8699_v3  ;;  %v15700_v40 = vcombine.low %v8791_v41, %v8795_v46 }
 0x4ed   : > { %8315 = vmatpush2.bf16.msra.mxu1 %v15387_v9  ;;  %v15484_v9 = vcombine.low %v8575_v38, %v8579_v63  ;;  %v8787_v38 = vld [vmem:[%s18204_s22 + $0x760] sm:$0xff] }
 0x4ee   : > { %8316 = vmatprep.subr.bf16.mxu1 %v15380_v54  ;;  %v15477_v54 = vcombine.high %v8567_v5, %v8571_v49 }
 0x4ef   : > { %8276 = vmatpush2.bf16.msra.mxu0 %v15251_v20  ;;  %v8691_v20 = vld [vmem:[%s18204_s22 + $0x460] sm:$0xff] }
 0x4f0   : > { %11623 = vmatprep.subr.bf16.mxu0 %v15517_v62  ;;  %v15604_v62 = vcombine.low %v8695_v50, %v8699_v3  ;;  %v15597_v2 = vcombine.high %v8687_v17, %v8691_v20 }
 0x4f1   : > { %8317 = vmatpush2.bf16.msra.mxu1 %v15379_v61  ;;  %v15476_v61 = vcombine.low %v8567_v5, %v8571_v49  ;;  %v8779_v5 = vld [vmem:[%s18204_s22 + $0x720] sm:$0xff] }
 0x4f2   : > { %11664 = vmatprep.subr.bf16.mxu1 %v15645_v1  ;;  %v19491_v15 = vpop.f32.mrf.mxu0  ;;  %8278 = vmatmul.mubr.bf16.vlgmr.msra.gmra.mxu0 %v18409_v55  ;;  %v15469_v1 = vcombine.high %v8559_v59, %v8563_v60 }
 0x4f3   : > { %11624 = vmatpush1.bf16.msra.mxu0 %v15516_v10  ;;  %11655 = vmatprep.mubr.bf16.mxu0 %v18273_v11  ;;  %v8683_v10 = vld [vmem:[%s18204_s22 + $0x420] sm:$0xff] }
 0x4f4   : > { %v19496_v35 = vpop.f32.mrf.mxu1  ;;  %8319 = vmatmul.mubr.bf16.vlgmr.msra.gmra.mxu1 %v18415_v58  ;;  %v19499_v21 = vpop.f32.mrf.mxu0  ;;  %11625 = vmatprep.subr.bf16.mxu0 %v15509_v32  ;;  %v15596_v32 = vcombine.low %v8687_v17, %v8691_v20  ;;  %v15589_v13 = vcombine.high %v8679_v7, %v8683_v10 }
 0x4f5   : > { %11665 = vmatpush1.bf16.msra.mxu1 %v15644_v12  ;;  %11696 = vmatprep.mubr.bf16.mxu1 %v18280_v16  ;;  %v15468_v12 = vcombine.low %v8559_v59, %v8563_v60  ;;  %v8771_v59 = vld [vmem:[%s18204_s22 + $0x6e0] sm:$0xff] }
 0x4f6   : > { %v19501_v29 = vpop.f32.mrf.mxu1  ;;  %11666 = vmatprep.subr.bf16.mxu1 %v15637_v51  ;;  %v8037_v4 = vpop.f32.mrf.mxu0  ;;  %v15461_v51 = vcombine.high %v8551_v28, %v8555_v6 }
 0x4f7   : > { %11626 = vmatpush1.bf16.msra.mxu0 %v15508_v39  ;;  %v8803_v39 = vld [vmem:[%s18204_s22 + $0x7e0] sm:$0xff] }
 0x4f8   : > { %v8078_v31 = vpop.f32.mrf.mxu1  ;;  %v8038_v48 = vpop.f32.mrf.mxu0  ;;  %11627 = vmatprep.subr.bf16.mxu0 %v15501_v27  ;;  %v15588_v27 = vcombine.low %v8679_v7, %v8683_v10  ;;  %v15709_v44 = vcombine.high %v8799_v19, %v8803_v39  ;;  %v8667_v4 = vld [vmem:[%s18204_s22 + $0x3a0] sm:$0xff] }
 0x4f9   : > { %11667 = vmatpush1.bf16.msra.mxu1 %v15636_v26  ;;  %v15460_v26 = vcombine.low %v8551_v28, %v8555_v6  ;;  %v15580_v31 = vcombine.low %v8671_v14, %v8675_v18  ;;  %v15573_v48 = vcombine.high %v8663_v47, %v8667_v4  ;;  %v15572_v63 = vcombine.low %v8663_v47, %v8667_v4  ;;  %v8763_v28 = vld [vmem:[%s18204_s22 + $0x6a0] sm:$0xff] }
 0x4fa   : > { %v8079_v34 = vpop.f32.mrf.mxu1  ;;  %11668 = vmatprep.subr.bf16.mxu1 %v15629_v30  ;;  %v15581_v30 = vcombine.high %v8671_v14, %v8675_v18  ;;  %v8755_v14 = vld [vmem:[%s18204_s22 + $0x660] sm:$0xff] }
 0x4fb   : > { %11628 = vmatpush1.bf16.msra.mxu0 %v15500_v53  ;;  %v15708_v53 = vcombine.low %v8799_v19, %v8803_v39  ;;  %v8659_v34 = vld [vmem:[%s18204_s22 + $0x360] sm:$0xff] }
 0x4fc   : > { %11629 = vmatprep.subr.bf16.mxu0 %v15493_v57  ;;  %v8655_v57 = vld [vmem:[%s18204_s22 + $0x340] sm:$0xff] }
 0x4fd   : > { %11669 = vmatpush1.bf16.msra.mxu1 %v15628_v52  ;;  %v15701_v52 = vcombine.high %v8791_v41, %v8795_v46  ;;  %v15565_v22 = vcombine.high %v8655_v57, %v8659_v34  ;;  %v15564_v49 = vcombine.low %v8655_v57, %v8659_v34  ;;  %v8747_v47 = vld [vmem:[%s18204_s22 + $0x620] sm:$0xff] }
 0x4fe   : > { %11670 = vmatprep.subr.bf16.mxu1 %v15621_v37  ;;  %v8783_v37 = vld [vmem:[%s18204_s22 + $0x740] sm:$0xff] }
 0x4ff   : > { %11630 = vmatpush1.bf16.msra.mxu0 %v15492_v0  ;;  %v15693_v0 = vcombine.high %v8783_v37, %v8787_v38  ;;  %v15692_v50 = vcombine.low %v8783_v37, %v8787_v38  ;;  %v8995_v57 = vld [vmem:[%s18204_s22 + $0xde0] sm:$0xff] }
 0x500   : > { %11631 = vmatprep.subr.bf16.mxu0 %v15485_v25  ;;  %v8651_v25 = vld [vmem:[%s18204_s22 + $0x320] sm:$0xff] }
 0x501   : > { %11671 = vmatpush1.bf16.msra.mxu1 %v15620_v24  ;;  %v8647_v24 = vld [vmem:[%s18204_s22 + $0x300] sm:$0xff] }
 0x502   : > { %11672 = vmatprep.subr.bf16.mxu1 %v15613_v43  ;;  %v8775_v43 = vld [vmem:[%s18204_s22 + $0x700] sm:$0xff]  ;;  %v15557_v3 = vcombine.high %v8647_v24, %v8651_v25  ;;  %v15556_v60 = vcombine.low %v8647_v24, %v8651_v25 }
 0x503   : > { %11632 = vmatpush1.bf16.msra.mxu0 %v15484_v9  ;;  %v15685_v9 = vcombine.high %v8775_v43, %v8779_v5  ;;  %v15684_v17 = vcombine.low %v8775_v43, %v8779_v5  ;;  %v8987_v24 = vld [vmem:[%s18204_s22 + $0xda0] sm:$0xff] }
 0x504   : > { %11633 = vmatprep.subr.bf16.mxu0 %v15477_v54  ;;  %v8643_v54 = vld [vmem:[%s18204_s22 + $0x2e0] sm:$0xff] }
 0x505   : > { %11673 = vmatpush1.bf16.msra.mxu1 %v15612_v8  ;;  %v8639_v8 = vld [vmem:[%s18204_s22 + $0x2c0] sm:$0xff] }
 0x506   : > { %11674 = vmatprep.subr.bf16.mxu1 %v15605_v56  ;;  %v8767_v56 = vld [vmem:[%s18204_s22 + $0x6c0] sm:$0xff]  ;;  %v15549_v20 = vcombine.high %v8639_v8, %v8643_v54  ;;  %v15548_v6 = vcombine.low %v8639_v8, %v8643_v54 }
 0x507   : > { %11634 = vmatpush1.bf16.msra.mxu0 %v15476_v61  ;;  %v15677_v61 = vcombine.high %v8767_v56, %v8771_v59  ;;  %v15676_v7 = vcombine.low %v8767_v56, %v8771_v59  ;;  %v8975_v54 = vld [vmem:[%s18204_s22 + $0xd40] sm:$0xff]  ;;  %v8077_v59 = vadd.f32 %v19501_v29, %v19499_v21 }
 0x508   : > { %11635 = vmatprep.subr.bf16.mxu0 %v15469_v1  ;;  %v8635_v1 = vld [vmem:[%s18204_s22 + $0x2a0] sm:$0xff] }
 0x509   : > { %11675 = vmatpush1.bf16.msra.mxu1 %v15604_v62  ;;  %v8631_v62 = vld [vmem:[%s18204_s22 + $0x280] sm:$0xff] }
 0x50a   : > { %11676 = vmatprep.subr.bf16.mxu1 %v15597_v2  ;;  %v8759_v2 = vld [vmem:[%s18204_s22 + $0x680] sm:$0xff]  ;;  %v15541_v10 = vcombine.high %v8631_v62, %v8635_v1  ;;  %v15540_v18 = vcombine.low %v8631_v62, %v8635_v1 }
 0x50b   : > { %11636 = vmatpush1.bf16.msra.mxu0 %v15468_v12  ;;  %v15669_v12 = vcombine.high %v8759_v2, %v8763_v28  ;;  %v15668_v19 = vcombine.low %v8759_v2, %v8763_v28  ;;  %v8979_v56 = vld [vmem:[%s18204_s22 + $0xd60] sm:$0xff] }
 0x50c   : > { %11637 = vmatprep.subr.bf16.mxu0 %v15461_v51  ;;  %v8627_v51 = vld [vmem:[%s18204_s22 + $0x260] sm:$0xff]  ;;  %v15885_v21 = vcombine.high %v8975_v54, %v8979_v56 }
 0x50d   : > { %11677 = vmatpush1.bf16.msra.mxu1 %v15596_v32  ;;  %v8623_v32 = vld [vmem:[%s18204_s22 + $0x240] sm:$0xff] }
 0x50e   : > { %11678 = vmatprep.subr.bf16.mxu1 %v15589_v13  ;;  %v8751_v13 = vld [vmem:[%s18204_s22 + $0x640] sm:$0xff]  ;;  %v15533_v39 = vcombine.high %v8623_v32, %v8627_v51  ;;  %v15532_v4 = vcombine.low %v8623_v32, %v8627_v51 }
 0x50f   : > { %11638 = vmatpush1.bf16.msra.mxu0 %v15460_v26  ;;  %v15661_v26 = vcombine.high %v8751_v13, %v8755_v14  ;;  %v15660_v41 = vcombine.low %v8751_v13, %v8755_v14  ;;  %v8839_v29 = vld [vmem:[%s18204_s22 + $0x900] sm:$0xff] }
 0x510   : > { %11639 = vmatprep.subr.bf16.mxu0 %v15581_v30  ;;  %v8619_v30 = vld [vmem:[%s18204_s22 + $0x220] sm:$0xff] }
 0x511   : > { %11679 = vmatpush1.bf16.msra.mxu1 %v15588_v27  ;;  %v8615_v27 = vld [vmem:[%s18204_s22 + $0x200] sm:$0xff] }
 0x512   : > { %11680 = vmatprep.subr.bf16.mxu1 %v15709_v44  ;;  %v8743_v44 = vld [vmem:[%s18204_s22 + $0x600] sm:$0xff]  ;;  %v15525_v46 = vcombine.high %v8615_v27, %v8619_v30  ;;  %v15524_v34 = vcombine.low %v8615_v27, %v8619_v30 }
 0x513   : > { %11640 = vmatpush2.bf16.msra.mxu0 %v15580_v31  ;;  %v15653_v31 = vcombine.high %v8743_v44, %v8747_v47  ;;  %v15652_v37 = vcombine.low %v8743_v44, %v8747_v47  ;;  %v8843_v28 = vld [vmem:[%s18204_s22 + $0x920] sm:$0xff] }
 0x514   : > { %11641 = vmatprep.subr.bf16.mxu0 %v15573_v48  ;;  %v8867_v48 = vld [vmem:[%s18204_s22 + $0x9e0] sm:$0xff] }
 0x515   : > { %11681 = vmatpush2.bf16.msra.mxu1 %v15708_v53  ;;  %v8863_v53 = vld [vmem:[%s18204_s22 + $0x9c0] sm:$0xff] }
 0x516   : > { %11682 = vmatprep.subr.bf16.mxu1 %v15701_v52  ;;  %v8991_v52 = vld [vmem:[%s18204_s22 + $0xdc0] sm:$0xff]  ;;  %v15773_v38 = vcombine.high %v8863_v53, %v8867_v48  ;;  %v15772_v25 = vcombine.low %v8863_v53, %v8867_v48 }
 0x517   : > { %11642 = vmatpush2.bf16.msra.mxu0 %v15572_v63  ;;  %v15901_v63 = vcombine.high %v8991_v52, %v8995_v57  ;;  %v15900_v43 = vcombine.low %v8991_v52, %v8995_v57  ;;  %v8831_v44 = vld [vmem:[%s18204_s22 + $0x8c0] sm:$0xff] }
 0x518   : > { %11643 = vmatprep.subr.bf16.mxu0 %v15565_v22  ;;  %v8859_v22 = vld [vmem:[%s18204_s22 + $0x9a0] sm:$0xff] }
 0x519   : > { %11683 = vmatpush2.bf16.msra.mxu1 %v15700_v40  ;;  %v8855_v40 = vld [vmem:[%s18204_s22 + $0x980] sm:$0xff] }
 0x51a   : > { %11684 = vmatprep.subr.bf16.mxu1 %v15693_v0  ;;  %v8983_v0 = vld [vmem:[%s18204_s22 + $0xd80] sm:$0xff]  ;;  %v15765_v5 = vcombine.high %v8855_v40, %v8859_v22 }
 0x51b   : > { %11644 = vmatpush2.bf16.msra.mxu0 %v15564_v49  ;;  %v8075_v49 = vadd.f32 %v19496_v35, %v19491_v15  ;;  %v15764_v15 = vcombine.low %v8855_v40, %v8859_v22  ;;  %v8835_v47 = vld [vmem:[%s18204_s22 + $0x8e0] sm:$0xff] }
 0x51c   : > { %11645 = vmatprep.subr.bf16.mxu0 %v15557_v3  ;;  %v8847_v3 = vld [vmem:[%s18204_s22 + $0x940] sm:$0xff]  ;;  %v15741_v48 = vcombine.high %v8831_v44, %v8835_v47 }
 0x51d   : > { %11685 = vmatpush2.bf16.msra.mxu1 %v15692_v50  ;;  %v15893_v50 = vcombine.high %v8983_v0, %v8987_v24  ;;  %v8823_v57 = vld [vmem:[%s18204_s22 + $0x880] sm:$0xff] }
 0x51e   : > { %11686 = vmatprep.subr.bf16.mxu1 %v15685_v9  ;;  %v8851_v9 = vld [vmem:[%s18204_s22 + $0x960] sm:$0xff] }
 0x51f   : > { %11646 = vmatpush2.bf16.msra.mxu0 %v15556_v60  ;;  %v15756_v13 = vcombine.low %v8847_v3, %v8851_v9 }
 0x520   : > { %11647 = vmatprep.subr.bf16.mxu0 %v15549_v20  ;;  %v15892_v20 = vcombine.low %v8983_v0, %v8987_v24  ;;  %v8815_v24 = vld [vmem:[%s18204_s22 + $0x840] sm:$0xff] }
 0x521   : > { %11687 = vmatpush2.bf16.msra.mxu1 %v15684_v17 }
 0x522   : > { %11688 = vmatprep.subr.bf16.mxu1 %v15677_v61  ;;  %v15757_v61 = vcombine.high %v8847_v3, %v8851_v9 }
 0x523   : > { %11648 = vmatpush2.bf16.msra.mxu0 %v15548_v6 }
 0x524   : > { %11649 = vmatprep.subr.bf16.mxu0 %v15541_v10  ;;  %v8971_v10 = vld [vmem:[%s18204_s22 + $0xd20] sm:$0xff] }
 0x525   : > { %11689 = vmatpush2.bf16.msra.mxu1 %v15676_v7  ;;  %v8967_v7 = vld [vmem:[%s18204_s22 + $0xd00] sm:$0xff] }
 0x526   : > { %11690 = vmatprep.subr.bf16.mxu1 %v15669_v12  ;;  %v15877_v30 = vcombine.high %v8967_v7, %v8971_v10  ;;  %v15876_v53 = vcombine.low %v8967_v7, %v8971_v10  ;;  %v8923_v7 = vld [vmem:[%s18204_s22 + $0xba0] sm:$0xff] }
 0x527   : > { %11650 = vmatpush2.bf16.msra.mxu0 %v15540_v18  ;;  %v15884_v18 = vcombine.low %v8975_v54, %v8979_v56  ;;  %v8811_v54 = vld [vmem:[%s18204_s22 + $0x820] sm:$0xff] }
 0x528   : > { %11651 = vmatprep.subr.bf16.mxu0 %v15533_v39  ;;  %v8935_v56 = vld [vmem:[%s18204_s22 + $0xc00] sm:$0xff] }
 0x529   : > { %11691 = vmatpush2.bf16.msra.mxu1 %v15668_v19  ;;  %v15749_v19 = vcombine.high %v8839_v29, %v8843_v28  ;;  %v9047_v10 = vld [vmem:[%s18204_s22 + $0xf80] sm:$0xff] }
 0x52a   : > { %11692 = vmatprep.subr.bf16.mxu1 %v15661_v26 }
 0x52b   : > { %11652 = vmatpush2.bf16.msra.mxu0 %v15532_v4  ;;  %v8959_v4 = vld [vmem:[%s18204_s22 + $0xcc0] sm:$0xff] }
 0x52c   : > { %11653 = vmatprep.subr.bf16.mxu0 %v15525_v46 }
 0x52d   : > { %11693 = vmatpush2.bf16.msra.mxu1 %v15660_v41  ;;  %v8963_v41 = vld [vmem:[%s18204_s22 + $0xce0] sm:$0xff] }
 0x52e   : > { %11694 = vmatprep.subr.bf16.mxu1 %v15653_v31  ;;  %v15748_v31 = vcombine.low %v8839_v29, %v8843_v28  ;;  %v15869_v52 = vcombine.high %v8959_v4, %v8963_v41  ;;  %v15868_v40 = vcombine.low %v8959_v4, %v8963_v41  ;;  %v8903_v4 = vld [vmem:[%s18204_s22 + $0xb00] sm:$0xff] }
 0x52f   : > { %11654 = vmatpush2.bf16.msra.mxu0 %v15524_v34  ;;  %v8827_v34 = vld [vmem:[%s18204_s22 + $0x8a0] sm:$0xff] }
 0x530   : > { %11705 = vmatprep.subr.bf16.mxu0 %v15773_v38  ;;  %v8955_v38 = vld [vmem:[%s18204_s22 + $0xca0] sm:$0xff]  ;;  %v15733_v22 = vcombine.high %v8823_v57, %v8827_v34 }
 0x531   : > { %11695 = vmatpush2.bf16.msra.mxu1 %v15652_v37  ;;  %v8951_v37 = vld [vmem:[%s18204_s22 + $0xc80] sm:$0xff] }
 0x532   : > { %11746 = vmatprep.subr.bf16.mxu1 %v15901_v63  ;;  %v8115_v8 = vpop.f32.mrf.mxu0  ;;  %11656 = vmatmul.mubr.bf16.vlgmr.msra.gmra.mxu0 %v18327_v33  ;;  %v15740_v63 = vcombine.low %v8831_v44, %v8835_v47  ;;  %v15861_v0 = vcombine.high %v8951_v37, %v8955_v38  ;;  %v8907_v41 = vld [vmem:[%s18204_s22 + $0xb20] sm:$0xff] }
 0x533   : > { %v8116_v60 = vadd.f32 %v8115_v8, %v8075_v49  ;;  %11706 = vmatpush1.bf16.msra.mxu0 %v15772_v25  ;;  %11737 = vmatprep.mubr.bf16.mxu0 %v18339_v42  ;;  %v8819_v25 = vld [vmem:[%s18204_s22 + $0x860] sm:$0xff]  ;;  %v15732_v49 = vcombine.low %v8823_v57, %v8827_v34 }
 0x534   : > { %v8156_v17 = vpop.f32.mrf.mxu1  ;;  %11697 = vmatmul.mubr.bf16.vlgmr.msra.gmra.mxu1 %v18335_v36  ;;  %v8117_v35 = vpop.f32.mrf.mxu0  ;;  %11707 = vmatprep.subr.bf16.mxu0 %v15765_v5  ;;  %v8947_v5 = vld [vmem:[%s18204_s22 + $0xc60] sm:$0xff]  ;;  %v15725_v3 = vcombine.high %v8815_v24, %v8819_v25 }
 0x535   : > { %11747 = vmatpush1.bf16.msra.mxu1 %v15900_v43  ;;  %v8157_v62 = vadd.f32 %v8156_v17, %v8116_v60  ;;  %v8118_v1 = vadd.f32 %v8117_v35, %v8077_v59  ;;  %11778 = vmatprep.mubr.bf16.mxu1 %v18344_v45  ;;  %v8943_v43 = vld [vmem:[%s18204_s22 + $0xc40] sm:$0xff]  ;;  %v15724_v60 = vcombine.low %v8815_v24, %v8819_v25 }
 0x536   : > { %v8158_v2 = vpop.f32.mrf.mxu1  ;;  %11748 = vmatprep.subr.bf16.mxu1 %v15893_v50  ;;  %v8119_v6 = vpop.f32.mrf.mxu0  ;;  %v15860_v50 = vcombine.low %v8951_v37, %v8955_v38  ;;  %v15853_v9 = vcombine.high %v8943_v43, %v8947_v5  ;;  %v8807_v8 = vld [vmem:[%s18204_s22 + $0x800] sm:$0xff]  ;;  %v15852_v17 = vcombine.low %v8943_v43, %v8947_v5 }
 0x537   : > { %v8446_v12 = vrot.slane %v8157_v62, %v18634_v23  ;;  %v8159_v32 = vadd.f32 %v8158_v2, %v8118_v1  ;;  %11708 = vmatpush1.bf16.msra.mxu0 %v15764_v15  ;;  %v8939_v59 = vld [vmem:[%s18204_s22 + $0xc20] sm:$0xff]  ;;  %v15717_v15 = vcombine.high %v8807_v8, %v8811_v54  ;;  %v15716_v2 = vcombine.low %v8807_v8, %v8811_v54 }
 0x538   : > { %v8160_v51 = vpop.f32.mrf.mxu1  ;;  %v8120_v14 = vpop.f32.mrf.mxu0  ;;  %11709 = vmatprep.subr.bf16.mxu0 %v15757_v61  ;;  %v15845_v35 = vcombine.high %v8935_v56, %v8939_v59  ;;  %v8931_v61 = vld [vmem:[%s18204_s22 + $0xbe0] sm:$0xff] }
 0x539   : > { %11749 = vmatpush1.bf16.msra.mxu1 %v15892_v20  ;;  %v8447_v39 = vcombine.high %v8446_v12, %v8446_v12  ;;  %16103 = vst.sshfl [vmem:[%s19272_s9 + $0x4] sm:$0x1 pattern:$0x73625140] %v8446_v12  ;;  %v8474_v26 = vrot.slane %v8159_v32, %v18634_v23  ;;  %v8927_v20 = vld [vmem:[%s18204_s22 + $0xbc0] sm:$0xff] }
 0x53a   : > { %v8161_v27 = vpop.f32.mrf.mxu1  ;;  %11750 = vmatprep.subr.bf16.mxu1 %v15885_v21  ;;  %v9055_v62 = vld [vmem:[%s18204_s22 + $0xfc0] sm:$0xff]  ;;  %v15844_v21 = vcombine.low %v8935_v56, %v8939_v59  ;;  %v15837_v29 = vcombine.high %v8927_v20, %v8931_v61  ;;  %v15836_v32 = vcombine.low %v8927_v20, %v8931_v61 }
 0x53b   : > { %16104 = vst.sshfl [vmem:[%s19272_s9 + $0x44] sm:$0x1 pattern:$0x73625140] %v8447_v39  ;;  %v8475_v46 = vcombine.high %v8474_v26, %v8474_v26  ;;  %11710 = vmatpush1.bf16.msra.mxu0 %v15756_v13  ;;  %v9059_v1 = vld [vmem:[%s18204_s22 + $0xfe0] sm:$0xff] }
 0x53c   : > { %16105 = vst.sshfl [vmem:[%s19272_s9 + $0x5] sm:$0x1 pattern:$0x73625140] %v8474_v26  ;;  %11711 = vmatprep.subr.bf16.mxu0 %v15749_v19  ;;  %v15965_v28 = vcombine.high %v9055_v62, %v9059_v1  ;;  %v8919_v6 = vld [vmem:[%s18204_s22 + $0xb80] sm:$0xff]  ;;  %v15964_v51 = vcombine.low %v9055_v62, %v9059_v1 }
 0x53d   : > { %11751 = vmatpush1.bf16.msra.mxu1 %v15884_v18  ;;  %16106 = vst.sshfl [vmem:[%s19272_s9 + $0x45] sm:$0x1 pattern:$0x73625140] %v8475_v46  ;;  %v9051_v12 = vld [vmem:[%s18204_s22 + $0xfa0] sm:$0xff]  ;;  %v15829_v13 = vcombine.high %v8919_v6, %v8923_v7  ;;  %v15828_v27 = vcombine.low %v8919_v6, %v8923_v7  ;;  %v8608_v7 = vld [vmem:[%s18204_s22 + $0x1c8] sm:$0xff] }
 0x53e   : > { %11752 = vmatprep.subr.bf16.mxu1 %v15877_v30  ;;  %v15957_v14 = vcombine.high %v9047_v10, %v9051_v12  ;;  %v8911_v18 = vld [vmem:[%s18204_s22 + $0xb40] sm:$0xff]  ;;  %v15956_v30 = vcombine.low %v9047_v10, %v9051_v12  ;;  %v8612_v10 = vld [vmem:[%s18204_s22 + $0x1e8] sm:$0xff] }
 0x53f   : > { %11712 = vmatpush1.bf16.msra.mxu0 %v15748_v31  ;;  %v8915_v19 = vld [vmem:[%s18204_s22 + $0xb60] sm:$0xff]  ;;  %v8736_v12 = vld [vmem:[%s18204_s22 + $0x5c8] sm:$0xff] }
 0x540   : > { %11713 = vmatprep.subr.bf16.mxu0 %v15741_v48  ;;  %v9039_v39 = vld [vmem:[%s18204_s22 + $0xf40] sm:$0xff]  ;;  %v15821_v44 = vcombine.high %v8911_v18, %v8915_v19 }
 0x541   : > { %11753 = vmatpush1.bf16.msra.mxu1 %v15876_v53  ;;  %v9043_v26 = vld [vmem:[%s18204_s22 + $0xf60] sm:$0xff]  ;;  %v15820_v53 = vcombine.low %v8911_v18, %v8915_v19  ;;  %v8600_v19 = vld [vmem:[%s18204_s22 + $0x188] sm:$0xff] }
 0x542   : > { %11754 = vmatprep.subr.bf16.mxu1 %v15869_v52  ;;  %v15949_v47 = vcombine.high %v9039_v39, %v9043_v26  ;;  %v9031_v46 = vld [vmem:[%s18204_s22 + $0xf00] sm:$0xff]  ;;  %v15948_v48 = vcombine.low %v9039_v39, %v9043_v26  ;;  %v15813_v52 = vcombine.high %v8903_v4, %v8907_v41  ;;  %v8604_v39 = vld [vmem:[%s18204_s22 + $0x1a8] sm:$0xff] }
 0x543   : > { %11714 = vmatpush1.bf16.msra.mxu0 %v15740_v63  ;;  %v9035_v31 = vld [vmem:[%s18204_s22 + $0xf20] sm:$0xff]  ;;  %v8728_v26 = vld [vmem:[%s18204_s22 + $0x588] sm:$0xff] }
 0x544   : > { %11715 = vmatprep.subr.bf16.mxu0 %v15733_v22  ;;  %v15941_v57 = vcombine.high %v9031_v46, %v9035_v31  ;;  %v8895_v34 = vld [vmem:[%s18204_s22 + $0xac0] sm:$0xff]  ;;  %v15940_v22 = vcombine.low %v9031_v46, %v9035_v31  ;;  %v8596_v46 = vld [vmem:[%s18204_s22 + $0x168] sm:$0xff] }
 0x545   : > { %11755 = vmatpush1.bf16.msra.mxu1 %v15868_v40  ;;  %v8899_v37 = vld [vmem:[%s18204_s22 + $0xae0] sm:$0xff]  ;;  %v15812_v40 = vcombine.low %v8903_v4, %v8907_v41  ;;  %v8592_v41 = vld [vmem:[%s18204_s22 + $0x148] sm:$0xff] }
 0x546   : > { %11756 = vmatprep.subr.bf16.mxu1 %v15861_v0  ;;  %v9023_v38 = vld [vmem:[%s18204_s22 + $0xec0] sm:$0xff]  ;;  %v15805_v0 = vcombine.high %v8895_v34, %v8899_v37 }
 0x547   : > { %11716 = vmatpush1.bf16.msra.mxu0 %v15732_v49  ;;  %v9027_v63 = vld [vmem:[%s18204_s22 + $0xee0] sm:$0xff] }
 0x548   : > { %11717 = vmatprep.subr.bf16.mxu0 %v15725_v3  ;;  %v15933_v24 = vcombine.high %v9023_v38, %v9027_v63  ;;  %v8887_v25 = vld [vmem:[%s18204_s22 + $0xa80] sm:$0xff]  ;;  %v15932_v3 = vcombine.low %v9023_v38, %v9027_v63  ;;  %v15503_v38 = vcombine.high %v8592_v41, %v8596_v46 }
 0x549   : > { %11757 = vmatpush1.bf16.msra.mxu1 %v15860_v50  ;;  %v8891_v43 = vld [vmem:[%s18204_s22 + $0xaa0] sm:$0xff]  ;;  %v15804_v50 = vcombine.low %v8895_v34, %v8899_v37 }
 0x54a   : > { %11758 = vmatprep.subr.bf16.mxu1 %v15853_v9  ;;  %v9015_v5 = vld [vmem:[%s18204_s22 + $0xe80] sm:$0xff]  ;;  %v15797_v9 = vcombine.high %v8887_v25, %v8891_v43 }
 0x54b   : > { %11718 = vmatpush1.bf16.msra.mxu0 %v15724_v60  ;;  %v9019_v49 = vld [vmem:[%s18204_s22 + $0xea0] sm:$0xff] }
 0x54c   : > { %11719 = vmatprep.subr.bf16.mxu0 %v15717_v15  ;;  %v15925_v8 = vcombine.high %v9015_v5, %v9019_v49  ;;  %v8879_v54 = vld [vmem:[%s18204_s22 + $0xa40] sm:$0xff]  ;;  %v15924_v15 = vcombine.low %v9015_v5, %v9019_v49  ;;  %v15502_v49 = vcombine.low %v8592_v41, %v8596_v46  ;;  %v8672_v46 = vld [vmem:[%s18204_s22 + $0x3c8] sm:$0xff] }
 0x54d   : > { %11759 = vmatpush1.bf16.msra.mxu1 %v15852_v17  ;;  %v8883_v56 = vld [vmem:[%s18204_s22 + $0xa60] sm:$0xff]  ;;  %v15796_v17 = vcombine.low %v8887_v25, %v8891_v43  ;;  %v8712_v25 = vld [vmem:[%s18204_s22 + $0x508] sm:$0xff] }
 0x54e   : > { %11760 = vmatprep.subr.bf16.mxu1 %v15845_v35  ;;  %v9007_v59 = vld [vmem:[%s18204_s22 + $0xe40] sm:$0xff]  ;;  %v15789_v35 = vcombine.high %v8879_v54, %v8883_v56  ;;  %v8716_v43 = vld [vmem:[%s18204_s22 + $0x528] sm:$0xff] }
 0x54f   : > { %11720 = vmatpush1.bf16.msra.mxu0 %v15716_v2  ;;  %v9011_v60 = vld [vmem:[%s18204_s22 + $0xe60] sm:$0xff] }
 0x550   : > { %11721 = vmatprep.subr.bf16.mxu0 %v15837_v29  ;;  %v15917_v20 = vcombine.high %v9007_v59, %v9011_v60  ;;  %v8871_v61 = vld [vmem:[%s18204_s22 + $0xa00] sm:$0xff]  ;;  %v15916_v29 = vcombine.low %v9007_v59, %v9011_v60  ;;  %v8580_v59 = vld [vmem:[%s18204_s22 + $0xe8] sm:$0xff] }
 0x551   : > { %11761 = vmatpush1.bf16.msra.mxu1 %v15844_v21  ;;  %v8875_v62 = vld [vmem:[%s18204_s22 + $0xa20] sm:$0xff]  ;;  %v15788_v21 = vcombine.low %v8879_v54, %v8883_v56  ;;  %v15623_v54 = vcombine.high %v8712_v25, %v8716_v43  ;;  %v8576_v56 = vld [vmem:[%s18204_s22 + $0xc8] sm:$0xff] }
 0x552   : > { %11762 = vmatprep.subr.bf16.mxu1 %v15965_v28  ;;  %v8999_v1 = vld [vmem:[%s18204_s22 + $0xe00] sm:$0xff]  ;;  %v15781_v28 = vcombine.high %v8871_v61, %v8875_v62  ;;  %v8704_v60 = vld [vmem:[%s18204_s22 + $0x4c8] sm:$0xff] }
 0x553   : > { %11722 = vmatpush2.bf16.msra.mxu0 %v15836_v32  ;;  %v9003_v2 = vld [vmem:[%s18204_s22 + $0xe20] sm:$0xff]  ;;  %v8740_v32 = vld [vmem:[%s18204_s22 + $0x5e8] sm:$0xff] }
 0x554   : > { %11723 = vmatprep.subr.bf16.mxu0 %v15829_v13  ;;  %v15909_v6 = vcombine.high %v8999_v1, %v9003_v2  ;;  %v15908_v13 = vcombine.low %v8999_v1, %v9003_v2  ;;  %v15647_v18 = vcombine.high %v8736_v12, %v8740_v32  ;;  %v8572_v1 = vld [vmem:[%s18204_s22 + $0xa8] sm:$0xff] }
 0x555   : > { %11763 = vmatpush2.bf16.msra.mxu1 %v15964_v51  ;;  %v15780_v51 = vcombine.low %v8871_v61, %v8875_v62  ;;  %v8568_v62 = vld [vmem:[%s18204_s22 + $0x88] sm:$0xff] }
 0x556   : > { %11764 = vmatprep.subr.bf16.mxu1 %v15957_v14  ;;  %v15519_v14 = vcombine.high %v8608_v7, %v8612_v10  ;;  %v8696_v2 = vld [vmem:[%s18204_s22 + $0x488] sm:$0xff] }
 0x557   : > { %11724 = vmatpush2.bf16.msra.mxu0 %v15828_v27  ;;  %v8732_v27 = vld [vmem:[%s18204_s22 + $0x5a8] sm:$0xff] }
 0x558   : > { %11725 = vmatprep.subr.bf16.mxu0 %v15821_v44  ;;  %v15646_v44 = vcombine.low %v8736_v12, %v8740_v32  ;;  %v15639_v4 = vcombine.high %v8728_v26, %v8732_v27  ;;  %v15638_v37 = vcombine.low %v8728_v26, %v8732_v27  ;;  %v8564_v12 = vld [vmem:[%s18204_s22 + $0x68] sm:$0xff] }
 0x559   : > { %11765 = vmatpush2.bf16.msra.mxu1 %v15956_v30  ;;  %v15518_v30 = vcombine.low %v8608_v7, %v8612_v10  ;;  %v8560_v10 = vld [vmem:[%s18204_s22 + $0x48] sm:$0xff] }
 0x55a   : > { %11766 = vmatprep.subr.bf16.mxu1 %v15949_v47  ;;  %v15511_v47 = vcombine.high %v8600_v19, %v8604_v39  ;;  %v8688_v32 = vld [vmem:[%s18204_s22 + $0x448] sm:$0xff] }
 0x55b   : > { %11726 = vmatpush2.bf16.msra.mxu0 %v15820_v53  ;;  %v8720_v53 = vld [vmem:[%s18204_s22 + $0x548] sm:$0xff] }
 0x55c   : > { %11727 = vmatprep.subr.bf16.mxu0 %v15813_v52  ;;  %v8556_v26 = vld [vmem:[%s18204_s22 + $0x28] sm:$0xff] }
 0x55d   : > { %11767 = vmatpush2.bf16.msra.mxu1 %v15948_v48  ;;  %v8724_v48 = vld [vmem:[%s18204_s22 + $0x568] sm:$0xff] }
 0x55e   : > { %11768 = vmatprep.subr.bf16.mxu1 %v15941_v57  ;;  %v15510_v57 = vcombine.low %v8600_v19, %v8604_v39  ;;  %v8552_v39 = vld [vmem:[%s18204_s22 + $0x8] sm:$0xff] }
 0x55f   : > { %11728 = vmatpush2.bf16.msra.mxu0 %v15812_v40  ;;  %v15631_v40 = vcombine.high %v8720_v53, %v8724_v48  ;;  %v8680_v27 = vld [vmem:[%s18204_s22 + $0x408] sm:$0xff] }
 0x560   : > { %11729 = vmatprep.subr.bf16.mxu0 %v15805_v0  ;;  %v8588_v0 = vld [vmem:[%s18204_s22 + $0x128] sm:$0xff] }
 0x561   : > { %11769 = vmatpush2.bf16.msra.mxu1 %v15940_v22  ;;  %v8584_v22 = vld [vmem:[%s18204_s22 + $0x108] sm:$0xff] }
 0x562   : > { %11770 = vmatprep.subr.bf16.mxu1 %v15933_v24 }
 0x563   : > { %11730 = vmatpush2.bf16.msra.mxu0 %v15804_v50 }
 0x564   : > { %11731 = vmatprep.subr.bf16.mxu0 %v15797_v9  ;;  %v15495_v9 = vcombine.high %v8584_v22, %v8588_v0 }
 0x565   : > { %11771 = vmatpush2.bf16.msra.mxu1 %v15932_v3  ;;  %v15630_v3 = vcombine.low %v8720_v53, %v8724_v48  ;;  %v8676_v53 = vld [vmem:[%s18204_s22 + $0x3e8] sm:$0xff] }
 0x566   : > { %11772 = vmatprep.subr.bf16.mxu1 %v15925_v8  ;;  %v8800_v48 = vld [vmem:[%s18204_s22 + $0x7c8] sm:$0xff] }
 0x567   : > { %11732 = vmatpush2.bf16.msra.mxu0 %v15796_v17  ;;  %v8708_v17 = vld [vmem:[%s18204_s22 + $0x4e8] sm:$0xff] }
 0x568   : > { %11733 = vmatprep.subr.bf16.mxu0 %v15789_v35  ;;  %v15622_v35 = vcombine.low %v8712_v25, %v8716_v43  ;;  %v15615_v61 = vcombine.high %v8704_v60, %v8708_v17  ;;  %v8792_v25 = vld [vmem:[%s18204_s22 + $0x788] sm:$0xff] }
 0x569   : > { %11773 = vmatpush2.bf16.msra.mxu1 %v15924_v15  ;;  %v15494_v15 = vcombine.low %v8584_v22, %v8588_v0  ;;  %v8664_v0 = vld [vmem:[%s18204_s22 + $0x388] sm:$0xff] }
 0x56a   : > { %11774 = vmatprep.subr.bf16.mxu1 %v15917_v20  ;;  %v15487_v20 = vcombine.high %v8576_v56, %v8580_v59  ;;  %v8796_v43 = vld [vmem:[%s18204_s22 + $0x7a8] sm:$0xff] }
 0x56b   : > { %11734 = vmatpush2.bf16.msra.mxu0 %v15788_v21  ;;  %v8700_v21 = vld [vmem:[%s18204_s22 + $0x4a8] sm:$0xff] }
 0x56c   : > { %11735 = vmatprep.subr.bf16.mxu0 %v15781_v28  ;;  %v15614_v28 = vcombine.low %v8704_v60, %v8708_v17  ;;  %v15607_v7 = vcombine.high %v8696_v2, %v8700_v21  ;;  %v15702_v60 = vcombine.low %v8792_v25, %v8796_v43 }
 0x56d   : > { %11775 = vmatpush2.bf16.msra.mxu1 %v15916_v29  ;;  %v15486_v29 = vcombine.low %v8576_v56, %v8580_v59  ;;  %v8788_v56 = vld [vmem:[%s18204_s22 + $0x768] sm:$0xff] }
 0x56e   : > { %11776 = vmatprep.subr.bf16.mxu1 %v15909_v6  ;;  %v15479_v6 = vcombine.high %v8568_v62, %v8572_v1 }
 0x56f   : > { %11736 = vmatpush2.bf16.msra.mxu0 %v15780_v51  ;;  %v8692_v51 = vld [vmem:[%s18204_s22 + $0x468] sm:$0xff] }
 0x570   : > { %11787 = vmatprep.subr.bf16.mxu0 %v15519_v14  ;;  %v15606_v14 = vcombine.low %v8696_v2, %v8700_v21  ;;  %v15599_v19 = vcombine.high %v8688_v32, %v8692_v51 }
 0x571   : > { %11777 = vmatpush2.bf16.msra.mxu1 %v15908_v13  ;;  %v15478_v13 = vcombine.low %v8568_v62, %v8572_v1  ;;  %v8780_v62 = vld [vmem:[%s18204_s22 + $0x728] sm:$0xff] }
 0x572   : > { %11828 = vmatprep.subr.bf16.mxu1 %v15647_v18  ;;  %v19645_v31 = vpop.f32.mrf.mxu0  ;;  %11738 = vmatmul.mubr.bf16.vlgmr.msra.gmra.mxu0 %v18409_v55  ;;  %v15471_v18 = vcombine.high %v8560_v10, %v8564_v12 }
 0x573   : > { %11788 = vmatpush1.bf16.msra.mxu0 %v15518_v30  ;;  %11819 = vmatprep.mubr.bf16.mxu0 %v18273_v11  ;;  %v8684_v30 = vld [vmem:[%s18204_s22 + $0x428] sm:$0xff] }
 0x574   : > { %v19650_v52 = vpop.f32.mrf.mxu1  ;;  %11779 = vmatmul.mubr.bf16.vlgmr.msra.gmra.mxu1 %v18415_v58  ;;  %v19653_v34 = vpop.f32.mrf.mxu0  ;;  %11789 = vmatprep.subr.bf16.mxu0 %v15511_v47  ;;  %v15598_v47 = vcombine.low %v8688_v32, %v8692_v51  ;;  %v15591_v41 = vcombine.high %v8680_v27, %v8684_v30 }
 0x575   : > { %11829 = vmatpush1.bf16.msra.mxu1 %v15646_v44  ;;  %11860 = vmatprep.mubr.bf16.mxu1 %v18280_v16  ;;  %v15470_v44 = vcombine.low %v8560_v10, %v8564_v12  ;;  %v8772_v10 = vld [vmem:[%s18204_s22 + $0x6e8] sm:$0xff] }
 0x576   : > { %v19655_v63 = vpop.f32.mrf.mxu1  ;;  %11830 = vmatprep.subr.bf16.mxu1 %v15639_v4  ;;  %v8201_v24 = vpop.f32.mrf.mxu0  ;;  %v15463_v4 = vcombine.high %v8552_v39, %v8556_v26 }
 0x577   : > { %11790 = vmatpush1.bf16.msra.mxu0 %v15510_v57  ;;  %v8804_v57 = vld [vmem:[%s18204_s22 + $0x7e8] sm:$0xff] }
 0x578   : > { %v8242_v5 = vpop.f32.mrf.mxu1  ;;  %v8202_v50 = vpop.f32.mrf.mxu0  ;;  %11791 = vmatprep.subr.bf16.mxu0 %v15503_v38  ;;  %v15590_v38 = vcombine.low %v8680_v27, %v8684_v30  ;;  %v15711_v22 = vcombine.high %v8800_v48, %v8804_v57  ;;  %v8668_v24 = vld [vmem:[%s18204_s22 + $0x3a8] sm:$0xff] }
 0x579   : > { %11831 = vmatpush1.bf16.msra.mxu1 %v15638_v37  ;;  %v15462_v37 = vcombine.low %v8552_v39, %v8556_v26  ;;  %v15582_v5 = vcombine.low %v8672_v46, %v8676_v53  ;;  %v15575_v50 = vcombine.high %v8664_v0, %v8668_v24  ;;  %v15574_v59 = vcombine.low %v8664_v0, %v8668_v24  ;;  %v8764_v39 = vld [vmem:[%s18204_s22 + $0x6a8] sm:$0xff] }
 0x57a   : > { %v8243_v8 = vpop.f32.mrf.mxu1  ;;  %11832 = vmatprep.subr.bf16.mxu1 %v15631_v40  ;;  %v15583_v40 = vcombine.high %v8672_v46, %v8676_v53  ;;  %v8756_v46 = vld [vmem:[%s18204_s22 + $0x668] sm:$0xff] }
 0x57b   : > { %11792 = vmatpush1.bf16.msra.mxu0 %v15502_v49  ;;  %v15710_v49 = vcombine.low %v8800_v48, %v8804_v57  ;;  %v8660_v8 = vld [vmem:[%s18204_s22 + $0x368] sm:$0xff] }
 0x57c   : > { %11793 = vmatprep.subr.bf16.mxu0 %v15495_v9  ;;  %v8656_v9 = vld [vmem:[%s18204_s22 + $0x348] sm:$0xff] }
 0x57d   : > { %11833 = vmatpush1.bf16.msra.mxu1 %v15630_v3  ;;  %v15703_v3 = vcombine.high %v8792_v25, %v8796_v43  ;;  %v15567_v17 = vcombine.high %v8656_v9, %v8660_v8  ;;  %v15566_v1 = vcombine.low %v8656_v9, %v8660_v8  ;;  %v8748_v0 = vld [vmem:[%s18204_s22 + $0x628] sm:$0xff] }
 0x57e   : > { %11834 = vmatprep.subr.bf16.mxu1 %v15623_v54  ;;  %v8784_v54 = vld [vmem:[%s18204_s22 + $0x748] sm:$0xff] }
 0x57f   : > { %11794 = vmatpush1.bf16.msra.mxu0 %v15494_v15  ;;  %v15695_v15 = vcombine.high %v8784_v54, %v8788_v56  ;;  %v15694_v2 = vcombine.low %v8784_v54, %v8788_v56  ;;  %v8996_v9 = vld [vmem:[%s18204_s22 + $0xde8] sm:$0xff] }
 0x580   : > { %11795 = vmatprep.subr.bf16.mxu0 %v15487_v20  ;;  %v8652_v20 = vld [vmem:[%s18204_s22 + $0x328] sm:$0xff] }
 0x581   : > { %11835 = vmatpush1.bf16.msra.mxu1 %v15622_v35  ;;  %v8648_v35 = vld [vmem:[%s18204_s22 + $0x308] sm:$0xff] }
 0x582   : > { %11836 = vmatprep.subr.bf16.mxu1 %v15615_v61  ;;  %v8776_v61 = vld [vmem:[%s18204_s22 + $0x708] sm:$0xff]  ;;  %v15559_v21 = vcombine.high %v8648_v35, %v8652_v20  ;;  %v15558_v12 = vcombine.low %v8648_v35, %v8652_v20 }
 0x583   : > { %11796 = vmatpush1.bf16.msra.mxu0 %v15486_v29  ;;  %v15687_v29 = vcombine.high %v8776_v61, %v8780_v62  ;;  %v15686_v32 = vcombine.low %v8776_v61, %v8780_v62  ;;  %v8988_v35 = vld [vmem:[%s18204_s22 + $0xda8] sm:$0xff] }
 0x584   : > { %11797 = vmatprep.subr.bf16.mxu0 %v15479_v6  ;;  %v8644_v6 = vld [vmem:[%s18204_s22 + $0x2e8] sm:$0xff] }
 0x585   : > { %11837 = vmatpush1.bf16.msra.mxu1 %v15614_v28  ;;  %v8640_v28 = vld [vmem:[%s18204_s22 + $0x2c8] sm:$0xff] }
 0x586   : > { %11838 = vmatprep.subr.bf16.mxu1 %v15607_v7  ;;  %v8768_v7 = vld [vmem:[%s18204_s22 + $0x6c8] sm:$0xff]  ;;  %v15551_v51 = vcombine.high %v8640_v28, %v8644_v6  ;;  %v15550_v26 = vcombine.low %v8640_v28, %v8644_v6 }
 0x587   : > { %11798 = vmatpush1.bf16.msra.mxu0 %v15478_v13  ;;  %v15679_v13 = vcombine.high %v8768_v7, %v8772_v10  ;;  %v15678_v27 = vcombine.low %v8768_v7, %v8772_v10  ;;  %v8976_v6 = vld [vmem:[%s18204_s22 + $0xd48] sm:$0xff]  ;;  %v8241_v10 = vadd.f32 %v19655_v63, %v19653_v34 }
 0x588   : > { %11799 = vmatprep.subr.bf16.mxu0 %v15471_v18  ;;  %v8636_v18 = vld [vmem:[%s18204_s22 + $0x2a8] sm:$0xff] }
 0x589   : > { %11839 = vmatpush1.bf16.msra.mxu1 %v15606_v14  ;;  %v8632_v14 = vld [vmem:[%s18204_s22 + $0x288] sm:$0xff] }
 0x58a   : > { %11840 = vmatprep.subr.bf16.mxu1 %v15599_v19  ;;  %v8760_v19 = vld [vmem:[%s18204_s22 + $0x688] sm:$0xff]  ;;  %v15543_v30 = vcombine.high %v8632_v14, %v8636_v18  ;;  %v15542_v53 = vcombine.low %v8632_v14, %v8636_v18 }
 0x58b   : > { %11800 = vmatpush1.bf16.msra.mxu0 %v15470_v44  ;;  %v15671_v44 = vcombine.high %v8760_v19, %v8764_v39  ;;  %v15670_v48 = vcombine.low %v8760_v19, %v8764_v39  ;;  %v8980_v7 = vld [vmem:[%s18204_s22 + $0xd68] sm:$0xff] }
 0x58c   : > { %11801 = vmatprep.subr.bf16.mxu0 %v15463_v4  ;;  %v8628_v4 = vld [vmem:[%s18204_s22 + $0x268] sm:$0xff]  ;;  %v15887_v34 = vcombine.high %v8976_v6, %v8980_v7 }
 0x58d   : > { %11841 = vmatpush1.bf16.msra.mxu1 %v15598_v47  ;;  %v8624_v47 = vld [vmem:[%s18204_s22 + $0x248] sm:$0xff] }
 0x58e   : > { %11842 = vmatprep.subr.bf16.mxu1 %v15591_v41  ;;  %v8752_v41 = vld [vmem:[%s18204_s22 + $0x648] sm:$0xff]  ;;  %v15535_v57 = vcombine.high %v8624_v47, %v8628_v4  ;;  %v15534_v24 = vcombine.low %v8624_v47, %v8628_v4 }
 0x58f   : > { %11802 = vmatpush1.bf16.msra.mxu0 %v15462_v37  ;;  %v15663_v37 = vcombine.high %v8752_v41, %v8756_v46  ;;  %v15662_v25 = vcombine.low %v8752_v41, %v8756_v46  ;;  %v8840_v63 = vld [vmem:[%s18204_s22 + $0x908] sm:$0xff] }
 0x590   : > { %11803 = vmatprep.subr.bf16.mxu0 %v15583_v40  ;;  %v8620_v40 = vld [vmem:[%s18204_s22 + $0x228] sm:$0xff] }
 0x591   : > { %11843 = vmatpush1.bf16.msra.mxu1 %v15590_v38  ;;  %v8616_v38 = vld [vmem:[%s18204_s22 + $0x208] sm:$0xff] }
 0x592   : > { %11844 = vmatprep.subr.bf16.mxu1 %v15711_v22  ;;  %v8744_v22 = vld [vmem:[%s18204_s22 + $0x608] sm:$0xff]  ;;  %v15527_v43 = vcombine.high %v8616_v38, %v8620_v40  ;;  %v15526_v8 = vcombine.low %v8616_v38, %v8620_v40 }
 0x593   : > { %11804 = vmatpush2.bf16.msra.mxu0 %v15582_v5  ;;  %v15655_v5 = vcombine.high %v8744_v22, %v8748_v0  ;;  %v15654_v54 = vcombine.low %v8744_v22, %v8748_v0  ;;  %v8844_v39 = vld [vmem:[%s18204_s22 + $0x928] sm:$0xff] }
 0x594   : > { %11805 = vmatprep.subr.bf16.mxu0 %v15575_v50  ;;  %v8868_v50 = vld [vmem:[%s18204_s22 + $0x9e8] sm:$0xff] }
 0x595   : > { %11845 = vmatpush2.bf16.msra.mxu1 %v15710_v49  ;;  %v8864_v49 = vld [vmem:[%s18204_s22 + $0x9c8] sm:$0xff] }
 0x596   : > { %11846 = vmatprep.subr.bf16.mxu1 %v15703_v3  ;;  %v8992_v3 = vld [vmem:[%s18204_s22 + $0xdc8] sm:$0xff]  ;;  %v15775_v56 = vcombine.high %v8864_v49, %v8868_v50  ;;  %v15774_v20 = vcombine.low %v8864_v49, %v8868_v50 }
 0x597   : > { %11806 = vmatpush2.bf16.msra.mxu0 %v15574_v59  ;;  %v15903_v59 = vcombine.high %v8992_v3, %v8996_v9  ;;  %v15902_v61 = vcombine.low %v8992_v3, %v8996_v9  ;;  %v8832_v22 = vld [vmem:[%s18204_s22 + $0x8c8] sm:$0xff] }
 0x598   : > { %11807 = vmatprep.subr.bf16.mxu0 %v15567_v17  ;;  %v8860_v17 = vld [vmem:[%s18204_s22 + $0x9a8] sm:$0xff] }
 0x599   : > { %11847 = vmatpush2.bf16.msra.mxu1 %v15702_v60  ;;  %v8856_v60 = vld [vmem:[%s18204_s22 + $0x988] sm:$0xff] }
 0x59a   : > { %11848 = vmatprep.subr.bf16.mxu1 %v15695_v15  ;;  %v8984_v15 = vld [vmem:[%s18204_s22 + $0xd88] sm:$0xff]  ;;  %v15767_v62 = vcombine.high %v8856_v60, %v8860_v17 }
 0x59b   : > { %11808 = vmatpush2.bf16.msra.mxu0 %v15566_v1  ;;  %v8239_v1 = vadd.f32 %v19650_v52, %v19645_v31  ;;  %v15766_v31 = vcombine.low %v8856_v60, %v8860_v17  ;;  %v8836_v0 = vld [vmem:[%s18204_s22 + $0x8e8] sm:$0xff] }
 0x59c   : > { %11809 = vmatprep.subr.bf16.mxu0 %v15559_v21  ;;  %v8848_v21 = vld [vmem:[%s18204_s22 + $0x948] sm:$0xff]  ;;  %v15743_v50 = vcombine.high %v8832_v22, %v8836_v0 }
 0x59d   : > { %11849 = vmatpush2.bf16.msra.mxu1 %v15694_v2  ;;  %v15895_v2 = vcombine.high %v8984_v15, %v8988_v35  ;;  %v8824_v9 = vld [vmem:[%s18204_s22 + $0x888] sm:$0xff] }
 0x59e   : > { %11850 = vmatprep.subr.bf16.mxu1 %v15687_v29  ;;  %v8852_v29 = vld [vmem:[%s18204_s22 + $0x968] sm:$0xff] }
 0x59f   : > { %11810 = vmatpush2.bf16.msra.mxu0 %v15558_v12  ;;  %v15758_v41 = vcombine.low %v8848_v21, %v8852_v29 }
 0x5a0   : > { %11811 = vmatprep.subr.bf16.mxu0 %v15551_v51  ;;  %v15894_v51 = vcombine.low %v8984_v15, %v8988_v35  ;;  %v8816_v35 = vld [vmem:[%s18204_s22 + $0x848] sm:$0xff] }
 0x5a1   : > { %11851 = vmatpush2.bf16.msra.mxu1 %v15686_v32 }
 0x5a2   : > { %11852 = vmatprep.subr.bf16.mxu1 %v15679_v13  ;;  %v15759_v13 = vcombine.high %v8848_v21, %v8852_v29 }
 0x5a3   : > { %11812 = vmatpush2.bf16.msra.mxu0 %v15550_v26 }
 0x5a4   : > { %11813 = vmatprep.subr.bf16.mxu0 %v15543_v30  ;;  %v8972_v30 = vld [vmem:[%s18204_s22 + $0xd28] sm:$0xff] }
 0x5a5   : > { %11853 = vmatpush2.bf16.msra.mxu1 %v15678_v27  ;;  %v8968_v27 = vld [vmem:[%s18204_s22 + $0xd08] sm:$0xff] }
 0x5a6   : > { %11854 = vmatprep.subr.bf16.mxu1 %v15671_v44  ;;  %v15879_v40 = vcombine.high %v8968_v27, %v8972_v30  ;;  %v15878_v49 = vcombine.low %v8968_v27, %v8972_v30  ;;  %v8924_v27 = vld [vmem:[%s18204_s22 + $0xba8] sm:$0xff] }
 0x5a7   : > { %11814 = vmatpush2.bf16.msra.mxu0 %v15542_v53  ;;  %v15886_v53 = vcombine.low %v8976_v6, %v8980_v7  ;;  %v8812_v6 = vld [vmem:[%s18204_s22 + $0x828] sm:$0xff] }
 0x5a8   : > { %11815 = vmatprep.subr.bf16.mxu0 %v15535_v57  ;;  %v8936_v7 = vld [vmem:[%s18204_s22 + $0xc08] sm:$0xff] }
 0x5a9   : > { %11855 = vmatpush2.bf16.msra.mxu1 %v15670_v48  ;;  %v15751_v48 = vcombine.high %v8840_v63, %v8844_v39  ;;  %v9048_v30 = vld [vmem:[%s18204_s22 + $0xf88] sm:$0xff] }
 0x5aa   : > { %11856 = vmatprep.subr.bf16.mxu1 %v15663_v37 }
 0x5ab   : > { %11816 = vmatpush2.bf16.msra.mxu0 %v15534_v24  ;;  %v8960_v24 = vld [vmem:[%s18204_s22 + $0xcc8] sm:$0xff] }
 0x5ac   : > { %11817 = vmatprep.subr.bf16.mxu0 %v15527_v43 }
 0x5ad   : > { %11857 = vmatpush2.bf16.msra.mxu1 %v15662_v25  ;;  %v8964_v25 = vld [vmem:[%s18204_s22 + $0xce8] sm:$0xff] }
 0x5ae   : > { %11858 = vmatprep.subr.bf16.mxu1 %v15655_v5  ;;  %v15750_v5 = vcombine.low %v8840_v63, %v8844_v39  ;;  %v15871_v3 = vcombine.high %v8960_v24, %v8964_v25  ;;  %v15870_v60 = vcombine.low %v8960_v24, %v8964_v25  ;;  %v8904_v24 = vld [vmem:[%s18204_s22 + $0xb08] sm:$0xff] }
 0x5af   : > { %11818 = vmatpush2.bf16.msra.mxu0 %v15526_v8  ;;  %v8828_v8 = vld [vmem:[%s18204_s22 + $0x8a8] sm:$0xff] }
 0x5b0   : > { %11869 = vmatprep.subr.bf16.mxu0 %v15775_v56  ;;  %v8956_v56 = vld [vmem:[%s18204_s22 + $0xca8] sm:$0xff]  ;;  %v15735_v17 = vcombine.high %v8824_v9, %v8828_v8 }
 0x5b1   : > { %11859 = vmatpush2.bf16.msra.mxu1 %v15654_v54  ;;  %v8952_v54 = vld [vmem:[%s18204_s22 + $0xc88] sm:$0xff] }
 0x5b2   : > { %11910 = vmatprep.subr.bf16.mxu1 %v15903_v59  ;;  %v8279_v28 = vpop.f32.mrf.mxu0  ;;  %11820 = vmatmul.mubr.bf16.vlgmr.msra.gmra.mxu0 %v18327_v33  ;;  %v15742_v59 = vcombine.low %v8832_v22, %v8836_v0  ;;  %v15863_v15 = vcombine.high %v8952_v54, %v8956_v56  ;;  %v8908_v25 = vld [vmem:[%s18204_s22 + $0xb28] sm:$0xff] }
 0x5b3   : > { %v8280_v12 = vadd.f32 %v8279_v28, %v8239_v1  ;;  %11870 = vmatpush1.bf16.msra.mxu0 %v15774_v20  ;;  %11901 = vmatprep.mubr.bf16.mxu0 %v18339_v42  ;;  %v8820_v20 = vld [vmem:[%s18204_s22 + $0x868] sm:$0xff]  ;;  %v15734_v1 = vcombine.low %v8824_v9, %v8828_v8 }
 0x5b4   : > { %v8320_v32 = vpop.f32.mrf.mxu1  ;;  %11861 = vmatmul.mubr.bf16.vlgmr.msra.gmra.mxu1 %v18335_v36  ;;  %v8281_v52 = vpop.f32.mrf.mxu0  ;;  %11871 = vmatprep.subr.bf16.mxu0 %v15767_v62  ;;  %v8948_v62 = vld [vmem:[%s18204_s22 + $0xc68] sm:$0xff]  ;;  %v15727_v21 = vcombine.high %v8816_v35, %v8820_v20 }
 0x5b5   : > { %11911 = vmatpush1.bf16.msra.mxu1 %v15902_v61  ;;  %v8321_v14 = vadd.f32 %v8320_v32, %v8280_v12  ;;  %v8282_v18 = vadd.f32 %v8281_v52, %v8241_v10  ;;  %11942 = vmatprep.mubr.bf16.mxu1 %v18344_v45  ;;  %v8944_v61 = vld [vmem:[%s18204_s22 + $0xc48] sm:$0xff]  ;;  %v15726_v12 = vcombine.low %v8816_v35, %v8820_v20 }
 0x5b6   : > { %v8322_v19 = vpop.f32.mrf.mxu1  ;;  %11912 = vmatprep.subr.bf16.mxu1 %v15895_v2  ;;  %v8283_v26 = vpop.f32.mrf.mxu0  ;;  %v15862_v2 = vcombine.low %v8952_v54, %v8956_v56  ;;  %v15855_v29 = vcombine.high %v8944_v61, %v8948_v62  ;;  %v8808_v28 = vld [vmem:[%s18204_s22 + $0x808] sm:$0xff]  ;;  %v15854_v32 = vcombine.low %v8944_v61, %v8948_v62 }
 0x5b7   : > { %v8502_v44 = vrot.slane %v8321_v14, %v18634_v23  ;;  %v8323_v47 = vadd.f32 %v8322_v19, %v8282_v18  ;;  %11872 = vmatpush1.bf16.msra.mxu0 %v15766_v31  ;;  %v8940_v10 = vld [vmem:[%s18204_s22 + $0xc28] sm:$0xff]  ;;  %v15719_v31 = vcombine.high %v8808_v28, %v8812_v6  ;;  %v15718_v19 = vcombine.low %v8808_v28, %v8812_v6 }
 0x5b8   : > { %v8324_v4 = vpop.f32.mrf.mxu1  ;;  %v8284_v46 = vpop.f32.mrf.mxu0  ;;  %11873 = vmatprep.subr.bf16.mxu0 %v15759_v13  ;;  %v15847_v52 = vcombine.high %v8936_v7, %v8940_v10  ;;  %v8932_v13 = vld [vmem:[%s18204_s22 + $0xbe8] sm:$0xff] }
 0x5b9   : > { %11913 = vmatpush1.bf16.msra.mxu1 %v15894_v51  ;;  %v8503_v57 = vcombine.high %v8502_v44, %v8502_v44  ;;  %16107 = vst.sshfl [vmem:[%s19272_s9 + $0x6] sm:$0x1 pattern:$0x73625140] %v8502_v44  ;;  %v8530_v37 = vrot.slane %v8323_v47, %v18634_v23  ;;  %v8928_v51 = vld [vmem:[%s18204_s22 + $0xbc8] sm:$0xff] }
 0x5ba   : > { %v8325_v38 = vpop.f32.mrf.mxu1  ;;  %11914 = vmatprep.subr.bf16.mxu1 %v15887_v34  ;;  %v9056_v14 = vld [vmem:[%s18204_s22 + $0xfc8] sm:$0xff]  ;;  %v15846_v34 = vcombine.low %v8936_v7, %v8940_v10  ;;  %v15839_v63 = vcombine.high %v8928_v51, %v8932_v13  ;;  %v15838_v47 = vcombine.low %v8928_v51, %v8932_v13 }
 0x5bb   : > { %16108 = vst.sshfl [vmem:[%s19272_s9 + $0x46] sm:$0x1 pattern:$0x73625140] %v8503_v57  ;;  %v8531_v43 = vcombine.high %v8530_v37, %v8530_v37  ;;  %11874 = vmatpush1.bf16.msra.mxu0 %v15758_v41  ;;  %v9060_v18 = vld [vmem:[%s18204_s22 + $0xfe8] sm:$0xff] }
 0x5bc   : > { %16109 = vst.sshfl [vmem:[%s19272_s9 + $0x7] sm:$0x1 pattern:$0x73625140] %v8530_v37  ;;  %11875 = vmatprep.subr.bf16.mxu0 %v15751_v48  ;;  %v15967_v39 = vcombine.high %v9056_v14, %v9060_v18  ;;  %v8920_v26 = vld [vmem:[%s18204_s22 + $0xb88] sm:$0xff]  ;;  %v15966_v4 = vcombine.low %v9056_v14, %v9060_v18 }
 0x5bd   : > { %11915 = vmatpush1.bf16.msra.mxu1 %v15886_v53  ;;  %16110 = vst.sshfl [vmem:[%s19272_s9 + $0x47] sm:$0x1 pattern:$0x73625140] %v8531_v43  ;;  %v9052_v44 = vld [vmem:[%s18204_s22 + $0xfa8] sm:$0xff]  ;;  %v15831_v41 = vcombine.high %v8920_v26, %v8924_v27  ;;  %v15830_v38 = vcombine.low %v8920_v26, %v8924_v27  ;;  %v8609_v27 = vld [vmem:[%s18204_s22 + $0x1d0] sm:$0xff] }
 0x5be   : > { %11916 = vmatprep.subr.bf16.mxu1 %v15879_v40  ;;  %v15959_v46 = vcombine.high %v9048_v30, %v9052_v44  ;;  %v8912_v53 = vld [vmem:[%s18204_s22 + $0xb48] sm:$0xff]  ;;  %v15958_v40 = vcombine.low %v9048_v30, %v9052_v44  ;;  %v8613_v30 = vld [vmem:[%s18204_s22 + $0x1f0] sm:$0xff] }
 0x5bf   : > { %11876 = vmatpush1.bf16.msra.mxu0 %v15750_v5  ;;  %v8916_v48 = vld [vmem:[%s18204_s22 + $0xb68] sm:$0xff]  ;;  %v8737_v44 = vld [vmem:[%s18204_s22 + $0x5d0] sm:$0xff] }
 0x5c0   : > { %11877 = vmatprep.subr.bf16.mxu0 %v15743_v50  ;;  %v9040_v57 = vld [vmem:[%s18204_s22 + $0xf48] sm:$0xff]  ;;  %v15823_v22 = vcombine.high %v8912_v53, %v8916_v48 }
 0x5c1   : > { %11917 = vmatpush1.bf16.msra.mxu1 %v15878_v49  ;;  %v9044_v37 = vld [vmem:[%s18204_s22 + $0xf68] sm:$0xff]  ;;  %v15822_v49 = vcombine.low %v8912_v53, %v8916_v48  ;;  %v8601_v48 = vld [vmem:[%s18204_s22 + $0x190] sm:$0xff] }
 0x5c2   : > { %11918 = vmatprep.subr.bf16.mxu1 %v15871_v3  ;;  %v15951_v0 = vcombine.high %v9040_v57, %v9044_v37  ;;  %v9032_v43 = vld [vmem:[%s18204_s22 + $0xf08] sm:$0xff]  ;;  %v15950_v50 = vcombine.low %v9040_v57, %v9044_v37  ;;  %v15815_v3 = vcombine.high %v8904_v24, %v8908_v25  ;;  %v8605_v57 = vld [vmem:[%s18204_s22 + $0x1b0] sm:$0xff] }
 0x5c3   : > { %11878 = vmatpush1.bf16.msra.mxu0 %v15742_v59  ;;  %v9036_v5 = vld [vmem:[%s18204_s22 + $0xf28] sm:$0xff]  ;;  %v8729_v37 = vld [vmem:[%s18204_s22 + $0x590] sm:$0xff] }
 0x5c4   : > { %11879 = vmatprep.subr.bf16.mxu0 %v15735_v17  ;;  %v15943_v9 = vcombine.high %v9032_v43, %v9036_v5  ;;  %v8896_v8 = vld [vmem:[%s18204_s22 + $0xac8] sm:$0xff]  ;;  %v15942_v17 = vcombine.low %v9032_v43, %v9036_v5  ;;  %v8597_v43 = vld [vmem:[%s18204_s22 + $0x170] sm:$0xff] }
 0x5c5   : > { %11919 = vmatpush1.bf16.msra.mxu1 %v15870_v60  ;;  %v8900_v54 = vld [vmem:[%s18204_s22 + $0xae8] sm:$0xff]  ;;  %v15814_v60 = vcombine.low %v8904_v24, %v8908_v25  ;;  %v8593_v25 = vld [vmem:[%s18204_s22 + $0x150] sm:$0xff] }
 0x5c6   : > { %11920 = vmatprep.subr.bf16.mxu1 %v15863_v15  ;;  %v9024_v56 = vld [vmem:[%s18204_s22 + $0xec8] sm:$0xff]  ;;  %v15807_v15 = vcombine.high %v8896_v8, %v8900_v54 }
 0x5c7   : > { %11880 = vmatpush1.bf16.msra.mxu0 %v15734_v1  ;;  %v9028_v59 = vld [vmem:[%s18204_s22 + $0xee8] sm:$0xff] }
 0x5c8   : > { %11881 = vmatprep.subr.bf16.mxu0 %v15727_v21  ;;  %v15935_v35 = vcombine.high %v9024_v56, %v9028_v59  ;;  %v8888_v20 = vld [vmem:[%s18204_s22 + $0xa88] sm:$0xff]  ;;  %v15934_v21 = vcombine.low %v9024_v56, %v9028_v59  ;;  %v15505_v56 = vcombine.high %v8593_v25, %v8597_v43 }
 0x5c9   : > { %11921 = vmatpush1.bf16.msra.mxu1 %v15862_v2  ;;  %v8892_v61 = vld [vmem:[%s18204_s22 + $0xaa8] sm:$0xff]  ;;  %v15806_v2 = vcombine.low %v8896_v8, %v8900_v54 }
 0x5ca   : > { %11922 = vmatprep.subr.bf16.mxu1 %v15855_v29  ;;  %v9016_v62 = vld [vmem:[%s18204_s22 + $0xe88] sm:$0xff]  ;;  %v15799_v29 = vcombine.high %v8888_v20, %v8892_v61 }
 0x5cb   : > { %11882 = vmatpush1.bf16.msra.mxu0 %v15726_v12  ;;  %v9020_v1 = vld [vmem:[%s18204_s22 + $0xea8] sm:$0xff] }
 0x5cc   : > { %11883 = vmatprep.subr.bf16.mxu0 %v15719_v31  ;;  %v15927_v28 = vcombine.high %v9016_v62, %v9020_v1  ;;  %v8880_v6 = vld [vmem:[%s18204_s22 + $0xa48] sm:$0xff]  ;;  %v15926_v31 = vcombine.low %v9016_v62, %v9020_v1  ;;  %v15504_v1 = vcombine.low %v8593_v25, %v8597_v43  ;;  %v8673_v43 = vld [vmem:[%s18204_s22 + $0x3d0] sm:$0xff] }
 0x5cd   : > { %11923 = vmatpush1.bf16.msra.mxu1 %v15854_v32  ;;  %v8884_v7 = vld [vmem:[%s18204_s22 + $0xa68] sm:$0xff]  ;;  %v15798_v32 = vcombine.low %v8888_v20, %v8892_v61  ;;  %v8713_v20 = vld [vmem:[%s18204_s22 + $0x510] sm:$0xff] }
 0x5ce   : > { %11924 = vmatprep.subr.bf16.mxu1 %v15847_v52  ;;  %v9008_v10 = vld [vmem:[%s18204_s22 + $0xe48] sm:$0xff]  ;;  %v15791_v52 = vcombine.high %v8880_v6, %v8884_v7  ;;  %v8717_v61 = vld [vmem:[%s18204_s22 + $0x530] sm:$0xff] }
 0x5cf   : > { %11884 = vmatpush1.bf16.msra.mxu0 %v15718_v19  ;;  %v9012_v12 = vld [vmem:[%s18204_s22 + $0xe68] sm:$0xff] }
 0x5d0   : > { %11885 = vmatprep.subr.bf16.mxu0 %v15839_v63  ;;  %v15919_v51 = vcombine.high %v9008_v10, %v9012_v12  ;;  %v8872_v13 = vld [vmem:[%s18204_s22 + $0xa08] sm:$0xff]  ;;  %v15918_v63 = vcombine.low %v9008_v10, %v9012_v12  ;;  %v8581_v10 = vld [vmem:[%s18204_s22 + $0xf0] sm:$0xff] }
 0x5d1   : > { %11925 = vmatpush1.bf16.msra.mxu1 %v15846_v34  ;;  %v8876_v14 = vld [vmem:[%s18204_s22 + $0xa28] sm:$0xff]  ;;  %v15790_v34 = vcombine.low %v8880_v6, %v8884_v7  ;;  %v15625_v6 = vcombine.high %v8713_v20, %v8717_v61  ;;  %v8577_v7 = vld [vmem:[%s18204_s22 + $0xd0] sm:$0xff] }
 0x5d2   : > { %11926 = vmatprep.subr.bf16.mxu1 %v15967_v39  ;;  %v9000_v18 = vld [vmem:[%s18204_s22 + $0xe08] sm:$0xff]  ;;  %v15783_v39 = vcombine.high %v8872_v13, %v8876_v14  ;;  %v8705_v12 = vld [vmem:[%s18204_s22 + $0x4d0] sm:$0xff] }
 0x5d3   : > { %11886 = vmatpush2.bf16.msra.mxu0 %v15838_v47  ;;  %v9004_v19 = vld [vmem:[%s18204_s22 + $0xe28] sm:$0xff]  ;;  %v8741_v47 = vld [vmem:[%s18204_s22 + $0x5f0] sm:$0xff] }
 0x5d4   : > { %11887 = vmatprep.subr.bf16.mxu0 %v15831_v41  ;;  %v15911_v26 = vcombine.high %v9000_v18, %v9004_v19  ;;  %v15910_v41 = vcombine.low %v9000_v18, %v9004_v19  ;;  %v15649_v53 = vcombine.high %v8737_v44, %v8741_v47  ;;  %v8573_v18 = vld [vmem:[%s18204_s22 + $0xb0] sm:$0xff] }
 0x5d5   : > { %11927 = vmatpush2.bf16.msra.mxu1 %v15966_v4  ;;  %v15782_v4 = vcombine.low %v8872_v13, %v8876_v14  ;;  %v8569_v14 = vld [vmem:[%s18204_s22 + $0x90] sm:$0xff] }
 0x5d6   : > { %11928 = vmatprep.subr.bf16.mxu1 %v15959_v46  ;;  %v15521_v46 = vcombine.high %v8609_v27, %v8613_v30  ;;  %v8697_v19 = vld [vmem:[%s18204_s22 + $0x490] sm:$0xff] }
 0x5d7   : > { %11888 = vmatpush2.bf16.msra.mxu0 %v15830_v38  ;;  %v8733_v38 = vld [vmem:[%s18204_s22 + $0x5b0] sm:$0xff] }
 0x5d8   : > { %11889 = vmatprep.subr.bf16.mxu0 %v15823_v22  ;;  %v15648_v22 = vcombine.low %v8737_v44, %v8741_v47  ;;  %v15641_v24 = vcombine.high %v8729_v37, %v8733_v38  ;;  %v15640_v54 = vcombine.low %v8729_v37, %v8733_v38  ;;  %v8565_v44 = vld [vmem:[%s18204_s22 + $0x70] sm:$0xff] }
 0x5d9   : > { %11929 = vmatpush2.bf16.msra.mxu1 %v15958_v40  ;;  %v15520_v40 = vcombine.low %v8609_v27, %v8613_v30  ;;  %v8561_v30 = vld [vmem:[%s18204_s22 + $0x50] sm:$0xff] }
 0x5da   : > { %11930 = vmatprep.subr.bf16.mxu1 %v15951_v0  ;;  %v15513_v0 = vcombine.high %v8601_v48, %v8605_v57  ;;  %v8689_v47 = vld [vmem:[%s18204_s22 + $0x450] sm:$0xff] }
 0x5db   : > { %11890 = vmatpush2.bf16.msra.mxu0 %v15822_v49  ;;  %v8721_v49 = vld [vmem:[%s18204_s22 + $0x550] sm:$0xff] }
 0x5dc   : > { %11891 = vmatprep.subr.bf16.mxu0 %v15815_v3  ;;  %v8557_v37 = vld [vmem:[%s18204_s22 + $0x30] sm:$0xff] }
 0x5dd   : > { %11931 = vmatpush2.bf16.msra.mxu1 %v15950_v50  ;;  %v8725_v50 = vld [vmem:[%s18204_s22 + $0x570] sm:$0xff] }
 0x5de   : > { %11932 = vmatprep.subr.bf16.mxu1 %v15943_v9  ;;  %v15512_v9 = vcombine.low %v8601_v48, %v8605_v57  ;;  %v8553_v57 = vld [vmem:[%s18204_s22 + $0x10] sm:$0xff] }
 0x5df   : > { %11892 = vmatpush2.bf16.msra.mxu0 %v15814_v60  ;;  %v15633_v60 = vcombine.high %v8721_v49, %v8725_v50  ;;  %v8681_v38 = vld [vmem:[%s18204_s22 + $0x410] sm:$0xff] }
 0x5e0   : > { %11893 = vmatprep.subr.bf16.mxu0 %v15807_v15  ;;  %v8589_v15 = vld [vmem:[%s18204_s22 + $0x130] sm:$0xff] }
 0x5e1   : > { %11933 = vmatpush2.bf16.msra.mxu1 %v15942_v17  ;;  %v8585_v17 = vld [vmem:[%s18204_s22 + $0x110] sm:$0xff] }
 0x5e2   : > { %11934 = vmatprep.subr.bf16.mxu1 %v15935_v35 }
 0x5e3   : > { %11894 = vmatpush2.bf16.msra.mxu0 %v15806_v2 }
 0x5e4   : > { %11895 = vmatprep.subr.bf16.mxu0 %v15799_v29  ;;  %v15497_v29 = vcombine.high %v8585_v17, %v8589_v15 }
 0x5e5   : > { %11935 = vmatpush2.bf16.msra.mxu1 %v15934_v21  ;;  %v15632_v21 = vcombine.low %v8721_v49, %v8725_v50  ;;  %v8677_v49 = vld [vmem:[%s18204_s22 + $0x3f0] sm:$0xff] }
 0x5e6   : > { %11936 = vmatprep.subr.bf16.mxu1 %v15927_v28  ;;  %v8801_v50 = vld [vmem:[%s18204_s22 + $0x7d0] sm:$0xff] }
 0x5e7   : > { %11896 = vmatpush2.bf16.msra.mxu0 %v15798_v32  ;;  %v8709_v32 = vld [vmem:[%s18204_s22 + $0x4f0] sm:$0xff] }
 0x5e8   : > { %11897 = vmatprep.subr.bf16.mxu0 %v15791_v52  ;;  %v15624_v52 = vcombine.low %v8713_v20, %v8717_v61  ;;  %v15617_v13 = vcombine.high %v8705_v12, %v8709_v32  ;;  %v8793_v20 = vld [vmem:[%s18204_s22 + $0x790] sm:$0xff] }
 0x5e9   : > { %11937 = vmatpush2.bf16.msra.mxu1 %v15926_v31  ;;  %v15496_v31 = vcombine.low %v8585_v17, %v8589_v15  ;;  %v8665_v15 = vld [vmem:[%s18204_s22 + $0x390] sm:$0xff] }
 0x5ea   : > { %11938 = vmatprep.subr.bf16.mxu1 %v15919_v51  ;;  %v15489_v51 = vcombine.high %v8577_v7, %v8581_v10  ;;  %v8797_v61 = vld [vmem:[%s18204_s22 + $0x7b0] sm:$0xff] }
 0x5eb   : > { %11898 = vmatpush2.bf16.msra.mxu0 %v15790_v34  ;;  %v8701_v34 = vld [vmem:[%s18204_s22 + $0x4b0] sm:$0xff] }
 0x5ec   : > { %11899 = vmatprep.subr.bf16.mxu0 %v15783_v39  ;;  %v15616_v39 = vcombine.low %v8705_v12, %v8709_v32  ;;  %v15609_v27 = vcombine.high %v8697_v19, %v8701_v34  ;;  %v15704_v12 = vcombine.low %v8793_v20, %v8797_v61 }
 0x5ed   : > { %11939 = vmatpush2.bf16.msra.mxu1 %v15918_v63  ;;  %v15488_v63 = vcombine.low %v8577_v7, %v8581_v10  ;;  %v8789_v7 = vld [vmem:[%s18204_s22 + $0x770] sm:$0xff] }
 0x5ee   : > { %11940 = vmatprep.subr.bf16.mxu1 %v15911_v26  ;;  %v15481_v26 = vcombine.high %v8569_v14, %v8573_v18 }
 0x5ef   : > { %11900 = vmatpush2.bf16.msra.mxu0 %v15782_v4  ;;  %v8693_v4 = vld [vmem:[%s18204_s22 + $0x470] sm:$0xff] }
 0x5f0   : > { %11951 = vmatprep.subr.bf16.mxu0 %v15521_v46  ;;  %v15608_v46 = vcombine.low %v8697_v19, %v8701_v34  ;;  %v15601_v48 = vcombine.high %v8689_v47, %v8693_v4 }
 0x5f1   : > { %11941 = vmatpush2.bf16.msra.mxu1 %v15910_v41  ;;  %v15480_v41 = vcombine.low %v8569_v14, %v8573_v18  ;;  %v8781_v14 = vld [vmem:[%s18204_s22 + $0x730] sm:$0xff] }
 0x5f2   : > { %11992 = vmatprep.subr.bf16.mxu1 %v15649_v53  ;;  %v19799_v5 = vpop.f32.mrf.mxu0  ;;  %11902 = vmatmul.mubr.bf16.vlgmr.msra.gmra.mxu0 %v18409_v55  ;;  %v15473_v53 = vcombine.high %v8561_v30, %v8565_v44 }
 0x5f3   : > { %11952 = vmatpush1.bf16.msra.mxu0 %v15520_v40  ;;  %11983 = vmatprep.mubr.bf16.mxu0 %v18273_v11  ;;  %v8685_v40 = vld [vmem:[%s18204_s22 + $0x430] sm:$0xff] }
 0x5f4   : > { %v19804_v3 = vpop.f32.mrf.mxu1  ;;  %11943 = vmatmul.mubr.bf16.vlgmr.msra.gmra.mxu1 %v18415_v58  ;;  %v19807_v8 = vpop.f32.mrf.mxu0  ;;  %11953 = vmatprep.subr.bf16.mxu0 %v15513_v0  ;;  %v15600_v0 = vcombine.low %v8689_v47, %v8693_v4  ;;  %v15593_v25 = vcombine.high %v8681_v38, %v8685_v40 }
 0x5f5   : > { %11993 = vmatpush1.bf16.msra.mxu1 %v15648_v22  ;;  %12024 = vmatprep.mubr.bf16.mxu1 %v18280_v16  ;;  %v15472_v22 = vcombine.low %v8561_v30, %v8565_v44  ;;  %v8773_v30 = vld [vmem:[%s18204_s22 + $0x6f0] sm:$0xff] }
 0x5f6   : > { %v19809_v59 = vpop.f32.mrf.mxu1  ;;  %11994 = vmatprep.subr.bf16.mxu1 %v15641_v24  ;;  %v11661_v35 = vpop.f32.mrf.mxu0  ;;  %v15465_v24 = vcombine.high %v8553_v57, %v8557_v37 }
 0x5f7   : > { %11954 = vmatpush1.bf16.msra.mxu0 %v15512_v9  ;;  %v8805_v9 = vld [vmem:[%s18204_s22 + $0x7f0] sm:$0xff] }
 0x5f8   : > { %v11702_v62 = vpop.f32.mrf.mxu1  ;;  %v11662_v2 = vpop.f32.mrf.mxu0  ;;  %11955 = vmatprep.subr.bf16.mxu0 %v15505_v56  ;;  %v15592_v56 = vcombine.low %v8681_v38, %v8685_v40  ;;  %v15713_v17 = vcombine.high %v8801_v50, %v8805_v9  ;;  %v8669_v35 = vld [vmem:[%s18204_s22 + $0x3b0] sm:$0xff] }
 0x5f9   : > { %11995 = vmatpush1.bf16.msra.mxu1 %v15640_v54  ;;  %v15464_v54 = vcombine.low %v8553_v57, %v8557_v37  ;;  %v15584_v62 = vcombine.low %v8673_v43, %v8677_v49  ;;  %v15577_v2 = vcombine.high %v8665_v15, %v8669_v35  ;;  %v15576_v10 = vcombine.low %v8665_v15, %v8669_v35  ;;  %v8765_v57 = vld [vmem:[%s18204_s22 + $0x6b0] sm:$0xff] }
 0x5fa   : > { %v11703_v28 = vpop.f32.mrf.mxu1  ;;  %11996 = vmatprep.subr.bf16.mxu1 %v15633_v60  ;;  %v15585_v60 = vcombine.high %v8673_v43, %v8677_v49  ;;  %v8757_v43 = vld [vmem:[%s18204_s22 + $0x670] sm:$0xff] }
 0x5fb   : > { %11956 = vmatpush1.bf16.msra.mxu0 %v15504_v1  ;;  %v15712_v1 = vcombine.low %v8801_v50, %v8805_v9  ;;  %v8661_v28 = vld [vmem:[%s18204_s22 + $0x370] sm:$0xff] }
 0x5fc   : > { %11957 = vmatprep.subr.bf16.mxu0 %v15497_v29  ;;  %v8657_v29 = vld [vmem:[%s18204_s22 + $0x350] sm:$0xff] }
 0x5fd   : > { %11997 = vmatpush1.bf16.msra.mxu1 %v15632_v21  ;;  %v15705_v21 = vcombine.high %v8793_v20, %v8797_v61  ;;  %v15569_v32 = vcombine.high %v8657_v29, %v8661_v28  ;;  %v15568_v18 = vcombine.low %v8657_v29, %v8661_v28  ;;  %v8749_v15 = vld [vmem:[%s18204_s22 + $0x630] sm:$0xff] }
 0x5fe   : > { %11998 = vmatprep.subr.bf16.mxu1 %v15625_v6  ;;  %v8785_v6 = vld [vmem:[%s18204_s22 + $0x750] sm:$0xff] }
 0x5ff   : > { %11958 = vmatpush1.bf16.msra.mxu0 %v15496_v31  ;;  %v15697_v31 = vcombine.high %v8785_v6, %v8789_v7  ;;  %v15696_v19 = vcombine.low %v8785_v6, %v8789_v7  ;;  %v8997_v29 = vld [vmem:[%s18204_s22 + $0xdf0] sm:$0xff] }
 0x600   : > { %11959 = vmatprep.subr.bf16.mxu0 %v15489_v51  ;;  %v8653_v51 = vld [vmem:[%s18204_s22 + $0x330] sm:$0xff] }
 0x601   : > { %11999 = vmatpush1.bf16.msra.mxu1 %v15624_v52  ;;  %v8649_v52 = vld [vmem:[%s18204_s22 + $0x310] sm:$0xff] }
 0x602   : > { %12000 = vmatprep.subr.bf16.mxu1 %v15617_v13  ;;  %v8777_v13 = vld [vmem:[%s18204_s22 + $0x710] sm:$0xff]  ;;  %v15561_v34 = vcombine.high %v8649_v52, %v8653_v51  ;;  %v15560_v44 = vcombine.low %v8649_v52, %v8653_v51 }
 0x603   : > { %11960 = vmatpush1.bf16.msra.mxu0 %v15488_v63  ;;  %v15689_v63 = vcombine.high %v8777_v13, %v8781_v14  ;;  %v15688_v47 = vcombine.low %v8777_v13, %v8781_v14  ;;  %v8989_v52 = vld [vmem:[%s18204_s22 + $0xdb0] sm:$0xff] }
 0x604   : > { %11961 = vmatprep.subr.bf16.mxu0 %v15481_v26  ;;  %v8645_v26 = vld [vmem:[%s18204_s22 + $0x2f0] sm:$0xff] }
 0x605   : > { %12001 = vmatpush1.bf16.msra.mxu1 %v15616_v39  ;;  %v8641_v39 = vld [vmem:[%s18204_s22 + $0x2d0] sm:$0xff] }
 0x606   : > { %12002 = vmatprep.subr.bf16.mxu1 %v15609_v27  ;;  %v8769_v27 = vld [vmem:[%s18204_s22 + $0x6d0] sm:$0xff]  ;;  %v15553_v4 = vcombine.high %v8641_v39, %v8645_v26  ;;  %v15552_v37 = vcombine.low %v8641_v39, %v8645_v26 }
 0x607   : > { %11962 = vmatpush1.bf16.msra.mxu0 %v15480_v41  ;;  %v15681_v41 = vcombine.high %v8769_v27, %v8773_v30  ;;  %v15680_v38 = vcombine.low %v8769_v27, %v8773_v30  ;;  %v8977_v26 = vld [vmem:[%s18204_s22 + $0xd50] sm:$0xff]  ;;  %v11701_v30 = vadd.f32 %v19809_v59, %v19807_v8 }
 0x608   : > { %11963 = vmatprep.subr.bf16.mxu0 %v15473_v53  ;;  %v8637_v53 = vld [vmem:[%s18204_s22 + $0x2b0] sm:$0xff] }
 0x609   : > { %12003 = vmatpush1.bf16.msra.mxu1 %v15608_v46  ;;  %v8633_v46 = vld [vmem:[%s18204_s22 + $0x290] sm:$0xff] }
 0x60a   : > { %12004 = vmatprep.subr.bf16.mxu1 %v15601_v48  ;;  %v8761_v48 = vld [vmem:[%s18204_s22 + $0x690] sm:$0xff]  ;;  %v15545_v40 = vcombine.high %v8633_v46, %v8637_v53  ;;  %v15544_v49 = vcombine.low %v8633_v46, %v8637_v53 }
 0x60b   : > { %11964 = vmatpush1.bf16.msra.mxu0 %v15472_v22  ;;  %v15673_v22 = vcombine.high %v8761_v48, %v8765_v57  ;;  %v15672_v50 = vcombine.low %v8761_v48, %v8765_v57  ;;  %v8981_v27 = vld [vmem:[%s18204_s22 + $0xd70] sm:$0xff] }
 0x60c   : > { %11965 = vmatprep.subr.bf16.mxu0 %v15465_v24  ;;  %v8629_v24 = vld [vmem:[%s18204_s22 + $0x270] sm:$0xff]  ;;  %v15889_v8 = vcombine.high %v8977_v26, %v8981_v27 }
 0x60d   : > { %12005 = vmatpush1.bf16.msra.mxu1 %v15600_v0  ;;  %v8625_v0 = vld [vmem:[%s18204_s22 + $0x250] sm:$0xff] }
 0x60e   : > { %12006 = vmatprep.subr.bf16.mxu1 %v15593_v25  ;;  %v8753_v25 = vld [vmem:[%s18204_s22 + $0x650] sm:$0xff]  ;;  %v15537_v9 = vcombine.high %v8625_v0, %v8629_v24  ;;  %v15536_v35 = vcombine.low %v8625_v0, %v8629_v24 }
 0x60f   : > { %11966 = vmatpush1.bf16.msra.mxu0 %v15464_v54  ;;  %v15665_v54 = vcombine.high %v8753_v25, %v8757_v43  ;;  %v15664_v20 = vcombine.low %v8753_v25, %v8757_v43  ;;  %v8841_v59 = vld [vmem:[%s18204_s22 + $0x910] sm:$0xff] }
 0x610   : > { %11967 = vmatprep.subr.bf16.mxu0 %v15585_v60  ;;  %v8621_v60 = vld [vmem:[%s18204_s22 + $0x230] sm:$0xff] }
 0x611   : > { %12007 = vmatpush1.bf16.msra.mxu1 %v15592_v56  ;;  %v8617_v56 = vld [vmem:[%s18204_s22 + $0x210] sm:$0xff] }
 0x612   : > { %12008 = vmatprep.subr.bf16.mxu1 %v15713_v17  ;;  %v8745_v17 = vld [vmem:[%s18204_s22 + $0x610] sm:$0xff]  ;;  %v15529_v61 = vcombine.high %v8617_v56, %v8621_v60  ;;  %v15528_v28 = vcombine.low %v8617_v56, %v8621_v60 }
 0x613   : > { %11968 = vmatpush2.bf16.msra.mxu0 %v15584_v62  ;;  %v15657_v62 = vcombine.high %v8745_v17, %v8749_v15  ;;  %v15656_v6 = vcombine.low %v8745_v17, %v8749_v15  ;;  %v8845_v57 = vld [vmem:[%s18204_s22 + $0x930] sm:$0xff] }
 0x614   : > { %11969 = vmatprep.subr.bf16.mxu0 %v15577_v2  ;;  %v8869_v2 = vld [vmem:[%s18204_s22 + $0x9f0] sm:$0xff] }
 0x615   : > { %12009 = vmatpush2.bf16.msra.mxu1 %v15712_v1  ;;  %v8865_v1 = vld [vmem:[%s18204_s22 + $0x9d0] sm:$0xff] }
 0x616   : > { %12010 = vmatprep.subr.bf16.mxu1 %v15705_v21  ;;  %v8993_v21 = vld [vmem:[%s18204_s22 + $0xdd0] sm:$0xff]  ;;  %v15777_v7 = vcombine.high %v8865_v1, %v8869_v2  ;;  %v15776_v51 = vcombine.low %v8865_v1, %v8869_v2 }
 0x617   : > { %11970 = vmatpush2.bf16.msra.mxu0 %v15576_v10  ;;  %v15905_v10 = vcombine.high %v8993_v21, %v8997_v29  ;;  %v15904_v13 = vcombine.low %v8993_v21, %v8997_v29  ;;  %v8833_v17 = vld [vmem:[%s18204_s22 + $0x8d0] sm:$0xff] }
 0x618   : > { %11971 = vmatprep.subr.bf16.mxu0 %v15569_v32  ;;  %v8861_v32 = vld [vmem:[%s18204_s22 + $0x9b0] sm:$0xff] }
 0x619   : > { %12011 = vmatpush2.bf16.msra.mxu1 %v15704_v12  ;;  %v8857_v12 = vld [vmem:[%s18204_s22 + $0x990] sm:$0xff] }
 0x61a   : > { %12012 = vmatprep.subr.bf16.mxu1 %v15697_v31  ;;  %v8985_v31 = vld [vmem:[%s18204_s22 + $0xd90] sm:$0xff]  ;;  %v15769_v14 = vcombine.high %v8857_v12, %v8861_v32 }
 0x61b   : > { %11972 = vmatpush2.bf16.msra.mxu0 %v15568_v18  ;;  %v11699_v18 = vadd.f32 %v19804_v3, %v19799_v5  ;;  %v15768_v5 = vcombine.low %v8857_v12, %v8861_v32  ;;  %v8837_v15 = vld [vmem:[%s18204_s22 + $0x8f0] sm:$0xff] }
 0x61c   : > { %11973 = vmatprep.subr.bf16.mxu0 %v15561_v34  ;;  %v8849_v34 = vld [vmem:[%s18204_s22 + $0x950] sm:$0xff]  ;;  %v15745_v2 = vcombine.high %v8833_v17, %v8837_v15 }
 0x61d   : > { %12013 = vmatpush2.bf16.msra.mxu1 %v15696_v19  ;;  %v15897_v19 = vcombine.high %v8985_v31, %v8989_v52  ;;  %v8825_v29 = vld [vmem:[%s18204_s22 + $0x890] sm:$0xff] }
 0x61e   : > { %12014 = vmatprep.subr.bf16.mxu1 %v15689_v63  ;;  %v8853_v63 = vld [vmem:[%s18204_s22 + $0x970] sm:$0xff] }
 0x61f   : > { %11974 = vmatpush2.bf16.msra.mxu0 %v15560_v44  ;;  %v15760_v25 = vcombine.low %v8849_v34, %v8853_v63 }
 0x620   : > { %11975 = vmatprep.subr.bf16.mxu0 %v15553_v4  ;;  %v15896_v4 = vcombine.low %v8985_v31, %v8989_v52  ;;  %v8817_v52 = vld [vmem:[%s18204_s22 + $0x850] sm:$0xff] }
 0x621   : > { %12015 = vmatpush2.bf16.msra.mxu1 %v15688_v47 }
 0x622   : > { %12016 = vmatprep.subr.bf16.mxu1 %v15681_v41  ;;  %v15761_v41 = vcombine.high %v8849_v34, %v8853_v63 }
 0x623   : > { %11976 = vmatpush2.bf16.msra.mxu0 %v15552_v37 }
 0x624   : > { %11977 = vmatprep.subr.bf16.mxu0 %v15545_v40  ;;  %v8973_v40 = vld [vmem:[%s18204_s22 + $0xd30] sm:$0xff] }
 0x625   : > { %12017 = vmatpush2.bf16.msra.mxu1 %v15680_v38  ;;  %v8969_v38 = vld [vmem:[%s18204_s22 + $0xd10] sm:$0xff] }
 0x626   : > { %12018 = vmatprep.subr.bf16.mxu1 %v15673_v22  ;;  %v15881_v60 = vcombine.high %v8969_v38, %v8973_v40  ;;  %v15880_v1 = vcombine.low %v8969_v38, %v8973_v40  ;;  %v8925_v38 = vld [vmem:[%s18204_s22 + $0xbb0] sm:$0xff] }
 0x627   : > { %11978 = vmatpush2.bf16.msra.mxu0 %v15544_v49  ;;  %v15888_v49 = vcombine.low %v8977_v26, %v8981_v27  ;;  %v8813_v26 = vld [vmem:[%s18204_s22 + $0x830] sm:$0xff] }
 0x628   : > { %11979 = vmatprep.subr.bf16.mxu0 %v15537_v9  ;;  %v8937_v27 = vld [vmem:[%s18204_s22 + $0xc10] sm:$0xff] }
 0x629   : > { %12019 = vmatpush2.bf16.msra.mxu1 %v15672_v50  ;;  %v15753_v50 = vcombine.high %v8841_v59, %v8845_v57  ;;  %v9049_v40 = vld [vmem:[%s18204_s22 + $0xf90] sm:$0xff] }
 0x62a   : > { %12020 = vmatprep.subr.bf16.mxu1 %v15665_v54 }
 0x62b   : > { %11980 = vmatpush2.bf16.msra.mxu0 %v15536_v35  ;;  %v8961_v35 = vld [vmem:[%s18204_s22 + $0xcd0] sm:$0xff] }
 0x62c   : > { %11981 = vmatprep.subr.bf16.mxu0 %v15529_v61 }
 0x62d   : > { %12021 = vmatpush2.bf16.msra.mxu1 %v15664_v20  ;;  %v8965_v20 = vld [vmem:[%s18204_s22 + $0xcf0] sm:$0xff] }
 0x62e   : > { %12022 = vmatprep.subr.bf16.mxu1 %v15657_v62  ;;  %v15752_v62 = vcombine.low %v8841_v59, %v8845_v57  ;;  %v15873_v21 = vcombine.high %v8961_v35, %v8965_v20  ;;  %v15872_v12 = vcombine.low %v8961_v35, %v8965_v20  ;;  %v8905_v35 = vld [vmem:[%s18204_s22 + $0xb10] sm:$0xff] }
 0x62f   : > { %11982 = vmatpush2.bf16.msra.mxu0 %v15528_v28  ;;  %v8829_v28 = vld [vmem:[%s18204_s22 + $0x8b0] sm:$0xff] }
 0x630   : > { %12033 = vmatprep.subr.bf16.mxu0 %v15777_v7  ;;  %v8957_v7 = vld [vmem:[%s18204_s22 + $0xcb0] sm:$0xff]  ;;  %v15737_v32 = vcombine.high %v8825_v29, %v8829_v28 }
 0x631   : > { %12023 = vmatpush2.bf16.msra.mxu1 %v15656_v6  ;;  %v8953_v6 = vld [vmem:[%s18204_s22 + $0xc90] sm:$0xff] }
 0x632   : > { %12074 = vmatprep.subr.bf16.mxu1 %v15905_v10  ;;  %v11739_v39 = vpop.f32.mrf.mxu0  ;;  %11984 = vmatmul.mubr.bf16.vlgmr.msra.gmra.mxu0 %v18327_v33  ;;  %v15744_v10 = vcombine.low %v8833_v17, %v8837_v15  ;;  %v15865_v31 = vcombine.high %v8953_v6, %v8957_v7  ;;  %v8909_v20 = vld [vmem:[%s18204_s22 + $0xb30] sm:$0xff] }
 0x633   : > { %v11740_v44 = vadd.f32 %v11739_v39, %v11699_v18  ;;  %12034 = vmatpush1.bf16.msra.mxu0 %v15776_v51  ;;  %12065 = vmatprep.mubr.bf16.mxu0 %v18339_v42  ;;  %v8821_v51 = vld [vmem:[%s18204_s22 + $0x870] sm:$0xff]  ;;  %v15736_v18 = vcombine.low %v8825_v29, %v8829_v28 }
 0x634   : > { %v11780_v47 = vpop.f32.mrf.mxu1  ;;  %12025 = vmatmul.mubr.bf16.vlgmr.msra.gmra.mxu1 %v18335_v36  ;;  %v11741_v3 = vpop.f32.mrf.mxu0  ;;  %12035 = vmatprep.subr.bf16.mxu0 %v15769_v14  ;;  %v8949_v14 = vld [vmem:[%s18204_s22 + $0xc70] sm:$0xff]  ;;  %v15729_v34 = vcombine.high %v8817_v52, %v8821_v51 }
 0x635   : > { %12075 = vmatpush1.bf16.msra.mxu1 %v15904_v13  ;;  %v11781_v46 = vadd.f32 %v11780_v47, %v11740_v44  ;;  %v11742_v53 = vadd.f32 %v11741_v3, %v11701_v30  ;;  %12106 = vmatprep.mubr.bf16.mxu1 %v18344_v45  ;;  %v8945_v13 = vld [vmem:[%s18204_s22 + $0xc50] sm:$0xff]  ;;  %v15728_v44 = vcombine.low %v8817_v52, %v8821_v51 }
 0x636   : > { %v11782_v48 = vpop.f32.mrf.mxu1  ;;  %12076 = vmatprep.subr.bf16.mxu1 %v15897_v19  ;;  %v11743_v37 = vpop.f32.mrf.mxu0  ;;  %v15864_v19 = vcombine.low %v8953_v6, %v8957_v7  ;;  %v15857_v63 = vcombine.high %v8945_v13, %v8949_v14  ;;  %v8809_v39 = vld [vmem:[%s18204_s22 + $0x810] sm:$0xff]  ;;  %v15856_v47 = vcombine.low %v8945_v13, %v8949_v14 }
 0x637   : > { %v12286_v22 = vrot.slane %v11781_v46, %v18634_v23  ;;  %v11783_v0 = vadd.f32 %v11782_v48, %v11742_v53  ;;  %12036 = vmatpush1.bf16.msra.mxu0 %v15768_v5  ;;  %v8941_v30 = vld [vmem:[%s18204_s22 + $0xc30] sm:$0xff]  ;;  %v15721_v5 = vcombine.high %v8809_v39, %v8813_v26  ;;  %v15720_v48 = vcombine.low %v8809_v39, %v8813_v26 }
 0x638   : > { %v11784_v24 = vpop.f32.mrf.mxu1  ;;  %v11744_v43 = vpop.f32.mrf.mxu0  ;;  %12037 = vmatprep.subr.bf16.mxu0 %v15761_v41  ;;  %v15849_v3 = vcombine.high %v8937_v27, %v8941_v30  ;;  %v8933_v41 = vld [vmem:[%s18204_s22 + $0xbf0] sm:$0xff] }
 0x639   : > { %12077 = vmatpush1.bf16.msra.mxu1 %v15896_v4  ;;  %v12287_v9 = vcombine.high %v12286_v22, %v12286_v22  ;;  %15972 = vst.sshfl [vmem:[%s19891_s15] sm:$0x1 pattern:$0x73625140] %v12286_v22  ;;  %v12314_v54 = vrot.slane %v11783_v0, %v18634_v23  ;;  %v8929_v4 = vld [vmem:[%s18204_s22 + $0xbd0] sm:$0xff] }
 0x63a   : > { %v11785_v56 = vpop.f32.mrf.mxu1  ;;  %12078 = vmatprep.subr.bf16.mxu1 %v15889_v8  ;;  %v9057_v46 = vld [vmem:[%s18204_s22 + $0xfd0] sm:$0xff]  ;;  %v15848_v8 = vcombine.low %v8937_v27, %v8941_v30  ;;  %v15841_v59 = vcombine.high %v8929_v4, %v8933_v41  ;;  %v15840_v0 = vcombine.low %v8929_v4, %v8933_v41 }
 0x63b   : > { %15973 = vst.sshfl [vmem:[%s19891_s15 + $0x40] sm:$0x1 pattern:$0x73625140] %v12287_v9  ;;  %v12315_v61 = vcombine.high %v12314_v54, %v12314_v54  ;;  %12038 = vmatpush1.bf16.msra.mxu0 %v15760_v25  ;;  %v9061_v53 = vld [vmem:[%s18204_s22 + $0xff0] sm:$0xff] }
 0x63c   : > { %16111 = vst.sshfl [vmem:[%s19891_s15 + $0x1] sm:$0x1 pattern:$0x73625140] %v12314_v54  ;;  %12039 = vmatprep.subr.bf16.mxu0 %v15753_v50  ;;  %v15969_v57 = vcombine.high %v9057_v46, %v9061_v53  ;;  %v8921_v37 = vld [vmem:[%s18204_s22 + $0xb90] sm:$0xff]  ;;  %v15968_v24 = vcombine.low %v9057_v46, %v9061_v53 }
 0x63d   : > { %12079 = vmatpush1.bf16.msra.mxu1 %v15888_v49  ;;  %16112 = vst.sshfl [vmem:[%s19891_s15 + $0x41] sm:$0x1 pattern:$0x73625140] %v12315_v61  ;;  %v9053_v22 = vld [vmem:[%s18204_s22 + $0xfb0] sm:$0xff]  ;;  %v15833_v25 = vcombine.high %v8921_v37, %v8925_v38  ;;  %v15832_v56 = vcombine.low %v8921_v37, %v8925_v38  ;;  %v8610_v38 = vld [vmem:[%s18204_s22 + $0x1d8] sm:$0xff] }
 0x63e   : > { %12080 = vmatprep.subr.bf16.mxu1 %v15881_v60  ;;  %v15961_v43 = vcombine.high %v9049_v40, %v9053_v22  ;;  %v8913_v49 = vld [vmem:[%s18204_s22 + $0xb50] sm:$0xff]  ;;  %v15960_v60 = vcombine.low %v9049_v40, %v9053_v22  ;;  %v8614_v40 = vld [vmem:[%s18204_s22 + $0x1f8] sm:$0xff] }
 0x63f   : > { %12040 = vmatpush1.bf16.msra.mxu0 %v15752_v62  ;;  %v8917_v50 = vld [vmem:[%s18204_s22 + $0xb70] sm:$0xff]  ;;  %v8738_v22 = vld [vmem:[%s18204_s22 + $0x5d8] sm:$0xff] }
 0x640   : > { %12041 = vmatprep.subr.bf16.mxu0 %v15745_v2  ;;  %v9041_v9 = vld [vmem:[%s18204_s22 + $0xf50] sm:$0xff]  ;;  %v15825_v17 = vcombine.high %v8913_v49, %v8917_v50 }
 0x641   : > { %12081 = vmatpush1.bf16.msra.mxu1 %v15880_v1  ;;  %v9045_v54 = vld [vmem:[%s18204_s22 + $0xf70] sm:$0xff]  ;;  %v15824_v1 = vcombine.low %v8913_v49, %v8917_v50  ;;  %v8602_v50 = vld [vmem:[%s18204_s22 + $0x198] sm:$0xff] }
 0x642   : > { %12082 = vmatprep.subr.bf16.mxu1 %v15873_v21  ;;  %v15953_v15 = vcombine.high %v9041_v9, %v9045_v54  ;;  %v9033_v61 = vld [vmem:[%s18204_s22 + $0xf10] sm:$0xff]  ;;  %v15952_v2 = vcombine.low %v9041_v9, %v9045_v54  ;;  %v15817_v21 = vcombine.high %v8905_v35, %v8909_v20  ;;  %v8606_v9 = vld [vmem:[%s18204_s22 + $0x1b8] sm:$0xff] }
 0x643   : > { %12042 = vmatpush1.bf16.msra.mxu0 %v15744_v10  ;;  %v9037_v62 = vld [vmem:[%s18204_s22 + $0xf30] sm:$0xff]  ;;  %v8730_v54 = vld [vmem:[%s18204_s22 + $0x598] sm:$0xff] }
 0x644   : > { %12043 = vmatprep.subr.bf16.mxu0 %v15737_v32  ;;  %v15945_v29 = vcombine.high %v9033_v61, %v9037_v62  ;;  %v8897_v28 = vld [vmem:[%s18204_s22 + $0xad0] sm:$0xff]  ;;  %v15944_v32 = vcombine.low %v9033_v61, %v9037_v62  ;;  %v8598_v61 = vld [vmem:[%s18204_s22 + $0x178] sm:$0xff] }
 0x645   : > { %12083 = vmatpush1.bf16.msra.mxu1 %v15872_v12  ;;  %v8901_v6 = vld [vmem:[%s18204_s22 + $0xaf0] sm:$0xff]  ;;  %v15816_v12 = vcombine.low %v8905_v35, %v8909_v20  ;;  %v8594_v20 = vld [vmem:[%s18204_s22 + $0x158] sm:$0xff] }
 0x646   : > { %12084 = vmatprep.subr.bf16.mxu1 %v15865_v31  ;;  %v9025_v7 = vld [vmem:[%s18204_s22 + $0xed0] sm:$0xff]  ;;  %v15809_v31 = vcombine.high %v8897_v28, %v8901_v6 }
 0x647   : > { %12044 = vmatpush1.bf16.msra.mxu0 %v15736_v18  ;;  %v9029_v10 = vld [vmem:[%s18204_s22 + $0xef0] sm:$0xff] }
 0x648   : > { %12045 = vmatprep.subr.bf16.mxu0 %v15729_v34  ;;  %v15937_v52 = vcombine.high %v9025_v7, %v9029_v10  ;;  %v8889_v51 = vld [vmem:[%s18204_s22 + $0xa90] sm:$0xff]  ;;  %v15936_v34 = vcombine.low %v9025_v7, %v9029_v10  ;;  %v15507_v7 = vcombine.high %v8594_v20, %v8598_v61 }
 0x649   : > { %12085 = vmatpush1.bf16.msra.mxu1 %v15864_v19  ;;  %v8893_v13 = vld [vmem:[%s18204_s22 + $0xab0] sm:$0xff]  ;;  %v15808_v19 = vcombine.low %v8897_v28, %v8901_v6 }
 0x64a   : > { %12086 = vmatprep.subr.bf16.mxu1 %v15857_v63  ;;  %v9017_v14 = vld [vmem:[%s18204_s22 + $0xe90] sm:$0xff]  ;;  %v15801_v63 = vcombine.high %v8889_v51, %v8893_v13 }
 0x64b   : > { %12046 = vmatpush1.bf16.msra.mxu0 %v15728_v44  ;;  %v9021_v18 = vld [vmem:[%s18204_s22 + $0xeb0] sm:$0xff] }
 0x64c   : > { %12047 = vmatprep.subr.bf16.mxu0 %v15721_v5  ;;  %v15929_v39 = vcombine.high %v9017_v14, %v9021_v18  ;;  %v8881_v26 = vld [vmem:[%s18204_s22 + $0xa50] sm:$0xff]  ;;  %v15928_v5 = vcombine.low %v9017_v14, %v9021_v18  ;;  %v15506_v18 = vcombine.low %v8594_v20, %v8598_v61  ;;  %v8678_v20 = vld [vmem:[%s18204_s22 + $0x3f8] sm:$0xff] }
 0x64d   : > { %12087 = vmatpush1.bf16.msra.mxu1 %v15856_v47  ;;  %v8885_v27 = vld [vmem:[%s18204_s22 + $0xa70] sm:$0xff]  ;;  %v15800_v47 = vcombine.low %v8889_v51, %v8893_v13  ;;  %v8714_v51 = vld [vmem:[%s18204_s22 + $0x518] sm:$0xff] }
 0x64e   : > { %12088 = vmatprep.subr.bf16.mxu1 %v15849_v3  ;;  %v9009_v30 = vld [vmem:[%s18204_s22 + $0xe50] sm:$0xff]  ;;  %v15793_v3 = vcombine.high %v8881_v26, %v8885_v27  ;;  %v8718_v13 = vld [vmem:[%s18204_s22 + $0x538] sm:$0xff] }
 0x64f   : > { %12048 = vmatpush1.bf16.msra.mxu0 %v15720_v48  ;;  %v9013_v44 = vld [vmem:[%s18204_s22 + $0xe70] sm:$0xff]  ;;  %v8802_v61 = vld [vmem:[%s18204_s22 + $0x7d8] sm:$0xff] }
 0x650   : > { %12049 = vmatprep.subr.bf16.mxu0 %v15841_v59  ;;  %v15921_v4 = vcombine.high %v9009_v30, %v9013_v44  ;;  %v8873_v41 = vld [vmem:[%s18204_s22 + $0xa10] sm:$0xff]  ;;  %v15920_v59 = vcombine.low %v9009_v30, %v9013_v44  ;;  %v8706_v30 = vld [vmem:[%s18204_s22 + $0x4d8] sm:$0xff] }
 0x651   : > { %12089 = vmatpush1.bf16.msra.mxu1 %v15848_v8  ;;  %v8877_v46 = vld [vmem:[%s18204_s22 + $0xa30] sm:$0xff]  ;;  %v15792_v8 = vcombine.low %v8881_v26, %v8885_v27  ;;  %v8578_v26 = vld [vmem:[%s18204_s22 + $0xd8] sm:$0xff] }
 0x652   : > { %12090 = vmatprep.subr.bf16.mxu1 %v15969_v57  ;;  %v9001_v53 = vld [vmem:[%s18204_s22 + $0xe10] sm:$0xff]  ;;  %v15785_v57 = vcombine.high %v8873_v41, %v8877_v46  ;;  %v8582_v27 = vld [vmem:[%s18204_s22 + $0xf8] sm:$0xff] }
 0x653   : > { %12050 = vmatpush2.bf16.msra.mxu0 %v15840_v0  ;;  %v9005_v48 = vld [vmem:[%s18204_s22 + $0xe30] sm:$0xff]  ;;  %v8742_v0 = vld [vmem:[%s18204_s22 + $0x5f8] sm:$0xff] }
 0x654   : > { %12051 = vmatprep.subr.bf16.mxu0 %v15833_v25  ;;  %v15913_v37 = vcombine.high %v9001_v53, %v9005_v48  ;;  %v15912_v25 = vcombine.low %v9001_v53, %v9005_v48  ;;  %v15651_v49 = vcombine.high %v8738_v22, %v8742_v0  ;;  %v8710_v44 = vld [vmem:[%s18204_s22 + $0x4f8] sm:$0xff]  ;;  %v15490_v48 = vcombine.low %v8578_v26, %v8582_v27 }
 0x655   : > { %12091 = vmatpush2.bf16.msra.mxu1 %v15968_v24  ;;  %v15784_v24 = vcombine.low %v8873_v41, %v8877_v46  ;;  %v8574_v41 = vld [vmem:[%s18204_s22 + $0xb8] sm:$0xff] }
 0x656   : > { %12092 = vmatprep.subr.bf16.mxu1 %v15961_v43  ;;  %v15523_v43 = vcombine.high %v8610_v38, %v8614_v40  ;;  %v8698_v46 = vld [vmem:[%s18204_s22 + $0x498] sm:$0xff] }
 0x657   : > { %12052 = vmatpush2.bf16.msra.mxu0 %v15832_v56  ;;  %v8734_v56 = vld [vmem:[%s18204_s22 + $0x5b8] sm:$0xff] }
 0x658   : > { %12053 = vmatprep.subr.bf16.mxu0 %v15825_v17  ;;  %v15650_v17 = vcombine.low %v8738_v22, %v8742_v0  ;;  %v15643_v35 = vcombine.high %v8730_v54, %v8734_v56  ;;  %v15642_v6 = vcombine.low %v8730_v54, %v8734_v56  ;;  %v8702_v53 = vld [vmem:[%s18204_s22 + $0x4b8] sm:$0xff] }
 0x659   : > { %12093 = vmatpush2.bf16.msra.mxu1 %v15960_v60  ;;  %v15522_v60 = vcombine.low %v8610_v38, %v8614_v40  ;;  %v8566_v38 = vld [vmem:[%s18204_s22 + $0x78] sm:$0xff] }
 0x65a   : > { %12094 = vmatprep.subr.bf16.mxu1 %v15953_v15  ;;  %v15515_v15 = vcombine.high %v8602_v50, %v8606_v9  ;;  %v8690_v40 = vld [vmem:[%s18204_s22 + $0x458] sm:$0xff] }
 0x65b   : > { %12054 = vmatpush2.bf16.msra.mxu0 %v15824_v1  ;;  %v8722_v1 = vld [vmem:[%s18204_s22 + $0x558] sm:$0xff] }
 0x65c   : > { %12055 = vmatprep.subr.bf16.mxu0 %v15817_v21  ;;  %v8694_v22 = vld [vmem:[%s18204_s22 + $0x478] sm:$0xff] }
 0x65d   : > { %12095 = vmatpush2.bf16.msra.mxu1 %v15952_v2  ;;  %v8726_v2 = vld [vmem:[%s18204_s22 + $0x578] sm:$0xff] }
 0x65e   : > { %12096 = vmatprep.subr.bf16.mxu1 %v15945_v29  ;;  %v15514_v29 = vcombine.low %v8602_v50, %v8606_v9  ;;  %v8558_v50 = vld [vmem:[%s18204_s22 + $0x38] sm:$0xff] }
 0x65f   : > { %12056 = vmatpush2.bf16.msra.mxu0 %v15816_v12  ;;  %v15635_v12 = vcombine.high %v8722_v1, %v8726_v2  ;;  %v8682_v9 = vld [vmem:[%s18204_s22 + $0x418] sm:$0xff] }
 0x660   : > { %12057 = vmatprep.subr.bf16.mxu0 %v15809_v31  ;;  %v8590_v31 = vld [vmem:[%s18204_s22 + $0x138] sm:$0xff] }
 0x661   : > { %12097 = vmatpush2.bf16.msra.mxu1 %v15944_v32  ;;  %v8586_v32 = vld [vmem:[%s18204_s22 + $0x118] sm:$0xff] }
 0x662   : > { %12098 = vmatprep.subr.bf16.mxu1 %v15937_v52  ;;  %v8686_v54 = vld [vmem:[%s18204_s22 + $0x438] sm:$0xff] }
 0x663   : > { %12058 = vmatpush2.bf16.msra.mxu0 %v15808_v19 }
 0x664   : > { %12059 = vmatprep.subr.bf16.mxu0 %v15801_v63  ;;  %v15499_v63 = vcombine.high %v8586_v32, %v8590_v31 }
 0x665   : > { %12099 = vmatpush2.bf16.msra.mxu1 %v15936_v34  ;;  %v15634_v34 = vcombine.low %v8722_v1, %v8726_v2  ;;  %v8806_v1 = vld [vmem:[%s18204_s22 + $0x7f8] sm:$0xff] }
 0x666   : > { %12100 = vmatprep.subr.bf16.mxu1 %v15929_v39 }
 0x667   : > { %12060 = vmatpush2.bf16.msra.mxu0 %v15800_v47  ;;  %v15626_v47 = vcombine.low %v8714_v51, %v8718_v13 }
 0x668   : > { %12061 = vmatprep.subr.bf16.mxu0 %v15793_v3  ;;  %v15619_v3 = vcombine.high %v8706_v30, %v8710_v44 }
 0x669   : > { %12101 = vmatpush2.bf16.msra.mxu1 %v15928_v5  ;;  %v15491_v5 = vcombine.high %v8578_v26, %v8582_v27 }
 0x66a   : > { %12102 = vmatprep.subr.bf16.mxu1 %v15921_v4  ;;  %v8570_v4 = vld [vmem:[%s18204_s22 + $0x98] sm:$0xff] }
 0x66b   : > { %12062 = vmatpush2.bf16.msra.mxu0 %v15792_v8  ;;  %v15618_v8 = vcombine.low %v8706_v30, %v8710_v44  ;;  %v15482_v0 = vcombine.low %v8570_v4, %v8574_v41  ;;  %v8650_v44 = vld [vmem:[%s18204_s22 + $0x318] sm:$0xff] }
 0x66c   : > { %12063 = vmatprep.subr.bf16.mxu0 %v15785_v57  ;;  %v15611_v57 = vcombine.high %v8698_v46, %v8702_v53 }
 0x66d   : > { %12103 = vmatpush2.bf16.msra.mxu1 %v15920_v59  ;;  %v15483_v59 = vcombine.high %v8570_v4, %v8574_v41 }
 0x66e   : > { %12104 = vmatprep.subr.bf16.mxu1 %v15913_v37  ;;  %v8562_v37 = vld [vmem:[%s18204_s22 + $0x58] sm:$0xff] }
 0x66f   : > { %12064 = vmatpush2.bf16.msra.mxu0 %v15784_v24  ;;  %v15610_v24 = vcombine.low %v8698_v46, %v8702_v53  ;;  %v15474_v56 = vcombine.low %v8562_v37, %v8566_v38  ;;  %v8642_v53 = vld [vmem:[%s18204_s22 + $0x2d8] sm:$0xff] }
 0x670   : > { %12115 = vmatprep.subr.bf16.mxu0 %v15523_v43  ;;  %v15603_v43 = vcombine.high %v8690_v40, %v8694_v22 }
 0x671   : > { %12105 = vmatpush2.bf16.msra.mxu1 %v15912_v25  ;;  %v15475_v25 = vcombine.high %v8562_v37, %v8566_v38 }
 0x672   : > { %12156 = vmatprep.subr.bf16.mxu1 %v15651_v49  ;;  %v19956_v62 = vpop.f32.mrf.mxu0  ;;  %12066 = vmatmul.mubr.bf16.vlgmr.msra.gmra.mxu0 %v18409_v55  ;;  %v8554_v49 = vld [vmem:[%s18204_s22 + $0x18] sm:$0xff] }
 0x673   : > { %12116 = vmatpush1.bf16.msra.mxu0 %v15522_v60  ;;  %12147 = vmatprep.mubr.bf16.mxu0 %v18273_v11  ;;  %v15627_v11 = vcombine.high %v8714_v51, %v8718_v13  ;;  %v15602_v60 = vcombine.low %v8690_v40, %v8694_v22  ;;  %v15466_v2 = vcombine.low %v8554_v49, %v8558_v50  ;;  %v8634_v22 = vld [vmem:[%s18204_s22 + $0x298] sm:$0xff] }
 0x674   : > { %v19961_v21 = vpop.f32.mrf.mxu1  ;;  %12107 = vmatmul.mubr.bf16.vlgmr.msra.gmra.mxu1 %v18415_v58  ;;  %v19964_v28 = vpop.f32.mrf.mxu0  ;;  %12117 = vmatprep.subr.bf16.mxu0 %v15515_v15  ;;  %v15595_v15 = vcombine.high %v8682_v9, %v8686_v54  ;;  %v15714_v13 = vcombine.low %v8802_v61, %v8806_v1 }
 0x675   : > { %12157 = vmatpush1.bf16.msra.mxu1 %v15650_v17  ;;  %12188 = vmatprep.mubr.bf16.mxu1 %v18280_v16  ;;  %v15498_v16 = vcombine.low %v8586_v32, %v8590_v31  ;;  %v15467_v17 = vcombine.high %v8554_v49, %v8558_v50  ;;  %v8670_v32 = vld [vmem:[%s18204_s22 + $0x3b8] sm:$0xff] }
 0x676   : > { %v19966_v10 = vpop.f32.mrf.mxu1  ;;  %12158 = vmatprep.subr.bf16.mxu1 %v15643_v35  ;;  %v11825_v52 = vpop.f32.mrf.mxu0  ;;  %v8674_v35 = vld [vmem:[%s18204_s22 + $0x3d8] sm:$0xff] }
 0x677   : > { %12118 = vmatpush1.bf16.msra.mxu0 %v15514_v29  ;;  %v15594_v29 = vcombine.low %v8682_v9, %v8686_v54  ;;  %v8794_v31 = vld [vmem:[%s18204_s22 + $0x798] sm:$0xff]  ;;  %v15586_v51 = vcombine.low %v8674_v35, %v8678_v20 }
 0x678   : > { %v11866_v14 = vpop.f32.mrf.mxu1  ;;  %v11826_v19 = vpop.f32.mrf.mxu0  ;;  %12119 = vmatprep.subr.bf16.mxu0 %v15507_v7  ;;  %v15715_v7 = vcombine.high %v8802_v61, %v8806_v1  ;;  %v8798_v52 = vld [vmem:[%s18204_s22 + $0x7b8] sm:$0xff] }
 0x679   : > { %12159 = vmatpush1.bf16.msra.mxu1 %v15642_v6  ;;  %v15587_v6 = vcombine.high %v8674_v35, %v8678_v20  ;;  %v8658_v19 = vld [vmem:[%s18204_s22 + $0x358] sm:$0xff]  ;;  %v15706_v26 = vcombine.low %v8794_v31, %v8798_v52 }
 0x67a   : > { %v11867_v39 = vpop.f32.mrf.mxu1  ;;  %12160 = vmatprep.subr.bf16.mxu1 %v15635_v12  ;;  %v8666_v12 = vld [vmem:[%s18204_s22 + $0x398] sm:$0xff] }
 0x67b   : > { %12120 = vmatpush1.bf16.msra.mxu0 %v15506_v18  ;;  %v15579_v14 = vcombine.high %v8666_v12, %v8670_v32  ;;  %v15707_v18 = vcombine.high %v8794_v31, %v8798_v52  ;;  %v8790_v39 = vld [vmem:[%s18204_s22 + $0x778] sm:$0xff] }
 0x67c   : > { %12121 = vmatprep.subr.bf16.mxu0 %v15499_v63  ;;  %v8786_v63 = vld [vmem:[%s18204_s22 + $0x758] sm:$0xff] }
 0x67d   : > { %12161 = vmatpush1.bf16.msra.mxu1 %v15634_v34  ;;  %v8662_v34 = vld [vmem:[%s18204_s22 + $0x378] sm:$0xff]  ;;  %v15699_v30 = vcombine.high %v8786_v63, %v8790_v39  ;;  %v15698_v4 = vcombine.low %v8786_v63, %v8790_v39 }
 0x67e   : > { %12162 = vmatprep.subr.bf16.mxu1 %v15627_v11  ;;  %v15578_v11 = vcombine.low %v8666_v12, %v8670_v32  ;;  %v15571_v27 = vcombine.high %v8658_v19, %v8662_v34  ;;  %v8626_v54 = vld [vmem:[%s18204_s22 + $0x258] sm:$0xff] }
 0x67f   : > { %12122 = vmatpush1.bf16.msra.mxu0 %v15498_v16  ;;  %v8654_v16 = vld [vmem:[%s18204_s22 + $0x338] sm:$0xff] }
 0x680   : > { %12123 = vmatprep.subr.bf16.mxu0 %v15491_v5  ;;  %v8782_v5 = vld [vmem:[%s18204_s22 + $0x738] sm:$0xff]  ;;  %v15563_v41 = vcombine.high %v8650_v44, %v8654_v16 }
 0x681   : > { %12163 = vmatpush1.bf16.msra.mxu1 %v15626_v47  ;;  %v8778_v47 = vld [vmem:[%s18204_s22 + $0x718] sm:$0xff] }
 0x682   : > { %12164 = vmatprep.subr.bf16.mxu1 %v15619_v3  ;;  %v15570_v3 = vcombine.low %v8658_v19, %v8662_v34  ;;  %v15691_v46 = vcombine.high %v8778_v47, %v8782_v5  ;;  %v15690_v37 = vcombine.low %v8778_v47, %v8782_v5  ;;  %v8618_v1 = vld [vmem:[%s18204_s22 + $0x218] sm:$0xff]  ;;  %v11863_v47 = vadd.f32 %v19961_v21, %v19956_v62 }
 0x683   : > { %12124 = vmatpush1.bf16.msra.mxu0 %v15490_v48  ;;  %v8646_v48 = vld [vmem:[%s18204_s22 + $0x2f8] sm:$0xff] }
 0x684   : > { %12125 = vmatprep.subr.bf16.mxu0 %v15483_v59  ;;  %v8774_v59 = vld [vmem:[%s18204_s22 + $0x6f8] sm:$0xff]  ;;  %v15555_v38 = vcombine.high %v8642_v53, %v8646_v48 }
 0x685   : > { %12165 = vmatpush1.bf16.msra.mxu1 %v15618_v8  ;;  %v8770_v8 = vld [vmem:[%s18204_s22 + $0x6d8] sm:$0xff] }
 0x686   : > { %12166 = vmatprep.subr.bf16.mxu1 %v15611_v57  ;;  %v15562_v57 = vcombine.low %v8650_v44, %v8654_v16  ;;  %v15683_v40 = vcombine.high %v8770_v8, %v8774_v59  ;;  %v15682_v49 = vcombine.low %v8770_v8, %v8774_v59  ;;  %v8866_v52 = vld [vmem:[%s18204_s22 + $0x9d8] sm:$0xff] }
 0x687   : > { %12126 = vmatpush1.bf16.msra.mxu0 %v15482_v0  ;;  %v8638_v0 = vld [vmem:[%s18204_s22 + $0x2b8] sm:$0xff] }
 0x688   : > { %12127 = vmatprep.subr.bf16.mxu0 %v15475_v25  ;;  %v8766_v25 = vld [vmem:[%s18204_s22 + $0x6b8] sm:$0xff]  ;;  %v15547_v50 = vcombine.high %v8634_v22, %v8638_v0 }
 0x689   : > { %12167 = vmatpush1.bf16.msra.mxu1 %v15610_v24  ;;  %v8762_v24 = vld [vmem:[%s18204_s22 + $0x698] sm:$0xff] }
 0x68a   : > { %12168 = vmatprep.subr.bf16.mxu1 %v15603_v43  ;;  %v15554_v43 = vcombine.low %v8642_v53, %v8646_v48  ;;  %v15675_v9 = vcombine.high %v8762_v24, %v8766_v25  ;;  %v15674_v35 = vcombine.low %v8762_v24, %v8766_v25  ;;  %v8858_v39 = vld [vmem:[%s18204_s22 + $0x998] sm:$0xff]  ;;  %v11865_v48 = vadd.f32 %v19966_v10, %v19964_v28 }
 0x68b   : > { %12128 = vmatpush1.bf16.msra.mxu0 %v15474_v56  ;;  %v8630_v56 = vld [vmem:[%s18204_s22 + $0x278] sm:$0xff] }
 0x68c   : > { %12129 = vmatprep.subr.bf16.mxu0 %v15467_v17  ;;  %v8758_v17 = vld [vmem:[%s18204_s22 + $0x678] sm:$0xff]  ;;  %v15539_v20 = vcombine.high %v8626_v54, %v8630_v56 }
 0x68d   : > { %12169 = vmatpush1.bf16.msra.mxu1 %v15602_v60  ;;  %v8754_v60 = vld [vmem:[%s18204_s22 + $0x658] sm:$0xff] }
 0x68e   : > { %12170 = vmatprep.subr.bf16.mxu1 %v15595_v15  ;;  %v15546_v15 = vcombine.low %v8634_v22, %v8638_v0  ;;  %v15667_v61 = vcombine.high %v8754_v60, %v8758_v17  ;;  %v15666_v12 = vcombine.low %v8754_v60, %v8758_v17  ;;  %v8982_v53 = vld [vmem:[%s18204_s22 + $0xd78] sm:$0xff] }
 0x68f   : > { %12130 = vmatpush1.bf16.msra.mxu0 %v15466_v2  ;;  %v8622_v2 = vld [vmem:[%s18204_s22 + $0x238] sm:$0xff] }
 0x690   : > { %12131 = vmatprep.subr.bf16.mxu0 %v15587_v6  ;;  %v8750_v6 = vld [vmem:[%s18204_s22 + $0x638] sm:$0xff]  ;;  %v15531_v32 = vcombine.high %v8618_v1, %v8622_v2 }
 0x691   : > { %12171 = vmatpush1.bf16.msra.mxu1 %v15594_v29  ;;  %v8746_v29 = vld [vmem:[%s18204_s22 + $0x618] sm:$0xff] }
 0x692   : > { %12172 = vmatprep.subr.bf16.mxu1 %v15715_v7  ;;  %v15538_v7 = vcombine.low %v8626_v54, %v8630_v56  ;;  %v15659_v31 = vcombine.high %v8746_v29, %v8750_v6  ;;  %v15658_v19 = vcombine.low %v8746_v29, %v8750_v6  ;;  %v8842_v10 = vld [vmem:[%s18204_s22 + $0x918] sm:$0xff] }
 0x693   : > { %12132 = vmatpush2.bf16.msra.mxu0 %v15586_v51  ;;  %v8870_v51 = vld [vmem:[%s18204_s22 + $0x9f8] sm:$0xff] }
 0x694   : > { %12133 = vmatprep.subr.bf16.mxu0 %v15579_v14  ;;  %v8998_v14 = vld [vmem:[%s18204_s22 + $0xdf8] sm:$0xff]  ;;  %v15779_v34 = vcombine.high %v8866_v52, %v8870_v51 }
 0x695   : > { %12173 = vmatpush2.bf16.msra.mxu1 %v15714_v13  ;;  %v8994_v13 = vld [vmem:[%s18204_s22 + $0xdd8] sm:$0xff] }
 0x696   : > { %12174 = vmatprep.subr.bf16.mxu1 %v15707_v18  ;;  %v15530_v18 = vcombine.low %v8618_v1, %v8622_v2  ;;  %v15907_v63 = vcombine.high %v8994_v13, %v8998_v14  ;;  %v15906_v44 = vcombine.low %v8994_v13, %v8998_v14  ;;  %v8846_v22 = vld [vmem:[%s18204_s22 + $0x938] sm:$0xff] }
 0x697   : > { %12134 = vmatpush2.bf16.msra.mxu0 %v15578_v11  ;;  %v8862_v11 = vld [vmem:[%s18204_s22 + $0x9b8] sm:$0xff]  ;;  %v15755_v54 = vcombine.high %v8842_v10, %v8846_v22  ;;  %v15754_v2 = vcombine.low %v8842_v10, %v8846_v22 }
 0x698   : > { %12135 = vmatprep.subr.bf16.mxu0 %v15571_v27  ;;  %v8990_v27 = vld [vmem:[%s18204_s22 + $0xdb8] sm:$0xff]  ;;  %v15771_v16 = vcombine.high %v8858_v39, %v8862_v11  ;;  %v15770_v62 = vcombine.low %v8858_v39, %v8862_v11 }
 0x699   : > { %12175 = vmatpush2.bf16.msra.mxu1 %v15706_v26  ;;  %v8986_v26 = vld [vmem:[%s18204_s22 + $0xd98] sm:$0xff] }
 0x69a   : > { %12176 = vmatprep.subr.bf16.mxu1 %v15699_v30  ;;  %v15778_v30 = vcombine.low %v8866_v52, %v8870_v51  ;;  %v15899_v5 = vcombine.high %v8986_v26, %v8990_v27  ;;  %v8970_v0 = vld [vmem:[%s18204_s22 + $0xd18] sm:$0xff] }
 0x69b   : > { %12136 = vmatpush2.bf16.msra.mxu0 %v15570_v3  ;;  %v8850_v3 = vld [vmem:[%s18204_s22 + $0x958] sm:$0xff] }
 0x69c   : > { %12137 = vmatprep.subr.bf16.mxu0 %v15563_v41  ;;  %v8974_v24 = vld [vmem:[%s18204_s22 + $0xd38] sm:$0xff] }
 0x69d   : > { %12177 = vmatpush2.bf16.msra.mxu1 %v15698_v4  ;;  %v8854_v4 = vld [vmem:[%s18204_s22 + $0x978] sm:$0xff]  ;;  %v15883_v17 = vcombine.high %v8970_v0, %v8974_v24  ;;  %v15882_v29 = vcombine.low %v8970_v0, %v8974_v24 }
 0x69e   : > { %12178 = vmatprep.subr.bf16.mxu1 %v15691_v46  ;;  %v8978_v46 = vld [vmem:[%s18204_s22 + $0xd58] sm:$0xff] }
 0x69f   : > { %12138 = vmatpush2.bf16.msra.mxu0 %v15562_v57  ;;  %v15898_v57 = vcombine.low %v8986_v26, %v8990_v27  ;;  %v15891_v28 = vcombine.high %v8978_v46, %v8982_v53  ;;  %v8958_v52 = vld [vmem:[%s18204_s22 + $0xcb8] sm:$0xff] }
 0x6a0   : > { %12139 = vmatprep.subr.bf16.mxu0 %v15555_v38  ;;  %v8950_v39 = vld [vmem:[%s18204_s22 + $0xc78] sm:$0xff] }
 0x6a1   : > { %12179 = vmatpush2.bf16.msra.mxu1 %v15690_v37  ;;  %v8914_v24 = vld [vmem:[%s18204_s22 + $0xb58] sm:$0xff] }
 0x6a2   : > { %12180 = vmatprep.subr.bf16.mxu1 %v15683_v40 }
 0x6a3   : > { %12140 = vmatpush2.bf16.msra.mxu0 %v15554_v43 }
 0x6a4   : > { %12141 = vmatprep.subr.bf16.mxu0 %v15547_v50  ;;  %v15762_v50 = vcombine.low %v8850_v3, %v8854_v4 }
 0x6a5   : > { %12181 = vmatpush2.bf16.msra.mxu1 %v15682_v49 }
 0x6a6   : > { %12182 = vmatprep.subr.bf16.mxu1 %v15675_v9 }
 0x6a7   : > { %12142 = vmatpush2.bf16.msra.mxu0 %v15546_v15  ;;  %v8834_v15 = vld [vmem:[%s18204_s22 + $0x8d8] sm:$0xff] }
 0x6a8   : > { %12143 = vmatprep.subr.bf16.mxu0 %v15539_v20  ;;  %v8962_v20 = vld [vmem:[%s18204_s22 + $0xcd8] sm:$0xff] }
 0x6a9   : > { %12183 = vmatpush2.bf16.msra.mxu1 %v15674_v35  ;;  %v8838_v35 = vld [vmem:[%s18204_s22 + $0x8f8] sm:$0xff] }
 0x6aa   : > { %12184 = vmatprep.subr.bf16.mxu1 %v15667_v61  ;;  %v8966_v61 = vld [vmem:[%s18204_s22 + $0xcf8] sm:$0xff]  ;;  %v15747_v6 = vcombine.high %v8834_v15, %v8838_v35  ;;  %v15746_v51 = vcombine.low %v8834_v15, %v8838_v35 }
 0x6ab   : > { %12144 = vmatpush2.bf16.msra.mxu0 %v15538_v7  ;;  %v15875_v7 = vcombine.high %v8962_v20, %v8966_v61  ;;  %v15874_v13 = vcombine.low %v8962_v20, %v8966_v61 }
 0x6ac   : > { %12145 = vmatprep.subr.bf16.mxu0 %v15531_v32  ;;  %v8830_v32 = vld [vmem:[%s18204_s22 + $0x8b8] sm:$0xff] }
 0x6ad   : > { %12185 = vmatpush2.bf16.msra.mxu1 %v15666_v12  ;;  %v8826_v12 = vld [vmem:[%s18204_s22 + $0x898] sm:$0xff] }
 0x6ae   : > { %12186 = vmatprep.subr.bf16.mxu1 %v15659_v31  ;;  %v8954_v31 = vld [vmem:[%s18204_s22 + $0xc98] sm:$0xff]  ;;  %v15739_v14 = vcombine.high %v8826_v12, %v8830_v32  ;;  %v15738_v11 = vcombine.low %v8826_v12, %v8830_v32 }
 0x6af   : > { %12146 = vmatpush2.bf16.msra.mxu0 %v15530_v18  ;;  %v15867_v18 = vcombine.high %v8954_v31, %v8958_v52  ;;  %v15866_v26 = vcombine.low %v8954_v31, %v8958_v52  ;;  %v8890_v52 = vld [vmem:[%s18204_s22 + $0xa98] sm:$0xff] }
 0x6b0   : > { %12197 = vmatprep.subr.bf16.mxu0 %v15779_v34  ;;  %v8822_v34 = vld [vmem:[%s18204_s22 + $0x878] sm:$0xff] }
 0x6b1   : > { %12187 = vmatpush2.bf16.msra.mxu1 %v15658_v19  ;;  %v8818_v19 = vld [vmem:[%s18204_s22 + $0x858] sm:$0xff] }
 0x6b2   : > { %12238 = vmatprep.subr.bf16.mxu1 %v15907_v63  ;;  %v11903_v41 = vpop.f32.mrf.mxu0  ;;  %12148 = vmatmul.mubr.bf16.vlgmr.msra.gmra.mxu0 %v18327_v33  ;;  %v15763_v33 = vcombine.high %v8850_v3, %v8854_v4  ;;  %v8946_v63 = vld [vmem:[%s18204_s22 + $0xc58] sm:$0xff]  ;;  %v15731_v27 = vcombine.high %v8818_v19, %v8822_v34  ;;  %v15730_v3 = vcombine.low %v8818_v19, %v8822_v34 }
 0x6b3   : > { %v11904_v8 = vadd.f32 %v11903_v41, %v11863_v47  ;;  %12198 = vmatpush1.bf16.msra.mxu0 %v15778_v30  ;;  %12229 = vmatprep.mubr.bf16.mxu0 %v18339_v42  ;;  %v15890_v42 = vcombine.low %v8978_v46, %v8982_v53  ;;  %v15859_v30 = vcombine.high %v8946_v63, %v8950_v39  ;;  %v8938_v47 = vld [vmem:[%s18204_s22 + $0xc18] sm:$0xff] }
 0x6b4   : > { %v11944_v59 = vpop.f32.mrf.mxu1  ;;  %12189 = vmatmul.mubr.bf16.vlgmr.msra.gmra.mxu1 %v18335_v36  ;;  %v11905_v21 = vpop.f32.mrf.mxu0  ;;  %12199 = vmatprep.subr.bf16.mxu0 %v15771_v16  ;;  %v8814_v16 = vld [vmem:[%s18204_s22 + $0x838] sm:$0xff]  ;;  %v15858_v4 = vcombine.low %v8946_v63, %v8950_v39 }
 0x6b5   : > { %12239 = vmatpush1.bf16.msra.mxu1 %v15906_v44  ;;  %v11945_v37 = vadd.f32 %v11944_v59, %v11904_v8  ;;  %v11906_v38 = vadd.f32 %v11905_v21, %v11865_v48  ;;  %12270 = vmatprep.mubr.bf16.mxu1 %v18344_v45  ;;  %v8810_v44 = vld [vmem:[%s18204_s22 + $0x818] sm:$0xff] }
 0x6b6   : > { %v11946_v40 = vpop.f32.mrf.mxu1  ;;  %12240 = vmatprep.subr.bf16.mxu1 %v15899_v5  ;;  %v11907_v36 = vpop.f32.mrf.mxu0  ;;  %v8942_v5 = vld [vmem:[%s18204_s22 + $0xc38] sm:$0xff]  ;;  %v15723_v41 = vcombine.high %v8810_v44, %v8814_v16 }
 0x6b7   : > { %v12342_v25 = vrot.slane %v11945_v37, %v18634_v23  ;;  %v11947_v43 = vadd.f32 %v11946_v40, %v11906_v38  ;;  %12200 = vmatpush1.bf16.msra.mxu0 %v15770_v62  ;;  %v15851_v46 = vcombine.high %v8938_v47, %v8942_v5  ;;  %v8930_v53 = vld [vmem:[%s18204_s22 + $0xbd8] sm:$0xff]  ;;  %v15722_v62 = vcombine.low %v8810_v44, %v8814_v16 }
 0x6b8   : > { %v11948_v49 = vpop.f32.mrf.mxu1  ;;  %v11908_v9 = vpop.f32.mrf.mxu0  ;;  %12201 = vmatprep.subr.bf16.mxu0 %v15763_v33  ;;  %v8934_v48 = vld [vmem:[%s18204_s22 + $0xbf8] sm:$0xff]  ;;  %v15850_v21 = vcombine.low %v8938_v47, %v8942_v5 }
 0x6b9   : > { %12241 = vmatpush1.bf16.msra.mxu1 %v15898_v57  ;;  %v12343_v56 = vcombine.high %v12342_v25, %v12342_v25  ;;  %16113 = vst.sshfl [vmem:[%s19891_s15 + $0x2] sm:$0x1 pattern:$0x73625140] %v12342_v25  ;;  %v12370_v45 = vrot.slane %v11947_v43, %v18634_v23  ;;  %v9058_v8 = vld [vmem:[%s18204_s22 + $0xfd8] sm:$0xff]  ;;  %v15843_v57 = vcombine.high %v8930_v53, %v8934_v48 }
 0x6ba   : > { %v11949_v60 = vpop.f32.mrf.mxu1  ;;  %12242 = vmatprep.subr.bf16.mxu1 %v15891_v28  ;;  %v9062_v59 = vld [vmem:[%s18204_s22 + $0xff8] sm:$0xff]  ;;  %v15842_v10 = vcombine.low %v8930_v53, %v8934_v48 }
 0x6bb   : > { %16114 = vst.sshfl [vmem:[%s19891_s15 + $0x42] sm:$0x1 pattern:$0x73625140] %v12343_v56  ;;  %v12371_v1 = vcombine.high %v12370_v45, %v12370_v45  ;;  %12202 = vmatpush1.bf16.msra.mxu0 %v15762_v50  ;;  %v15971_v33 = vcombine.high %v9058_v8, %v9062_v59  ;;  %v8922_v37 = vld [vmem:[%s18204_s22 + $0xb98] sm:$0xff]  ;;  %v15970_v22 = vcombine.low %v9058_v8, %v9062_v59 }
 0x6bc   : > { %16115 = vst.sshfl [vmem:[%s19891_s15 + $0x3] sm:$0x1 pattern:$0x73625140] %v12370_v45  ;;  %12203 = vmatprep.subr.bf16.mxu0 %v15755_v54  ;;  %v8926_v38 = vld [vmem:[%s18204_s22 + $0xbb8] sm:$0xff] }
 0x6bd   : > { %12243 = vmatpush1.bf16.msra.mxu1 %v15890_v42  ;;  %16116 = vst.sshfl [vmem:[%s19891_s15 + $0x43] sm:$0x1 pattern:$0x73625140] %v12371_v1  ;;  %v9050_v40 = vld [vmem:[%s18204_s22 + $0xf98] sm:$0xff]  ;;  %v15835_v36 = vcombine.high %v8922_v37, %v8926_v38  ;;  %v15834_v50 = vcombine.low %v8922_v37, %v8926_v38 }
 0x6be   : > { %12244 = vmatprep.subr.bf16.mxu1 %v15883_v17  ;;  %v9054_v28 = vld [vmem:[%s18204_s22 + $0xfb8] sm:$0xff] }
 0x6bf   : > { %12204 = vmatpush1.bf16.msra.mxu0 %v15754_v2  ;;  %v15963_v0 = vcombine.high %v9050_v40, %v9054_v28  ;;  %v8918_v25 = vld [vmem:[%s18204_s22 + $0xb78] sm:$0xff]  ;;  %v15962_v9 = vcombine.low %v9050_v40, %v9054_v28 }
 0x6c0   : > { %12205 = vmatprep.subr.bf16.mxu0 %v15747_v6  ;;  %v9042_v43 = vld [vmem:[%s18204_s22 + $0xf58] sm:$0xff]  ;;  %v15827_v42 = vcombine.high %v8914_v24, %v8918_v25  ;;  %v15826_v15 = vcombine.low %v8914_v24, %v8918_v25 }
 0x6c1   : > { %12245 = vmatpush1.bf16.msra.mxu1 %v15882_v29  ;;  %v9046_v49 = vld [vmem:[%s18204_s22 + $0xf78] sm:$0xff] }
 0x6c2   : > { %12246 = vmatprep.subr.bf16.mxu1 %v15875_v7  ;;  %v15955_v54 = vcombine.high %v9042_v43, %v9046_v49  ;;  %v8906_v56 = vld [vmem:[%s18204_s22 + $0xb18] sm:$0xff]  ;;  %v15954_v35 = vcombine.low %v9042_v43, %v9046_v49 }
 0x6c3   : > { %12206 = vmatpush1.bf16.msra.mxu0 %v15746_v51  ;;  %v8910_v45 = vld [vmem:[%s18204_s22 + $0xb38] sm:$0xff] }
 0x6c4   : > { %12207 = vmatprep.subr.bf16.mxu0 %v15739_v14  ;;  %v9034_v60 = vld [vmem:[%s18204_s22 + $0xf18] sm:$0xff]  ;;  %v15819_v20 = vcombine.high %v8906_v56, %v8910_v45  ;;  %v15818_v7 = vcombine.low %v8906_v56, %v8910_v45 }
 0x6c5   : > { %12247 = vmatpush1.bf16.msra.mxu1 %v15874_v13  ;;  %v9038_v17 = vld [vmem:[%s18204_s22 + $0xf38] sm:$0xff] }
 0x6c6   : > { %12248 = vmatprep.subr.bf16.mxu1 %v15867_v18  ;;  %v15947_v61 = vcombine.high %v9034_v60, %v9038_v17  ;;  %v8898_v1 = vld [vmem:[%s18204_s22 + $0xad8] sm:$0xff]  ;;  %v15946_v12 = vcombine.low %v9034_v60, %v9038_v17 }
 0x6c7   : > { %12208 = vmatpush1.bf16.msra.mxu0 %v15738_v11  ;;  %v8902_v2 = vld [vmem:[%s18204_s22 + $0xaf8] sm:$0xff] }
 0x6c8   : > { %12209 = vmatprep.subr.bf16.mxu0 %v15731_v27  ;;  %v9026_v29 = vld [vmem:[%s18204_s22 + $0xed8] sm:$0xff]  ;;  %v15811_v32 = vcombine.high %v8898_v1, %v8902_v2  ;;  %v15810_v18 = vcombine.low %v8898_v1, %v8902_v2 }
 0x6c9   : > { %12249 = vmatpush1.bf16.msra.mxu1 %v15866_v26  ;;  %v9030_v6 = vld [vmem:[%s18204_s22 + $0xef8] sm:$0xff] }
 0x6ca   : > { %12250 = vmatprep.subr.bf16.mxu1 %v15859_v30  ;;  %v15939_v31 = vcombine.high %v9026_v29, %v9030_v6  ;;  %v8894_v51 = vld [vmem:[%s18204_s22 + $0xab8] sm:$0xff]  ;;  %v15938_v19 = vcombine.low %v9026_v29, %v9030_v6 }
 0x6cb   : > { %12210 = vmatpush1.bf16.msra.mxu0 %v15730_v3  ;;  %v9018_v13 = vld [vmem:[%s18204_s22 + $0xe98] sm:$0xff]  ;;  %v15803_v34 = vcombine.high %v8890_v52, %v8894_v51  ;;  %v15802_v30 = vcombine.low %v8890_v52, %v8894_v51 }
 0x6cc   : > { %12211 = vmatprep.subr.bf16.mxu0 %v15723_v41  ;;  %v9022_v14 = vld [vmem:[%s18204_s22 + $0xeb8] sm:$0xff] }
 0x6cd   : > { %12251 = vmatpush1.bf16.msra.mxu1 %v15858_v4  ;;  %v15931_v63 = vcombine.high %v9018_v13, %v9022_v14  ;;  %v8882_v39 = vld [vmem:[%s18204_s22 + $0xa58] sm:$0xff]  ;;  %v15930_v44 = vcombine.low %v9018_v13, %v9022_v14 }
 0x6ce   : > { %12252 = vmatprep.subr.bf16.mxu1 %v15851_v46  ;;  %v8886_v11 = vld [vmem:[%s18204_s22 + $0xa78] sm:$0xff] }
 0x6cf   : > { %12212 = vmatpush1.bf16.msra.mxu0 %v15722_v62  ;;  %v9010_v26 = vld [vmem:[%s18204_s22 + $0xe58] sm:$0xff]  ;;  %v15795_v16 = vcombine.high %v8882_v39, %v8886_v11  ;;  %v15794_v46 = vcombine.low %v8882_v39, %v8886_v11 }
 0x6d0   : > { %12213 = vmatprep.subr.bf16.mxu0 %v15843_v57  ;;  %v9014_v27 = vld [vmem:[%s18204_s22 + $0xe78] sm:$0xff] }
 0x6d1   : > { %12253 = vmatpush1.bf16.msra.mxu1 %v15850_v21  ;;  %v15923_v47 = vcombine.high %v9010_v26, %v9014_v27  ;;  %v8874_v5 = vld [vmem:[%s18204_s22 + $0xa18] sm:$0xff]  ;;  %v15922_v53 = vcombine.low %v9010_v26, %v9014_v27 }
 0x6d2   : > { %12254 = vmatprep.subr.bf16.mxu1 %v15971_v33  ;;  %v8878_v3 = vld [vmem:[%s18204_s22 + $0xa38] sm:$0xff] }
 0x6d3   : > { %12214 = vmatpush2.bf16.msra.mxu0 %v15842_v10  ;;  %v9002_v4 = vld [vmem:[%s18204_s22 + $0xe18] sm:$0xff]  ;;  %v15787_v48 = vcombine.high %v8874_v5, %v8878_v3  ;;  %v15786_v59 = vcombine.low %v8874_v5, %v8878_v3 }
 0x6d4   : > { %12215 = vmatprep.subr.bf16.mxu0 %v15835_v36  ;;  %v9006_v41 = vld [vmem:[%s18204_s22 + $0xe38] sm:$0xff] }
 0x6d5   : > { %12255 = vmatpush2.bf16.msra.mxu1 %v15970_v22  ;;  %v15915_v8 = vcombine.high %v9002_v4, %v9006_v41  ;;  %v15914_v62 = vcombine.low %v9002_v4, %v9006_v41 }
 0x6d6   : > { %12256 = vmatprep.subr.bf16.mxu1 %v15963_v0 }
 0x6d7   : > { %12216 = vmatpush2.bf16.msra.mxu0 %v15834_v50 }
 0x6d8   : > { %12217 = vmatprep.subr.bf16.mxu0 %v15827_v42 }
 0x6d9   : > { %12257 = vmatpush2.bf16.msra.mxu1 %v15962_v9 }
 0x6da   : > { %12258 = vmatprep.subr.bf16.mxu1 %v15955_v54 }
 0x6db   : > { %12218 = vmatpush2.bf16.msra.mxu0 %v15826_v15 }
 0x6dc   : > { %12219 = vmatprep.subr.bf16.mxu0 %v15819_v20 }
 0x6dd   : > { %12259 = vmatpush2.bf16.msra.mxu1 %v15954_v35 }
 0x6de   : > { %12260 = vmatprep.subr.bf16.mxu1 %v15947_v61 }
 0x6df   : > { %12220 = vmatpush2.bf16.msra.mxu0 %v15818_v7 }
 0x6e0   : > { %12221 = vmatprep.subr.bf16.mxu0 %v15811_v32 }
 0x6e1   : > { %12261 = vmatpush2.bf16.msra.mxu1 %v15946_v12 }
 0x6e2   : > { %12262 = vmatprep.subr.bf16.mxu1 %v15939_v31 }
 0x6e3   : > { %12222 = vmatpush2.bf16.msra.mxu0 %v15810_v18 }
 0x6e4   : > { %12223 = vmatprep.subr.bf16.mxu0 %v15803_v34 }
 0x6e5   : > { %12263 = vmatpush2.bf16.msra.mxu1 %v15938_v19 }
 0x6e6   : > { %12264 = vmatprep.subr.bf16.mxu1 %v15931_v63 }
 0x6e7   : > { %12224 = vmatpush2.bf16.msra.mxu0 %v15802_v30 }
 0x6e8   : > { %12225 = vmatprep.subr.bf16.mxu0 %v15795_v16 }
 0x6e9   : > { %12265 = vmatpush2.bf16.msra.mxu1 %v15930_v44 }
 0x6ea   : > { %12266 = vmatprep.subr.bf16.mxu1 %v15923_v47 }
 0x6eb   : > { %12226 = vmatpush2.bf16.msra.mxu0 %v15794_v46 }
 0x6ec   : > { %12227 = vmatprep.subr.bf16.mxu0 %v15787_v48 }
 0x6ed   : > { %12267 = vmatpush2.bf16.msra.mxu1 %v15922_v53 }
 0x6ee   : > { %12268 = vmatprep.subr.bf16.mxu1 %v15915_v8 }
 0x6ef   : > { %12228 = vmatpush2.bf16.msra.mxu0 %v15786_v59 }
 0x6f1   : > { %12269 = vmatpush2.bf16.msra.mxu1 %v15914_v62 }
 0x6f2   : > { %v11985_v21 = vpop.f32.mrf.mxu0  ;;  %12230 = vmatmul.mubr.bf16.vlgmr.msra.gmra.mxu0 %v18409_v55 }
 0x6f4   : > { %v12026_v57 = vpop.f32.mrf.mxu1  ;;  %12271 = vmatmul.mubr.bf16.vlgmr.msra.gmra.mxu1 %v18415_v58  ;;  %v11987_v33 = vpop.f32.mrf.mxu0 }
 0x6f5   : > { %v12027_v22 = vadd.f32 %v12026_v57, %v11985_v21 }
 0x6f6   : > { %v12028_v37 = vpop.f32.mrf.mxu1  ;;  %v11989_v38 = vpop.f32.mrf.mxu0 }
 0x6f7   : > { %v12029_v0 = vadd.f32 %v12028_v37, %v11987_v33 }
 0x6f8   : > { %v12030_v40 = vpop.f32.mrf.mxu1  ;;  %v11990_v28 = vpop.f32.mrf.mxu0 }
 0x6fa   : > { %v12031_v10 = vpop.f32.mrf.mxu1 }
 0x732   : > { %v12067_v36 = vpop.f32.mrf.mxu0 }
 0x733   : > { %v12068_v24 = vadd.f32 %v12067_v36, %v12027_v22 }
 0x734   : > { %v12108_v25 = vpop.f32.mrf.mxu1  ;;  %v12069_v43 = vpop.f32.mrf.mxu0 }
 0x735   : > { %v12109_v55 = vadd.f32 %v12108_v25, %v12068_v24  ;;  %v12070_v49 = vadd.f32 %v12069_v43, %v12029_v0 }
 0x736   : > { %v12110_v50 = vpop.f32.mrf.mxu1  ;;  %v12071_v58 = vpop.f32.mrf.mxu0 }
 0x737   : > { %v12398_v9 = vrot.slane %v12109_v55, %v18634_v23  ;;  %v12111_v42 = vadd.f32 %v12110_v50, %v12070_v49 }
 0x738   : > { %v12112_v54 = vpop.f32.mrf.mxu1  ;;  %v12072_v56 = vpop.f32.mrf.mxu0 }
 0x739   : > { %v12399_v45 = vcombine.high %v12398_v9, %v12398_v9  ;;  %16117 = vst.sshfl [vmem:[%s19891_s15 + $0x4] sm:$0x1 pattern:$0x73625140] %v12398_v9  ;;  %v12426_v60 = vrot.slane %v12111_v42, %v18634_v23 }
 0x73a   : > { %v12113_v17 = vpop.f32.mrf.mxu1 }
 0x73b   : > { %16118 = vst.sshfl [vmem:[%s19891_s15 + $0x44] sm:$0x1 pattern:$0x73625140] %v12399_v45  ;;  %v12427_v15 = vcombine.high %v12426_v60, %v12426_v60 }
 0x73c   : > { %16119 = vst.sshfl [vmem:[%s19891_s15 + $0x5] sm:$0x1 pattern:$0x73625140] %v12426_v60 }
 0x73d   : > { %16120 = vst.sshfl [vmem:[%s19891_s15 + $0x45] sm:$0x1 pattern:$0x73625140] %v12427_v15 }
 0x772   : > { %v12149_v35 = vpop.f32.mrf.mxu0 }
 0x774   : > { %v12190_v20 = vpop.f32.mrf.mxu1  ;;  %v12151_v61 = vpop.f32.mrf.mxu0 }
 0x775   : > { %v12191_v12 = vadd.f32 %v12190_v20, %v12149_v35 }
 0x776   : > { %v12192_v1 = vpop.f32.mrf.mxu1  ;;  %v12153_v2 = vpop.f32.mrf.mxu0 }
 0x777   : > { %v12193_v31 = vadd.f32 %v12192_v1, %v12151_v61 }
 0x778   : > { %v12194_v29 = vpop.f32.mrf.mxu1  ;;  %v12154_v6 = vpop.f32.mrf.mxu0 }
 0x77a   : > { %v12195_v7 = vpop.f32.mrf.mxu1 }
 0x7b2   : > { %v12231_v32 = vpop.f32.mrf.mxu0 }
 0x7b3   : > { %v12232_v52 = vadd.f32 %v12231_v32, %v12191_v12 }
 0x7b4   : > { %v12272_v51 = vpop.f32.mrf.mxu1  ;;  %v12233_v13 = vpop.f32.mrf.mxu0 }
 0x7b5   : > { %v12273_v14 = vadd.f32 %v12272_v51, %v12232_v52  ;;  %v12234_v18 = vadd.f32 %v12233_v13, %v12193_v31 }
 0x7b6   : > { %v12274_v19 = vpop.f32.mrf.mxu1  ;;  %v12235_v34 = vpop.f32.mrf.mxu0 }
 0x7b7   : > { %v12454_v63 = vrot.slane %v12273_v14, %v18634_v23  ;;  %v12275_v39 = vadd.f32 %v12274_v19, %v12234_v18 }
 0x7b8   : > { %v12276_v11 = vpop.f32.mrf.mxu1  ;;  %v12236_v26 = vpop.f32.mrf.mxu0 }
 0x7b9   : > { %v12455_v27 = vcombine.high %v12454_v63, %v12454_v63  ;;  %16121 = vst.sshfl [vmem:[%s19891_s15 + $0x6] sm:$0x1 pattern:$0x73625140] %v12454_v63  ;;  %v12482_v30 = vrot.slane %v12275_v39, %v18634_v23  ;;  %12506 = sbr.rel (%p21120_p7) target bundleno = 2482 (0x9b2), region = 112 }
 0x7ba   : > { %v12277_v44 = vpop.f32.mrf.mxu1 }
 0x7bb   : > { %16122 = vst.sshfl [vmem:[%s19891_s15 + $0x46] sm:$0x1 pattern:$0x73625140] %v12455_v27  ;;  %v12483_v16 = vcombine.high %v12482_v30, %v12482_v30 }
 0x7bc   : > { %16123 = vst.sshfl [vmem:[%s19891_s15 + $0x7] sm:$0x1 pattern:$0x73625140] %v12482_v30 }
 0x7bd   : > { %16124 = vst.sshfl [vmem:[%s19891_s15 + $0x47] sm:$0x1 pattern:$0x73625140] %v12483_v16 }
 0x7be   : > { %v12507_v47 = vld [vmem:[#allocation14] sm:$0xff]  ;;  %v12508_v5 = vld [vmem:[#allocation14 + $0x8] sm:$0xff]  ;;  %v12509_v3 = vld [vmem:[#allocation14 + $0x10] sm:$0xff]  ;;  %v20132_v25 = vmov 0.0   ;;  %v20134_v43 = vmov 0.0   ;;  %v20136_v55 = vmov 0.0  }
 0x7bf   : > { %v12510_v4 = vld [vmem:[#allocation14 + $0x18] sm:$0xff]  ;;  %v12511_v41 = vld [vmem:[#allocation14 + $0x20] sm:$0xff]  ;;  %v12512_v46 = vld [vmem:[#allocation14 + $0x28] sm:$0xff]  ;;  %v20116_v53 = vpack.c.bf16 %v12508_v5, %v12507_v47  ;;  %v20138_v49 = vmov 0.0   ;;  %v20140_v50 = vmov 0.0   ;;  %v20142_v58 = vmov 0.0  }
 0x7c0   : > { %v12513_v48 = vld [vmem:[#allocation14 + $0x30] sm:$0xff]  ;;  %v12514_v8 = vld [vmem:[#allocation14 + $0x38] sm:$0xff]  ;;  %v12515_v59 = vld [vmem:[#allocation14 + $0x40] sm:$0xff]  ;;  %v20118_v23 = vpack.c.bf16 %v12510_v4, %v12509_v3  ;;  %v20120_v62 = vpack.c.bf16 %v12512_v46, %v12511_v41  ;;  %v20144_v9 = vmov 0.0   ;;  %v20146_v42 = vmov 0.0   ;;  %s20196_s17 = smov 0  }
 0x7c1   : > { %21121 = vst [vmem:[#allocation35_spill] sm:$0xff] %v20116_v53  ;;  %v12516_v21 = vld [vmem:[#allocation14 + $0x48] sm:$0xff]  ;;  %v12517_v57 = vld [vmem:[#allocation14 + $0x50] sm:$0xff]  ;;  %v12518_v33 = vld [vmem:[#allocation14 + $0x58] sm:$0xff]  ;;  %v20122_v37 = vpack.c.bf16 %v12514_v8, %v12513_v48  ;;  %v20148_v54 = vmov 0.0   ;;  %v20150_v56 = vmov 0.0  }
 0x7c2   : > { %21122 = vst [vmem:[#allocation36_spill] sm:$0xff] %v20118_v23  ;;  %21123 = vst [vmem:[#allocation37_spill] sm:$0xff] %v20120_v62  ;;  %v12519_v38 = vld [vmem:[#allocation14 + $0x60] sm:$0xff]  ;;  %v12520_v40 = vld [vmem:[#allocation14 + $0x68] sm:$0xff]  ;;  %v20124_v10 = vpack.c.bf16 %v12516_v21, %v12515_v59  ;;  %v20126_v22 = vpack.c.bf16 %v12518_v33, %v12517_v57  ;;  %v20152_v45 = vmov 0.0   ;;  %v20154_v60 = vmov 0.0  }
 0x7c3   : > { %21124 = vst [vmem:[#allocation38_spill] sm:$0xff] %v20122_v37  ;;  %v12521_v28 = vld [vmem:[#allocation14 + $0x70] sm:$0xff]  ;;  %v12522_v36 = vld [vmem:[#allocation14 + $0x78] sm:$0xff]  ;;  %v20128_v0 = vpack.c.bf16 %v12520_v40, %v12519_v38  ;;  %v20156_v17 = vmov 0.0   ;;  %v20158_v15 = vmov 0.0   ;;  %v20160_v35 = vmov 0.0  }
 0x7c4   : > { %21125 = vst [vmem:[#allocation39_spill] sm:$0xff] %v20124_v10  ;;  %21126 = vst [vmem:[#allocation40_spill] sm:$0xff] %v20126_v22  ;;  %v20130_v24 = vpack.c.bf16 %v12522_v36, %v12521_v28  ;;  %v20162_v20 = vmov 0.0   ;;  %v20164_v61 = vmov 0.0   ;;  %v20166_v1 = vmov 0.0  }
 0x7c5   : > { %21127 = vst [vmem:[#allocation41_spill] sm:$0xff] %v20128_v0  ;;  %v20168_v2 = vmov 0.0   ;;  %v20170_v29 = vmov 0.0   ;;  %v20172_v6 = vmov 0.0   ;;  %v20174_v7 = vmov 0.0  }
 0x7c6   : > { %21128 = vst [vmem:[#allocation42_spill] sm:$0xff] %v20130_v24  ;;  %v20176_v12 = vmov 0.0   ;;  %v20178_v32 = vmov 0.0   ;;  %v20180_v31 = vmov 0.0   ;;  %v20182_v52 = vmov 0.0  }
 0x7c7   : > { %v20184_v51 = vmov 0.0   ;;  %v20186_v13 = vmov 0.0   ;;  %v20188_v14 = vmov 0.0   ;;  %v20190_v18 = vmov 0.0  }
 0x7c8   : > { %v20192_v19 = vmov 0.0   ;;  %v20194_v34 = vmov 0.0  }
 0x7c9 LB: >> { %v21129_v62 = vld [vmem:[#allocation37_spill] sm:$0xff]  ;;  %v21130_v53 = vld [vmem:[#allocation35_spill] sm:$0xff]  ;;  %v21133_v23 = vld [vmem:[#allocation36_spill] sm:$0xff]  ;;  %s16125_s30 = sshll.u32 %s17757_s17, 6  ;;  %s16126_s14 = sshll.u32 %s17757_s17, 7  ;;  %v17657_v42 = vphi %v20146_v42, %v21177_v42   ;;  %v17653_v9 = vphi %v20144_v9, %v21176_v9   ;;  %v17649_v58 = vphi %v20142_v58, %v21175_v58   ;;  %v17645_v50 = vphi %v20140_v50, %v21174_v50   ;;  %v17641_v49 = vphi %v20138_v49, %v21173_v49   ;;  %v17637_v55 = vphi %v20136_v55, %v21172_v55   ;;  %v17633_v43 = vphi %v20134_v43, %v21171_v43   ;;  %v17629_v25 = vphi %v20132_v25, %v21170_v25   ;;  %s17757_s17 = sphi %s20196_s17, %s21202_s17   ;;  %v17753_v34 = vphi %v20194_v34, %v21201_v34   ;;  %v17749_v19 = vphi %v20192_v19, %v21200_v19   ;;  %v17745_v18 = vphi %v20190_v18, %v21199_v18   ;;  %v17741_v14 = vphi %v20188_v14, %v21198_v14   ;;  %v17737_v13 = vphi %v20186_v13, %v21197_v13   ;;  %v17733_v51 = vphi %v20184_v51, %v21196_v51   ;;  %v17729_v52 = vphi %v20182_v52, %v21195_v52   ;;  %v17725_v31 = vphi %v20180_v31, %v21194_v31   ;;  %v17721_v32 = vphi %v20178_v32, %v21193_v32   ;;  %v17717_v12 = vphi %v20176_v12, %v21192_v12   ;;  %v17713_v7 = vphi %v20174_v7, %v21191_v7   ;;  %v17709_v6 = vphi %v20172_v6, %v21190_v6   ;;  %v17705_v29 = vphi %v20170_v29, %v21189_v29   ;;  %v17701_v2 = vphi %v20168_v2, %v21188_v2   ;;  %v17697_v1 = vphi %v20166_v1, %v21187_v1   ;;  %v17693_v61 = vphi %v20164_v61, %v21186_v61   ;;  %v17689_v20 = vphi %v20162_v20, %v21185_v20   ;;  %v17685_v35 = vphi %v20160_v35, %v21184_v35   ;;  %v17681_v15 = vphi %v20158_v15, %v21183_v15   ;;  %v17677_v17 = vphi %v20156_v17, %v21182_v17   ;;  %v17673_v60 = vphi %v20154_v60, %v21181_v60   ;;  %v17669_v45 = vphi %v20152_v45, %v21180_v45   ;;  %v17665_v56 = vphi %v20150_v56, %v21179_v56   ;;  %v17661_v54 = vphi %v20148_v54, %v21178_v54  }
 0x7ca   : >> { %v21131_v37 = vld [vmem:[#allocation38_spill] sm:$0xff]  ;;  %s20301_s29 = scalar_lea.vmem [#allocation23], %s16125_s30  ;;  %s20309_s27 = scalar_lea.vmem [#allocation15], %s16126_s14 }
 0x7cb   : >> { %v21134_v22 = vld [vmem:[#allocation40_spill] sm:$0xff]  ;;  %v21135_v10 = vld [vmem:[#allocation39_spill] sm:$0xff]  ;;  %v16839_v63 = vld [vmem:[%s20301_s29] sm:$0xff]   ;;  %s12536_s19 = sadd.s32 1, %s17757_s17  }
 0x7cc   : >> { %v21136_v0 = vld [vmem:[#allocation41_spill] sm:$0xff]  ;;  %16193 = vmatprep.mubr.bf16.mxu0 %v16839_v63  ;;  %v16849_v39 = vld [vmem:[%s20309_s27 + $0x74] ss:$8 sps:$4 sm:$0xff]   ;;  %v16847_v11 = vld [vmem:[%s20309_s27 + $0x70] ss:$8 sps:$4 sm:$0xff]   ;;  %v17846_v63 = vmov 0   ;;  %s21202_s17 = smov %s12536_s19 }
 0x7cd   : >> { %v21132_v24 = vld [vmem:[#allocation42_spill] sm:$0xff]  ;;  %16273 = vmatprep.subr.bf16.mxu1 %v16849_v39  ;;  %v16855_v30 = vld [vmem:[%s20309_s27 + $0x54] ss:$8 sps:$4 sm:$0xff]   ;;  %v16853_v44 = vld [vmem:[%s20309_s27 + $0x50] ss:$8 sps:$4 sm:$0xff]   ;;  %12892 = vmatprep.mubr.bf16.mxu1 %v17846_v63  ;;  %p20442_p2 = scmp.ge.s32.totalorder %s12536_s19, 27  }
 0x7ce   : >> { %16177 = vmatprep.subr.bf16.mxu0 %v21132_v24  ;;  %v16852_v26 = vld [vmem:[%s20309_s27 + $0x64] ss:$8 sps:$4 sm:$0xff]   ;;  %16281 = vmatpush1.bf16.msra.mxu1 %v16847_v11  ;;  %v16850_v27 = vld [vmem:[%s20309_s27 + $0x60] ss:$8 sps:$4 sm:$0xff]   ;;  %v16861_v5 = vld [vmem:[%s20309_s27 + $0x34] ss:$8 sps:$4 sm:$0xff]  }
 0x7cf   : >> { %16178 = vmatpush3.bf16.msra.mxu0 %v21132_v24  ;;  %16274 = vmatprep.subr.bf16.mxu1 %v16852_v26  ;;  %v16858_v16 = vld [vmem:[%s20309_s27 + $0x44] ss:$8 sps:$4 sm:$0xff]   ;;  %v16856_v47 = vld [vmem:[%s20309_s27 + $0x40] ss:$8 sps:$4 sm:$0xff]   ;;  %v16841_v4 = vld [vmem:[%s20301_s29 + $0x10] sm:$0xff]  }
 0x7d0   : >> { %16179 = vmatprep.subr.bf16.mxu0 %v21136_v0  ;;  %v16840_v3 = vld [vmem:[%s20301_s29 + $0x8] sm:$0xff]   ;;  %v16859_v41 = vld [vmem:[%s20309_s27 + $0x30] ss:$8 sps:$4 sm:$0xff]   ;;  %v16843_v59 = vld [vmem:[%s20301_s29 + $0x20] sm:$0xff]  }
 0x7d1   : >> { %v16864_v46 = vld [vmem:[%s20309_s27 + $0x24] ss:$8 sps:$4 sm:$0xff]   ;;  %v16862_v48 = vld [vmem:[%s20309_s27 + $0x20] ss:$8 sps:$4 sm:$0xff]   ;;  %v16842_v8 = vld [vmem:[%s20301_s29 + $0x18] sm:$0xff]  }
 0x7d2   : >> { %16282 = vmatpush1.bf16.msra.mxu1 %v16850_v27  ;;  %v16844_v21 = vld [vmem:[%s20301_s29 + $0x28] sm:$0xff]   ;;  %v16845_v57 = vld [vmem:[%s20301_s29 + $0x30] sm:$0xff]   ;;  %v16846_v33 = vld [vmem:[%s20301_s29 + $0x38] sm:$0xff]  }
 0x7d3   : >> { %16180 = vmatpush3.bf16.msra.mxu0 %v21136_v0  ;;  %16275 = vmatprep.subr.bf16.mxu1 %v16855_v30  ;;  %v16867_v38 = vld [vmem:[%s20309_s27 + $0x14] ss:$8 sps:$4 sm:$0xff]   ;;  %v16865_v40 = vld [vmem:[%s20309_s27 + $0x10] ss:$8 sps:$4 sm:$0xff]   ;;  %v16870_v28 = vld [vmem:[%s20309_s27 + $0x4] ss:$8 sps:$4 sm:$0xff]  }
 0x7d4   : >> { %16181 = vmatprep.subr.bf16.mxu0 %v21134_v22  ;;  %v16868_v36 = vld [vmem:[%s20309_s27] ss:$8 sps:$4 sm:$0xff]  }
 0x7d6   : >> { %16283 = vmatpush1.bf16.msra.mxu1 %v16853_v44 }
 0x7d7   : >> { %16182 = vmatpush3.bf16.msra.mxu0 %v21134_v22  ;;  %16276 = vmatprep.subr.bf16.mxu1 %v16858_v16 }
 0x7d8   : >> { %16183 = vmatprep.subr.bf16.mxu0 %v21135_v10 }
 0x7da   : >> { %16284 = vmatpush1.bf16.msra.mxu1 %v16856_v47 }
 0x7db   : >> { %16184 = vmatpush3.bf16.msra.mxu0 %v21135_v10  ;;  %16277 = vmatprep.subr.bf16.mxu1 %v16861_v5 }
 0x7dc   : >> { %16185 = vmatprep.subr.bf16.mxu0 %v21131_v37 }
 0x7de   : >> { %16285 = vmatpush1.bf16.msra.mxu1 %v16859_v41 }
 0x7df   : >> { %16186 = vmatpush3.bf16.msra.mxu0 %v21131_v37  ;;  %16278 = vmatprep.subr.bf16.mxu1 %v16864_v46 }
 0x7e0   : >> { %16187 = vmatprep.subr.bf16.mxu0 %v21129_v62 }
 0x7e2   : >> { %16286 = vmatpush1.bf16.msra.mxu1 %v16862_v48 }
 0x7e3   : >> { %16188 = vmatpush3.bf16.msra.mxu0 %v21129_v62  ;;  %16279 = vmatprep.subr.bf16.mxu1 %v16867_v38 }
 0x7e4   : >> { %16189 = vmatprep.subr.bf16.mxu0 %v21133_v23 }
 0x7e6   : >> { %16287 = vmatpush1.bf16.msra.mxu1 %v16865_v40 }
 0x7e7   : >> { %16190 = vmatpush3.bf16.msra.mxu0 %v21133_v23  ;;  %16280 = vmatprep.subr.bf16.mxu1 %v16870_v28 }
 0x7e8   : >> { %16191 = vmatprep.subr.bf16.mxu0 %v21130_v53 }
 0x7ea   : >> { %16288 = vmatpush1.bf16.msra.mxu1 %v16868_v36 }
 0x7eb   : >> { %16192 = vmatpush3.bf16.msra.mxu0 %v21130_v53 }
 0x7ec   : >> { %12840 = vmatprep.subr.bf16.mxu0 %v16849_v39 }
 0x7ee   : >> { %16194 = vmatmul.mubr.bf16.vlgmr.msra.gmra.mxu0 %v16840_v3 }
 0x7ef   : >> { %16197 = vmatprep.mubr.bf16.mxu0 %v16841_v4  ;;  %12841 = vmatpush1.bf16.msra.mxu0 %v16847_v11 }
 0x7f0   : >> { %12842 = vmatprep.subr.bf16.mxu0 %v16852_v26 }
 0x7f3   : >> { %12843 = vmatpush1.bf16.msra.mxu0 %v16850_v27 }
 0x7f4   : >> { %12844 = vmatprep.subr.bf16.mxu0 %v16855_v30 }
 0x7f6   : >> { %16198 = vmatmul.mubr.bf16.gmra.mxu0 %v16842_v8 }
 0x7f7   : >> { %16201 = vmatprep.mubr.bf16.mxu0 %v16843_v59  ;;  %12845 = vmatpush1.bf16.msra.mxu0 %v16853_v44 }
 0x7f8   : >> { %12846 = vmatprep.subr.bf16.mxu0 %v16858_v16 }
 0x7fb   : >> { %12847 = vmatpush1.bf16.msra.mxu0 %v16856_v47 }
 0x7fc   : >> { %12848 = vmatprep.subr.bf16.mxu0 %v16861_v5 }
 0x7fe   : >> { %16202 = vmatmul.mubr.bf16.gmra.mxu0 %v16844_v21 }
 0x7ff   : >> { %16205 = vmatprep.mubr.bf16.mxu0 %v16845_v57  ;;  %12849 = vmatpush1.bf16.msra.mxu0 %v16859_v41 }
 0x800   : >> { %12850 = vmatprep.subr.bf16.mxu0 %v16864_v46 }
 0x803   : >> { %12851 = vmatpush1.bf16.msra.mxu0 %v16862_v48 }
 0x804   : >> { %12852 = vmatprep.subr.bf16.mxu0 %v16867_v38 }
 0x806   : >> { %16206 = vmatmul.mubr.bf16.gmra.mxu0 %v16846_v33 }
 0x807   : >> { %12853 = vmatpush1.bf16.msra.mxu0 %v16865_v40  ;;  %12872 = vmatprep.mubr.bf16.mxu0 %v17846_v63 }
 0x808   : >> { %12854 = vmatprep.subr.bf16.mxu0 %v16870_v28 }
 0x80b   : >> { %12855 = vmatpush1.bf16.msra.mxu0 %v16868_v36 }
 0x8ae   : >> { %v16195_v39 = vpop.f32.mrf.mxu0 }
 0x8b0   : >> { %v12670_v11 = vpop.f32.mrf.mxu0 }
 0x8b2   : >> { %v16196_v26 = vpop.f32.mrf.mxu0 }
 0x8b3   : >> { %v12734_v3 = vpack.c.bf16 %v16196_v26, %v16195_v39 }
 0x8b4   : >> { %v12673_v27 = vpop.f32.mrf.mxu0 }
 0x8b5   : >> { %v12733_v30 = vpack.c.bf16 %v12673_v27, %v12670_v11 }
 0x8b6   : >> { %v16199_v44 = vpop.f32.mrf.mxu0 }
 0x8b7   : >> { %12873 = vmatmul.mubr.bf16.vlgmr.msra.gmra.mxu0 %v12733_v30 }
 0x8b8   : >> { %v12686_v16 = vpop.f32.mrf.mxu0  ;;  %12882 = vmatprep.mubr.bf16.mxu0 %v17846_v63 }
 0x8ba   : >> { %v16200_v47 = vpop.f32.mrf.mxu0 }
 0x8bb   : >> { %v12736_v48 = vpack.c.bf16 %v16200_v47, %v16199_v44 }
 0x8bc   : >> { %v12689_v5 = vpop.f32.mrf.mxu0 }
 0x8bd   : >> { %v12735_v4 = vpack.c.bf16 %v12689_v5, %v12686_v16 }
 0x8be   : >> { %v16203_v41 = vpop.f32.mrf.mxu0 }
 0x8bf   : >> { %12883 = vmatmul.mubr.bf16.gmra.mxu0 %v12734_v3  ;;  %12893 = vmatmul.mubr.bf16.vlgmr.msra.gmra.mxu1 %v12735_v4 }
 0x8c0   : >> { %12902 = vmatprep.mubr.bf16.mxu1 %v17846_v63  ;;  %v12702_v46 = vpop.f32.mrf.mxu0 }
 0x8c2   : >> { %v16204_v8 = vpop.f32.mrf.mxu0 }
 0x8c3   : >> { %v12738_v38 = vpack.c.bf16 %v16204_v8, %v16203_v41 }
 0x8c4   : >> { %v12705_v59 = vpop.f32.mrf.mxu0 }
 0x8c5   : >> { %v12737_v21 = vpack.c.bf16 %v12705_v59, %v12702_v46 }
 0x8c6   : >> { %v16207_v57 = vpop.f32.mrf.mxu0 }
 0x8c7   : >> { %12903 = vmatmul.mubr.bf16.gmra.mxu1 %v12736_v48 }
 0x8c8   : >> { %12912 = vmatprep.mubr.bf16.mxu1 %v17846_v63  ;;  %v12718_v33 = vpop.f32.mrf.mxu0 }
 0x8ca   : >> { %v16208_v40 = vpop.f32.mrf.mxu0 }
 0x8cb   : >> { %v12740_v39 = vpack.c.bf16 %v16208_v40, %v16207_v57 }
 0x8cc   : >> { %v12721_v28 = vpop.f32.mrf.mxu0 }
 0x8cd   : >> { %v12739_v36 = vpack.c.bf16 %v12721_v28, %v12718_v33 }
 0x8cf   : >> { %12913 = vmatmul.mubr.bf16.gmra.mxu1 %v12737_v21 }
 0x8d0   : >> { %12922 = vmatprep.mubr.bf16.mxu1 %v17846_v63 }
 0x8d7   : >> { %12923 = vmatmul.mubr.bf16.gmra.mxu1 %v12738_v38 }
 0x8d8   : >> { %12932 = vmatprep.mubr.bf16.mxu1 %v17846_v63 }
 0x8df   : >> { %12933 = vmatmul.mubr.bf16.gmra.mxu1 %v12739_v36 }
 0x8e0   : >> { %12942 = vmatprep.mubr.bf16.mxu1 %v17846_v63 }
 0x8e7   : >> { %12943 = vmatmul.mubr.bf16.gmra.mxu1 %v12740_v39 }
 0x977   : >> { %v12874_v11 = vpop.f32.mrf.mxu0 }
 0x978   : >> { %v20344_v34 = vadd.f32 %v17753_v34, %v12874_v11  }
 0x979   : >> { %v12876_v27 = vpop.f32.mrf.mxu0 }
 0x97a   : >> { %v21137_v26 = vmov %v20344_v34  ;;  %v20347_v19 = vadd.f32 %v17749_v19, %v12876_v27  }
 0x97b   : >> { %v12878_v44 = vpop.f32.mrf.mxu0  ;;  %12985 = vst [vmem:[#allocation5 + $0xb0] sm:$0xff] (%p20442_p2), %v21137_v26 }
 0x97c   : >> { %v21138_v30 = vmov %v20347_v19  ;;  %v20350_v18 = vadd.f32 %v17745_v18, %v12878_v44  }
 0x97d   : >> { %v12880_v47 = vpop.f32.mrf.mxu0  ;;  %12986 = vst [vmem:[#allocation5] sm:$0xff] (%p20442_p2), %v21138_v30 }
 0x97e   : >> { %v21139_v16 = vmov %v20350_v18  ;;  %v20353_v14 = vadd.f32 %v17741_v14, %v12880_v47  }
 0x97f   : >> { %v12884_v3 = vpop.f32.mrf.mxu0  ;;  %v12894_v63 = vpop.f32.mrf.mxu1  ;;  %12987 = vst [vmem:[#allocation5 + $0xd8] sm:$0xff] (%p20442_p2), %v21139_v16 }
 0x980   : >> { %v21140_v5 = vmov %v20353_v14  ;;  %v20356_v13 = vadd.f32 %v17737_v13, %v12884_v3   ;;  %v20359_v32 = vadd.f32 %v17721_v32, %v12894_v63  }
 0x981   : >> { %v12886_v34 = vpop.f32.mrf.mxu0  ;;  %v12896_v46 = vpop.f32.mrf.mxu1  ;;  %12988 = vst [vmem:[#allocation5 + $0x18] sm:$0xff] (%p20442_p2), %v21140_v5 }
 0x982   : >> { %v21141_v4 = vmov %v20356_v13  ;;  %v21142_v41 = vmov %v20359_v32  ;;  %v20362_v51 = vadd.f32 %v17733_v51, %v12886_v34   ;;  %v20365_v12 = vadd.f32 %v17717_v12, %v12896_v46  }
 0x983   : >> { %v12888_v18 = vpop.f32.mrf.mxu0  ;;  %v12898_v19 = vpop.f32.mrf.mxu1  ;;  %v21201_v34 = vmov %v21137_v26  ;;  %12989 = vst [vmem:[#allocation5 + $0x50] sm:$0xff] (%p20442_p2), %v21141_v4  ;;  %12993 = vst [vmem:[#allocation5 + $0x80] sm:$0xff] (%p20442_p2), %v21142_v41 }
 0x984   : >> { %v21143_v48 = vmov %v20362_v51  ;;  %v21144_v8 = vmov %v20365_v12  ;;  %v20368_v52 = vadd.f32 %v17729_v52, %v12888_v18   ;;  %v20371_v7 = vadd.f32 %v17713_v7, %v12898_v19  }
 0x985   : >> { %v12890_v13 = vpop.f32.mrf.mxu0  ;;  %v12900_v14 = vpop.f32.mrf.mxu1  ;;  %v21196_v51 = vmov %v21143_v48  ;;  %v21199_v18 = vmov %v21139_v16  ;;  %v21200_v19 = vmov %v21138_v30  ;;  %12990 = vst [vmem:[#allocation5 + $0x68] sm:$0xff] (%p20442_p2), %v21143_v48  ;;  %12994 = vst [vmem:[#allocation5 + $0x88] sm:$0xff] (%p20442_p2), %v21144_v8 }
 0x986   : >> { %v21145_v59 = vmov %v20368_v52  ;;  %v21146_v21 = vmov %v20371_v7  ;;  %v20374_v31 = vadd.f32 %v17725_v31, %v12890_v13   ;;  %v20377_v6 = vadd.f32 %v17709_v6, %v12900_v14  }
 0x987   : >> { %v12904_v32 = vpop.f32.mrf.mxu1  ;;  %v21197_v13 = vmov %v21141_v4  ;;  %v21198_v14 = vmov %v21140_v5  ;;  %12991 = vst [vmem:[#allocation5 + $0x30] sm:$0xff] (%p20442_p2), %v21145_v59  ;;  %12995 = vst [vmem:[#allocation5 + $0xe8] sm:$0xff] (%p20442_p2), %v21146_v21 }
 0x988   : >> { %v21147_v57 = vmov %v20374_v31  ;;  %v21148_v33 = vmov %v20377_v6  ;;  %v20380_v29 = vadd.f32 %v17705_v29, %v12904_v32   ;;  %v21193_v32 = vmov %v21142_v41 }
 0x989   : >> { %v12906_v12 = vpop.f32.mrf.mxu1  ;;  %12992 = vst [vmem:[#allocation5 + $0x48] sm:$0xff] (%p20442_p2), %v21147_v57  ;;  %12996 = vst [vmem:[#allocation5 + $0xb8] sm:$0xff] (%p20442_p2), %v21148_v33 }
 0x98a   : >> { %v21149_v38 = vmov %v20380_v29  ;;  %v20383_v2 = vadd.f32 %v17701_v2, %v12906_v12   ;;  %v21192_v12 = vmov %v21144_v8 }
 0x98b   : >> { %v12908_v52 = vpop.f32.mrf.mxu1  ;;  %12997 = vst [vmem:[#allocation5 + $0x60] sm:$0xff] (%p20442_p2), %v21149_v38 }
 0x98c   : >> { %v21150_v40 = vmov %v20383_v2  ;;  %v20386_v1 = vadd.f32 %v17697_v1, %v12908_v52   ;;  %v21195_v52 = vmov %v21145_v59 }
 0x98d   : >> { %v12910_v7 = vpop.f32.mrf.mxu1  ;;  %12998 = vst [vmem:[#allocation5 + $0xf0] sm:$0xff] (%p20442_p2), %v21150_v40 }
 0x98e   : >> { %v21151_v28 = vmov %v20386_v1  ;;  %v20389_v61 = vadd.f32 %v17693_v61, %v12910_v7   ;;  %v21191_v7 = vmov %v21146_v21 }
 0x98f   : >> { %v12914_v31 = vpop.f32.mrf.mxu1  ;;  %12999 = vst [vmem:[#allocation5 + $0x8] sm:$0xff] (%p20442_p2), %v21151_v28 }
 0x990   : >> { %v21152_v36 = vmov %v20389_v61  ;;  %v20392_v20 = vadd.f32 %v17689_v20, %v12914_v31   ;;  %v21194_v31 = vmov %v21147_v57 }
 0x991   : >> { %v12916_v6 = vpop.f32.mrf.mxu1  ;;  %13000 = vst [vmem:[#allocation5 + $0x78] sm:$0xff] (%p20442_p2), %v21152_v36 }
 0x992   : >> { %v21153_v39 = vmov %v20392_v20  ;;  %v20395_v35 = vadd.f32 %v17685_v35, %v12916_v6   ;;  %v21190_v6 = vmov %v21148_v33 }
 0x993   : >> { %v12918_v29 = vpop.f32.mrf.mxu1  ;;  %13001 = vst [vmem:[#allocation5 + $0x38] sm:$0xff] (%p20442_p2), %v21153_v39 }
 0x994   : >> { %v21154_v11 = vmov %v20395_v35  ;;  %v20398_v15 = vadd.f32 %v17681_v15, %v12918_v29   ;;  %v21189_v29 = vmov %v21149_v38 }
 0x995   : >> { %v12920_v2 = vpop.f32.mrf.mxu1  ;;  %13002 = vst [vmem:[#allocation5 + $0x58] sm:$0xff] (%p20442_p2), %v21154_v11 }
 0x996   : >> { %v21155_v27 = vmov %v20398_v15  ;;  %v20401_v17 = vadd.f32 %v17677_v17, %v12920_v2   ;;  %v21188_v2 = vmov %v21150_v40 }
 0x997   : >> { %v12924_v1 = vpop.f32.mrf.mxu1  ;;  %13003 = vst [vmem:[#allocation5 + $0x40] sm:$0xff] (%p20442_p2), %v21155_v27 }
 0x998   : >> { %v21156_v44 = vmov %v20401_v17  ;;  %v20404_v60 = vadd.f32 %v17673_v60, %v12924_v1   ;;  %v21187_v1 = vmov %v21151_v28 }
 0x999   : >> { %v12926_v61 = vpop.f32.mrf.mxu1  ;;  %13004 = vst [vmem:[#allocation5 + $0xc8] sm:$0xff] (%p20442_p2), %v21156_v44 }
 0x99a   : >> { %v21157_v47 = vmov %v20404_v60  ;;  %v20407_v45 = vadd.f32 %v17669_v45, %v12926_v61   ;;  %v21186_v61 = vmov %v21152_v36 }
 0x99b   : >> { %v12928_v20 = vpop.f32.mrf.mxu1  ;;  %13005 = vst [vmem:[#allocation5 + $0xe0] sm:$0xff] (%p20442_p2), %v21157_v47 }
 0x99c   : >> { %v21158_v3 = vmov %v20407_v45  ;;  %v20410_v56 = vadd.f32 %v17665_v56, %v12928_v20   ;;  %v21185_v20 = vmov %v21153_v39 }
 0x99d   : >> { %v12930_v35 = vpop.f32.mrf.mxu1  ;;  %13006 = vst [vmem:[#allocation5 + $0x90] sm:$0xff] (%p20442_p2), %v21158_v3 }
 0x99e   : >> { %v21159_v63 = vmov %v20410_v56  ;;  %v20413_v54 = vadd.f32 %v17661_v54, %v12930_v35   ;;  %v21184_v35 = vmov %v21154_v11 }
 0x99f   : >> { %v12934_v15 = vpop.f32.mrf.mxu1  ;;  %13007 = vst [vmem:[#allocation5 + $0x70] sm:$0xff] (%p20442_p2), %v21159_v63 }
 0x9a0   : >> { %v21160_v46 = vmov %v20413_v54  ;;  %v20416_v42 = vadd.f32 %v17657_v42, %v12934_v15   ;;  %v21183_v15 = vmov %v21155_v27 }
 0x9a1   : >> { %v12936_v17 = vpop.f32.mrf.mxu1  ;;  %13008 = vst [vmem:[#allocation5 + $0xc0] sm:$0xff] (%p20442_p2), %v21160_v46 }
 0x9a2   : >> { %v21161_v0 = vmov %v20416_v42  ;;  %v20419_v9 = vadd.f32 %v17653_v9, %v12936_v17   ;;  %v21182_v17 = vmov %v21156_v44 }
 0x9a3   : >> { %v12938_v60 = vpop.f32.mrf.mxu1  ;;  %13009 = vst [vmem:[#allocation5 + $0xa8] sm:$0xff] (%p20442_p2), %v21161_v0 }
 0x9a4   : >> { %v21162_v10 = vmov %v20419_v9  ;;  %v20422_v58 = vadd.f32 %v17649_v58, %v12938_v60   ;;  %v21181_v60 = vmov %v21157_v47 }
 0x9a5   : >> { %v12940_v45 = vpop.f32.mrf.mxu1  ;;  %13010 = vst [vmem:[#allocation5 + $0xd0] sm:$0xff] (%p20442_p2), %v21162_v10 }
 0x9a6   : >> { %v21163_v22 = vmov %v20422_v58  ;;  %v20425_v50 = vadd.f32 %v17645_v50, %v12940_v45   ;;  %v21180_v45 = vmov %v21158_v3 }
 0x9a7   : >> { %v12944_v56 = vpop.f32.mrf.mxu1  ;;  %v21175_v58 = vmov %v21163_v22  ;;  %13011 = vst [vmem:[#allocation5 + $0x10] sm:$0xff] (%p20442_p2), %v21163_v22 }
 0x9a8   : >> { %v21164_v23 = vmov %v20425_v50  ;;  %v20428_v49 = vadd.f32 %v17641_v49, %v12944_v56   ;;  %v21179_v56 = vmov %v21159_v63 }
 0x9a9   : >> { %v12946_v54 = vpop.f32.mrf.mxu1  ;;  %v21174_v50 = vmov %v21164_v23  ;;  %13012 = vst [vmem:[#allocation5 + $0x28] sm:$0xff] (%p20442_p2), %v21164_v23 }
 0x9aa   : >> { %v21165_v24 = vmov %v20428_v49  ;;  %v20431_v55 = vadd.f32 %v17637_v55, %v12946_v54   ;;  %v21178_v54 = vmov %v21160_v46 }
 0x9ab   : >> { %v12948_v42 = vpop.f32.mrf.mxu1  ;;  %v21173_v49 = vmov %v21165_v24  ;;  %13013 = vst [vmem:[#allocation5 + $0xa0] sm:$0xff] (%p20442_p2), %v21165_v24 }
 0x9ac   : >> { %v21166_v37 = vmov %v20431_v55  ;;  %v20434_v43 = vadd.f32 %v17633_v43, %v12948_v42   ;;  %v21177_v42 = vmov %v21161_v0 }
 0x9ad   : >> { %v12950_v9 = vpop.f32.mrf.mxu1  ;;  %v21172_v55 = vmov %v21166_v37  ;;  %12535 = sbr.rel (!%p20442_p2) target bundleno = 1993 (0x7c9), region = 208  ;;  %13014 = vst [vmem:[#allocation5 + $0xf8] sm:$0xff] (%p20442_p2), %v21166_v37 }
 0x9ae   : >> { %v21167_v53 = vmov %v20434_v43  ;;  %v20437_v25 = vadd.f32 %v17629_v25, %v12950_v9   ;;  %v21176_v9 = vmov %v21162_v10 }
 0x9af   : >> { %v21171_v43 = vmov %v21167_v53  ;;  %13015 = vst [vmem:[#allocation5 + $0x20] sm:$0xff] (%p20442_p2), %v21167_v53 }
 0x9b0   : >> { %v21168_v62 = vmov %v20437_v25 }
 0x9b1   : >> { %v21170_v25 = vmov %v21168_v62  ;;  %13016 = vst [vmem:[#allocation5 + $0x98] sm:$0xff] (%p20442_p2), %v21168_v62 }
 0x9b2 PF: > { %p16024_p13 = scmp.ne.s32.totalorder %s17931_s23, 7 }
 0x9b4   : > { %13020 = sbr.rel (%p16024_p13) target bundleno = 3092 (0xc14), region = 123 }
 0x9b9   : > { %v20581_v25 = vld [vmem:[#allocation4] sm:$0xff]  ;;  %v20583_v0 = vld [vmem:[#allocation4 + $0x8] sm:$0xff]  ;;  %v20585_v10 = vld [vmem:[#allocation4 + $0x10] sm:$0xff]  ;;  %s20741_s20 = smov 0  }
 0x9ba   : > { %v20587_v22 = vld [vmem:[#allocation4 + $0x18] sm:$0xff]  ;;  %v20589_v23 = vld [vmem:[#allocation4 + $0x20] sm:$0xff]  ;;  %v20591_v24 = vld [vmem:[#allocation4 + $0x28] sm:$0xff] }
 0x9bb   : > { %v13037_v37 = vld [vmem:[#allocation2] sm:$0xff]  ;;  %v20593_v53 = vld [vmem:[#allocation4 + $0x30] sm:$0xff]  ;;  %v20595_v62 = vld [vmem:[#allocation4 + $0x38] sm:$0xff] }
 0x9bc   : > { %v20597_v43 = vld [vmem:[#allocation4 + $0x40] sm:$0xff]  ;;  %v13038_v55 = vld [vmem:[#allocation2 + $0x8] sm:$0xff]  ;;  %v20601_v50 = vld [vmem:[#allocation4 + $0x50] sm:$0xff] }
 0x9bd   : > { %v20599_v49 = vld [vmem:[#allocation4 + $0x48] sm:$0xff]  ;;  %v20603_v58 = vld [vmem:[#allocation4 + $0x58] sm:$0xff]  ;;  %v13039_v51 = vld [vmem:[#allocation2 + $0x10] sm:$0xff] }
 0x9be   : > { %v13040_v26 = vld [vmem:[#allocation2 + $0x18] sm:$0xff]  ;;  %v13041_v30 = vld [vmem:[#allocation2 + $0x20] sm:$0xff]  ;;  %v20607_v5 = vld [vmem:[#allocation4 + $0x68] sm:$0xff] }
 0x9bf   : > { %v20605_v16 = vld [vmem:[#allocation4 + $0x60] sm:$0xff]  ;;  %v20609_v4 = vld [vmem:[#allocation4 + $0x70] sm:$0xff]  ;;  %v20611_v41 = vld [vmem:[#allocation4 + $0x78] sm:$0xff] }
 0x9c0   : > { %21203 = vst [vmem:[#allocation43_spill] sm:$0xff] %v20609_v4  ;;  %21204 = vst [vmem:[#allocation44_spill] sm:$0xff] %v20611_v41  ;;  %v13085_v34 = vld [vmem:[#allocation5 + $0xb0] sm:$0xff]  ;;  %v13086_v48 = vld [vmem:[#allocation5 + $0xd8] sm:$0xff] }
 0x9c1   : > { %v13087_v8 = vld [vmem:[#allocation5 + $0x50] sm:$0xff]  ;;  %v13089_v19 = vld [vmem:[#allocation5 + $0x80] sm:$0xff]  ;;  %v13042_v59 = vld [vmem:[#allocation2 + $0x28] sm:$0xff]  ;;  %v13101_v14 = vadd.f32 %v13085_v34, %v13037_v37  ;;  %v13102_v38 = vadd.f32 %v13086_v48, %v13038_v55 }
 0x9c2   : > { %v13088_v18 = vld [vmem:[#allocation5 + $0x30] sm:$0xff]  ;;  %v13090_v13 = vld [vmem:[#allocation5 + $0xe8] sm:$0xff]  ;;  %v13044_v57 = vld [vmem:[#allocation2 + $0x38] sm:$0xff]  ;;  %v13103_v28 = vadd.f32 %v13087_v8, %v13039_v51  ;;  %v13105_v36 = vadd.f32 %v13089_v19, %v13041_v30 }
 0x9c3   : > { %v13043_v21 = vld [vmem:[#allocation2 + $0x30] sm:$0xff]  ;;  %v13045_v33 = vld [vmem:[#allocation2 + $0x40] sm:$0xff]  ;;  %v13046_v12 = vld [vmem:[#allocation2 + $0x48] sm:$0xff]  ;;  %v13104_v7 = vadd.f32 %v13088_v18, %v13040_v26  ;;  %v13106_v11 = vadd.f32 %v13090_v13, %v13042_v59 }
 0x9c4   : > { %v13091_v32 = vld [vmem:[#allocation5 + $0x60] sm:$0xff]  ;;  %v13092_v40 = vld [vmem:[#allocation5 + $0x8] sm:$0xff]  ;;  %v13093_v52 = vld [vmem:[#allocation5 + $0x38] sm:$0xff] }
 0x9c5   : > { %v13047_v31 = vld [vmem:[#allocation2 + $0x50] sm:$0xff]  ;;  %v13094_v39 = vld [vmem:[#allocation5 + $0x40] sm:$0xff]  ;;  %v13048_v27 = vld [vmem:[#allocation2 + $0x58] sm:$0xff]  ;;  %v13107_v44 = vadd.f32 %v13091_v32, %v13043_v21  ;;  %v13108_v20 = vadd.f32 %v13092_v40, %v13044_v57  ;;  %v13109_v63 = vadd.f32 %v13093_v52, %v13045_v33 }
 0x9c6   : > { %v13095_v6 = vld [vmem:[#allocation5 + $0xe0] sm:$0xff]  ;;  %v13117_v29 = vld [vmem:[#allocation18] sm:$0xff]  ;;  %v13118_v1 = vld [vmem:[#allocation18 + $0x8] sm:$0xff]  ;;  %v13110_v26 = vadd.f32 %v13094_v39, %v13046_v12 }
 0x9c7   : > { %v13049_v2 = vld [vmem:[#allocation2 + $0x60] sm:$0xff]  ;;  %v13120_v61 = vld [vmem:[#allocation18 + $0x18] sm:$0xff]  ;;  %v13133_v3 = vadd.f32 %v13117_v29, %v13101_v14  ;;  %v13121_v35 = vld [vmem:[#allocation18 + $0x20] sm:$0xff]  ;;  %v13134_v17 = vadd.f32 %v13118_v1, %v13102_v38  ;;  %v13111_v59 = vadd.f32 %v13095_v6, %v13047_v31 }
 0x9c8   : > { %v13119_v47 = vld [vmem:[#allocation18 + $0x10] sm:$0xff]  ;;  %v13122_v46 = vld [vmem:[#allocation18 + $0x28] sm:$0xff]  ;;  %v13096_v60 = vld [vmem:[#allocation5 + $0x70] sm:$0xff]  ;;  %v13136_v42 = vadd.f32 %v13120_v61, %v13104_v7  ;;  %v13137_v9 = vadd.f32 %v13121_v35, %v13105_v36 }
 0x9c9   : > { %v13123_v15 = vld [vmem:[#allocation18 + $0x30] sm:$0xff]  ;;  %v13097_v45 = vld [vmem:[#allocation5 + $0xa8] sm:$0xff]  ;;  %v13135_v54 = vadd.f32 %v13119_v47, %v13103_v28  ;;  %v16025_v37 = vmul.f32 -1.442695, %v13133_v3  ;;  %v13051_v51 = vld [vmem:[#allocation2 + $0x70] sm:$0xff]  ;;  %v13138_v34 = vadd.f32 %v13122_v46, %v13106_v11  ;;  %v13112_v57 = vadd.f32 %v13096_v60, %v13048_v27 }
 0x9ca   : > { %v13124_v56 = vld [vmem:[#allocation18 + $0x38] sm:$0xff]  ;;  %v13125_v30 = vld [vmem:[#allocation18 + $0x40] sm:$0xff]  ;;  %v16026_v48 = vmul.f32 -1.442695, %v13134_v17  ;;  %v13052_v8 = vld [vmem:[#allocation2 + $0x78] sm:$0xff]  ;;  %v13139_v13 = vadd.f32 %v13123_v15, %v13107_v44  ;;  %v13113_v33 = vadd.f32 %v13097_v45, %v13049_v2 }
 0x9cb   : > { %v13050_v55 = vld [vmem:[#allocation2 + $0x68] sm:$0xff]  ;;  %v13098_v18 = vld [vmem:[#allocation5 + $0x10] sm:$0xff]  ;;  %v13099_v19 = vld [vmem:[#allocation5 + $0xa0] sm:$0xff]  ;;  %16871 = vpow2.f32 %v16025_v37  ;;  %v13140_v40 = vadd.f32 %v13124_v56, %v13108_v20  ;;  %v13141_v52 = vadd.f32 %v13125_v30, %v13109_v63  ;;  %v16027_v28 = vmul.f32 -1.442695, %v13135_v54 }
 0x9cc   : > { %v13126_v21 = vld [vmem:[#allocation18 + $0x48] sm:$0xff]  ;;  %v13100_v14 = vld [vmem:[#allocation5 + $0x20] sm:$0xff]  ;;  %v13128_v38 = vld [vmem:[#allocation18 + $0x58] sm:$0xff]  ;;  %16873 = vpow2.f32 %v16026_v48  ;;  %v16028_v12 = vmul.f32 -1.442695, %v13136_v42  ;;  %v13114_v36 = vadd.f32 %v13098_v18, %v13050_v55  ;;  %v13115_v1 = vadd.f32 %v13099_v19, %v13051_v51 }
 0x9cd   : > { %v13127_v32 = vld [vmem:[#allocation18 + $0x50] sm:$0xff]  ;;  %v16029_v7 = vmul.f32 -1.442695, %v13137_v9  ;;  %v13129_v39 = vld [vmem:[#allocation18 + $0x60] sm:$0xff]  ;;  %v13142_v11 = vadd.f32 %v13126_v21, %v13110_v26  ;;  %v16030_v29 = vmul.f32 -1.442695, %v13138_v34  ;;  %16875 = vpow2.f32 %v16027_v28 }
 0x9ce   : > { %v13130_v31 = vld [vmem:[#allocation18 + $0x68] sm:$0xff]  ;;  %v13143_v6 = vadd.f32 %v13127_v32, %v13111_v59  ;;  %v16031_v44 = vmul.f32 -1.442695, %v13139_v13  ;;  %v13116_v47 = vadd.f32 %v13100_v14, %v13052_v8  ;;  %v13131_v27 = vld [vmem:[#allocation18 + $0x70] sm:$0xff]  ;;  %v13144_v2 = vadd.f32 %v13128_v38, %v13112_v57  ;;  %v13132_v3 = vld [vmem:[#allocation18 + $0x78] sm:$0xff] }
 0x9cf   : > { %16877 = vpow2.f32 %v16028_v12  ;;  %v16032_v61 = vmul.f32 -1.442695, %v13140_v40  ;;  %v13145_v20 = vadd.f32 %v13129_v39, %v13113_v33  ;;  %v16033_v63 = vmul.f32 -1.442695, %v13141_v52  ;;  %v13053_v18 = vld [vmem:[#allocation3] sm:$0xff]  ;;  %v13054_v19 = vld [vmem:[#allocation3 + $0x8] sm:$0xff] }
 0x9d0   : > { %16879 = vpow2.f32 %v16029_v7  ;;  %v13146_v35 = vadd.f32 %v13130_v31, %v13114_v36  ;;  %v16034_v46 = vmul.f32 -1.442695, %v13142_v11  ;;  %v13147_v15 = vadd.f32 %v13131_v27, %v13115_v1  ;;  %v13245_v21 = vld [vmem:[#allocation5] sm:$0xff]  ;;  %v13055_v14 = vld [vmem:[#allocation3 + $0x10] sm:$0xff]  ;;  %v13056_v57 = vld [vmem:[#allocation3 + $0x18] sm:$0xff] }
 0x9d1   : > { %16881 = vpow2.f32 %v16030_v29  ;;  %v16035_v17 = vmul.f32 -1.442695, %v13143_v6  ;;  %v13148_v60 = vadd.f32 %v13132_v3, %v13116_v47  ;;  %v16036_v45 = vmul.f32 -1.442695, %v13144_v2  ;;  %v13246_v32 = vld [vmem:[#allocation5 + $0x18] sm:$0xff]  ;;  %v13057_v40 = vld [vmem:[#allocation3 + $0x20] sm:$0xff] }
 0x9d2   : > { %16883 = vpow2.f32 %v16031_v44  ;;  %v16037_v56 = vmul.f32 -1.442695, %v13145_v20  ;;  %v16038_v54 = vmul.f32 -1.442695, %v13146_v35  ;;  %v16039_v42 = vmul.f32 -1.442695, %v13147_v15 }
 0x9d3   : > { %16885 = vpow2.f32 %v16032_v61  ;;  %v16040_v37 = vmul.f32 -1.442695, %v13148_v60  ;;  %v13247_v28 = vld [vmem:[#allocation5 + $0x68] sm:$0xff]  ;;  %v13250_v29 = vld [vmem:[#allocation5 + $0xb8] sm:$0xff]  ;;  %v13261_v1 = vadd.f32 %v13245_v21, %v13053_v18  ;;  %v13059_v6 = vld [vmem:[#allocation3 + $0x30] sm:$0xff]  ;;  %v13262_v27 = vadd.f32 %v13246_v32, %v13054_v19 }
 0x9d4   : > { %16887 = vpow2.f32 %v16033_v63  ;;  %v13248_v12 = vld [vmem:[#allocation5 + $0x48] sm:$0xff]  ;;  %v13251_v47 = vld [vmem:[#allocation5 + $0xf0] sm:$0xff]  ;;  %v13060_v3 = vld [vmem:[#allocation3 + $0x38] sm:$0xff]  ;;  %v13263_v35 = vadd.f32 %v13247_v28, %v13055_v14 }
 0x9d5   : > { %16889 = vpow2.f32 %v16034_v46  ;;  %v13058_v36 = vld [vmem:[#allocation3 + $0x28] sm:$0xff]  ;;  %v13277_v2 = vld [vmem:[#allocation20] sm:$0xff]  ;;  %v13252_v63 = vld [vmem:[#allocation5 + $0x78] sm:$0xff]  ;;  %v13264_v46 = vadd.f32 %v13248_v12, %v13056_v57 }
 0x9d6   : > { %16891 = vpow2.f32 %v16035_v17  ;;  %v13249_v11 = vld [vmem:[#allocation5 + $0x88] sm:$0xff]  ;;  %v13278_v15 = vld [vmem:[#allocation20 + $0x8] sm:$0xff]  ;;  %v13061_v60 = vld [vmem:[#allocation3 + $0x40] sm:$0xff]  ;;  %v13268_v19 = vadd.f32 %v13252_v63, %v13060_v3 }
 0x9d7   : > { %16893 = vpow2.f32 %v16036_v45  ;;  %v13294_v21 = vadd.f32 %v13278_v15, %v13262_v27  ;;  %v13255_v28 = vld [vmem:[#allocation5 + $0x90] sm:$0xff]  ;;  %v13065_v27 = vld [vmem:[#allocation3 + $0x60] sm:$0xff]  ;;  %v13258_v15 = vld [vmem:[#allocation5 + $0x28] sm:$0xff] }
 0x9d8   : > { %v16872_v9 = vpop.eup %16871  ;;  %16895 = vpow2.f32 %v16037_v56  ;;  %v13253_v56 = vld [vmem:[#allocation5 + $0x58] sm:$0xff]  ;;  %v13285_v3 = vld [vmem:[#allocation20 + $0x40] sm:$0xff] }
 0x9d9   : > { %v16874_v55 = vpop.eup %16873  ;;  %v13197_v51 = vadd.f32 1.0, %v16872_v9  ;;  %16897 = vpow2.f32 %v16038_v54  ;;  %v13265_v54 = vadd.f32 %v13249_v11, %v13057_v40  ;;  %v13279_v9 = vld [vmem:[#allocation20 + $0x10] sm:$0xff]  ;;  %v13269_v57 = vadd.f32 %v13253_v56, %v13061_v60  ;;  %v13063_v40 = vld [vmem:[#allocation3 + $0x50] sm:$0xff]  ;;  %v13064_v11 = vld [vmem:[#allocation3 + $0x58] sm:$0xff] }
 0x9da   : > { %v13198_v26 = vadd.f32 1.0, %v16874_v55  ;;  %16899 = vpow2.f32 %v16039_v42  ;;  %v16876_v30 = vpop.eup %16875  ;;  %v13266_v42 = vadd.f32 %v13250_v29, %v13058_v36  ;;  %v13062_v55 = vld [vmem:[#allocation3 + $0x48] sm:$0xff]  ;;  %v13295_v32 = vadd.f32 %v13279_v9, %v13263_v35  ;;  %v13286_v60 = vld [vmem:[#allocation20 + $0x48] sm:$0xff]  ;;  %v13067_v9 = vld [vmem:[#allocation3 + $0x70] sm:$0xff] }
 0x9db   : > { %16901 = vpow2.f32 %v16040_v37  ;;  %v13199_v48 = vadd.f32 1.0, %v16876_v30  ;;  %v13267_v30 = vadd.f32 %v13251_v47, %v13059_v6  ;;  %v16042_v63 = vmul.f32 -1.442695, %v13294_v21 }
 0x9dc   : > { %v16878_v34 = vpop.eup %16877  ;;  %16903 = vrcp.f32 %v13197_v51  ;;  %v16043_v56 = vmul.f32 -1.442695, %v13295_v32  ;;  %v13301_v21 = vadd.f32 %v13285_v3, %v13269_v57  ;;  %v13291_v57 = vld [vmem:[#allocation20 + $0x70] sm:$0xff] }
 0x9dd   : > { %v16880_v8 = vpop.eup %16879  ;;  %v13200_v59 = vadd.f32 1.0, %v16878_v34  ;;  %16905 = vrcp.f32 %v13198_v26  ;;  %v13254_v26 = vld [vmem:[#allocation5 + $0xc8] sm:$0xff] }
 0x9de   : > { %v16882_v13 = vpop.eup %16881  ;;  %v13201_v33 = vadd.f32 1.0, %v16880_v8  ;;  %16907 = vrcp.f32 %v13199_v48  ;;  %v13280_v34 = vld [vmem:[#allocation20 + $0x18] sm:$0xff]  ;;  %v13293_v48 = vadd.f32 %v13277_v2, %v13261_v1  ;;  %v13270_v12 = vadd.f32 %v13254_v26, %v13062_v55  ;;  %v13256_v1 = vld [vmem:[#allocation5 + $0xc0] sm:$0xff] }
 0x9df   : > { %v16884_v38 = vpop.eup %16883  ;;  %v13202_v52 = vadd.f32 1.0, %v16882_v13  ;;  %16909 = vrcp.f32 %v13200_v59  ;;  %v13281_v59 = vld [vmem:[#allocation20 + $0x20] sm:$0xff]  ;;  %v13296_v36 = vadd.f32 %v13280_v34, %v13264_v46  ;;  %v13066_v46 = vld [vmem:[#allocation3 + $0x68] sm:$0xff]  ;;  %v13272_v55 = vadd.f32 %v13256_v1, %v13064_v11 }
 0x9e0   : > { %v16886_v7 = vpop.eup %16885  ;;  %v13203_v39 = vadd.f32 1.0, %v16884_v38  ;;  %16911 = vrcp.f32 %v13201_v33  ;;  %v13282_v33 = vld [vmem:[#allocation20 + $0x28] sm:$0xff]  ;;  %v13297_v6 = vadd.f32 %v13281_v59, %v13265_v54  ;;  %v13288_v59 = vld [vmem:[#allocation20 + $0x58] sm:$0xff]  ;;  %v13302_v32 = vadd.f32 %v13286_v60, %v13270_v12 }
 0x9e1   : > { %v16888_v31 = vpop.eup %16887  ;;  %v13204_v44 = vadd.f32 1.0, %v16886_v7  ;;  %16913 = vrcp.f32 %v13202_v52  ;;  %v13283_v7 = vld [vmem:[#allocation20 + $0x30] sm:$0xff]  ;;  %v16044_v34 = vmul.f32 -1.442695, %v13296_v36  ;;  %v13304_v11 = vadd.f32 %v13288_v59, %v13272_v55 }
 0x9e2   : > { %v16890_v61 = vpop.eup %16889  ;;  %v13205_v20 = vadd.f32 1.0, %v16888_v31  ;;  %16915 = vrcp.f32 %v13203_v39  ;;  %v13284_v31 = vld [vmem:[#allocation20 + $0x38] sm:$0xff] }
 0x9e3   : > { %v16892_v17 = vpop.eup %16891  ;;  %v13206_v45 = vadd.f32 1.0, %v16890_v61  ;;  %16917 = vrcp.f32 %v13204_v44  ;;  %v16041_v44 = vmul.f32 -1.442695, %v13293_v48  ;;  %v13257_v61 = vld [vmem:[#allocation5 + $0xd0] sm:$0xff]  ;;  %v13300_v26 = vadd.f32 %v13284_v31, %v13268_v19  ;;  %v13068_v48 = vld [vmem:[#allocation3 + $0x78] sm:$0xff]  ;;  %v13292_v31 = vld [vmem:[#allocation20 + $0x78] sm:$0xff] }
 0x9e4   : > { %v16894_v37 = vpop.eup %16893  ;;  %v13207_v51 = vadd.f32 1.0, %v16892_v17  ;;  %16919 = vrcp.f32 %v13205_v20  ;;  %v13298_v20 = vadd.f32 %v13282_v33, %v13266_v42  ;;  %v13271_v17 = vadd.f32 %v13255_v28, %v13063_v40  ;;  %v13289_v33 = vld [vmem:[#allocation20 + $0x60] sm:$0xff] }
 0x9e5   : > { %v16896_v8 = vpop.eup %16895  ;;  %v13208_v18 = vadd.f32 1.0, %v16894_v37  ;;  %16921 = vrcp.f32 %v13206_v45  ;;  %v13299_v45 = vadd.f32 %v13283_v7, %v13267_v30  ;;  %v13259_v37 = vld [vmem:[#allocation5 + $0xf8] sm:$0xff] }
 0x9e6   : > { %v16898_v13 = vpop.eup %16897  ;;  %v13209_v14 = vadd.f32 1.0, %v16896_v8  ;;  %16923 = vrcp.f32 %v13207_v51  ;;  %v13287_v51 = vld [vmem:[#allocation20 + $0x50] sm:$0xff]  ;;  %v13260_v8 = vld [vmem:[#allocation5 + $0x98] sm:$0xff]  ;;  %v13275_v19 = vadd.f32 %v13259_v37, %v13067_v9 }
 0x9e7   : > { %v16900_v38 = vpop.eup %16899  ;;  %v13210_v52 = vadd.f32 1.0, %v16898_v13  ;;  %16925 = vrcp.f32 %v13208_v18  ;;  %v13273_v18 = vadd.f32 %v13257_v61, %v13065_v27  ;;  %v16045_v13 = vmul.f32 -1.442695, %v13297_v6 }
 0x9e8   : > { %v16902_v39 = vpop.eup %16901  ;;  %v13211_v29 = vadd.f32 1.0, %v16900_v38  ;;  %16927 = vrcp.f32 %v13209_v14  ;;  %v13274_v14 = vadd.f32 %v13258_v15, %v13066_v46  ;;  %v16046_v38 = vmul.f32 -1.442695, %v13298_v20 }
 0x9e9   : > { %v20613_v47 = vpop.eup %16903  ;;  %v13212_v2 = vadd.f32 1.0, %v16902_v39  ;;  %16929 = vrcp.f32 %v13210_v52  ;;  %v13290_v52 = vld [vmem:[#allocation20 + $0x68] sm:$0xff]  ;;  %v13303_v28 = vadd.f32 %v13287_v51, %v13271_v17  ;;  %v16047_v7 = vmul.f32 -1.442695, %v13299_v45 }
 0x9ea   : > { %v20615_v35 = vpop.eup %16905  ;;  %16931 = vrcp.f32 %v13211_v29  ;;  %v13276_v39 = vadd.f32 %v13260_v8, %v13068_v48  ;;  %v16048_v29 = vmul.f32 -1.442695, %v13300_v26  ;;  %v13305_v12 = vadd.f32 %v13289_v33, %v13273_v18 }
 0x9eb   : > { %v20617_v54 = vpop.eup %16907  ;;  %16933 = vrcp.f32 %v13212_v2  ;;  %v16049_v6 = vmul.f32 -1.442695, %v13301_v21  ;;  %v13306_v27 = vadd.f32 %v13290_v52, %v13274_v14  ;;  %v16050_v2 = vmul.f32 -1.442695, %v13302_v32 }
 0x9ec   : > { %v20619_v42 = vpop.eup %16909  ;;  %16935 = vpow2.f32 %v16041_v44  ;;  %v13307_v3 = vadd.f32 %v13291_v57, %v13275_v19  ;;  %v16051_v20 = vmul.f32 -1.442695, %v13303_v28  ;;  %v13308_v46 = vadd.f32 %v13292_v31, %v13276_v39 }
 0x9ed   : > { %v20621_v30 = vpop.eup %16911  ;;  %16937 = vpow2.f32 %v16042_v63  ;;  %v16052_v15 = vmul.f32 -1.442695, %v13304_v11  ;;  %v16053_v60 = vmul.f32 -1.442695, %v13305_v12 }
 0x9ee   : > { %v20623_v40 = vpop.eup %16913  ;;  %16939 = vpow2.f32 %v16043_v56  ;;  %v16054_v56 = vmul.f32 -1.442695, %v13306_v27  ;;  %v16055_v37 = vmul.f32 -1.442695, %v13307_v3  ;;  %v16056_v51 = vmul.f32 -1.442695, %v13308_v46 }
 0x9ef   : > { %v20625_v36 = vpop.eup %16915  ;;  %16941 = vpow2.f32 %v16044_v34 }
 0x9f0   : > { %21205 = vst [vmem:[#allocation45_spill] sm:$0xff] %v20625_v36  ;;  %v20627_v1 = vpop.eup %16917  ;;  %16943 = vpow2.f32 %v16045_v13 }
 0x9f1   : > { %21206 = vst [vmem:[#allocation46_spill] sm:$0xff] %v20627_v1  ;;  %v20629_v44 = vpop.eup %16919  ;;  %16945 = vpow2.f32 %v16046_v38 }
 0x9f2   : > { %21207 = vst [vmem:[#allocation47_spill] sm:$0xff] %v20629_v44  ;;  %v20631_v61 = vpop.eup %16921  ;;  %16947 = vpow2.f32 %v16047_v7 }
 0x9f3   : > { %21208 = vst [vmem:[#allocation48_spill] sm:$0xff] %v20631_v61  ;;  %v20633_v63 = vpop.eup %16923  ;;  %16949 = vpow2.f32 %v16048_v29 }
 0x9f4   : > { %21209 = vst [vmem:[#allocation49_spill] sm:$0xff] %v20633_v63  ;;  %v20635_v17 = vpop.eup %16925  ;;  %16951 = vpow2.f32 %v16049_v6 }
 0x9f5   : > { %21210 = vst [vmem:[#allocation50_spill] sm:$0xff] %v20635_v17  ;;  %v20637_v45 = vpop.eup %16927  ;;  %16953 = vpow2.f32 %v16050_v2 }
 0x9f6   : > { %21211 = vst [vmem:[#allocation51_spill] sm:$0xff] %v20637_v45  ;;  %v20639_v9 = vpop.eup %16929  ;;  %16955 = vpow2.f32 %v16051_v20 }
 0x9f7   : > { %21212 = vst [vmem:[#allocation52_spill] sm:$0xff] %v20639_v9  ;;  %v20641_v55 = vpop.eup %16931  ;;  %16957 = vpow2.f32 %v16052_v15 }
 0x9f8   : > { %21213 = vst [vmem:[#allocation53_spill] sm:$0xff] %v20641_v55  ;;  %v20643_v26 = vpop.eup %16933  ;;  %16959 = vpow2.f32 %v16053_v60  ;;  %v20645_v60 = vld [vmem:[#allocation14] sm:$0xff] }
 0x9f9   : > { %21214 = vst [vmem:[#allocation54_spill] sm:$0xff] %v20643_v26  ;;  %v16936_v34 = vpop.eup %16935  ;;  %16961 = vpow2.f32 %v16054_v56 }
 0x9fa   : > { %v16938_v48 = vpop.eup %16937  ;;  %16963 = vpow2.f32 %v16055_v37  ;;  %v13357_v8 = vadd.f32 1.0, %v16936_v34 }
 0x9fb   : > { %v16940_v18 = vpop.eup %16939  ;;  %16965 = vpow2.f32 %v16056_v51  ;;  %v13358_v59 = vadd.f32 1.0, %v16938_v48  ;;  %v20647_v51 = vld [vmem:[#allocation14 + $0x8] sm:$0xff] }
 0x9fc   : > { %v16942_v21 = vpop.eup %16941  ;;  %v13359_v13 = vadd.f32 1.0, %v16940_v18  ;;  %16967 = vrcp.f32 %v13357_v8  ;;  %21215 = vst [vmem:[#allocation55_spill] sm:$0xff] %v20647_v51  ;;  %v20649_v8 = vld [vmem:[#allocation14 + $0x10] sm:$0xff] }
 0x9fd   : > { %v16944_v14 = vpop.eup %16943  ;;  %v13360_v33 = vadd.f32 1.0, %v16942_v21  ;;  %16969 = vrcp.f32 %v13358_v59  ;;  %21216 = vst [vmem:[#allocation56_spill] sm:$0xff] %v20649_v8  ;;  %v20651_v21 = vld [vmem:[#allocation14 + $0x18] sm:$0xff] }
 0x9fe   : > { %v16946_v32 = vpop.eup %16945  ;;  %v13361_v38 = vadd.f32 1.0, %v16944_v14  ;;  %16971 = vrcp.f32 %v13359_v13  ;;  %21217 = vst [vmem:[#allocation57_spill] sm:$0xff] %v20651_v21 }
 0x9ff   : > { %v16948_v19 = vpop.eup %16947  ;;  %v13362_v52 = vadd.f32 1.0, %v16946_v32  ;;  %16973 = vrcp.f32 %v13360_v33  ;;  %v20654_v33 = vld [vmem:[#allocation14 + $0x20] sm:$0xff] }
 0xa00   : > { %v16950_v28 = vpop.eup %16949  ;;  %v13363_v7 = vadd.f32 1.0, %v16948_v19  ;;  %16975 = vrcp.f32 %v13361_v38  ;;  %21218 = vst [vmem:[#allocation58_spill] sm:$0xff] %v20654_v33  ;;  %v20657_v19 = vld [vmem:[#allocation14 + $0x28] sm:$0xff] }
 0xa01   : > { %v16952_v39 = vpop.eup %16951  ;;  %v13364_v57 = vadd.f32 1.0, %v16950_v28  ;;  %16977 = vrcp.f32 %v13362_v52  ;;  %21219 = vst [vmem:[#allocation59_spill] sm:$0xff] %v20657_v19 }
 0xa02   : > { %v16954_v11 = vpop.eup %16953  ;;  %v13365_v29 = vadd.f32 1.0, %v16952_v39  ;;  %16979 = vrcp.f32 %v13363_v7  ;;  %v20660_v7 = vld [vmem:[#allocation14 + $0x30] sm:$0xff] }
 0xa03   : > { %v16956_v31 = vpop.eup %16955  ;;  %v13366_v12 = vadd.f32 1.0, %v16954_v11  ;;  %16981 = vrcp.f32 %v13364_v57  ;;  %21220 = vst [vmem:[#allocation60_spill] sm:$0xff] %v20660_v7 }
 0xa04   : > { %v16958_v6 = vpop.eup %16957  ;;  %v13367_v27 = vadd.f32 1.0, %v16956_v31  ;;  %16983 = vrcp.f32 %v13365_v29  ;;  %v20665_v29 = vld [vmem:[#allocation14 + $0x38] sm:$0xff] }
 0xa05   : > { %v16960_v2 = vpop.eup %16959  ;;  %v13368_v3 = vadd.f32 1.0, %v16958_v6  ;;  %16985 = vrcp.f32 %v13366_v12  ;;  %21222 = vst [vmem:[#allocation62_spill] sm:$0xff] %v20665_v29  ;;  %v20668_v6 = vld [vmem:[#allocation14 + $0x40] sm:$0xff] }
 0xa06   : > { %v16962_v20 = vpop.eup %16961  ;;  %v13369_v46 = vadd.f32 1.0, %v16960_v2  ;;  %16987 = vrcp.f32 %v13367_v27  ;;  %21223 = vst [vmem:[#allocation63_spill] sm:$0xff] %v20668_v6 }
 0xa07   : > { %v16964_v15 = vpop.eup %16963  ;;  %v13370_v56 = vadd.f32 1.0, %v16962_v20  ;;  %16989 = vrcp.f32 %v13368_v3  ;;  %v20673_v20 = vld [vmem:[#allocation14 + $0x48] sm:$0xff] }
 0xa08   : > { %v16966_v37 = vpop.eup %16965  ;;  %v13371_v34 = vadd.f32 1.0, %v16964_v15  ;;  %16991 = vrcp.f32 %v13369_v46  ;;  %21225 = vst [vmem:[#allocation65_spill] sm:$0xff] %v20673_v20 }
 0xa09   : > { %v16968_v48 = vpop.eup %16967  ;;  %v13372_v18 = vadd.f32 1.0, %v16966_v37  ;;  %16993 = vrcp.f32 %v13370_v56  ;;  %v20676_v56 = vld [vmem:[#allocation14 + $0x50] sm:$0xff] }
 0xa0a   : > { %v16970_v59 = vpop.eup %16969  ;;  %16995 = vrcp.f32 %v13371_v34  ;;  %v13405_v13 = vmul.f32 %v16968_v48, %v20645_v60  ;;  %21226 = vst [vmem:[#allocation66_spill] sm:$0xff] %v20676_v56 }
 0xa0b   : > { %v16972_v14 = vpop.eup %16971  ;;  %16997 = vrcp.f32 %v13372_v18  ;;  %v13406_v32 = vmul.f32 %v16970_v59, %v20647_v51  ;;  %v20681_v18 = vld [vmem:[#allocation14 + $0x58] sm:$0xff] }
 0xa0c   : > { %v16974_v38 = vpop.eup %16973  ;;  %v13407_v52 = vmul.f32 %v16972_v14, %v20649_v8  ;;  %21228 = vst [vmem:[#allocation68_spill] sm:$0xff] %v20681_v18  ;;  %v20684_v14 = vld [vmem:[#allocation14 + $0x60] sm:$0xff] }
 0xa0d   : > { %v16976_v28 = vpop.eup %16975  ;;  %v13408_v39 = vmul.f32 %v16974_v38, %v20651_v21  ;;  %v20663_v57 = vpack.c.bf16 %v13406_v32, %v13405_v13  ;;  %21229 = vst [vmem:[#allocation69_spill] sm:$0xff] %v20684_v14 }
 0xa0e   : > { %v16978_v11 = vpop.eup %16977  ;;  %v13409_v31 = vmul.f32 %v16976_v28, %v20654_v33  ;;  %v20689_v28 = vld [vmem:[#allocation14 + $0x68] sm:$0xff] }
 0xa0f   : > { %21221 = vst [vmem:[#allocation61_spill] sm:$0xff] %v20663_v57  ;;  %v16980_v12 = vpop.eup %16979  ;;  %v13410_v27 = vmul.f32 %v16978_v11, %v20657_v19  ;;  %v20671_v2 = vpack.c.bf16 %v13408_v39, %v13407_v52  ;;  %21231 = vst [vmem:[#allocation71_spill] sm:$0xff] %v20689_v28 }
 0xa10   : > { %v16982_v3 = vpop.eup %16981  ;;  %v13411_v46 = vmul.f32 %v16980_v12, %v20660_v7 }
 0xa11   : > { %21224 = vst [vmem:[#allocation64_spill] sm:$0xff] %v20671_v2  ;;  %v16984_v15 = vpop.eup %16983  ;;  %v13412_v37 = vmul.f32 %v16982_v3, %v20665_v29  ;;  %v20679_v34 = vpack.c.bf16 %v13410_v27, %v13409_v31  ;;  %v20692_v31 = vld [vmem:[#allocation14 + $0x70] sm:$0xff] }
 0xa12   : > { %v16986_v48 = vpop.eup %16985  ;;  %v13413_v59 = vmul.f32 %v16984_v15, %v20668_v6  ;;  %21232 = vst [vmem:[#allocation72_spill] sm:$0xff] %v20692_v31  ;;  %v20697_v15 = vld [vmem:[#allocation14 + $0x78] sm:$0xff] }
 0xa13   : > { %21227 = vst [vmem:[#allocation67_spill] sm:$0xff] %v20679_v34  ;;  %v16988_v13 = vpop.eup %16987  ;;  %v13414_v32 = vmul.f32 %v16986_v48, %v20673_v20  ;;  %v20687_v38 = vpack.c.bf16 %v13412_v37, %v13411_v46  ;;  %21234 = vst [vmem:[#allocation74_spill] sm:$0xff] %v20697_v15 }
 0xa14   : > { %v16990_v52 = vpop.eup %16989  ;;  %v13415_v39 = vmul.f32 %v16988_v13, %v20676_v56 }
 0xa15   : > { %21230 = vst [vmem:[#allocation70_spill] sm:$0xff] %v20687_v38  ;;  %v16992_v11 = vpop.eup %16991  ;;  %v13416_v12 = vmul.f32 %v16990_v52, %v20681_v18  ;;  %v20695_v27 = vpack.c.bf16 %v13414_v32, %v13413_v59  ;;  %v20709_v59 = vmov 0.0   ;;  %v20711_v32 = vmov 0.0  }
 0xa16   : > { %v16994_v3 = vpop.eup %16993  ;;  %v13417_v26 = vmul.f32 %v16992_v11, %v20684_v14  ;;  %v20713_v18 = vmov 0.0   ;;  %v20715_v11 = vmov 0.0  }
 0xa17   : > { %21233 = vst [vmem:[#allocation73_spill] sm:$0xff] %v20695_v27  ;;  %v16996_v48 = vpop.eup %16995  ;;  %v13418_v46 = vmul.f32 %v16994_v3, %v20689_v28  ;;  %v20701_v37 = vpack.c.bf16 %v13416_v12, %v13415_v39  ;;  %v20717_v3 = vmov 0.0   ;;  %v20719_v39 = vmov 0.0  }
 0xa18   : > { %v16998_v55 = vpop.eup %16997  ;;  %v13419_v13 = vmul.f32 %v16996_v48, %v20692_v31  ;;  %v20721_v12 = vmov 0.0   ;;  %v20723_v48 = vmov 0.0   ;;  %v20737_v31 = vmov 0.0  }
 0xa19   : > { %21235 = vst [vmem:[#allocation75_spill] sm:$0xff] %v20701_v37  ;;  %v13420_v9 = vmul.f32 %v16998_v55, %v20697_v15  ;;  %v20705_v56 = vpack.c.bf16 %v13418_v46, %v13417_v26  ;;  %v20725_v55 = vmov 0.0   ;;  %v20729_v26 = vmov 0.0  }
 0xa1a   : > { %v20731_v46 = vmov 0.0   ;;  %v20735_v15 = vmov 0.0   ;;  %v20739_v28 = vmov 0.0  }
 0xa1b   : > { %21236 = vst [vmem:[#allocation76_spill] sm:$0xff] %v20705_v56  ;;  %v20707_v52 = vpack.c.bf16 %v13420_v9, %v13419_v13  ;;  %v20727_v9 = vmov 0.0   ;;  %v20733_v13 = vmov 0.0  }
 0xa1d   : > { %21237 = vst [vmem:[#allocation77_spill] sm:$0xff] %v20707_v52 }
 0xa1e LB: >> { %v21238_v57 = vld [vmem:[#allocation61_spill] sm:$0xff]  ;;  %v21240_v38 = vld [vmem:[#allocation70_spill] sm:$0xff]  ;;  %v21241_v2 = vld [vmem:[#allocation64_spill] sm:$0xff]  ;;  %s16127_s25 = sshll.u32 %s17825_s20, 6  ;;  %s13434_s20 = sadd.s32 1, %s17825_s20   ;;  %v17789_v48 = vphi %v20723_v48, %v21263_v48   ;;  %v17785_v12 = vphi %v20721_v12, %v21262_v12   ;;  %v17781_v39 = vphi %v20719_v39, %v21261_v39   ;;  %v17777_v3 = vphi %v20717_v3, %v21260_v3   ;;  %v17773_v11 = vphi %v20715_v11, %v21259_v11   ;;  %v17769_v18 = vphi %v20713_v18, %v21258_v18   ;;  %v17765_v32 = vphi %v20711_v32, %v21257_v32   ;;  %v17761_v59 = vphi %v20709_v59, %v21256_v59   ;;  %s17825_s20 = sphi %s20741_s20, %s13434_s20   ;;  %v17821_v28 = vphi %v20739_v28, %v21271_v28   ;;  %v17817_v31 = vphi %v20737_v31, %v21270_v31   ;;  %v17813_v15 = vphi %v20735_v15, %v21269_v15   ;;  %v17809_v13 = vphi %v20733_v13, %v21268_v13   ;;  %v17805_v46 = vphi %v20731_v46, %v21267_v46   ;;  %v17801_v26 = vphi %v20729_v26, %v21266_v26   ;;  %v17797_v9 = vphi %v20727_v9, %v21265_v9   ;;  %v17793_v55 = vphi %v20725_v55, %v21264_v55  }
 0xa1f   : >> { %v21242_v34 = vld [vmem:[#allocation67_spill] sm:$0xff]  ;;  %v21243_v27 = vld [vmem:[#allocation73_spill] sm:$0xff]  ;;  %s20798_s21 = scalar_lea.vmem [#allocation23], %s16127_s25  ;;  %s20805_s1 = scalar_lea.vmem [#allocation17], %s16127_s25 }
 0xa20   : >> { %v21244_v37 = vld [vmem:[#allocation75_spill] sm:$0xff]  ;;  %v16999_v14 = vld [vmem:[%s20798_s21] sm:$0xff]   ;;  %v17013_v45 = vld [vmem:[%s20805_s1 + $0x8] sm:$0xff]   ;;  %p20862_p11 = scmp.ge.s32.totalorder %s13434_s20, 27  }
 0xa21   : >> { %16225 = vmatprep.mubr.bf16.mxu0 %v16999_v14  ;;  %v17008_v20 = vld [vmem:[%s20805_s1 + $0x30] sm:$0xff]   ;;  %v17009_v14 = vld [vmem:[%s20805_s1 + $0x28] sm:$0xff]   ;;  %v13820_v19 = vld [vmem:[#allocation21 + $0x10] sm:$0xff] (%p20862_p11) }
 0xa22   : >> { %v21239_v56 = vld [vmem:[#allocation76_spill] sm:$0xff]  ;;  %v13822_v8 = vld [vmem:[#allocation21 + $0x20] sm:$0xff] (%p20862_p11) }
 0xa23   : > { %v13823_v51 = vld [vmem:[#allocation21 + $0x28] sm:$0xff] (%p20862_p11) }
 0xa24   : >> { %v21245_v52 = vld [vmem:[#allocation77_spill] sm:$0xff] }
 0xa25   : >> { %16209 = vmatprep.subr.bf16.mxu0 %v21245_v52 }
 0xa26   : >> { %16210 = vmatpush3.bf16.msra.mxu0 %v21245_v52  ;;  %v17007_v52 = vld [vmem:[%s20805_s1 + $0x38] sm:$0xff]  }
 0xa27   : >> { %16211 = vmatprep.subr.bf16.mxu0 %v21239_v56  ;;  %16241 = vmatprep.subr.bf16.mxu1 %v17007_v52 }
 0xa28   : >> { %16242 = vmatpush3.bf16.msra.mxu1 %v17007_v52  ;;  %v17011_v52 = vld [vmem:[%s20805_s1 + $0x18] sm:$0xff]  }
 0xa29   : >> { %16243 = vmatprep.subr.bf16.mxu1 %v17008_v20 }
 0xa2a   : >> { %16212 = vmatpush3.bf16.msra.mxu0 %v21239_v56  ;;  %v17006_v56 = vld [vmem:[%s20798_s21 + $0x38] sm:$0xff]  }
 0xa2b   : >> { %16213 = vmatprep.subr.bf16.mxu0 %v21244_v37 }
 0xa2c   : >> { %16244 = vmatpush3.bf16.msra.mxu1 %v17008_v20  ;;  %v17012_v20 = vld [vmem:[%s20805_s1 + $0x10] sm:$0xff]  }
 0xa2d   : >> { %16245 = vmatprep.subr.bf16.mxu1 %v17009_v14 }
 0xa2e   : >> { %16214 = vmatpush3.bf16.msra.mxu0 %v21244_v37  ;;  %v17010_v37 = vld [vmem:[%s20805_s1 + $0x20] sm:$0xff]  }
 0xa2f   : >> { %16215 = vmatprep.subr.bf16.mxu0 %v21243_v27 }
 0xa30   : >> { %16246 = vmatpush3.bf16.msra.mxu1 %v17009_v14  ;;  %v17002_v14 = vld [vmem:[%s20798_s21 + $0x18] sm:$0xff]  }
 0xa31   : >> { %16247 = vmatprep.subr.bf16.mxu1 %v17010_v37 }
 0xa32   : >> { %16216 = vmatpush3.bf16.msra.mxu0 %v21243_v27  ;;  %v17000_v27 = vld [vmem:[%s20798_s21 + $0x8] sm:$0xff]  }
 0xa33   : >> { %16217 = vmatprep.subr.bf16.mxu0 %v21240_v38 }
 0xa34   : >> { %16248 = vmatpush3.bf16.msra.mxu1 %v17010_v37  ;;  %v17004_v37 = vld [vmem:[%s20798_s21 + $0x28] sm:$0xff]  }
 0xa35   : >> { %16249 = vmatprep.subr.bf16.mxu1 %v17011_v52 }
 0xa36   : >> { %16218 = vmatpush3.bf16.msra.mxu0 %v21240_v38  ;;  %v17005_v38 = vld [vmem:[%s20798_s21 + $0x30] sm:$0xff]  }
 0xa37   : >> { %16219 = vmatprep.subr.bf16.mxu0 %v21242_v34 }
 0xa38   : >> { %16250 = vmatpush3.bf16.msra.mxu1 %v17011_v52 }
 0xa39   : >> { %16251 = vmatprep.subr.bf16.mxu1 %v17012_v20 }
 0xa3a   : >> { %16220 = vmatpush3.bf16.msra.mxu0 %v21242_v34  ;;  %v17001_v34 = vld [vmem:[%s20798_s21 + $0x10] sm:$0xff]  }
 0xa3b   : >> { %16221 = vmatprep.subr.bf16.mxu0 %v21241_v2 }
 0xa3c   : >> { %16252 = vmatpush3.bf16.msra.mxu1 %v17012_v20 }
 0xa3d   : >> { %16253 = vmatprep.subr.bf16.mxu1 %v17013_v45 }
 0xa3e   : >> { %16222 = vmatpush3.bf16.msra.mxu0 %v21241_v2  ;;  %v17003_v2 = vld [vmem:[%s20798_s21 + $0x20] sm:$0xff]  }
 0xa3f   : >> { %16223 = vmatprep.subr.bf16.mxu0 %v21238_v57 }
 0xa40   : >> { %16254 = vmatpush3.bf16.msra.mxu1 %v17013_v45 }
 0xa42   : >> { %16224 = vmatpush3.bf16.msra.mxu0 %v21238_v57  ;;  %v17014_v57 = vld [vmem:[%s20805_s1] sm:$0xff]  }
 0xa43   : >> { %16255 = vmatprep.subr.bf16.mxu1 %v17014_v57 }
 0xa44   : >> { %16256 = vmatpush3.bf16.msra.mxu1 %v17014_v57 }
 0xa45   : >> { %16226 = vmatmul.mubr.bf16.vlgmr.msra.gmra.mxu0 %v17000_v27 }
 0xa46   : >> { %16229 = vmatprep.mubr.bf16.mxu0 %v17001_v34 }
 0xa4d   : >> { %16230 = vmatmul.mubr.bf16.gmra.mxu0 %v17002_v14 }
 0xa4e   : >> { %16233 = vmatprep.mubr.bf16.mxu0 %v17003_v2 }
 0xa55   : >> { %16234 = vmatmul.mubr.bf16.gmra.mxu0 %v17004_v37 }
 0xa56   : >> { %16237 = vmatprep.mubr.bf16.mxu0 %v17005_v38 }
 0xa5d   : >> { %16238 = vmatmul.mubr.bf16.gmra.mxu0 %v17006_v56 }
 0xb05   : >> { %v16227_v27 = vpop.f32.mrf.mxu0 }
 0xb07   : >> { %v13552_v52 = vpop.f32.mrf.mxu0 }
 0xb09   : >> { %v16228_v34 = vpop.f32.mrf.mxu0 }
 0xb0a   : >> { %v13616_v17 = vpack.c.bf16 %v16228_v34, %v16227_v27 }
 0xb0b   : >> { %v13555_v20 = vpop.f32.mrf.mxu0 }
 0xb0c   : >> { %v13615_v6 = vpack.c.bf16 %v13555_v20, %v13552_v52 }
 0xb0d   : >> { %v16231_v14 = vpop.f32.mrf.mxu0 }
 0xb0e   : >> { %16257 = vmatprep.mubr.bf16.mxu1 %v13615_v6 }
 0xb0f   : >> { %v13568_v2 = vpop.f32.mrf.mxu0  ;;  %16258 = vmatmul.mubr.bf16.vlgmr.msra.gmra.mxu1 %v13616_v17 }
 0xb11   : >> { %v16232_v37 = vpop.f32.mrf.mxu0 }
 0xb12   : >> { %v13618_v56 = vpack.c.bf16 %v16232_v37, %v16231_v14 }
 0xb13   : >> { %v13571_v38 = vpop.f32.mrf.mxu0 }
 0xb14   : >> { %v13617_v29 = vpack.c.bf16 %v13571_v38, %v13568_v2 }
 0xb15   : >> { %v16235_v63 = vpop.f32.mrf.mxu0 }
 0xb16   : >> { %16261 = vmatprep.mubr.bf16.mxu1 %v13617_v29 }
 0xb17   : >> { %v13584_v45 = vpop.f32.mrf.mxu0  ;;  %16262 = vmatmul.mubr.bf16.gmra.mxu1 %v13618_v56 }
 0xb19   : >> { %v16236_v61 = vpop.f32.mrf.mxu0 }
 0xb1a   : >> { %v13620_v44 = vpack.c.bf16 %v16236_v61, %v16235_v63 }
 0xb1b   : >> { %v13587_v57 = vpop.f32.mrf.mxu0 }
 0xb1c   : >> { %v13619_v7 = vpack.c.bf16 %v13587_v57, %v13584_v45 }
 0xb1d   : >> { %v16239_v1 = vpop.f32.mrf.mxu0 }
 0xb1e   : >> { %16265 = vmatprep.mubr.bf16.mxu1 %v13619_v7 }
 0xb1f   : >> { %v13600_v52 = vpop.f32.mrf.mxu0  ;;  %16266 = vmatmul.mubr.bf16.gmra.mxu1 %v13620_v44 }
 0xb21   : >> { %v16240_v27 = vpop.f32.mrf.mxu0 }
 0xb22   : >> { %v13622_v17 = vpack.c.bf16 %v16240_v27, %v16239_v1 }
 0xb23   : >> { %v13603_v6 = vpop.f32.mrf.mxu0 }
 0xb24   : >> { %v13621_v34 = vpack.c.bf16 %v13603_v6, %v13600_v52 }
 0xb26   : >> { %16269 = vmatprep.mubr.bf16.mxu1 %v13621_v34 }
 0xb27   : >> { %16270 = vmatmul.mubr.bf16.gmra.mxu1 %v13622_v17 }
 0xbcf   : >> { %v16259_v20 = vpop.f32.mrf.mxu1 }
 0xbd0   : >> { %v13788_v14 = vadd.f32 %v17813_v15, %v16259_v20  }
 0xbd1   : >> { %v13723_v29 = vpop.f32.mrf.mxu1 }
 0xbd2   : >> { %v13786_v2 = vadd.f32 %v17821_v28, %v13723_v29   ;;  %v13804_v36 = vadd.f32 (%p20862_p11), %v13788_v14, %v20585_v10 }
 0xbd3   : >> { %v16260_v37 = vpop.f32.mrf.mxu1 }
 0xbd4   : >> { %v13789_v38 = vadd.f32 %v17809_v13, %v16260_v37  }
 0xbd5   : >> { %v13726_v61 = vpop.f32.mrf.mxu1 }
 0xbd6   : >> { %v13787_v63 = vadd.f32 %v17817_v31, %v13726_v61   ;;  %v13805_v33 = vadd.f32 (%p20862_p11), %v13789_v38, %v20587_v22 }
 0xbd7   : >> { %v16263_v7 = vpop.f32.mrf.mxu1 }
 0xbd8   : >> { %v13792_v44 = vadd.f32 %v17797_v9, %v16263_v7   ;;  %v13802_v7 = vadd.f32 (%p20862_p11), %v13786_v2, %v20581_v25 }
 0xbd9   : >> { %v13739_v56 = vpop.f32.mrf.mxu1 }
 0xbda   : >> { %v13790_v1 = vadd.f32 %v17805_v46, %v13739_v56   ;;  %v13818_v56 = vld [vmem:[#allocation21] sm:$0xff] (%p20862_p11) }
 0xbdb   : >> { %v16264_v45 = vpop.f32.mrf.mxu1  ;;  %v13834_v41 = vadd.f32 (%p20862_p11), %v13818_v56, %v13802_v7  ;;  %v21280_v7 = vld [vmem:[#allocation45_spill] sm:$0xff] (%p20862_p11) }
 0xbdc   : >> { %v20838_v55 = vadd.f32 %v17793_v55, %v16264_v45   ;;  %v13803_v45 = vadd.f32 (%p20862_p11), %v13787_v63, %v20583_v0  ;;  %v13808_v0 = vadd.f32 (%p20862_p11), %v13792_v44, %v20593_v53  ;;  %v13872_v56 = vsub.f32 (%p20862_p11), 1.0, %v21280_v7 }
 0xbdd   : >> { %v13742_v15 = vpop.f32.mrf.mxu1  ;;  %17015 = vtanh.f32 (%p20862_p11), %v13834_v41 }
 0xbde   : >> { %v21246_v57 = vmov %v20838_v55  ;;  %v13791_v52 = vadd.f32 %v17801_v26, %v13742_v15   ;;  %v21269_v15 = vmov %v13788_v14 }
 0xbdf   : >> { %v16267_v28 = vpop.f32.mrf.mxu1  ;;  %v13832_v15 = vld [vmem:[#allocation21 + $0x70] sm:$0xff] (%p20862_p11) }
 0xbe0   : >> { %v20842_v39 = vadd.f32 %v17781_v39, %v16267_v28   ;;  %v21271_v28 = vmov %v13786_v2  ;;  %v13807_v25 = vadd.f32 (%p20862_p11), %v13791_v52, %v20591_v24 }
 0xbe1   : >> { %v13755_v13 = vpop.f32.mrf.mxu1  ;;  %v13819_v28 = vld [vmem:[#allocation21 + $0x8] sm:$0xff] (%p20862_p11) }
 0xbe2   : >> { %v21247_v27 = vmov %v20842_v39  ;;  %v13794_v6 = vadd.f32 %v17789_v48, %v13755_v13   ;;  %v21268_v13 = vmov %v13789_v38  ;;  %v13835_v21 = vadd.f32 (%p20862_p11), %v13819_v28, %v13803_v45 }
 0xbe3   : >> { %v16268_v31 = vpop.f32.mrf.mxu1  ;;  %v21273_v13 = vld [vmem:[#allocation56_spill] sm:$0xff] (%p20862_p11) }
 0xbe4   : >> { %v20846_v3 = vadd.f32 %v17777_v3, %v16268_v31   ;;  %v21263_v48 = vmov %v13794_v6  ;;  %v21270_v31 = vmov %v13787_v63  ;;  %17017 = vtanh.f32 (%p20862_p11), %v13835_v21 }
 0xbe5   : >> { %v13758_v9 = vpop.f32.mrf.mxu1  ;;  %v13810_v41 = vadd.f32 (%p20862_p11), %v13794_v6, %v20597_v43  ;;  %v13866_v21 = vsub.f32 (%p20862_p11), 1.0, %v20613_v47  ;;  %v13869_v48 = vsub.f32 (%p20862_p11), 1.0, %v20619_v42 }
 0xbe6   : >> { %v21248_v34 = vmov %v20846_v3  ;;  %v13795_v17 = vadd.f32 %v17785_v12, %v13758_v9   ;;  %v21265_v9 = vmov %v13792_v44  ;;  %v13831_v44 = vld [vmem:[#allocation21 + $0x68] sm:$0xff] (%p20862_p11) }
 0xbe7   : >> { %v16271_v46 = vpop.f32.mrf.mxu1  ;;  %v21260_v3 = vmov %v21248_v34  ;;  %v13813_v43 = vadd.f32 (%p20862_p11), %v21248_v34, %v20603_v58  ;;  %v13882_v38 = vmul.f32 (%p20862_p11), %v13866_v21, %v20645_v60  ;;  %v13833_v34 = vld [vmem:[#allocation21 + $0x78] sm:$0xff] (%p20862_p11) }
 0xbe8   : >> { %v20850_v32 = vadd.f32 %v17765_v32, %v16271_v46   ;;  %v21262_v12 = vmov %v13795_v17  ;;  %v21267_v46 = vmov %v13790_v1  ;;  %v13826_v3 = vld [vmem:[#allocation21 + $0x40] sm:$0xff] (%p20862_p11)  ;;  %v13811_v24 = vadd.f32 (%p20862_p11), %v13795_v17, %v20599_v49  ;;  %v21276_v17 = vld [vmem:[#allocation57_spill] sm:$0xff] (%p20862_p11) }
 0xbe9   : >> { %v13771_v55 = vpop.f32.mrf.mxu1  ;;  %v13867_v12 = vsub.f32 (%p20862_p11), 1.0, %v20615_v35  ;;  %v13830_v49 = vld [vmem:[#allocation21 + $0x60] sm:$0xff] (%p20862_p11)  ;;  %v13885_v46 = vmul.f32 (%p20862_p11), %v13869_v48, %v21276_v17  ;;  %v21287_v48 = vld [vmem:[#allocation62_spill] sm:$0xff] (%p20862_p11) }
 0xbea   : >> { %21249 = vst [vmem:[#allocation78_spill] sm:$0xff] %v20850_v32  ;;  %v21250_v20 = vmov %v20850_v32  ;;  %v20853_v11 = vadd.f32 %v17773_v11, %v13771_v55   ;;  %v21264_v55 = vmov %v21246_v57  ;;  %v17016_v9 = vpop.eup (%p20862_p11), %17015 }
 0xbeb   : >> { %v16272_v26 = vpop.f32.mrf.mxu1  ;;  %v21257_v32 = vmov %v21250_v20  ;;  %v13836_v20 = vadd.f32 (%p20862_p11), %v13820_v19, %v13804_v36  ;;  %v13809_v36 = vadd.f32 (%p20862_p11), %v21246_v57, %v20595_v62  ;;  %v13829_v19 = vld [vmem:[#allocation21 + $0x58] sm:$0xff] (%p20862_p11)  ;;  %v13868_v62 = vsub.f32 (%p20862_p11), 1.0, %v20617_v54  ;;  %v21277_v55 = vld [vmem:[#allocation44_spill] sm:$0xff] (%p20862_p11) }
 0xbec   : >> { %v21251_v29 = vmov %v20853_v11  ;;  %v20856_v59 = vadd.f32 %v17761_v59, %v16272_v26   ;;  %v21266_v26 = vmov %v13791_v52  ;;  %v13839_v32 = vadd.f32 (%p20862_p11), %v13823_v51, %v13807_v25  ;;  %v13828_v51 = vld [vmem:[#allocation21 + $0x50] sm:$0xff] (%p20862_p11)  ;;  %v21272_v52 = vld [vmem:[#allocation55_spill] sm:$0xff] (%p20862_p11) }
 0xbed   : >> { %v13774_v39 = vpop.f32.mrf.mxu1  ;;  %v21259_v11 = vmov %v21251_v29  ;;  %13433 = sbr.rel (!%p20862_p11) target bundleno = 2590 (0xa1e), region = 219  ;;  %17019 = vtanh.f32 (%p20862_p11), %v13836_v20  ;;  %v13814_v2 = vadd.f32 (%p20862_p11), %v21251_v29, %v20605_v16  ;;  %v13845_v63 = vadd.f32 (%p20862_p11), %v13829_v19, %v13813_v43  ;;  %v21274_v16 = vld [vmem:[#allocation43_spill] sm:$0xff] (%p20862_p11) }
 0xbee   : >> { %21252 = vst [vmem:[#allocation79_spill] sm:$0xff] %v20856_v59  ;;  %v21253_v37 = vmov %v20856_v59  ;;  %v20859_v18 = vadd.f32 %v17769_v18, %v13774_v39   ;;  %v21261_v39 = vmov %v21247_v27  ;;  %v13825_v11 = vld [vmem:[#allocation21 + $0x38] sm:$0xff] (%p20862_p11)  ;;  %v13884_v6 = vmul.f32 (%p20862_p11), %v13868_v62, %v21273_v13  ;;  %v21281_v25 = vld [vmem:[#allocation59_spill] sm:$0xff] (%p20862_p11)  ;;  %v21286_v62 = vld [vmem:[#allocation49_spill] sm:$0xff] (%p20862_p11) }
 0xbef   : >> { %v21256_v59 = vmov %v21253_v37  ;;  %v13821_v37 = vld [vmem:[#allocation21 + $0x18] sm:$0xff] (%p20862_p11)  ;;  %v13841_v53 = vadd.f32 (%p20862_p11), %v13825_v11, %v13809_v36  ;;  %v13846_v57 = vadd.f32 (%p20862_p11), %v13830_v49, %v13814_v2  ;;  %v13876_v43 = vsub.f32 (%p20862_p11), 1.0, %v21286_v62 }
 0xbf0   : >> { %v21254_v61 = vmov %v20859_v18  ;;  %v13837_v4 = vadd.f32 (%p20862_p11), %v13821_v37, %v13805_v33  ;;  %v13824_v59 = vld [vmem:[#allocation21 + $0x30] sm:$0xff] (%p20862_p11)  ;;  %v13812_v33 = vadd.f32 (%p20862_p11), %v21247_v27, %v20601_v50  ;;  %v13870_v50 = vsub.f32 (%p20862_p11), 1.0, %v20621_v30  ;;  %v21279_v39 = vld [vmem:[#allocation58_spill] sm:$0xff] (%p20862_p11) }
 0xbf1   : >> { %v21258_v18 = vmov %v21254_v61  ;;  %v13840_v22 = vadd.f32 (%p20862_p11), %v13824_v59, %v13808_v0  ;;  %v13815_v58 = vadd.f32 (%p20862_p11), %v21254_v61, %v20607_v5  ;;  %v13883_v27 = vmul.f32 (%p20862_p11), %v13867_v12, %v21272_v52  ;;  %v21275_v60 = vld [vmem:[#allocation78_spill] sm:$0xff] (%p20862_p11)  ;;  %v17018_v37 = vpop.eup (%p20862_p11), %17017  ;;  %v21291_v52 = vld [vmem:[#allocation65_spill] sm:$0xff] (%p20862_p11) }
 0xbf2   : > { %v13806_v18 = vadd.f32 %v13790_v1, %v20589_v23  ;;  %17021 = vtanh.f32 %v13837_v4  ;;  %v13827_v23 = vld [vmem:[#allocation21 + $0x48] sm:$0xff]  ;;  %v13844_v14 = vadd.f32 %v13828_v51, %v13812_v33  ;;  %v13871_v1 = vsub.f32 1.0, %v20623_v40  ;;  %v21282_v11 = vld [vmem:[#allocation46_spill] sm:$0xff] }
 0xbf3   : > { %v13843_v4 = vadd.f32 %v13827_v23, %v13811_v24  ;;  %v13816_v31 = vadd.f32 %v21275_v60, %v21274_v16  ;;  %v13847_v20 = vadd.f32 %v13831_v44, %v13815_v58  ;;  %v13898_v5 = vmul.f32 %v17016_v9, %v20613_v47  ;;  %v21283_v23 = vld [vmem:[#allocation47_spill] sm:$0xff]  ;;  %v21288_v2 = vld [vmem:[#allocation50_spill] sm:$0xff] }
 0xbf4   : > { %v13838_v10 = vadd.f32 %v13822_v8, %v13806_v18  ;;  %v13842_v8 = vadd.f32 %v13826_v3, %v13810_v41  ;;  %v13886_v61 = vmul.f32 %v13870_v50, %v21279_v39  ;;  %v13899_v18 = vmul.f32 %v17018_v37, %v20615_v35  ;;  %v21292_v16 = vld [vmem:[#allocation66_spill] sm:$0xff] }
 0xbf5   : > { %v21278_v29 = vld [vmem:[#allocation79_spill] sm:$0xff]  ;;  %v13848_v45 = vadd.f32 %v13832_v15, %v13816_v31  ;;  %v13887_v59 = vmul.f32 %v13871_v1, %v21281_v25  ;;  %v13873_v3 = vsub.f32 1.0, %v21282_v11  ;;  %v13874_v24 = vsub.f32 1.0, %v21283_v23  ;;  %v21293_v31 = vld [vmem:[#allocation52_spill] sm:$0xff] }
 0xbf6   : > { %17023 = vtanh.f32 %v13838_v10  ;;  %v13817_v26 = vadd.f32 %v21278_v29, %v21277_v55  ;;  %v13915_v36 = vadd.f32 %v13899_v18, %v13883_v27  ;;  %v21290_v1 = vld [vmem:[#allocation51_spill] sm:$0xff]  ;;  %v13892_v60 = vmul.f32 %v13876_v43, %v21292_v16  ;;  %v21295_v29 = vld [vmem:[#allocation53_spill] sm:$0xff] }
 0xbf7   : > { %17025 = vtanh.f32 %v13839_v32  ;;  %v13914_v32 = vadd.f32 %v13898_v5, %v13882_v38  ;;  %v13877_v38 = vsub.f32 1.0, %v21288_v2 }
 0xbf8   : > { %17027 = vtanh.f32 %v13840_v22  ;;  %v13849_v0 = vadd.f32 %v13833_v34, %v13817_v26  ;;  %13931 = vst [vmem:[#allocation24 + $0x8] sm:$0xff] %v13915_v36  ;;  %v13879_v34 = vsub.f32 1.0, %v21293_v31  ;;  %v13880_v26 = vsub.f32 1.0, %v21295_v29 }
 0xbf9   : > { %17029 = vtanh.f32 %v13841_v53  ;;  %13930 = vst [vmem:[#allocation24] sm:$0xff] %v13914_v32 }
 0xbfa   : > { %17031 = vtanh.f32 %v13842_v8  ;;  %v17020_v28 = vpop.eup %17019  ;;  %v21284_v8 = vld [vmem:[#allocation60_spill] sm:$0xff] }
 0xbfb   : > { %17033 = vtanh.f32 %v13843_v4  ;;  %v13900_v22 = vmul.f32 %v17020_v28, %v20617_v54  ;;  %v13888_v51 = vmul.f32 %v13872_v56, %v21284_v8  ;;  %v21285_v4 = vld [vmem:[#allocation48_spill] sm:$0xff]  ;;  %v21297_v56 = vld [vmem:[#allocation54_spill] sm:$0xff] }
 0xbfc   : > { %17035 = vtanh.f32 %v13844_v14  ;;  %v13875_v33 = vsub.f32 1.0, %v21285_v4  ;;  %v13889_v14 = vmul.f32 %v13873_v3, %v21287_v48  ;;  %v21299_v3 = vld [vmem:[#allocation72_spill] sm:$0xff] }
 0xbfd   : > { %17037 = vtanh.f32 %v13845_v63  ;;  %v13916_v35 = vadd.f32 %v13900_v22, %v13884_v6  ;;  %v21289_v63 = vld [vmem:[#allocation63_spill] sm:$0xff] }
 0xbfe   : > { %17039 = vtanh.f32 %v13846_v57  ;;  %v13890_v44 = vmul.f32 %v13874_v24, %v21289_v63  ;;  %v13878_v57 = vsub.f32 1.0, %v21290_v1  ;;  %v13891_v27 = vmul.f32 %v13875_v33, %v21291_v52  ;;  %v21300_v24 = vld [vmem:[#allocation74_spill] sm:$0xff] }
 0xbff   : > { %17041 = vtanh.f32 %v13847_v20  ;;  %v17022_v10 = vpop.eup %17021  ;;  %13932 = vst [vmem:[#allocation24 + $0x10] sm:$0xff] %v13916_v35  ;;  %v21294_v20 = vld [vmem:[#allocation68_spill] sm:$0xff] }
 0xc00   : > { %17043 = vtanh.f32 %v13848_v45  ;;  %v13901_v41 = vmul.f32 %v17022_v10, %v20619_v42  ;;  %v13893_v55 = vmul.f32 %v13877_v38, %v21294_v20  ;;  %v13881_v45 = vsub.f32 1.0, %v21297_v56  ;;  %v21298_v10 = vld [vmem:[#allocation71_spill] sm:$0xff] }
 0xc01   : > { %17045 = vtanh.f32 %v13849_v0  ;;  %v13895_v32 = vmul.f32 %v13879_v34, %v21298_v10 }
 0xc02   : > { %v13917_v19 = vadd.f32 %v13901_v41, %v13885_v46 }
 0xc03   : > { %v17024_v47 = vpop.eup %17023 }
 0xc04   : > { %v17026_v21 = vpop.eup %17025  ;;  %v13902_v53 = vmul.f32 %v17024_v47, %v20621_v30  ;;  %13933 = vst [vmem:[#allocation24 + $0x18] sm:$0xff] %v13917_v19  ;;  %v13896_v47 = vmul.f32 %v13880_v26, %v21299_v3 }
 0xc05   : > { %v17028_v54 = vpop.eup %17027  ;;  %v13903_v12 = vmul.f32 %v17026_v21, %v20623_v40  ;;  %v13897_v21 = vmul.f32 %v13881_v45, %v21300_v24 }
 0xc06   : > { %v13918_v42 = vadd.f32 %v13902_v53, %v13886_v61  ;;  %v13904_v49 = vmul.f32 %v17028_v54, %v21280_v7  ;;  %v17030_v30 = vpop.eup %17029  ;;  %v21296_v61 = vld [vmem:[#allocation69_spill] sm:$0xff] }
 0xc07   : > { %v13919_v50 = vadd.f32 %v13903_v12, %v13887_v59  ;;  %v17032_v58 = vpop.eup %17031  ;;  %v13905_v15 = vmul.f32 %v17030_v30, %v21282_v11  ;;  %v13894_v7 = vmul.f32 %v13878_v57, %v21296_v61 }
 0xc08   : > { %13934 = vst [vmem:[#allocation24 + $0x20] sm:$0xff] %v13918_v42  ;;  %v13920_v40 = vadd.f32 %v13904_v49, %v13888_v51  ;;  %v17034_v13 = vpop.eup %17033  ;;  %v13906_v6 = vmul.f32 %v17032_v58, %v21283_v23 }
 0xc09   : > { %13935 = vst [vmem:[#allocation24 + $0x28] sm:$0xff] %v13919_v50  ;;  %v17036_v9 = vpop.eup %17035  ;;  %v13921_v17 = vadd.f32 %v13905_v15, %v13889_v14  ;;  %v13907_v46 = vmul.f32 %v17034_v13, %v21285_v4 }
 0xc0a   : > { %13936 = vst [vmem:[#allocation24 + $0x30] sm:$0xff] %v13920_v40  ;;  %v17038_v37 = vpop.eup %17037  ;;  %v13922_v5 = vadd.f32 %v13906_v6, %v13890_v44  ;;  %v13908_v39 = vmul.f32 %v17036_v9, %v21286_v62 }
 0xc0b   : > { %v17040_v28 = vpop.eup %17039  ;;  %13937 = vst [vmem:[#allocation24 + $0x38] sm:$0xff] %v13921_v17  ;;  %v13923_v18 = vadd.f32 %v13907_v46, %v13891_v27  ;;  %v13909_v25 = vmul.f32 %v17038_v37, %v21288_v2 }
 0xc0c   : > { %13938 = vst [vmem:[#allocation24 + $0x40] sm:$0xff] %v13922_v5  ;;  %v13924_v59 = vadd.f32 %v13908_v39, %v13892_v60  ;;  %v13910_v0 = vmul.f32 %v17040_v28, %v21290_v1  ;;  %v17042_v22 = vpop.eup %17041 }
 0xc0d   : > { %13939 = vst [vmem:[#allocation24 + $0x48] sm:$0xff] %v13923_v18  ;;  %v13925_v11 = vadd.f32 %v13909_v25, %v13893_v55  ;;  %v17044_v36 = vpop.eup %17043  ;;  %v13911_v23 = vmul.f32 %v17042_v22, %v21293_v31 }
 0xc0e   : > { %13940 = vst [vmem:[#allocation24 + $0x50] sm:$0xff] %v13924_v59  ;;  %v13926_v41 = vadd.f32 %v13910_v0, %v13894_v7  ;;  %v17046_v35 = vpop.eup %17045  ;;  %v13912_v53 = vmul.f32 %v17044_v36, %v21295_v29 }
 0xc0f   : > { %13941 = vst [vmem:[#allocation24 + $0x58] sm:$0xff] %v13925_v11  ;;  %v13927_v8 = vadd.f32 %v13911_v23, %v13895_v32  ;;  %v13913_v51 = vmul.f32 %v17046_v35, %v21297_v56 }
 0xc10   : > { %13942 = vst [vmem:[#allocation24 + $0x60] sm:$0xff] %v13926_v41  ;;  %v13928_v4 = vadd.f32 %v13912_v53, %v13896_v47 }
 0xc11   : > { %13943 = vst [vmem:[#allocation24 + $0x68] sm:$0xff] %v13927_v8  ;;  %v13929_v33 = vadd.f32 %v13913_v51, %v13897_v21 }
 0xc12   : > { %13944 = vst [vmem:[#allocation24 + $0x70] sm:$0xff] %v13928_v4 }
 0xc13   : > { %13945 = vst [vmem:[#allocation24 + $0x78] sm:$0xff] %v13929_v33 }
 0xc14 PF: > { %p16383_p12 = scmp.eq.s32.totalorder %s17931_s23, 7  ;;  %s17847_s13 = smov [#allocation24]  }
 0xc15   : > { %s13952_s12 = sshll.u32 %s17847_s13, 4  ;;  %s13953_s12 = int_to_ptr.vmem [resolvable:$true] %s13952_s12 }
 0xc16   : > { %s17339_s7 = scalar_lea.vmem %s13953_s12, 2048  ;;  %p17346_p10 = scmp.lt.s32.totalorder %s13953_s12, %s13953_s12 }
 0xc17   : > { %p17340_p0 = scmp.ne.s32.totalorder %s13953_s12, %s17339_s7  ;;  %p17347_p1 = scmp.lt.s32.totalorder %s17339_s7, %s17339_s7 }
 0xc19   : > { %p17341_p6 = pnand %p17340_p0, %p16383_p12  ;;  %p17348_p4 = por %p17347_p1, %p17346_p10 }
 0xc1b   : > { %p17342_p8 = pneg %p17341_p6 }
 0xc1d   : > { %p17349_p5 = pnand %p17348_p4, %p17342_p8 }
 0xc1f   : > { %17352 = shalt.err (!%p17349_p5)
}
 0xc20   : > { %s17848_s24 = smov 128   ;;  %s17849_s0 = smov 8  }
 0xc21   : > { %16328 = dma.vmem_to_hbm [thread:$0]  (%p16383_p12), %s13953_s12, 2048, %s21016_s11, [#allocation8], %s17848_s24, %s17848_s24, %s17849_s0  }
 0xc22   : > { %17608 = dma.done.wait (%p16383_p12), [#allocation8], 2048  }
 0xc23   : > { %17610 = vsyncadd (%p16383_p12), [#allocation8], 4294965248 }
 0xc24 PF: > { %s21301_s5 = sld [smem:[#allocation33_spill]]  ;;  %p29_p9 = scmp.ge.s32.totalorder %s18010_s28, 10  }
 0xc25   : > { %s21302_s19 = sld [smem:[#allocation34_spill]]  ;;  %s21303_s17 = smov %s17617_s18 }
 0xc26   : > { %s21305_s20 = smov %s18010_s28  ;;  %31 = sbr.rel (!%p29_p9) target bundleno = 17 (0x11), region = 230 }
 0xc2a   : > { %s21304_s18 = smov %s21301_s5 }
 0xc2b   :  { %13968 = vsyncpa [#allocation7], 1 }
 0xc2c   :  { %13970 = vsyncpa [#allocation7 + $0x1], 1 }
 0xc2d   :  { %13971 = vsyncpa [#allocation10], 1 }
 0xc2e   :  { %13973 = vsyncpa [#allocation10 + $0x1], 1 }
 0xc2f   :  { %13974 = vsyncpa [#allocation13], 1 }
 0xc30   :  { %13976 = vsyncpa [#allocation13 + $0x1], 1 }
 0xc31   :  { %13977 = vsyncpa [#allocation16], 1 }
 0xc32   :  { %13978 = vsyncpa [#allocation19], 1 }
 0xc33   :  { %13979 = vsyncpa [#allocation22], 1 }
 0xc34   :  { %13980 = vsyncpa [#allocation8], 1 }
 0xc35   :  { %13982 = vsyncpa [#allocation8 + $0x1], 1 }

</bundles_post_ra>
